<compile_context>
chip_gen: v7x
topology: tpu7x:2x2x1
jax: 0.10.0
libtpu: 0.0.40
codegen_flags: <defaults>
</compile_context>

<pallas_src>
import functools

import jax
import jax.numpy as jnp
from jax import lax
from jax.experimental import pallas as pl
from jax.experimental.pallas import tpu as pltpu

BERT_LEN = 768
HIDDEN = 7680
N_SPLIT = 2  # hidden-dim split across TensorCores (v7x megacore); harmless on 1-TC chips


def _mlp_kernel(x_ref, w1_ref, b1_ref, w2t_ref, o_ref):
    """One grid step = one tile of the hidden dimension (for one core-split c).

    o_ref (f32, VMEM-resident across the reduction axis) accumulates this hidden
    tile's contribution:  o += tanh(x @ W1[:, tile] + b1[tile]) @ W2[tile, :],
    where W2 is supplied transposed ([n_out, tile_h], bf16, lane-dense).
    The bias b2 and the cross-core combine are done in the JAX wrapper.
    """
    k = pl.program_id(1)

    @pl.when(k == 0)
    def _():
        o_ref[...] = jnp.zeros_like(o_ref)

    # First linear (bf16 x / W1 on the MXU, f32 accumulation) + tanh (EUP).
    h = jnp.tanh(
        jnp.dot(x_ref[...], w1_ref[...], preferred_element_type=jnp.float32)
        + b1_ref[...]
    )
    # Dropout(0.1) -> identity in eval mode (scaling happens only in training).

    # Second linear: contract the hidden (last) dims of h [B, tile_h] (bf16) and
    # W2^T [n_out, tile_h] (bf16), accumulating in f32 into the output block.
    o_ref[...] += lax.dot_general(
        h.astype(jnp.bfloat16),
        w2t_ref[...],
        dimension_numbers=(((1,), (1,)), ((), ())),
        preferred_element_type=jnp.float32,
    )


@functools.partial(jax.jit, static_argnames=("tile_h",))
def classifier_forward(x, w1_bf, b1, w2t_bf, b2, *, tile_h=3840):
    """x: [B, BERT_LEN] f32; w1_bf: [BERT_LEN, HIDDEN] bf16; b1: [1, HIDDEN] f32;
    w2t_bf: [n_out, HIDDEN] bf16 (transposed W2); b2: [1, n_out] f32.
    Returns [B, n_out] f32."""
    B, d_in = x.shape
    n_out, d_hidden = w2t_bf.shape
    assert d_in == BERT_LEN
    assert d_hidden % (N_SPLIT * tile_h) == 0
    steps = d_hidden // (N_SPLIT * tile_h)  # reduction steps per core-split

    # Only the tiny activation is cast per call; W1/W2 were converted once at init.
    x_bf = x.astype(jnp.bfloat16)

    cost = pl.CostEstimate(
        flops=2 * B * d_in * d_hidden + 2 * B * d_hidden * n_out,
        transcendentals=B * d_hidden,
        bytes_accessed=int(
            d_in * d_hidden * 2          # W1 (bf16) -- dominates
            + n_out * d_hidden * 2       # W2^T (bf16)
            + B * d_in * 2               # x (bf16)
            + d_hidden * 4               # b1 (f32)
            + N_SPLIT * B * n_out * 4    # partial outputs (f32)
        ),
    )

    partials = pl.pallas_call(
        _mlp_kernel,
        out_shape=jax.ShapeDtypeStruct((N_SPLIT, B, n_out), jnp.float32),
        grid_spec=pl.GridSpec(
            grid=(N_SPLIT, steps),
            in_specs=[
                pl.BlockSpec((B, d_in), lambda c, k: (0, 0)),                     # x (full, bf16)
                pl.BlockSpec((d_in, tile_h), lambda c, k: (0, c * steps + k)),    # W1 tile (bf16)
                pl.BlockSpec((1, tile_h), lambda c, k: (0, c * steps + k)),       # b1 tile (f32)
                pl.BlockSpec((n_out, tile_h), lambda c, k: (0, c * steps + k)),   # W2^T tile (bf16)
            ],
            # One f32 output block per core-split; accumulator across the k axis.
            out_specs=pl.BlockSpec((None, B, n_out), lambda c, k: (c, 0, 0)),
        ),
        compiler_params=pltpu.CompilerParams(
            dimension_semantics=("parallel", "arbitrary"),
            vmem_limit_bytes=32 * 1024 * 1024,
        ),
        cost_estimate=cost,
    )(x_bf, w1_bf, b1, w2t_bf)

    # Combine the per-core partial sums and add the second bias exactly once.
    return partials.sum(axis=0) + b2


def init_params(key, ans_len):
    """Deterministic parameter init matching nn.Linear shapes.

    torch stores Linear weights as [out, in]; we keep W1 as [in, out] so the kernel
    computes x @ W1 + b1 directly, and W2 transposed as [out, in] (= torch layout) in
    bf16 so the kernel streams it lane-dense. The f32->bf16 conversion happens HERE,
    once, not per forward call.
    Returns (kernel_params, f32_reference_params).
    """
    n_out = ans_len + 1
    k1, k2, k3, k4 = jax.random.split(key, 4)
    bound1 = 1.0 / (BERT_LEN ** 0.5)
    bound2 = 1.0 / (HIDDEN ** 0.5)
    w1 = jax.random.uniform(k1, (BERT_LEN, HIDDEN), jnp.float32, -bound1, bound1)
    b1 = jax.random.uniform(k2, (1, HIDDEN), jnp.float32, -bound1, bound1)
    w2 = jax.random.uniform(k3, (HIDDEN, n_out), jnp.float32, -bound2, bound2)
    b2 = jax.random.uniform(k4, (1, n_out), jnp.float32, -bound2, bound2)

    w1_bf = w1.astype(jnp.bfloat16)          # one-time cast (hoisted out of forward)
    w2t_bf = w2.T.astype(jnp.bfloat16)       # transposed, lane-dense streaming layout
    kernel_params = (w1_bf, b1, w2t_bf, b2)
    ref_params = (w1, b1, w2, b2)
    return kernel_params, ref_params


if __name__ == "__main__":
    ans_len = 9          # -> n_out = 10
    batch = 2

    key = jax.random.PRNGKey(0)
    kx, kp = jax.random.split(key)
    x = jax.random.normal(kx, (batch, BERT_LEN), jnp.float32)
    (w1_bf, b1, w2t_bf, b2), (w1, _, w2, _) = init_params(kp, ans_len)

    out = classifier_forward(x, w1_bf, b1, w2t_bf, b2)
    out = jax.block_until_ready(out)
    assert out.shape == (batch, ans_len + 1)

    # Near-bit-faithful reference: same bf16 quantization of x / W1 / h / W2, f32 accumulation.
    x_q = x.astype(jnp.bfloat16).astype(jnp.float32)
    w1_q = w1_bf.astype(jnp.float32)
    w2_q = w2t_bf.astype(jnp.float32).T
    h_q = jnp.tanh(x_q @ w1_q + b1).astype(jnp.bfloat16).astype(jnp.float32)
    ref_q = h_q @ w2_q + b2
    assert jnp.allclose(out, ref_q, atol=2e-3, rtol=2e-3), "mismatch vs bf16-quantized reference"

    # Loose check against the full-f32 reference (expected bf16 quantization error only).
    ref_f32 = jnp.tanh(x @ w1 + b1) @ w2 + b2
    assert jnp.allclose(out, ref_f32, atol=3e-2, rtol=3e-2), "mismatch vs f32 reference"

    print("KERNEL_OK")
</pallas_src>

<mosaic_0001>
module attributes {stable_mosaic.version = 11 : i64} {
  func.func @_mlp_kernel(%arg0: i32, %arg1: i32, %arg2: memref<2x768xbf16, #tpu.memory_space<vmem>>, %arg3: memref<768x3840xbf16, #tpu.memory_space<vmem>>, %arg4: memref<1x3840xf32, #tpu.memory_space<vmem>>, %arg5: memref<10x3840xbf16, #tpu.memory_space<vmem>>, %arg6: memref<1x2x10xf32, #tpu.memory_space<vmem>>) attributes {dimension_semantics = [#tpu.dimension_semantics<parallel>, #tpu.dimension_semantics<arbitrary>], iteration_bounds = array<i64: 2, 1>, scalar_prefetch = 0 : i64, scratch_operands = 0 : i64, tpu.core_type = #tpu.core_type<tc>, window_params = [{pipeline_mode = #tpu.pipeline_mode<synchronous>, transform_indices = @transform_0, window_bounds = array<i64: 2, 768>}, {transform_indices = @transform_1, window_bounds = array<i64: 768, 3840>}, {transform_indices = @transform_2, window_bounds = array<i64: 1, 3840>}, {transform_indices = @transform_3, window_bounds = array<i64: 10, 3840>}, {transform_indices = @transform_4, window_bounds = array<i64: 1, 2, 10>}]} {
    %c0_i32 = arith.constant 0 : i32
    %0 = arith.cmpi eq, %arg1, %c0_i32 : i32
    %1 = arith.extui %0 : i1 to i32
    %c0_i32_0 = arith.constant 0 : i32
    %2 = arith.cmpi ne, %1, %c0_i32_0 : i32
    scf.if %2 {
      %cst_15 = arith.constant 0.000000e+00 : f32
      %19 = vector.broadcast %cst_15 : f32 to vector<2x10xf32>
      %c0_16 = arith.constant 0 : index
      %c0_17 = arith.constant 0 : index
      %c0_18 = arith.constant 0 : index
      %20 = vector.load %arg6[%c0_16, %c0_17, %c0_18] : memref<1x2x10xf32, #tpu.memory_space<vmem>>, vector<1x2x10xf32>
      %21 = vector.shape_cast %20 : vector<1x2x10xf32> to vector<2x10xf32>
      %22 = vector.shape_cast %19 : vector<2x10xf32> to vector<1x2x10xf32>
      tpu.vector_store %arg6[%c0_16, %c0_17, %c0_18], %22 {strides = array<i32>} : memref<1x2x10xf32, #tpu.memory_space<vmem>>, vector<1x2x10xf32>,
    } else {
    }
    %c0 = arith.constant 0 : index
    %c0_1 = arith.constant 0 : index
    %3 = vector.load %arg2[%c0, %c0_1] : memref<2x768xbf16, #tpu.memory_space<vmem>>, vector<2x768xbf16>
    %c0_2 = arith.constant 0 : index
    %c0_3 = arith.constant 0 : index
    %4 = vector.load %arg3[%c0_2, %c0_3] : memref<768x3840xbf16, #tpu.memory_space<vmem>>, vector<768x3840xbf16>
    %cst = arith.constant dense<0.000000e+00> : vector<2x3840xf32>
    %5 = tpu.matmul %3, %4, %cst {dimension_numbers = #tpu.dot_dimension_numbers<[1], [0], [0], [1], [0, 0, 1, 1], [], []>} : vector<2x768xbf16>, vector<768x3840xbf16>, vector<2x3840xf32> -> vector<2x3840xf32>
    %c0_4 = arith.constant 0 : index
    %c0_5 = arith.constant 0 : index
    %6 = vector.load %arg4[%c0_4, %c0_5] : memref<1x3840xf32, #tpu.memory_space<vmem>>, vector<1x3840xf32>
    %7 = vector.broadcast %6 : vector<1x3840xf32> to vector<2x3840xf32>
    %8 = arith.addf %5, %7 : vector<2x3840xf32>
    %9 = math.tanh %8 : vector<2x3840xf32>
    %c0_6 = arith.constant 0 : index
    %c0_7 = arith.constant 0 : index
    %c0_8 = arith.constant 0 : index
    %10 = vector.load %arg6[%c0_6, %c0_7, %c0_8] : memref<1x2x10xf32, #tpu.memory_space<vmem>>, vector<1x2x10xf32>
    %11 = vector.shape_cast %10 : vector<1x2x10xf32> to vector<2x10xf32>
    %12 = arith.truncf %9 : vector<2x3840xf32> to vector<2x3840xbf16>
    %c0_9 = arith.constant 0 : index
    %c0_10 = arith.constant 0 : index
    %13 = vector.load %arg5[%c0_9, %c0_10] : memref<10x3840xbf16, #tpu.memory_space<vmem>>, vector<10x3840xbf16>
    %cst_11 = arith.constant dense<0.000000e+00> : vector<2x10xf32>
    %14 = tpu.matmul %12, %13, %cst_11 {dimension_numbers = #tpu.dot_dimension_numbers<[1], [1], [0], [0], [0, 0, 1, 0], [], []>} : vector<2x3840xbf16>, vector<10x3840xbf16>, vector<2x10xf32> -> vector<2x10xf32>
    %15 = arith.addf %11, %14 : vector<2x10xf32>
    %c0_12 = arith.constant 0 : index
    %c0_13 = arith.constant 0 : index
    %c0_14 = arith.constant 0 : index
    %16 = vector.load %arg6[%c0_12, %c0_13, %c0_14] : memref<1x2x10xf32, #tpu.memory_space<vmem>>, vector<1x2x10xf32>
    %17 = vector.shape_cast %16 : vector<1x2x10xf32> to vector<2x10xf32>
    %18 = vector.shape_cast %15 : vector<2x10xf32> to vector<1x2x10xf32>
    tpu.vector_store %arg6[%c0_12, %c0_13, %c0_14], %18 {strides = array<i32>} : memref<1x2x10xf32, #tpu.memory_space<vmem>>, vector<1x2x10xf32>,
    return
  }
  func.func @transform_0(%arg0: i32, %arg1: i32) -> (i32, i32) {
    %c0_i32 = arith.constant 0 : i32
    %c0_i32_0 = arith.constant 0 : i32
    %c0_i32_1 = arith.constant 0 : i32
    return %c0_i32, %c0_i32_0 : i32, i32
  }
  func.func @transform_1(%arg0: i32, %arg1: i32) -> (i32, i32) {
    %c1_i32 = arith.constant 1 : i32
    %0 = arith.muli %arg0, %c1_i32 : i32
    %1 = arith.addi %0, %arg1 : i32
    %c0_i32 = arith.constant 0 : i32
    %c0_i32_0 = arith.constant 0 : i32
    return %c0_i32, %1 : i32, i32
  }
  func.func @transform_2(%arg0: i32, %arg1: i32) -> (i32, i32) {
    %c1_i32 = arith.constant 1 : i32
    %0 = arith.muli %arg0, %c1_i32 : i32
    %1 = arith.addi %0, %arg1 : i32
    %c0_i32 = arith.constant 0 : i32
    %c0_i32_0 = arith.constant 0 : i32
    return %c0_i32, %1 : i32, i32
  }
  func.func @transform_3(%arg0: i32, %arg1: i32) -> (i32, i32) {
    %c1_i32 = arith.constant 1 : i32
    %0 = arith.muli %arg0, %c1_i32 : i32
    %1 = arith.addi %0, %arg1 : i32
    %c0_i32 = arith.constant 0 : i32
    %c0_i32_0 = arith.constant 0 : i32
    return %c0_i32, %1 : i32, i32
  }
  func.func @transform_4(%arg0: i32, %arg1: i32) -> (i32, i32, i32) {
    %c0_i32 = arith.constant 0 : i32
    %c0_i32_0 = arith.constant 0 : i32
    %c0_i32_1 = arith.constant 0 : i32
    return %arg0, %c0_i32, %c0_i32_0 : i32, i32, i32
  }
}

</mosaic_0001>

<bundles_post_ra>
// kernel: classifier_forward.1
= control target key start
LH: loop header
LB: loop body
LE: loop exit
PB: predicated region body
PF: predicated region fallthrough
CT: control target
= control target key end

     0   :  { %s18138_s0 = inlined_call_operand.vmem [shape: bf16[2,768], index: 0, kind: input, shape index: {}]   ;;  %s18139_s1 = inlined_call_operand.hbm [shape: bf16[768,7680], index: 1, kind: input, shape index: {}]   ;;  %s18140_s2 = inlined_call_operand.hbm [shape: f32[1,7680], index: 2, kind: input, shape index: {}]   ;;  %s18141_s3 = inlined_call_operand.hbm [shape: bf16[10,7680], index: 3, kind: input, shape index: {}]   ;;  %s18142_s4 = inlined_call_operand.vmem [shape: f32[2,2,10], index: 4, kind: output, shape index: {}]  }
   0x1   :  { %18145 = sst [smem:[#allocation9_spill]] %s18139_s1 }
   0x2   :  { %9 = vsyncpa [#allocation3], 0 }
   0x3   :  { %11 = vsyncpa [#allocation3 + $0x1], 0 }
   0x4   :  { %12 = vsyncpa [#allocation5], 0 }
   0x5   :  { %14 = vsyncpa [#allocation5 + $0x1], 0  ;;  %s16140_s15 = smov 0   ;;  %s16142_s16 = smov 0  }
   0x6   :  { %s16144_s17 = smov 0   ;;  %s16146_s18 = smov 0  }
   0x7   :  { %s16148_s19 = smov 0   ;;  %s16150_s20 = smov 0  }
   0x8 LB: > { %s18144_s21 = sadd.s32 4294967295, %s16105_s20   ;;  %s32_s22 = sadd.s32 1, %s16101_s19  ;;  %s16105_s20 = sphi %s16150_s20, %s20_s20   ;;  %s16101_s19 = sphi %s16148_s19, %s18158_s19   ;;  %s16097_s18 = sphi %s16146_s18, %s18157_s18   ;;  %s16093_s17 = sphi %s16144_s17, %s18156_s17   ;;  %s16089_s16 = sphi %s16142_s16, %s18155_s16   ;;  %s16085_s15 = sphi %s16140_s15, %s18154_s15  }
   0x9   : > { %p34_p0 = scmp.ge.s32.totalorder %s32_s22, 2  ;;  %s62_s23 = sadd.s32 1, %s16093_s17 }
   0xa   : > { %p69_p1 = scmp.ne.s32.totalorder %s16093_s17, %s16089_s16  ;;  %p70_p2 = scmp.eq.s32.totalorder %s16105_s20, 0 }
   0xb   : > { %s18160_s22 = smov (%p34_p0, %s32_s22), 0  ;;  %p75_p4 = scmp.ne.s32.totalorder %s16089_s16, %s16085_s15 }
   0xc   : > { %p71_p3 = por %p70_p2, %p69_p1  ;;  %s59_s24 = ssub.s32 %s16101_s19, %s18160_s22 }
   0xd   : > { %p76_p5 = scmp.eq.s32.totalorder %s18144_s21, 0  ;;  %p60_p6 = scmp.eq.s32.totalorder %s59_s24, 0 }
   0xe   : > { %p13640_p8 = scmp.lt.s32.totalorder %s16105_s20, 2  ;;  %s16190_s27 = sand.u32 1, %s16093_s17  }
   0xf   : > { %p16181_p7 = por %p76_p5, %p75_p4  ;;  %s13467_s28 = smul.u32 1920, %s16101_s19 }
  0x10   : > { %s16187_s26 = scalar_select %p60_p6, %s16093_s17, %s62_s23  }
  0x11   : > { %s18146_s25 = scalar_select %p16181_p7, 1, 0 }
  0x12   : > { %s13618_s29 = smul.u32 11520, %s16190_s27  ;;  %p16194_p9 = pnand %p13640_p8, %p71_p3 }
  0x13   : > { %s206_s5 = sand.u32 1, %s16105_s20   ;;  %s13619_s6 = smul.u32 30, %s16190_s27 }
  0x14   : > { %s13468_s7 = smul.u32 480, %s16101_s19  ;;  %s16209_s14 = scalar_lea.sflag [#allocation5], %s206_s5 }
  0x15   : > { %s210_s8 = scalar_lea.vmem [#allocation4], %s13619_s6  ;;  %s13620_s10 = smul.u32 240, %s16190_s27 }
  0x16   : > { %s219_s9 = sshll.u32 %s210_s8, 4  ;;  %s16205_s13 = scalar_lea.hbm %s18140_s2, %s13468_s7  ;;  %s16207_s9 = int_to_ptr.vmem [resolvable:$true] %s219_s9 }
  0x17   : > { %s15961_s15 = scalar_lea.hbm %s16205_s13, 480  ;;  %p16215_p11 = pneg %p16194_p9 }
  0x18   : > { %p15962_p10 = scmp.ne.s32.totalorder %s16205_s13, %s15961_s15  ;;  %s15966_s7 = scalar_lea.hbm %s18140_s2, 960 }
  0x19   : > { %p15967_p0 = scmp.lt.u32.totalorder %s16205_s13, %s18140_s2  ;;  %p15968_p1 = scmp.lt.u32.totalorder %s15966_s7, %s15961_s15 }
  0x1a   : > { %p15964_p12 = pnand %p16215_p11, %p15962_p10  ;;  %p15970_p3 = scmp.lt.u32.totalorder %s15961_s15, %s16205_s13 }
  0x1b   : > { %p15969_p2 = por %p15968_p1, %p15967_p0 }
  0x1c   : > { %p15965_p13 = pneg %p15964_p12 }
  0x1d   : > { %p15971_p4 = por %p15970_p3, %p15969_p2 }
  0x1f   : > { %p15972_p5 = pnand %p15971_p4, %p15965_p13 }
  0x21   : > { %15975 = shalt.err (!%p15972_p5)
}
  0x22   : > { %s15976_s5 = scalar_lea.vmem %s16207_s9, 480  ;;  %s16107_s12 = smov [#allocation4]  }
  0x23   : > { %p15977_p6 = scmp.ne.s32.totalorder %s16207_s9, %s15976_s5  ;;  %s15981_s24 = sshll.u32 %s16107_s12, 4  ;;  %s15982_s24 = int_to_ptr.vmem [resolvable:$false] %s15981_s24 }
  0x24   : > { %s15983_s6 = scalar_lea.vmem %s15982_s24, 960  ;;  %p15984_p12 = scmp.lt.s32.totalorder %s16207_s9, %s15982_s24 }
  0x25   : > { %p15979_p8 = pnand %p15977_p6, %p16215_p11  ;;  %p15985_p7 = scmp.lt.s32.totalorder %s15983_s6, %s15976_s5 }
  0x27   : > { %p15980_p10 = pneg %p15979_p8  ;;  %p15986_p0 = por %p15985_p7, %p15984_p12 }
  0x29   : > { %p15987_p1 = pnand %p15986_p0, %p15980_p10 }
  0x2b   : > { %15990 = shalt.err (!%p15987_p1)
}
  0x2c   : > { %13636 = dma.hbm_to_vmem [thread:$0]  (!%p16194_p9), %s16205_s13, 480, %s16207_s9, %s16209_s14  }
  0x2d   : > { %s16244_s8 = scalar_lea.hbm %s18141_s3, %s13467_s28  ;;  %s230_s11 = scalar_lea.vmem [#allocation6], %s13620_s10 }
  0x2e   : > { %s238_s5 = sshll.u32 %s230_s11, 4  ;;  %p11993_p7 = scmp.ge.s32.totalorder %s16105_s20, 1  ;;  %s16249_s5 = int_to_ptr.vmem [resolvable:$true] %s238_s5 }
  0x2f   : > { %p246_p13 = scmp.lt.s32.totalorder %s16105_s20, 3  ;;  %s18150_s1 = sld [smem:[#allocation9_spill]] }
  0x30   : > { %s188_s10 = scalar_lea.vmem [#allocation2], %s13618_s29  ;;  %s185_s15 = scalar_lea.sflag [#allocation3], %s16190_s27 }
  0x31   : > { %p16252_p2 = pnand %p11993_p7, %p246_p13  ;;  %s196_s6 = sshll.u32 %s188_s10, 4  ;;  %s16265_s6 = int_to_ptr.vmem [resolvable:$true] %s196_s6 }
  0x33   : > { %s18149_s12 = scalar_select %p16252_p2, 1, 0 }
  0x35   : > { %s16261_s13 = scalar_lea.hbm %s18150_s1, %s13467_s28  ;;  %s15996_s28 = scalar_lea.hbm %s18150_s1, 368640 }
  0x36   : > { %s15991_s7 = scalar_lea.hbm %s16261_s13, 184320  ;;  %p15997_p6 = scmp.lt.u32.totalorder %s16261_s13, %s18150_s1 }
  0x37   : > { %p15992_p3 = scmp.ne.s32.totalorder %s16261_s13, %s15991_s7  ;;  %p15998_p8 = scmp.lt.u32.totalorder %s15996_s28, %s15991_s7 }
  0x38   : > { %p16000_p12 = scmp.lt.u32.totalorder %s15991_s7, %s16261_s13 }
  0x39   : > { %p15994_p4 = pnand %p15992_p3, %p16215_p11  ;;  %p15999_p10 = por %p15998_p8, %p15997_p6 }
  0x3b   : > { %p15995_p5 = pneg %p15994_p4  ;;  %p16001_p0 = por %p16000_p12, %p15999_p10 }
  0x3d   : > { %p16002_p1 = pnand %p16001_p0, %p15995_p5 }
  0x3f   : > { %16005 = shalt.err (!%p16002_p1)
}
  0x40   : > { %s16006_s29 = scalar_lea.vmem %s16265_s6, 184320  ;;  %s16108_s21 = smov [#allocation2]  }
  0x41   : > { %p16007_p7 = scmp.ne.s32.totalorder %s16265_s6, %s16006_s29  ;;  %s16011_s10 = sshll.u32 %s16108_s21, 4  ;;  %s16012_s10 = int_to_ptr.vmem [resolvable:$false] %s16011_s10 }
  0x42   : > { %s16013_s11 = scalar_lea.vmem %s16012_s10, 368640  ;;  %p16014_p4 = scmp.lt.s32.totalorder %s16265_s6, %s16012_s10 }
  0x43   : > { %p16009_p13 = pnand %p16007_p7, %p16215_p11  ;;  %p16015_p2 = scmp.lt.s32.totalorder %s16013_s11, %s16006_s29 }
  0x45   : > { %p16010_p3 = pneg %p16009_p13  ;;  %p16016_p6 = por %p16015_p2, %p16014_p4 }
  0x47   : > { %p16017_p8 = pnand %p16016_p6, %p16010_p3 }
  0x49   : > { %16020 = shalt.err (!%p16017_p8)
}
  0x4a   : > { %s16109_s7 = smov 3840   ;;  %s16110_s28 = smov 1920  }
  0x4b   : > { %s16111_s24 = smov 120   ;;  %s16021_s9 = scalar_lea.hbm %s16244_s8, 3840 }
  0x4c   : > { %13633 = dma.hbm_to_vmem [thread:$0]  (!%p16194_p9), %s16261_s13, 184320, %s16265_s6, %s185_s15, %s16109_s7, %s16110_s28, %s16111_s24  }
  0x4d   : > { %p16022_p2 = scmp.ne.s32.totalorder %s16244_s8, %s16021_s9  ;;  %s16026_s10 = scalar_lea.hbm %s18141_s3, 7680 }
  0x4e   : > { %p16027_p12 = scmp.lt.u32.totalorder %s16244_s8, %s18141_s3  ;;  %p16028_p0 = scmp.lt.u32.totalorder %s16026_s10, %s16021_s9 }
  0x4f   : > { %p16024_p5 = pnand %p16022_p2, %p16215_p11  ;;  %p16030_p7 = scmp.lt.u32.totalorder %s16021_s9, %s16244_s8 }
  0x50   : > { %p16029_p1 = por %p16028_p0, %p16027_p12 }
  0x51   : > { %p16025_p10 = pneg %p16024_p5 }
  0x52   : > { %p16031_p13 = por %p16030_p7, %p16029_p1 }
  0x54   : > { %p16032_p3 = pnand %p16031_p13, %p16025_p10 }
  0x56   : > { %16035 = shalt.err (!%p16032_p3)
}
  0x57   : > { %s16036_s27 = scalar_lea.vmem %s16249_s5, 3840  ;;  %s16112_s13 = smov [#allocation6]  }
  0x58   : > { %p16037_p4 = scmp.ne.s32.totalorder %s16249_s5, %s16036_s27  ;;  %s16041_s6 = sshll.u32 %s16112_s13, 4  ;;  %s16042_s6 = int_to_ptr.vmem [resolvable:$false] %s16041_s6 }
  0x59   : > { %s16043_s1 = scalar_lea.vmem %s16042_s6, 7680  ;;  %p16044_p2 = scmp.lt.s32.totalorder %s16249_s5, %s16042_s6 }
  0x5a   : > { %p16039_p6 = pnand %p16037_p4, %p16215_p11  ;;  %p16045_p5 = scmp.lt.s32.totalorder %s16043_s1, %s16036_s27 }
  0x5c   : > { %p16040_p8 = pneg %p16039_p6  ;;  %p16046_p12 = por %p16045_p5, %p16044_p2 }
  0x5e   : > { %p16047_p0 = pnand %p16046_p12, %p16040_p8 }
  0x60   : > { %16050 = shalt.err (!%p16047_p0)
}
  0x61   : > { %13639 = dma.hbm_to_vmem [thread:$0]  (!%p16194_p9), %s16244_s8, 3840, %s16249_s5, %s16209_s14, %s16109_s7, %s16110_s28, %s16111_s24  }
  0x62   : > { %p18151_p11 = scmp.ne.s32.totalorder %s18149_s12, 0 }
  0x63   : > { %s16322_s23 = sand.u32 (!%p18151_p11), 1, %s16089_s16   ;;  %p18152_p10 = scmp.ne.s32.totalorder (!%p18151_p11), %s18146_s25, 0 }
  0x64   : > { %250 = sbr.rel (%p18151_p11) target bundleno = 2032 (0x7f0), region = 36  ;;  %s253_s9 = scalar_lea.sflag (!%p18151_p11), [#allocation3], %s16322_s23 }
  0x65   : > { %s13621_s15 = smul.u32 (!%p18151_p11), 11520, %s16322_s23 }
  0x67   : > { %s16326_s29 = scalar_lea.vmem (!%p18151_p11), [#allocation2], %s13621_s15 }
  0x6b   : > { %16076 = dma.done.wait (%p18152_p10), %s253_s9, 184320  }
  0x6c   : > { %16078 = vsyncadd (%p18152_p10), %s253_s9, 4294782976  ;;  %s18153_s30 = sadd.s32 4294967295, %s16105_s20   ;;  %s13622_s8 = smul.u32 30, %s16322_s23 }
  0x6d   : > { %s261_s14 = sand.u32 1, %s18153_s30  }
  0x6e   : > { %s262_s5 = scalar_lea.sflag [#allocation5], %s261_s14  ;;  %s16335_s12 = scalar_lea.vmem [#allocation4], %s13622_s8 }
  0x6f   : > { %16080 = dma.done.wait (%p18152_p10), %s262_s5, 4320  }
  0x70   : > { %16082 = vsyncadd (%p18152_p10), %s262_s5, 4294962976  ;;  %v13694_v0 = vld [vmem:[%s16326_s29 + $0x4] ss:$120 sps:$4 sm:$0xff]   ;;  %v13698_v2 = vld [vmem:[%s16326_s29] ss:$120 sps:$4 sm:$0xff]   ;;  %v1774_v36 = vlaneseq  ;;  %s13623_s28 = smul.u32 240, %s16322_s23 }
  0x71   : > { %v13696_v1 = vld [vmem:[%s16326_s29 + $0xf04] ss:$120 sps:$4 sm:$0xff]   ;;  %9178 = vmatprep.subr.bf16.mxu1 %v13694_v0  ;;  %v13699_v3 = vld [vmem:[%s16326_s29 + $0xf00] ss:$120 sps:$4 sm:$0xff]   ;;  %v13700_v4 = vld [vmem:[%s16326_s29 + $0xf4] ss:$120 sps:$4 sm:$0xff]  }
  0x72   : > { %9219 = vmatprep.subr.bf16.mxu0 %v13696_v1  ;;  %9179 = vmatpush1.bf16.msra.mxu1 %v13698_v2  ;;  %v13702_v5 = vld [vmem:[%s16326_s29 + $0xff4] ss:$120 sps:$4 sm:$0xff]   ;;  %v13704_v6 = vld [vmem:[%s16326_s29 + $0xf0] ss:$120 sps:$4 sm:$0xff]   ;;  %v13706_v8 = vld [vmem:[%s16326_s29 + $0x1e4] ss:$120 sps:$4 sm:$0xff]  }
  0x73   : > { %9220 = vmatpush1.bf16.msra.mxu0 %v13699_v3  ;;  %9180 = vmatprep.subr.bf16.mxu1 %v13700_v4  ;;  %v13705_v7 = vld [vmem:[%s16326_s29 + $0xff0] ss:$120 sps:$4 sm:$0xff]   ;;  %v13708_v9 = vld [vmem:[%s16326_s29 + $0x10e4] ss:$120 sps:$4 sm:$0xff]   ;;  %v13710_v10 = vld [vmem:[%s16326_s29 + $0x1e0] ss:$120 sps:$4 sm:$0xff]  }
  0x74   : > { %9221 = vmatprep.subr.bf16.mxu0 %v13702_v5  ;;  %v13711_v11 = vld [vmem:[%s16326_s29 + $0x10e0] ss:$120 sps:$4 sm:$0xff]   ;;  %v13712_v12 = vld [vmem:[%s16326_s29 + $0x2d4] ss:$120 sps:$4 sm:$0xff]   ;;  %v13716_v14 = vld [vmem:[%s16326_s29 + $0x2d0] ss:$120 sps:$4 sm:$0xff]  }
  0x75   : > { %v13714_v13 = vld [vmem:[%s16326_s29 + $0x11d4] ss:$120 sps:$4 sm:$0xff]   ;;  %v13717_v15 = vld [vmem:[%s16326_s29 + $0x11d0] ss:$120 sps:$4 sm:$0xff]   ;;  %v13718_v16 = vld [vmem:[%s16326_s29 + $0x3c4] ss:$120 sps:$4 sm:$0xff]  }
  0x76   : > { %9181 = vmatpush1.bf16.msra.mxu1 %v13704_v6  ;;  %v13720_v17 = vld [vmem:[%s16326_s29 + $0x12c4] ss:$120 sps:$4 sm:$0xff]   ;;  %v13722_v18 = vld [vmem:[%s16326_s29 + $0x3c0] ss:$120 sps:$4 sm:$0xff]   ;;  %v13724_v20 = vld [vmem:[%s16326_s29 + $0x4b4] ss:$120 sps:$4 sm:$0xff]  }
  0x77   : > { %9222 = vmatpush1.bf16.msra.mxu0 %v13705_v7  ;;  %9182 = vmatprep.subr.bf16.mxu1 %v13706_v8  ;;  %v13723_v19 = vld [vmem:[%s16326_s29 + $0x12c0] ss:$120 sps:$4 sm:$0xff]   ;;  %v13726_v21 = vld [vmem:[%s16326_s29 + $0x13b4] ss:$120 sps:$4 sm:$0xff]   ;;  %v13728_v22 = vld [vmem:[%s16326_s29 + $0x4b0] ss:$120 sps:$4 sm:$0xff]  }
  0x78   : > { %9223 = vmatprep.subr.bf16.mxu0 %v13708_v9  ;;  %v13729_v23 = vld [vmem:[%s16326_s29 + $0x13b0] ss:$120 sps:$4 sm:$0xff]   ;;  %v13730_v24 = vld [vmem:[%s16326_s29 + $0x5a4] ss:$120 sps:$4 sm:$0xff]   ;;  %v13734_v26 = vld [vmem:[%s16326_s29 + $0x5a0] ss:$120 sps:$4 sm:$0xff]  }
  0x79   : > { %v13732_v25 = vld [vmem:[%s16326_s29 + $0x14a4] ss:$120 sps:$4 sm:$0xff]   ;;  %v13735_v27 = vld [vmem:[%s16326_s29 + $0x14a0] ss:$120 sps:$4 sm:$0xff]   ;;  %v13736_v28 = vld [vmem:[%s16326_s29 + $0x694] ss:$120 sps:$4 sm:$0xff]  }
  0x7a   : > { %9183 = vmatpush1.bf16.msra.mxu1 %v13710_v10  ;;  %v13738_v29 = vld [vmem:[%s16326_s29 + $0x1594] ss:$120 sps:$4 sm:$0xff]   ;;  %v13740_v30 = vld [vmem:[%s16326_s29 + $0x690] ss:$120 sps:$4 sm:$0xff]   ;;  %v13742_v32 = vld [vmem:[%s16326_s29 + $0x784] ss:$120 sps:$4 sm:$0xff]  }
  0x7b   : > { %9224 = vmatpush1.bf16.msra.mxu0 %v13711_v11  ;;  %9184 = vmatprep.subr.bf16.mxu1 %v13712_v12  ;;  %v13741_v31 = vld [vmem:[%s16326_s29 + $0x1590] ss:$120 sps:$4 sm:$0xff]   ;;  %v13744_v33 = vld [vmem:[%s16326_s29 + $0x1684] ss:$120 sps:$4 sm:$0xff]   ;;  %v13746_v34 = vld [vmem:[%s16326_s29 + $0x780] ss:$120 sps:$4 sm:$0xff]  }
  0x7c   : > { %9225 = vmatprep.subr.bf16.mxu0 %v13714_v13  ;;  %v13747_v35 = vld [vmem:[%s16326_s29 + $0x1680] ss:$120 sps:$4 sm:$0xff]   ;;  %v16113_v37 = vmov 1966171168   ;;  %v13748_v39 = vld [vmem:[%s16326_s29 + $0x874] ss:$120 sps:$4 sm:$0xff]  }
  0x7d   : > { %v1927_v38 = vunpack.c.l.s4 %v16113_v37  ;;  %v13750_v40 = vld [vmem:[%s16326_s29 + $0x1774] ss:$120 sps:$4 sm:$0xff]   ;;  %v13752_v41 = vld [vmem:[%s16326_s29 + $0x870] ss:$120 sps:$4 sm:$0xff]   ;;  %v16380_v42 = vshrl.u32 %v1774_v36, 7  ;;  %s17800_s24 = scalar_lea.vmem [#allocation6], %s13623_s28 }
  0x7e   : > { %9185 = vmatpush1.bf16.msra.mxu1 %v13716_v14  ;;  %v13753_v44 = vld [vmem:[%s16326_s29 + $0x1770] ss:$120 sps:$4 sm:$0xff]   ;;  %v13754_v45 = vld [vmem:[%s16326_s29 + $0x964] ss:$120 sps:$4 sm:$0xff]   ;;  %v13758_v47 = vld [vmem:[%s16326_s29 + $0x960] ss:$120 sps:$4 sm:$0xff]  }
  0x7f   : > { %9226 = vmatpush1.bf16.msra.mxu0 %v13717_v15  ;;  %9186 = vmatprep.subr.bf16.mxu1 %v13718_v16  ;;  %v1928_v43 = vunpack.c.0.s8 %v1927_v38  ;;  %v13756_v46 = vld [vmem:[%s16326_s29 + $0x1864] ss:$120 sps:$4 sm:$0xff]   ;;  %v13759_v48 = vld [vmem:[%s16326_s29 + $0x1860] ss:$120 sps:$4 sm:$0xff]   ;;  %v13760_v50 = vld [vmem:[%s16326_s29 + $0xa54] ss:$120 sps:$4 sm:$0xff]  }
  0x80   : > { %9227 = vmatprep.subr.bf16.mxu0 %v13720_v17  ;;  %v13762_v51 = vld [vmem:[%s16326_s29 + $0x1954] ss:$120 sps:$4 sm:$0xff]   ;;  %v325_v52 = vld [vmem:[%s18138_s0] sm:$0x3f]  ;;  %v13764_v53 = vld [vmem:[%s16326_s29 + $0xa50] ss:$120 sps:$4 sm:$0xff]  }
  0x81   : > { %v16388_v49 = vsub.s32 %v1928_v43, %v16380_v42  ;;  %v1925_v55 = vcombine.high %v325_v52, %v325_v52  ;;  %v13765_v56 = vld [vmem:[%s16326_s29 + $0x1950] ss:$120 sps:$4 sm:$0xff]   ;;  %v13766_v57 = vld [vmem:[%s16326_s29 + $0xb44] ss:$120 sps:$4 sm:$0xff]   ;;  %v13770_v61 = vld [vmem:[%s16326_s29 + $0xb40] ss:$120 sps:$4 sm:$0xff]  }
  0x82   : > { %9187 = vmatpush1.bf16.msra.mxu1 %v13722_v18  ;;  %v13768_v58 = vld [vmem:[%s16326_s29 + $0x1a44] ss:$120 sps:$4 sm:$0xff]   ;;  %v13771_v0 = vld [vmem:[%s16326_s29 + $0x1a40] ss:$120 sps:$4 sm:$0xff]   ;;  %v13772_v1 = vld [vmem:[%s16326_s29 + $0xc34] ss:$120 sps:$4 sm:$0xff]  }
  0x83   : > { %9228 = vmatpush1.bf16.msra.mxu0 %v13723_v19  ;;  %9188 = vmatprep.subr.bf16.mxu1 %v13724_v20  ;;  %v1932_v54 = vrot.slane %v325_v52, %v16388_v49  ;;  %v1939_v60 = vrot.slane %v1925_v55, %v16388_v49  ;;  %v13774_v2 = vld [vmem:[%s16326_s29 + $0x1b34] ss:$120 sps:$4 sm:$0xff]   ;;  %v13776_v4 = vld [vmem:[%s16326_s29 + $0xc30] ss:$120 sps:$4 sm:$0xff]   ;;  %v13778_v6 = vld [vmem:[%s16326_s29 + $0xd24] ss:$120 sps:$4 sm:$0xff]  }
  0x84   : > { %9229 = vmatprep.subr.bf16.mxu0 %v13726_v21  ;;  %v13777_v5 = vld [vmem:[%s16326_s29 + $0x1b30] ss:$120 sps:$4 sm:$0xff]   ;;  %v13780_v7 = vld [vmem:[%s16326_s29 + $0x1c24] ss:$120 sps:$4 sm:$0xff]   ;;  %v13782_v8 = vld [vmem:[%s16326_s29 + $0xd20] ss:$120 sps:$4 sm:$0xff]  }
  0x85   : > { %v1940_v59 = vcombine.high %v1932_v54, %v1932_v54  ;;  %v16406_v63 = vrot.slane %v1939_v60, %v16388_v49  ;;  %v13783_v9 = vld [vmem:[%s16326_s29 + $0x1c20] ss:$120 sps:$4 sm:$0xff]   ;;  %v13784_v10 = vld [vmem:[%s16326_s29 + $0xe14] ss:$120 sps:$4 sm:$0xff]   ;;  %v13788_v12 = vld [vmem:[%s16326_s29 + $0xe10] ss:$120 sps:$4 sm:$0xff]   ;;  %v16427_v13 = vrot.slane %v1932_v54, %v16388_v49  ;;  %v1941_v17 = vcombine.high %v1939_v60, %v1939_v60 }
  0x86   : > { %9189 = vmatpush1.bf16.msra.mxu1 %v13728_v22  ;;  %v13786_v11 = vld [vmem:[%s16326_s29 + $0x1d14] ss:$120 sps:$4 sm:$0xff]   ;;  %v13789_v14 = vld [vmem:[%s16326_s29 + $0x1d10] ss:$120 sps:$4 sm:$0xff]   ;;  %v13792_v15 = vld [vmem:[%s16326_s29 + $0x1e04] ss:$120 sps:$4 sm:$0xff]  }
  0x87   : > { %9230 = vmatpush1.bf16.msra.mxu0 %v13729_v23  ;;  %9190 = vmatprep.subr.bf16.mxu1 %v13730_v24  ;;  %v16403_v62 = vrot.slane %v1940_v59, %v16388_v49  ;;  %v13795_v16 = vld [vmem:[%s16326_s29 + $0xc] ss:$120 sps:$4 sm:$0xff]   ;;  %v13790_v18 = vld [vmem:[%s16326_s29 + $0x1e00] ss:$120 sps:$4 sm:$0xff]   ;;  %v16435_v19 = vcombine.high %v16427_v13, %v16427_v13  ;;  %v13801_v22 = vld [vmem:[%s16326_s29 + $0xfc] ss:$120 sps:$4 sm:$0xff]   ;;  %v16441_v23 = vrot.slane %v1941_v17, %v16388_v49 }
  0x88   : > { %9231 = vmatprep.subr.bf16.mxu0 %v13732_v25  ;;  %v13793_v20 = vld [vmem:[%s16326_s29 + $0x8] ss:$120 sps:$4 sm:$0xff]   ;;  %v13798_v21 = vld [vmem:[%s16326_s29 + $0x1ef4] ss:$120 sps:$4 sm:$0xff]   ;;  %v13799_v25 = vld [vmem:[%s16326_s29 + $0xf8] ss:$120 sps:$4 sm:$0xff]  }
  0x89   : > { %v16413_v3 = vcombine.high %v16403_v62, %v16403_v62  ;;  %9210 = vmatprep.mubr.bf16.mxu1 %v16403_v62  ;;  %v13796_v24 = vld [vmem:[%s16326_s29 + $0x1ef0] ss:$120 sps:$4 sm:$0xff]   ;;  %v13814_v36 = vld [vmem:[%s16326_s29 + $0x21c0] ss:$120 sps:$4 sm:$0xff]   ;;  %v13822_v38 = vld [vmem:[%s16326_s29 + $0x22b4] ss:$120 sps:$4 sm:$0xff]  }
  0x8a   : > { %9191 = vmatpush1.bf16.msra.mxu1 %v13734_v26  ;;  %v13804_v26 = vld [vmem:[%s16326_s29 + $0x1fe4] ss:$120 sps:$4 sm:$0xff]   ;;  %v13817_v37 = vld [vmem:[%s16326_s29 + $0x3c8] ss:$120 sps:$4 sm:$0xff]   ;;  %v13846_v55 = vld [vmem:[%s16326_s29 + $0x2674] ss:$120 sps:$4 sm:$0xff]  }
  0x8b   : > { %9232 = vmatpush1.bf16.msra.mxu0 %v13735_v27  ;;  %9192 = vmatprep.subr.bf16.mxu1 %v13736_v28  ;;  %v13807_v27 = vld [vmem:[%s16326_s29 + $0x1ec] ss:$120 sps:$4 sm:$0xff]   ;;  %v13802_v28 = vld [vmem:[%s16326_s29 + $0x1fe0] ss:$120 sps:$4 sm:$0xff]   ;;  %v13832_v49 = vld [vmem:[%s16326_s29 + $0x2490] ss:$120 sps:$4 sm:$0xff]  }
  0x8c   : > { %9233 = vmatprep.subr.bf16.mxu0 %v13738_v29  ;;  %9251 = vmatprep.mubr.bf16.mxu0 %v16413_v3  ;;  %v13805_v29 = vld [vmem:[%s16326_s29 + $0x1e8] ss:$120 sps:$4 sm:$0xff]   ;;  %v13828_v43 = vld [vmem:[%s16326_s29 + $0x23a4] ss:$120 sps:$4 sm:$0xff]   ;;  %p314_p9 = scmp.lt.s32.totalorder %s16097_s18, 1  ;;  %vm323_vm0 = vcmask 74752  }
  0x8d   : > { %v13843_v52 = vld [vmem:[%s16326_s29 + $0x78c] ss:$120 sps:$4 sm:$0xff]   ;;  %v13841_v54 = vld [vmem:[%s16326_s29 + $0x788] ss:$120 sps:$4 sm:$0xff]  }
  0x8e   : > { %9193 = vmatpush1.bf16.msra.mxu1 %v13740_v30  ;;  %v13810_v30 = vld [vmem:[%s16326_s29 + $0x20d4] ss:$120 sps:$4 sm:$0xff]   ;;  %v13852_v59 = vld [vmem:[%s16326_s29 + $0x2764] ss:$120 sps:$4 sm:$0xff]   ;;  %v13874_v17 = vld [vmem:[%s16326_s29 + $0x2b20] ss:$120 sps:$4 sm:$0xff]  }
  0x8f   : > { %9234 = vmatpush1.bf16.msra.mxu0 %v13741_v31  ;;  %9194 = vmatprep.subr.bf16.mxu1 %v13742_v32  ;;  %v13813_v31 = vld [vmem:[%s16326_s29 + $0x2dc] ss:$120 sps:$4 sm:$0xff]   ;;  %v13808_v32 = vld [vmem:[%s16326_s29 + $0x20d0] ss:$120 sps:$4 sm:$0xff]   ;;  %v13855_v60 = vld [vmem:[%s16326_s29 + $0x96c] ss:$120 sps:$4 sm:$0xff]  }
  0x90   : > { %9235 = vmatprep.subr.bf16.mxu0 %v13744_v33  ;;  %v13811_v33 = vld [vmem:[%s16326_s29 + $0x2d8] ss:$120 sps:$4 sm:$0xff]   ;;  %s18162_s18 = smov (!%p314_p9, %s16097_s18), 1 }
  0x91   : > { %s11994_s21 = sshll.u32 %s18162_s18, 1 }
  0x92   : > { %9195 = vmatpush1.bf16.msra.mxu1 %v13746_v34  ;;  %v13816_v34 = vld [vmem:[%s16326_s29 + $0x21c4] ss:$120 sps:$4 sm:$0xff]   ;;  %s317_s27 = scalar_lea.vmem %s18142_s4, %s11994_s21 }
  0x93   : > { %9236 = vmatpush1.bf16.msra.mxu0 %v13747_v35  ;;  %9196 = vmatprep.subr.bf16.mxu1 %v13748_v39  ;;  %v13819_v35 = vld [vmem:[%s16326_s29 + $0x3cc] ss:$120 sps:$4 sm:$0xff]   ;;  %v13825_v39 = vld [vmem:[%s16326_s29 + $0x4bc] ss:$120 sps:$4 sm:$0xff]  }
  0x94   : > { %9237 = vmatprep.subr.bf16.mxu0 %v13750_v40  ;;  %v13820_v40 = vld [vmem:[%s16326_s29 + $0x22b0] ss:$120 sps:$4 sm:$0xff]  }
  0x96   : > { %9197 = vmatpush1.bf16.msra.mxu1 %v13752_v41  ;;  %v13823_v41 = vld [vmem:[%s16326_s29 + $0x4b8] ss:$120 sps:$4 sm:$0xff]  }
  0x97   : > { %9238 = vmatpush1.bf16.msra.mxu0 %v13753_v44  ;;  %9198 = vmatprep.subr.bf16.mxu1 %v13754_v45  ;;  %v13831_v44 = vld [vmem:[%s16326_s29 + $0x5ac] ss:$120 sps:$4 sm:$0xff]   ;;  %v13826_v45 = vld [vmem:[%s16326_s29 + $0x23a0] ss:$120 sps:$4 sm:$0xff]  }
  0x98   : > { %9239 = vmatprep.subr.bf16.mxu0 %v13756_v46  ;;  %v13829_v46 = vld [vmem:[%s16326_s29 + $0x5a8] ss:$120 sps:$4 sm:$0xff]  }
  0x9a   : > { %9199 = vmatpush1.bf16.msra.mxu1 %v13758_v47  ;;  %v13834_v47 = vld [vmem:[%s16326_s29 + $0x2494] ss:$120 sps:$4 sm:$0xff]  }
  0x9b   : > { %9240 = vmatpush1.bf16.msra.mxu0 %v13759_v48  ;;  %9200 = vmatprep.subr.bf16.mxu1 %v13760_v50  ;;  %v13837_v48 = vld [vmem:[%s16326_s29 + $0x69c] ss:$120 sps:$4 sm:$0xff]   ;;  %v13835_v50 = vld [vmem:[%s16326_s29 + $0x698] ss:$120 sps:$4 sm:$0xff]  }
  0x9c   : > { %9241 = vmatprep.subr.bf16.mxu0 %v13762_v51  ;;  %v13840_v51 = vld [vmem:[%s16326_s29 + $0x2584] ss:$120 sps:$4 sm:$0xff]  }
  0x9e   : > { %9201 = vmatpush1.bf16.msra.mxu1 %v13764_v53  ;;  %v13838_v53 = vld [vmem:[%s16326_s29 + $0x2580] ss:$120 sps:$4 sm:$0xff]  }
  0x9f   : > { %9242 = vmatpush1.bf16.msra.mxu0 %v13765_v56  ;;  %9202 = vmatprep.subr.bf16.mxu1 %v13766_v57  ;;  %v13849_v56 = vld [vmem:[%s16326_s29 + $0x87c] ss:$120 sps:$4 sm:$0xff]   ;;  %v13844_v57 = vld [vmem:[%s16326_s29 + $0x2670] ss:$120 sps:$4 sm:$0xff]  }
  0xa0   : > { %9243 = vmatprep.subr.bf16.mxu0 %v13768_v58  ;;  %v13847_v58 = vld [vmem:[%s16326_s29 + $0x878] ss:$120 sps:$4 sm:$0xff]  }
  0xa2   : > { %9203 = vmatpush1.bf16.msra.mxu1 %v13770_v61  ;;  %v13850_v61 = vld [vmem:[%s16326_s29 + $0x2760] ss:$120 sps:$4 sm:$0xff]  }
  0xa3   : > { %9244 = vmatpush1.bf16.msra.mxu0 %v13771_v0  ;;  %9204 = vmatprep.subr.bf16.mxu1 %v13772_v1  ;;  %v13853_v0 = vld [vmem:[%s16326_s29 + $0x968] ss:$120 sps:$4 sm:$0xff]   ;;  %v13858_v1 = vld [vmem:[%s16326_s29 + $0x2854] ss:$120 sps:$4 sm:$0xff]  }
  0xa4   : > { %9245 = vmatprep.subr.bf16.mxu0 %v13774_v2  ;;  %v13861_v2 = vld [vmem:[%s16326_s29 + $0xa5c] ss:$120 sps:$4 sm:$0xff]  }
  0xa6   : > { %9205 = vmatpush1.bf16.msra.mxu1 %v13776_v4  ;;  %v13856_v4 = vld [vmem:[%s16326_s29 + $0x2850] ss:$120 sps:$4 sm:$0xff]  }
  0xa7   : > { %9246 = vmatpush1.bf16.msra.mxu0 %v13777_v5  ;;  %9206 = vmatprep.subr.bf16.mxu1 %v13778_v6  ;;  %v13859_v5 = vld [vmem:[%s16326_s29 + $0xa58] ss:$120 sps:$4 sm:$0xff]   ;;  %v13864_v6 = vld [vmem:[%s16326_s29 + $0x2944] ss:$120 sps:$4 sm:$0xff]  }
  0xa8   : > { %9247 = vmatprep.subr.bf16.mxu0 %v13780_v7  ;;  %v13867_v7 = vld [vmem:[%s16326_s29 + $0xb4c] ss:$120 sps:$4 sm:$0xff]  }
  0xaa   : > { %9207 = vmatpush1.bf16.msra.mxu1 %v13782_v8  ;;  %v13862_v8 = vld [vmem:[%s16326_s29 + $0x2940] ss:$120 sps:$4 sm:$0xff]  }
  0xab   : > { %9248 = vmatpush1.bf16.msra.mxu0 %v13783_v9  ;;  %9208 = vmatprep.subr.bf16.mxu1 %v13784_v10  ;;  %v13865_v9 = vld [vmem:[%s16326_s29 + $0xb48] ss:$120 sps:$4 sm:$0xff]   ;;  %v13870_v10 = vld [vmem:[%s16326_s29 + $0x2a34] ss:$120 sps:$4 sm:$0xff]  }
  0xac   : > { %9249 = vmatprep.subr.bf16.mxu0 %v13786_v11  ;;  %v13873_v11 = vld [vmem:[%s16326_s29 + $0xc3c] ss:$120 sps:$4 sm:$0xff]  }
  0xae   : > { %9209 = vmatpush1.bf16.msra.mxu1 %v13788_v12  ;;  %v13868_v12 = vld [vmem:[%s16326_s29 + $0x2a30] ss:$120 sps:$4 sm:$0xff]  }
  0xaf   : > { %9250 = vmatpush1.bf16.msra.mxu0 %v13789_v14  ;;  %9301 = vmatprep.subr.bf16.mxu1 %v13795_v16  ;;  %v13871_v14 = vld [vmem:[%s16326_s29 + $0xc38] ss:$120 sps:$4 sm:$0xff]   ;;  %v13879_v16 = vld [vmem:[%s16326_s29 + $0xd2c] ss:$120 sps:$4 sm:$0xff]  }
  0xb0   : > { %9260 = vmatprep.subr.bf16.mxu0 %v13792_v15  ;;  %v13876_v15 = vld [vmem:[%s16326_s29 + $0x2b24] ss:$120 sps:$4 sm:$0xff]  }
  0xb1   : > { %9211 = vmatmul.mubr.bf16.vlgmr.msra.gmra.mrb[0].mxu1 %v16427_v13 }
  0xb2   : > { %9252 = vmatmul.mubr.bf16.vlgmr.msra.gmra.mrb[0].mxu0 %v16435_v19  ;;  %9302 = vmatpush1.bf16.msra.mxu1 %v13793_v20  ;;  %v13882_v20 = vld [vmem:[%s16326_s29 + $0x2c14] ss:$120 sps:$4 sm:$0xff]  }
  0xb3   : > { %9261 = vmatpush1.bf16.msra.mxu0 %v13790_v18  ;;  %9303 = vmatprep.subr.bf16.mxu1 %v13801_v22  ;;  %v13877_v18 = vld [vmem:[%s16326_s29 + $0xd28] ss:$120 sps:$4 sm:$0xff]  }
  0xb4   : > { %9262 = vmatprep.subr.bf16.mxu0 %v13798_v21  ;;  %9292 = vmatprep.mubr.bf16.mxu0 %v16441_v23  ;;  %v13885_v21 = vld [vmem:[%s16326_s29 + $0xe1c] ss:$120 sps:$4 sm:$0xff]   ;;  %v13880_v22 = vld [vmem:[%s16326_s29 + $0x2c10] ss:$120 sps:$4 sm:$0xff]  }
  0xb5   : > { %9333 = vmatprep.mubr.bf16.mxu1 %v16403_v62 }
  0xb6   : > { %9304 = vmatpush1.bf16.msra.mxu1 %v13799_v25  ;;  %v13889_v25 = vld [vmem:[%s16326_s29 + $0xf0c] ss:$120 sps:$4 sm:$0xff]  }
  0xb7   : > { %9263 = vmatpush1.bf16.msra.mxu0 %v13796_v24  ;;  %9305 = vmatprep.subr.bf16.mxu1 %v13807_v27  ;;  %v13883_v24 = vld [vmem:[%s16326_s29 + $0xe18] ss:$120 sps:$4 sm:$0xff]   ;;  %v13887_v27 = vld [vmem:[%s16326_s29 + $0xf08] ss:$120 sps:$4 sm:$0xff]  }
  0xb8   : > { %9264 = vmatprep.subr.bf16.mxu0 %v13804_v26  ;;  %v13892_v26 = vld [vmem:[%s16326_s29 + $0x14] ss:$120 sps:$4 sm:$0xff]  }
  0xba   : > { %9306 = vmatpush1.bf16.msra.mxu1 %v13805_v29  ;;  %v13895_v29 = vld [vmem:[%s16326_s29 + $0xffc] ss:$120 sps:$4 sm:$0xff]  }
  0xbb   : > { %9265 = vmatpush1.bf16.msra.mxu0 %v13802_v28  ;;  %9307 = vmatprep.subr.bf16.mxu1 %v13813_v31  ;;  %v13890_v28 = vld [vmem:[%s16326_s29 + $0x10] ss:$120 sps:$4 sm:$0xff]  }
  0xbc   : > { %9266 = vmatprep.subr.bf16.mxu0 %v13810_v30  ;;  %v13898_v30 = vld [vmem:[%s16326_s29 + $0x104] ss:$120 sps:$4 sm:$0xff]   ;;  %v13893_v31 = vld [vmem:[%s16326_s29 + $0xff8] ss:$120 sps:$4 sm:$0xff]  }
  0xbe   : > { %9308 = vmatpush1.bf16.msra.mxu1 %v13811_v33  ;;  %v13901_v33 = vld [vmem:[%s16326_s29 + $0x10ec] ss:$120 sps:$4 sm:$0xff]  }
  0xbf   : > { %9267 = vmatpush1.bf16.msra.mxu0 %v13808_v32  ;;  %9309 = vmatprep.subr.bf16.mxu1 %v13819_v35  ;;  %v13896_v32 = vld [vmem:[%s16326_s29 + $0x100] ss:$120 sps:$4 sm:$0xff]  }
  0xc0   : > { %9268 = vmatprep.subr.bf16.mxu0 %v13816_v34  ;;  %v13904_v34 = vld [vmem:[%s16326_s29 + $0x1f4] ss:$120 sps:$4 sm:$0xff]   ;;  %v13899_v35 = vld [vmem:[%s16326_s29 + $0x10e8] ss:$120 sps:$4 sm:$0xff]  }
  0xc2   : > { %9310 = vmatpush1.bf16.msra.mxu1 %v13817_v37  ;;  %v13907_v37 = vld [vmem:[%s16326_s29 + $0x11dc] ss:$120 sps:$4 sm:$0xff]  }
  0xc3   : > { %9269 = vmatpush1.bf16.msra.mxu0 %v13814_v36  ;;  %9311 = vmatprep.subr.bf16.mxu1 %v13825_v39  ;;  %v13902_v36 = vld [vmem:[%s16326_s29 + $0x1f0] ss:$120 sps:$4 sm:$0xff]  }
  0xc4   : > { %9270 = vmatprep.subr.bf16.mxu0 %v13822_v38  ;;  %v13910_v38 = vld [vmem:[%s16326_s29 + $0x2e4] ss:$120 sps:$4 sm:$0xff]   ;;  %v13905_v39 = vld [vmem:[%s16326_s29 + $0x11d8] ss:$120 sps:$4 sm:$0xff]  }
  0xc6   : > { %9312 = vmatpush1.bf16.msra.mxu1 %v13823_v41  ;;  %v13913_v41 = vld [vmem:[%s16326_s29 + $0x12cc] ss:$120 sps:$4 sm:$0xff]  }
  0xc7   : > { %9271 = vmatpush1.bf16.msra.mxu0 %v13820_v40  ;;  %9313 = vmatprep.subr.bf16.mxu1 %v13831_v44  ;;  %v13908_v40 = vld [vmem:[%s16326_s29 + $0x2e0] ss:$120 sps:$4 sm:$0xff]  }
  0xc8   : > { %9272 = vmatprep.subr.bf16.mxu0 %v13828_v43  ;;  %v13916_v43 = vld [vmem:[%s16326_s29 + $0x3d4] ss:$120 sps:$4 sm:$0xff]   ;;  %v13911_v44 = vld [vmem:[%s16326_s29 + $0x12c8] ss:$120 sps:$4 sm:$0xff]  }
  0xca   : > { %9314 = vmatpush1.bf16.msra.mxu1 %v13829_v46  ;;  %v13919_v46 = vld [vmem:[%s16326_s29 + $0x13bc] ss:$120 sps:$4 sm:$0xff]  }
  0xcb   : > { %9273 = vmatpush1.bf16.msra.mxu0 %v13826_v45  ;;  %9315 = vmatprep.subr.bf16.mxu1 %v13837_v48  ;;  %v13914_v45 = vld [vmem:[%s16326_s29 + $0x3d0] ss:$120 sps:$4 sm:$0xff]  }
  0xcc   : > { %9274 = vmatprep.subr.bf16.mxu0 %v13834_v47  ;;  %v13922_v47 = vld [vmem:[%s16326_s29 + $0x4c4] ss:$120 sps:$4 sm:$0xff]   ;;  %v13917_v48 = vld [vmem:[%s16326_s29 + $0x13b8] ss:$120 sps:$4 sm:$0xff]  }
  0xce   : > { %9316 = vmatpush1.bf16.msra.mxu1 %v13835_v50  ;;  %v13925_v50 = vld [vmem:[%s16326_s29 + $0x14ac] ss:$120 sps:$4 sm:$0xff]  }
  0xcf   : > { %9275 = vmatpush1.bf16.msra.mxu0 %v13832_v49  ;;  %9317 = vmatprep.subr.bf16.mxu1 %v13843_v52  ;;  %v13920_v49 = vld [vmem:[%s16326_s29 + $0x4c0] ss:$120 sps:$4 sm:$0xff]  }
  0xd0   : > { %9276 = vmatprep.subr.bf16.mxu0 %v13840_v51  ;;  %v13928_v51 = vld [vmem:[%s16326_s29 + $0x5b4] ss:$120 sps:$4 sm:$0xff]   ;;  %v13923_v52 = vld [vmem:[%s16326_s29 + $0x14a8] ss:$120 sps:$4 sm:$0xff]  }
  0xd2   : > { %9318 = vmatpush1.bf16.msra.mxu1 %v13841_v54  ;;  %v13931_v54 = vld [vmem:[%s16326_s29 + $0x159c] ss:$120 sps:$4 sm:$0xff]  }
  0xd3   : > { %9277 = vmatpush1.bf16.msra.mxu0 %v13838_v53  ;;  %9319 = vmatprep.subr.bf16.mxu1 %v13849_v56  ;;  %v13926_v53 = vld [vmem:[%s16326_s29 + $0x5b0] ss:$120 sps:$4 sm:$0xff]  }
  0xd4   : > { %9278 = vmatprep.subr.bf16.mxu0 %v13846_v55  ;;  %v13934_v55 = vld [vmem:[%s16326_s29 + $0x6a4] ss:$120 sps:$4 sm:$0xff]   ;;  %v13929_v56 = vld [vmem:[%s16326_s29 + $0x1598] ss:$120 sps:$4 sm:$0xff]  }
  0xd6   : > { %9320 = vmatpush1.bf16.msra.mxu1 %v13847_v58  ;;  %v13937_v58 = vld [vmem:[%s16326_s29 + $0x168c] ss:$120 sps:$4 sm:$0xff]  }
  0xd7   : > { %9279 = vmatpush1.bf16.msra.mxu0 %v13844_v57  ;;  %9321 = vmatprep.subr.bf16.mxu1 %v13855_v60  ;;  %v13932_v57 = vld [vmem:[%s16326_s29 + $0x6a0] ss:$120 sps:$4 sm:$0xff]  }
  0xd8   : > { %9280 = vmatprep.subr.bf16.mxu0 %v13852_v59  ;;  %v13940_v59 = vld [vmem:[%s16326_s29 + $0x794] ss:$120 sps:$4 sm:$0xff]   ;;  %v13935_v60 = vld [vmem:[%s16326_s29 + $0x1688] ss:$120 sps:$4 sm:$0xff]  }
  0xda   : > { %9322 = vmatpush1.bf16.msra.mxu1 %v13853_v0  ;;  %v13943_v0 = vld [vmem:[%s16326_s29 + $0x177c] ss:$120 sps:$4 sm:$0xff]  }
  0xdb   : > { %9281 = vmatpush1.bf16.msra.mxu0 %v13850_v61  ;;  %9323 = vmatprep.subr.bf16.mxu1 %v13861_v2  ;;  %v13938_v61 = vld [vmem:[%s16326_s29 + $0x790] ss:$120 sps:$4 sm:$0xff]  }
  0xdc   : > { %9282 = vmatprep.subr.bf16.mxu0 %v13858_v1  ;;  %v13946_v1 = vld [vmem:[%s16326_s29 + $0x884] ss:$120 sps:$4 sm:$0xff]   ;;  %v13941_v2 = vld [vmem:[%s16326_s29 + $0x1778] ss:$120 sps:$4 sm:$0xff]  }
  0xde   : > { %9324 = vmatpush1.bf16.msra.mxu1 %v13859_v5  ;;  %v13949_v5 = vld [vmem:[%s16326_s29 + $0x186c] ss:$120 sps:$4 sm:$0xff]  }
  0xdf   : > { %9283 = vmatpush1.bf16.msra.mxu0 %v13856_v4  ;;  %9325 = vmatprep.subr.bf16.mxu1 %v13867_v7  ;;  %v13944_v4 = vld [vmem:[%s16326_s29 + $0x880] ss:$120 sps:$4 sm:$0xff]  }
  0xe0   : > { %9284 = vmatprep.subr.bf16.mxu0 %v13864_v6  ;;  %v13952_v6 = vld [vmem:[%s16326_s29 + $0x974] ss:$120 sps:$4 sm:$0xff]   ;;  %v13947_v7 = vld [vmem:[%s16326_s29 + $0x1868] ss:$120 sps:$4 sm:$0xff]  }
  0xe2   : > { %9326 = vmatpush1.bf16.msra.mxu1 %v13865_v9  ;;  %v13955_v9 = vld [vmem:[%s16326_s29 + $0x195c] ss:$120 sps:$4 sm:$0xff]  }
  0xe3   : > { %9285 = vmatpush1.bf16.msra.mxu0 %v13862_v8  ;;  %9327 = vmatprep.subr.bf16.mxu1 %v13873_v11  ;;  %v13950_v8 = vld [vmem:[%s16326_s29 + $0x970] ss:$120 sps:$4 sm:$0xff]  }
  0xe4   : > { %9286 = vmatprep.subr.bf16.mxu0 %v13870_v10  ;;  %v13958_v10 = vld [vmem:[%s16326_s29 + $0xa64] ss:$120 sps:$4 sm:$0xff]   ;;  %v13953_v11 = vld [vmem:[%s16326_s29 + $0x1958] ss:$120 sps:$4 sm:$0xff]  }
  0xe6   : > { %9328 = vmatpush1.bf16.msra.mxu1 %v13871_v14  ;;  %v13961_v14 = vld [vmem:[%s16326_s29 + $0x1a4c] ss:$120 sps:$4 sm:$0xff]  }
  0xe7   : > { %9287 = vmatpush1.bf16.msra.mxu0 %v13868_v12  ;;  %9329 = vmatprep.subr.bf16.mxu1 %v13879_v16  ;;  %v13956_v12 = vld [vmem:[%s16326_s29 + $0xa60] ss:$120 sps:$4 sm:$0xff]  }
  0xe8   : > { %9288 = vmatprep.subr.bf16.mxu0 %v13876_v15  ;;  %v13964_v15 = vld [vmem:[%s16326_s29 + $0xb54] ss:$120 sps:$4 sm:$0xff]   ;;  %v13959_v16 = vld [vmem:[%s16326_s29 + $0x1a48] ss:$120 sps:$4 sm:$0xff]  }
  0xea   : > { %9330 = vmatpush1.bf16.msra.mxu1 %v13877_v18  ;;  %v13967_v18 = vld [vmem:[%s16326_s29 + $0x1b3c] ss:$120 sps:$4 sm:$0xff]  }
  0xeb   : > { %9289 = vmatpush1.bf16.msra.mxu0 %v13874_v17  ;;  %9331 = vmatprep.subr.bf16.mxu1 %v13885_v21  ;;  %v13962_v17 = vld [vmem:[%s16326_s29 + $0xb50] ss:$120 sps:$4 sm:$0xff]  }
  0xec   : > { %9290 = vmatprep.subr.bf16.mxu0 %v13882_v20  ;;  %v13970_v20 = vld [vmem:[%s16326_s29 + $0xc44] ss:$120 sps:$4 sm:$0xff]   ;;  %v13965_v21 = vld [vmem:[%s16326_s29 + $0x1b38] ss:$120 sps:$4 sm:$0xff]  }
  0xee   : > { %9332 = vmatpush1.bf16.msra.mxu1 %v13883_v24  ;;  %v13973_v24 = vld [vmem:[%s16326_s29 + $0x1c2c] ss:$120 sps:$4 sm:$0xff]  }
  0xef   : > { %9291 = vmatpush1.bf16.msra.mxu0 %v13880_v22  ;;  %9342 = vmatprep.subr.bf16.mxu1 %v13889_v25  ;;  %v13968_v22 = vld [vmem:[%s16326_s29 + $0xc40] ss:$120 sps:$4 sm:$0xff]   ;;  %v13976_v25 = vld [vmem:[%s16326_s29 + $0xd34] ss:$120 sps:$4 sm:$0xff]  }
  0xf0   : > { %9424 = vmatprep.subr.bf16.mxu0 %v13892_v26  ;;  %v13971_v26 = vld [vmem:[%s16326_s29 + $0x1c28] ss:$120 sps:$4 sm:$0xff]  }
  0xf1   : > { %9334 = vmatmul.mubr.bf16.vlgmr.msra.gmra.mrb[4].mxu1 %v16427_v13 }
  0xf2   : > { %9293 = vmatmul.mubr.bf16.vlgmr.msra.gmra.mrb[0].mxu0 %v16406_v63  ;;  %9343 = vmatpush1.bf16.msra.mxu1 %v13887_v27  ;;  %v13974_v27 = vld [vmem:[%s16326_s29 + $0xd30] ss:$120 sps:$4 sm:$0xff]  }
  0xf3   : > { %9425 = vmatpush1.bf16.msra.mxu0 %v13890_v28  ;;  %9344 = vmatprep.subr.bf16.mxu1 %v13895_v29  ;;  %v13979_v28 = vld [vmem:[%s16326_s29 + $0x1d1c] ss:$120 sps:$4 sm:$0xff]  }
  0xf4   : > { %9426 = vmatprep.subr.bf16.mxu0 %v13898_v30  ;;  %9374 = vmatprep.mubr.bf16.mxu1 %v16413_v3  ;;  %v13982_v29 = vld [vmem:[%s16326_s29 + $0xe24] ss:$120 sps:$4 sm:$0xff]   ;;  %v13977_v30 = vld [vmem:[%s16326_s29 + $0x1d18] ss:$120 sps:$4 sm:$0xff]  }
  0xf5   : > { %9456 = vmatprep.mubr.bf16.mxu0 %v16403_v62 }
  0xf6   : > { %9345 = vmatpush1.bf16.msra.mxu1 %v13893_v31  ;;  %v13980_v31 = vld [vmem:[%s16326_s29 + $0xe20] ss:$120 sps:$4 sm:$0xff]  }
  0xf7   : > { %9427 = vmatpush1.bf16.msra.mxu0 %v13896_v32  ;;  %9346 = vmatprep.subr.bf16.mxu1 %v13901_v33  ;;  %v13985_v32 = vld [vmem:[%s16326_s29 + $0x1e0c] ss:$120 sps:$4 sm:$0xff]  }
  0xf8   : > { %9428 = vmatprep.subr.bf16.mxu0 %v13904_v34  ;;  %v13988_v33 = vld [vmem:[%s16326_s29 + $0xf14] ss:$120 sps:$4 sm:$0xff]   ;;  %v13983_v34 = vld [vmem:[%s16326_s29 + $0x1e08] ss:$120 sps:$4 sm:$0xff]  }
  0xfa   : > { %9347 = vmatpush1.bf16.msra.mxu1 %v13899_v35  ;;  %v13986_v35 = vld [vmem:[%s16326_s29 + $0xf10] ss:$120 sps:$4 sm:$0xff]  }
  0xfb   : > { %9429 = vmatpush1.bf16.msra.mxu0 %v13902_v36  ;;  %9348 = vmatprep.subr.bf16.mxu1 %v13907_v37  ;;  %v13991_v36 = vld [vmem:[%s16326_s29 + $0x1efc] ss:$120 sps:$4 sm:$0xff]  }
  0xfc   : > { %9430 = vmatprep.subr.bf16.mxu0 %v13910_v38  ;;  %v13994_v37 = vld [vmem:[%s16326_s29 + $0x1004] ss:$120 sps:$4 sm:$0xff]   ;;  %v13989_v38 = vld [vmem:[%s16326_s29 + $0x1ef8] ss:$120 sps:$4 sm:$0xff]  }
  0xfe   : > { %9349 = vmatpush1.bf16.msra.mxu1 %v13905_v39  ;;  %v13992_v39 = vld [vmem:[%s16326_s29 + $0x1000] ss:$120 sps:$4 sm:$0xff]  }
  0xff   : > { %9431 = vmatpush1.bf16.msra.mxu0 %v13908_v40  ;;  %9350 = vmatprep.subr.bf16.mxu1 %v13913_v41  ;;  %v13997_v40 = vld [vmem:[%s16326_s29 + $0x1fec] ss:$120 sps:$4 sm:$0xff]  }
 0x100   : > { %9432 = vmatprep.subr.bf16.mxu0 %v13916_v43  ;;  %v14000_v41 = vld [vmem:[%s16326_s29 + $0x10f4] ss:$120 sps:$4 sm:$0xff]   ;;  %v13995_v43 = vld [vmem:[%s16326_s29 + $0x1fe8] ss:$120 sps:$4 sm:$0xff]  }
 0x102   : > { %9351 = vmatpush1.bf16.msra.mxu1 %v13911_v44  ;;  %v13998_v44 = vld [vmem:[%s16326_s29 + $0x10f0] ss:$120 sps:$4 sm:$0xff]  }
 0x103   : > { %9433 = vmatpush1.bf16.msra.mxu0 %v13914_v45  ;;  %9352 = vmatprep.subr.bf16.mxu1 %v13919_v46  ;;  %v14003_v45 = vld [vmem:[%s16326_s29 + $0x20dc] ss:$120 sps:$4 sm:$0xff]  }
 0x104   : > { %9434 = vmatprep.subr.bf16.mxu0 %v13922_v47  ;;  %v14006_v46 = vld [vmem:[%s16326_s29 + $0x11e4] ss:$120 sps:$4 sm:$0xff]   ;;  %v14001_v47 = vld [vmem:[%s16326_s29 + $0x20d8] ss:$120 sps:$4 sm:$0xff]  }
 0x106   : > { %9353 = vmatpush1.bf16.msra.mxu1 %v13917_v48  ;;  %v14004_v48 = vld [vmem:[%s16326_s29 + $0x11e0] ss:$120 sps:$4 sm:$0xff]  }
 0x107   : > { %9435 = vmatpush1.bf16.msra.mxu0 %v13920_v49  ;;  %9354 = vmatprep.subr.bf16.mxu1 %v13925_v50  ;;  %v14009_v49 = vld [vmem:[%s16326_s29 + $0x21cc] ss:$120 sps:$4 sm:$0xff]  }
 0x108   : > { %9436 = vmatprep.subr.bf16.mxu0 %v13928_v51  ;;  %v14012_v50 = vld [vmem:[%s16326_s29 + $0x12d4] ss:$120 sps:$4 sm:$0xff]   ;;  %v14007_v51 = vld [vmem:[%s16326_s29 + $0x21c8] ss:$120 sps:$4 sm:$0xff]  }
 0x10a   : > { %9355 = vmatpush1.bf16.msra.mxu1 %v13923_v52  ;;  %v14010_v52 = vld [vmem:[%s16326_s29 + $0x12d0] ss:$120 sps:$4 sm:$0xff]  }
 0x10b   : > { %9437 = vmatpush1.bf16.msra.mxu0 %v13926_v53  ;;  %9356 = vmatprep.subr.bf16.mxu1 %v13931_v54  ;;  %v14015_v53 = vld [vmem:[%s16326_s29 + $0x22bc] ss:$120 sps:$4 sm:$0xff]  }
 0x10c   : > { %9438 = vmatprep.subr.bf16.mxu0 %v13934_v55  ;;  %v14018_v54 = vld [vmem:[%s16326_s29 + $0x13c4] ss:$120 sps:$4 sm:$0xff]   ;;  %v14013_v55 = vld [vmem:[%s16326_s29 + $0x22b8] ss:$120 sps:$4 sm:$0xff]  }
 0x10e   : > { %9357 = vmatpush1.bf16.msra.mxu1 %v13929_v56  ;;  %v14016_v56 = vld [vmem:[%s16326_s29 + $0x13c0] ss:$120 sps:$4 sm:$0xff]  }
 0x10f   : > { %9439 = vmatpush1.bf16.msra.mxu0 %v13932_v57  ;;  %9358 = vmatprep.subr.bf16.mxu1 %v13937_v58  ;;  %v14021_v57 = vld [vmem:[%s16326_s29 + $0x23ac] ss:$120 sps:$4 sm:$0xff]  }
 0x110   : > { %9440 = vmatprep.subr.bf16.mxu0 %v13940_v59  ;;  %v14024_v58 = vld [vmem:[%s16326_s29 + $0x14b4] ss:$120 sps:$4 sm:$0xff]   ;;  %v14019_v59 = vld [vmem:[%s16326_s29 + $0x23a8] ss:$120 sps:$4 sm:$0xff]  }
 0x112   : > { %9359 = vmatpush1.bf16.msra.mxu1 %v13935_v60  ;;  %v14022_v60 = vld [vmem:[%s16326_s29 + $0x14b0] ss:$120 sps:$4 sm:$0xff]  }
 0x113   : > { %9441 = vmatpush1.bf16.msra.mxu0 %v13938_v61  ;;  %9360 = vmatprep.subr.bf16.mxu1 %v13943_v0  ;;  %v14027_v61 = vld [vmem:[%s16326_s29 + $0x249c] ss:$120 sps:$4 sm:$0xff]  }
 0x114   : > { %9442 = vmatprep.subr.bf16.mxu0 %v13946_v1  ;;  %v14030_v0 = vld [vmem:[%s16326_s29 + $0x15a4] ss:$120 sps:$4 sm:$0xff]   ;;  %v14025_v1 = vld [vmem:[%s16326_s29 + $0x2498] ss:$120 sps:$4 sm:$0xff]  }
 0x116   : > { %9361 = vmatpush1.bf16.msra.mxu1 %v13941_v2  ;;  %v14028_v2 = vld [vmem:[%s16326_s29 + $0x15a0] ss:$120 sps:$4 sm:$0xff]  }
 0x117   : > { %9443 = vmatpush1.bf16.msra.mxu0 %v13944_v4  ;;  %9362 = vmatprep.subr.bf16.mxu1 %v13949_v5  ;;  %v14033_v4 = vld [vmem:[%s16326_s29 + $0x258c] ss:$120 sps:$4 sm:$0xff]  }
 0x118   : > { %9444 = vmatprep.subr.bf16.mxu0 %v13952_v6  ;;  %v14036_v5 = vld [vmem:[%s16326_s29 + $0x1694] ss:$120 sps:$4 sm:$0xff]   ;;  %v14031_v6 = vld [vmem:[%s16326_s29 + $0x2588] ss:$120 sps:$4 sm:$0xff]  }
 0x11a   : > { %9363 = vmatpush1.bf16.msra.mxu1 %v13947_v7  ;;  %v14034_v7 = vld [vmem:[%s16326_s29 + $0x1690] ss:$120 sps:$4 sm:$0xff]  }
 0x11b   : > { %9445 = vmatpush1.bf16.msra.mxu0 %v13950_v8  ;;  %9364 = vmatprep.subr.bf16.mxu1 %v13955_v9  ;;  %v14039_v8 = vld [vmem:[%s16326_s29 + $0x267c] ss:$120 sps:$4 sm:$0xff]  }
 0x11c   : > { %9446 = vmatprep.subr.bf16.mxu0 %v13958_v10  ;;  %v14042_v9 = vld [vmem:[%s16326_s29 + $0x1784] ss:$120 sps:$4 sm:$0xff]   ;;  %v14037_v10 = vld [vmem:[%s16326_s29 + $0x2678] ss:$120 sps:$4 sm:$0xff]  }
 0x11e   : > { %9365 = vmatpush1.bf16.msra.mxu1 %v13953_v11  ;;  %v14040_v11 = vld [vmem:[%s16326_s29 + $0x1780] ss:$120 sps:$4 sm:$0xff]  }
 0x11f   : > { %9447 = vmatpush1.bf16.msra.mxu0 %v13956_v12  ;;  %9366 = vmatprep.subr.bf16.mxu1 %v13961_v14  ;;  %v14045_v12 = vld [vmem:[%s16326_s29 + $0x276c] ss:$120 sps:$4 sm:$0xff]  }
 0x120   : > { %9448 = vmatprep.subr.bf16.mxu0 %v13964_v15  ;;  %v14048_v14 = vld [vmem:[%s16326_s29 + $0x1874] ss:$120 sps:$4 sm:$0xff]   ;;  %v14043_v15 = vld [vmem:[%s16326_s29 + $0x2768] ss:$120 sps:$4 sm:$0xff]  }
 0x122   : > { %9367 = vmatpush1.bf16.msra.mxu1 %v13959_v16  ;;  %v14046_v16 = vld [vmem:[%s16326_s29 + $0x1870] ss:$120 sps:$4 sm:$0xff]  }
 0x123   : > { %9449 = vmatpush1.bf16.msra.mxu0 %v13962_v17  ;;  %9368 = vmatprep.subr.bf16.mxu1 %v13967_v18  ;;  %v14051_v17 = vld [vmem:[%s16326_s29 + $0x285c] ss:$120 sps:$4 sm:$0xff]  }
 0x124   : > { %9450 = vmatprep.subr.bf16.mxu0 %v13970_v20  ;;  %v14054_v18 = vld [vmem:[%s16326_s29 + $0x1964] ss:$120 sps:$4 sm:$0xff]   ;;  %v14049_v20 = vld [vmem:[%s16326_s29 + $0x2858] ss:$120 sps:$4 sm:$0xff]  }
 0x126   : > { %9369 = vmatpush1.bf16.msra.mxu1 %v13965_v21  ;;  %v14052_v21 = vld [vmem:[%s16326_s29 + $0x1960] ss:$120 sps:$4 sm:$0xff]  }
 0x127   : > { %9451 = vmatpush1.bf16.msra.mxu0 %v13968_v22  ;;  %9370 = vmatprep.subr.bf16.mxu1 %v13973_v24  ;;  %v14057_v22 = vld [vmem:[%s16326_s29 + $0x294c] ss:$120 sps:$4 sm:$0xff]  }
 0x128   : > { %9452 = vmatprep.subr.bf16.mxu0 %v13976_v25  ;;  %v14060_v24 = vld [vmem:[%s16326_s29 + $0x1a54] ss:$120 sps:$4 sm:$0xff]   ;;  %v14055_v25 = vld [vmem:[%s16326_s29 + $0x2948] ss:$120 sps:$4 sm:$0xff]  }
 0x12a   : > { %9371 = vmatpush1.bf16.msra.mxu1 %v13971_v26  ;;  %v14058_v26 = vld [vmem:[%s16326_s29 + $0x1a50] ss:$120 sps:$4 sm:$0xff]  }
 0x12b   : > { %9453 = vmatpush1.bf16.msra.mxu0 %v13974_v27  ;;  %9372 = vmatprep.subr.bf16.mxu1 %v13979_v28  ;;  %v14063_v27 = vld [vmem:[%s16326_s29 + $0x2a3c] ss:$120 sps:$4 sm:$0xff]  }
 0x12c   : > { %9454 = vmatprep.subr.bf16.mxu0 %v13982_v29  ;;  %v14066_v28 = vld [vmem:[%s16326_s29 + $0x1b44] ss:$120 sps:$4 sm:$0xff]   ;;  %v14061_v29 = vld [vmem:[%s16326_s29 + $0x2a38] ss:$120 sps:$4 sm:$0xff]  }
 0x12e   : > { %9373 = vmatpush1.bf16.msra.mxu1 %v13977_v30  ;;  %v14064_v30 = vld [vmem:[%s16326_s29 + $0x1b40] ss:$120 sps:$4 sm:$0xff]  }
 0x12f   : > { %9455 = vmatpush1.bf16.msra.mxu0 %v13980_v31  ;;  %9383 = vmatprep.subr.bf16.mxu1 %v13985_v32  ;;  %v14069_v31 = vld [vmem:[%s16326_s29 + $0x2b2c] ss:$120 sps:$4 sm:$0xff]  }
 0x130   : > { %9465 = vmatprep.subr.bf16.mxu0 %v13988_v33  ;;  %v14072_v32 = vld [vmem:[%s16326_s29 + $0x1c34] ss:$120 sps:$4 sm:$0xff]   ;;  %v14067_v33 = vld [vmem:[%s16326_s29 + $0x2b28] ss:$120 sps:$4 sm:$0xff]  }
 0x131   : > { %9375 = vmatmul.mubr.bf16.vlgmr.msra.gmra.mrb[4].mxu1 %v16435_v19 }
 0x132   : > { %9457 = vmatmul.mubr.bf16.vlgmr.msra.gmra.mrb[4].mxu0 %v16427_v13  ;;  %9384 = vmatpush1.bf16.msra.mxu1 %v13983_v34  ;;  %v14070_v34 = vld [vmem:[%s16326_s29 + $0x1c30] ss:$120 sps:$4 sm:$0xff]  }
 0x133   : > { %9466 = vmatpush1.bf16.msra.mxu0 %v13986_v35  ;;  %9385 = vmatprep.subr.bf16.mxu1 %v13991_v36  ;;  %v14075_v35 = vld [vmem:[%s16326_s29 + $0x2c1c] ss:$120 sps:$4 sm:$0xff]  }
 0x134   : > { %9467 = vmatprep.subr.bf16.mxu0 %v13994_v37  ;;  %9415 = vmatprep.mubr.bf16.mxu1 %v16441_v23  ;;  %v14078_v36 = vld [vmem:[%s16326_s29 + $0x1d24] ss:$120 sps:$4 sm:$0xff]   ;;  %v14073_v37 = vld [vmem:[%s16326_s29 + $0x2c18] ss:$120 sps:$4 sm:$0xff]  }
 0x135   : > { %9497 = vmatprep.mubr.bf16.mxu0 %v16413_v3 }
 0x136   : > { %9386 = vmatpush1.bf16.msra.mxu1 %v13989_v38  ;;  %v14076_v38 = vld [vmem:[%s16326_s29 + $0x1d20] ss:$120 sps:$4 sm:$0xff]  }
 0x137   : > { %9468 = vmatpush1.bf16.msra.mxu0 %v13992_v39  ;;  %9387 = vmatprep.subr.bf16.mxu1 %v13997_v40  ;;  %v14081_v39 = vld [vmem:[%s16326_s29 + $0x1e14] ss:$120 sps:$4 sm:$0xff]  }
 0x138   : > { %9469 = vmatprep.subr.bf16.mxu0 %v14000_v41  ;;  %v14084_v40 = vld [vmem:[%s16326_s29 + $0x1c] ss:$120 sps:$4 sm:$0xff]   ;;  %v14079_v41 = vld [vmem:[%s16326_s29 + $0x1e10] ss:$120 sps:$4 sm:$0xff]  }
 0x13a   : > { %9388 = vmatpush1.bf16.msra.mxu1 %v13995_v43  ;;  %v14082_v43 = vld [vmem:[%s16326_s29 + $0x18] ss:$120 sps:$4 sm:$0xff]  }
 0x13b   : > { %9470 = vmatpush1.bf16.msra.mxu0 %v13998_v44  ;;  %9389 = vmatprep.subr.bf16.mxu1 %v14003_v45  ;;  %v14087_v44 = vld [vmem:[%s16326_s29 + $0x1f04] ss:$120 sps:$4 sm:$0xff]  }
 0x13c   : > { %9471 = vmatprep.subr.bf16.mxu0 %v14006_v46  ;;  %v14090_v45 = vld [vmem:[%s16326_s29 + $0x10c] ss:$120 sps:$4 sm:$0xff]   ;;  %v14085_v46 = vld [vmem:[%s16326_s29 + $0x1f00] ss:$120 sps:$4 sm:$0xff]  }
 0x13e   : > { %9390 = vmatpush1.bf16.msra.mxu1 %v14001_v47  ;;  %v14088_v47 = vld [vmem:[%s16326_s29 + $0x108] ss:$120 sps:$4 sm:$0xff]  }
 0x13f   : > { %9472 = vmatpush1.bf16.msra.mxu0 %v14004_v48  ;;  %9391 = vmatprep.subr.bf16.mxu1 %v14009_v49  ;;  %v14093_v48 = vld [vmem:[%s16326_s29 + $0x1ff4] ss:$120 sps:$4 sm:$0xff]  }
 0x140   : > { %9473 = vmatprep.subr.bf16.mxu0 %v14012_v50  ;;  %v14096_v49 = vld [vmem:[%s16326_s29 + $0x1fc] ss:$120 sps:$4 sm:$0xff]   ;;  %v14091_v50 = vld [vmem:[%s16326_s29 + $0x1ff0] ss:$120 sps:$4 sm:$0xff]  }
 0x142   : > { %9392 = vmatpush1.bf16.msra.mxu1 %v14007_v51  ;;  %v14094_v51 = vld [vmem:[%s16326_s29 + $0x1f8] ss:$120 sps:$4 sm:$0xff]  }
 0x143   : > { %9474 = vmatpush1.bf16.msra.mxu0 %v14010_v52  ;;  %9393 = vmatprep.subr.bf16.mxu1 %v14015_v53  ;;  %v14099_v52 = vld [vmem:[%s16326_s29 + $0x20e4] ss:$120 sps:$4 sm:$0xff]  }
 0x144   : > { %9475 = vmatprep.subr.bf16.mxu0 %v14018_v54  ;;  %v14102_v53 = vld [vmem:[%s16326_s29 + $0x2ec] ss:$120 sps:$4 sm:$0xff]   ;;  %v14097_v54 = vld [vmem:[%s16326_s29 + $0x20e0] ss:$120 sps:$4 sm:$0xff]  }
 0x146   : > { %9394 = vmatpush1.bf16.msra.mxu1 %v14013_v55  ;;  %v14100_v55 = vld [vmem:[%s16326_s29 + $0x2e8] ss:$120 sps:$4 sm:$0xff]  }
 0x147   : > { %9476 = vmatpush1.bf16.msra.mxu0 %v14016_v56  ;;  %9395 = vmatprep.subr.bf16.mxu1 %v14021_v57  ;;  %v14105_v56 = vld [vmem:[%s16326_s29 + $0x21d4] ss:$120 sps:$4 sm:$0xff]  }
 0x148   : > { %9477 = vmatprep.subr.bf16.mxu0 %v14024_v58  ;;  %v14108_v57 = vld [vmem:[%s16326_s29 + $0x3dc] ss:$120 sps:$4 sm:$0xff]   ;;  %v14103_v58 = vld [vmem:[%s16326_s29 + $0x21d0] ss:$120 sps:$4 sm:$0xff]  }
 0x14a   : > { %9396 = vmatpush1.bf16.msra.mxu1 %v14019_v59  ;;  %v14106_v59 = vld [vmem:[%s16326_s29 + $0x3d8] ss:$120 sps:$4 sm:$0xff]  }
 0x14b   : > { %9478 = vmatpush1.bf16.msra.mxu0 %v14022_v60  ;;  %9397 = vmatprep.subr.bf16.mxu1 %v14027_v61  ;;  %v14111_v60 = vld [vmem:[%s16326_s29 + $0x22c4] ss:$120 sps:$4 sm:$0xff]  }
 0x14c   : > { %9479 = vmatprep.subr.bf16.mxu0 %v14030_v0  ;;  %v14114_v61 = vld [vmem:[%s16326_s29 + $0x4cc] ss:$120 sps:$4 sm:$0xff]   ;;  %v14109_v0 = vld [vmem:[%s16326_s29 + $0x22c0] ss:$120 sps:$4 sm:$0xff]  }
 0x14e   : > { %9398 = vmatpush1.bf16.msra.mxu1 %v14025_v1  ;;  %v14112_v1 = vld [vmem:[%s16326_s29 + $0x4c8] ss:$120 sps:$4 sm:$0xff]  }
 0x14f   : > { %9480 = vmatpush1.bf16.msra.mxu0 %v14028_v2  ;;  %9399 = vmatprep.subr.bf16.mxu1 %v14033_v4  ;;  %v14117_v2 = vld [vmem:[%s16326_s29 + $0x23b4] ss:$120 sps:$4 sm:$0xff]  }
 0x150   : > { %9481 = vmatprep.subr.bf16.mxu0 %v14036_v5  ;;  %v14120_v4 = vld [vmem:[%s16326_s29 + $0x5bc] ss:$120 sps:$4 sm:$0xff]  }
 0x152   : > { %9400 = vmatpush1.bf16.msra.mxu1 %v14031_v6 }
 0x153   : > { %9482 = vmatpush1.bf16.msra.mxu0 %v14034_v7  ;;  %9401 = vmatprep.subr.bf16.mxu1 %v14039_v8  ;;  %v14115_v7 = vld [vmem:[%s16326_s29 + $0x23b0] ss:$120 sps:$4 sm:$0xff]  }
 0x154   : > { %9483 = vmatprep.subr.bf16.mxu0 %v14042_v9  ;;  %v14118_v8 = vld [vmem:[%s16326_s29 + $0x5b8] ss:$120 sps:$4 sm:$0xff]  }
 0x156   : > { %9402 = vmatpush1.bf16.msra.mxu1 %v14037_v10  ;;  %v14123_v10 = vld [vmem:[%s16326_s29 + $0x24a4] ss:$120 sps:$4 sm:$0xff]  }
 0x157   : > { %9484 = vmatpush1.bf16.msra.mxu0 %v14040_v11  ;;  %9403 = vmatprep.subr.bf16.mxu1 %v14045_v12  ;;  %v14126_v11 = vld [vmem:[%s16326_s29 + $0x6ac] ss:$120 sps:$4 sm:$0xff]  }
 0x158   : > { %9485 = vmatprep.subr.bf16.mxu0 %v14048_v14  ;;  %v14121_v14 = vld [vmem:[%s16326_s29 + $0x24a0] ss:$120 sps:$4 sm:$0xff]  }
 0x15a   : > { %9404 = vmatpush1.bf16.msra.mxu1 %v14043_v15  ;;  %v14124_v15 = vld [vmem:[%s16326_s29 + $0x6a8] ss:$120 sps:$4 sm:$0xff]  }
 0x15b   : > { %9486 = vmatpush1.bf16.msra.mxu0 %v14046_v16  ;;  %9405 = vmatprep.subr.bf16.mxu1 %v14051_v17  ;;  %v14129_v16 = vld [vmem:[%s16326_s29 + $0x2594] ss:$120 sps:$4 sm:$0xff]  }
 0x15c   : > { %9487 = vmatprep.subr.bf16.mxu0 %v14054_v18  ;;  %v14132_v17 = vld [vmem:[%s16326_s29 + $0x79c] ss:$120 sps:$4 sm:$0xff]   ;;  %v14127_v18 = vld [vmem:[%s16326_s29 + $0x2590] ss:$120 sps:$4 sm:$0xff]  }
 0x15e   : > { %9406 = vmatpush1.bf16.msra.mxu1 %v14049_v20  ;;  %v14130_v20 = vld [vmem:[%s16326_s29 + $0x798] ss:$120 sps:$4 sm:$0xff]  }
 0x15f   : > { %9488 = vmatpush1.bf16.msra.mxu0 %v14052_v21  ;;  %9407 = vmatprep.subr.bf16.mxu1 %v14057_v22  ;;  %v14135_v21 = vld [vmem:[%s16326_s29 + $0x2684] ss:$120 sps:$4 sm:$0xff]  }
 0x160   : > { %9489 = vmatprep.subr.bf16.mxu0 %v14060_v24  ;;  %v14138_v22 = vld [vmem:[%s16326_s29 + $0x88c] ss:$120 sps:$4 sm:$0xff]   ;;  %v14133_v24 = vld [vmem:[%s16326_s29 + $0x2680] ss:$120 sps:$4 sm:$0xff]  }
 0x162   : > { %9408 = vmatpush1.bf16.msra.mxu1 %v14055_v25  ;;  %v14136_v25 = vld [vmem:[%s16326_s29 + $0x888] ss:$120 sps:$4 sm:$0xff]  }
 0x163   : > { %9490 = vmatpush1.bf16.msra.mxu0 %v14058_v26  ;;  %9409 = vmatprep.subr.bf16.mxu1 %v14063_v27  ;;  %v14141_v26 = vld [vmem:[%s16326_s29 + $0x2774] ss:$120 sps:$4 sm:$0xff]  }
 0x164   : > { %9491 = vmatprep.subr.bf16.mxu0 %v14066_v28  ;;  %v14144_v27 = vld [vmem:[%s16326_s29 + $0x97c] ss:$120 sps:$4 sm:$0xff]   ;;  %v14139_v28 = vld [vmem:[%s16326_s29 + $0x2770] ss:$120 sps:$4 sm:$0xff]  }
 0x166   : > { %9410 = vmatpush1.bf16.msra.mxu1 %v14061_v29  ;;  %v14142_v29 = vld [vmem:[%s16326_s29 + $0x978] ss:$120 sps:$4 sm:$0xff]  }
 0x167   : > { %9492 = vmatpush1.bf16.msra.mxu0 %v14064_v30  ;;  %9411 = vmatprep.subr.bf16.mxu1 %v14069_v31  ;;  %v14147_v30 = vld [vmem:[%s16326_s29 + $0x2864] ss:$120 sps:$4 sm:$0xff]  }
 0x168   : > { %9493 = vmatprep.subr.bf16.mxu0 %v14072_v32  ;;  %v14150_v31 = vld [vmem:[%s16326_s29 + $0xa6c] ss:$120 sps:$4 sm:$0xff]   ;;  %v14145_v32 = vld [vmem:[%s16326_s29 + $0x2860] ss:$120 sps:$4 sm:$0xff]  }
 0x16a   : > { %9412 = vmatpush1.bf16.msra.mxu1 %v14067_v33  ;;  %v14148_v33 = vld [vmem:[%s16326_s29 + $0xa68] ss:$120 sps:$4 sm:$0xff]  }
 0x16b   : > { %9494 = vmatpush1.bf16.msra.mxu0 %v14070_v34  ;;  %9413 = vmatprep.subr.bf16.mxu1 %v14075_v35  ;;  %v14153_v34 = vld [vmem:[%s16326_s29 + $0x2954] ss:$120 sps:$4 sm:$0xff]  }
 0x16c   : > { %9495 = vmatprep.subr.bf16.mxu0 %v14078_v36  ;;  %v14156_v35 = vld [vmem:[%s16326_s29 + $0xb5c] ss:$120 sps:$4 sm:$0xff]   ;;  %v14151_v36 = vld [vmem:[%s16326_s29 + $0x2950] ss:$120 sps:$4 sm:$0xff]  }
 0x16e   : > { %9414 = vmatpush1.bf16.msra.mxu1 %v14073_v37  ;;  %v14154_v37 = vld [vmem:[%s16326_s29 + $0xb58] ss:$120 sps:$4 sm:$0xff]  }
 0x16f   : > { %9496 = vmatpush1.bf16.msra.mxu0 %v14076_v38  ;;  %9547 = vmatprep.subr.bf16.mxu1 %v14084_v40  ;;  %v14159_v38 = vld [vmem:[%s16326_s29 + $0x2a44] ss:$120 sps:$4 sm:$0xff]   ;;  %v14157_v40 = vld [vmem:[%s16326_s29 + $0x2a40] ss:$120 sps:$4 sm:$0xff]  }
 0x170   : > { %9506 = vmatprep.subr.bf16.mxu0 %v14081_v39  ;;  %v14162_v39 = vld [vmem:[%s16326_s29 + $0xc4c] ss:$120 sps:$4 sm:$0xff]  }
 0x171   : > { %9416 = vmatmul.mubr.bf16.vlgmr.msra.gmra.mrb[4].mxu1 %v16406_v63 }
 0x172   : > { %9498 = vmatmul.mubr.bf16.vlgmr.msra.gmra.mrb[4].mxu0 %v16435_v19  ;;  %9548 = vmatpush1.bf16.msra.mxu1 %v14082_v43  ;;  %v14165_v43 = vld [vmem:[%s16326_s29 + $0x2b34] ss:$120 sps:$4 sm:$0xff]  }
 0x173   : > { %9507 = vmatpush1.bf16.msra.mxu0 %v14079_v41  ;;  %9549 = vmatprep.subr.bf16.mxu1 %v14090_v45  ;;  %v14160_v41 = vld [vmem:[%s16326_s29 + $0xc48] ss:$120 sps:$4 sm:$0xff]  }
 0x174   : > { %9508 = vmatprep.subr.bf16.mxu0 %v14087_v44  ;;  %9538 = vmatprep.mubr.bf16.mxu0 %v16441_v23  ;;  %v14168_v44 = vld [vmem:[%s16326_s29 + $0xd3c] ss:$120 sps:$4 sm:$0xff]   ;;  %v14163_v45 = vld [vmem:[%s16326_s29 + $0x2b30] ss:$120 sps:$4 sm:$0xff]  }
 0x175   : > { %9579 = vmatprep.mubr.bf16.mxu1 %v16403_v62 }
 0x176   : > { %9550 = vmatpush1.bf16.msra.mxu1 %v14088_v47  ;;  %v14171_v47 = vld [vmem:[%s16326_s29 + $0x2c24] ss:$120 sps:$4 sm:$0xff]  }
 0x177   : > { %9509 = vmatpush1.bf16.msra.mxu0 %v14085_v46  ;;  %9551 = vmatprep.subr.bf16.mxu1 %v14096_v49  ;;  %v14166_v46 = vld [vmem:[%s16326_s29 + $0xd38] ss:$120 sps:$4 sm:$0xff]  }
 0x178   : > { %9510 = vmatprep.subr.bf16.mxu0 %v14093_v48  ;;  %v14174_v48 = vld [vmem:[%s16326_s29 + $0xe2c] ss:$120 sps:$4 sm:$0xff]   ;;  %v14169_v49 = vld [vmem:[%s16326_s29 + $0x2c20] ss:$120 sps:$4 sm:$0xff]  }
 0x17a   : > { %9552 = vmatpush1.bf16.msra.mxu1 %v14094_v51  ;;  %v14177_v51 = vld [vmem:[%s16326_s29 + $0xf1c] ss:$120 sps:$4 sm:$0xff]  }
 0x17b   : > { %9511 = vmatpush1.bf16.msra.mxu0 %v14091_v50  ;;  %9553 = vmatprep.subr.bf16.mxu1 %v14102_v53  ;;  %v14172_v50 = vld [vmem:[%s16326_s29 + $0xe28] ss:$120 sps:$4 sm:$0xff]   ;;  %v14175_v53 = vld [vmem:[%s16326_s29 + $0xf18] ss:$120 sps:$4 sm:$0xff]  }
 0x17c   : > { %9512 = vmatprep.subr.bf16.mxu0 %v14099_v52  ;;  %v14180_v52 = vld [vmem:[%s16326_s29 + $0x24] ss:$120 sps:$4 sm:$0xff]  }
 0x17e   : > { %9554 = vmatpush1.bf16.msra.mxu1 %v14100_v55  ;;  %v14183_v55 = vld [vmem:[%s16326_s29 + $0x100c] ss:$120 sps:$4 sm:$0xff]  }
 0x17f   : > { %9513 = vmatpush1.bf16.msra.mxu0 %v14097_v54  ;;  %9555 = vmatprep.subr.bf16.mxu1 %v14108_v57  ;;  %v14178_v54 = vld [vmem:[%s16326_s29 + $0x20] ss:$120 sps:$4 sm:$0xff]  }
 0x180   : > { %9514 = vmatprep.subr.bf16.mxu0 %v14105_v56  ;;  %v14186_v56 = vld [vmem:[%s16326_s29 + $0x114] ss:$120 sps:$4 sm:$0xff]   ;;  %v14181_v57 = vld [vmem:[%s16326_s29 + $0x1008] ss:$120 sps:$4 sm:$0xff]  }
 0x182   : > { %9556 = vmatpush1.bf16.msra.mxu1 %v14106_v59  ;;  %v14189_v59 = vld [vmem:[%s16326_s29 + $0x10fc] ss:$120 sps:$4 sm:$0xff]  }
 0x183   : > { %9515 = vmatpush1.bf16.msra.mxu0 %v14103_v58  ;;  %9557 = vmatprep.subr.bf16.mxu1 %v14114_v61  ;;  %v14184_v58 = vld [vmem:[%s16326_s29 + $0x110] ss:$120 sps:$4 sm:$0xff]  }
 0x184   : > { %9516 = vmatprep.subr.bf16.mxu0 %v14111_v60  ;;  %v16671_v5 = vpop.f32.mrb[0].mxu1  ;;  %v14192_v60 = vld [vmem:[%s16326_s29 + $0x204] ss:$120 sps:$4 sm:$0xff]   ;;  %v14187_v61 = vld [vmem:[%s16326_s29 + $0x10f8] ss:$120 sps:$4 sm:$0xff]  }
 0x185   : > { %v16673_v6 = vpop.f32.mrb[1].mxu1 }
 0x186   : > { %9558 = vmatpush1.bf16.msra.mxu1 %v14112_v1  ;;  %v9216_v9 = vpop.f32.mrb[2].mxu1  ;;  %v14195_v1 = vld [vmem:[%s16326_s29 + $0x11ec] ss:$120 sps:$4 sm:$0xff]  }
 0x187   : > { %9517 = vmatpush1.bf16.msra.mxu0 %v14109_v0  ;;  %9559 = vmatprep.subr.bf16.mxu1 %v14120_v4  ;;  %v9217_v12 = vpop.f32.mrb[3].mxu1  ;;  %v14190_v0 = vld [vmem:[%s16326_s29 + $0x200] ss:$120 sps:$4 sm:$0xff]   ;;  %v16735_v9 = vsub.s32 0, %v16380_v42 }
 0x188   : > { %9518 = vmatprep.subr.bf16.mxu0 %v14117_v2  ;;  %v14198_v2 = vld [vmem:[%s16326_s29 + $0x2f4] ss:$120 sps:$4 sm:$0xff]   ;;  %v1766_v4 = vld [vmem:[%s16335_s12] sm:$0xff]  ;;  %v16740_v12 = vsub.s32 1, %v16380_v42 }
 0x18a   : > { %9560 = vmatpush1.bf16.msra.mxu1 %v14118_v8  ;;  %v14196_v8 = vld [vmem:[%s16326_s29 + $0x2f0] ss:$120 sps:$4 sm:$0xff]  }
 0x18b   : > { %9519 = vmatpush1.bf16.msra.mxu0 %v14115_v7  ;;  %9561 = vmatprep.subr.bf16.mxu1 %v14126_v11  ;;  %v14193_v7 = vld [vmem:[%s16326_s29 + $0x11e8] ss:$120 sps:$4 sm:$0xff]   ;;  %v14204_v11 = vld [vmem:[%s16326_s29 + $0x3e4] ss:$120 sps:$4 sm:$0xff]  }
 0x18c   : > { %9520 = vmatprep.subr.bf16.mxu0 %v14123_v10  ;;  %v14201_v10 = vld [vmem:[%s16326_s29 + $0x12dc] ss:$120 sps:$4 sm:$0xff]  }
 0x18e   : > { %9562 = vmatpush1.bf16.msra.mxu1 %v14124_v15  ;;  %v14202_v15 = vld [vmem:[%s16326_s29 + $0x3e0] ss:$120 sps:$4 sm:$0xff]  }
 0x18f   : > { %9521 = vmatpush1.bf16.msra.mxu0 %v14121_v14  ;;  %9563 = vmatprep.subr.bf16.mxu1 %v14132_v17  ;;  %v14199_v14 = vld [vmem:[%s16326_s29 + $0x12d8] ss:$120 sps:$4 sm:$0xff]   ;;  %v14207_v17 = vld [vmem:[%s16326_s29 + $0x13cc] ss:$120 sps:$4 sm:$0xff]  }
 0x190   : > { %9522 = vmatprep.subr.bf16.mxu0 %v14129_v16  ;;  %v1777_v16 = vrot.slane %v1766_v4, %v16735_v9 }
 0x192   : > { %9564 = vmatpush1.bf16.msra.mxu1 %v14130_v20  ;;  %v1781_v20 = vrot.slane %v1766_v4, %v16740_v12  ;;  %v14259_v4 = vld [vmem:[%s16326_s29 + $0x1c38] ss:$120 sps:$4 sm:$0xff]  }
 0x193   : > { %9523 = vmatpush1.bf16.msra.mxu0 %v14127_v18  ;;  %9565 = vmatprep.subr.bf16.mxu1 %v14138_v22  ;;  %v14210_v18 = vld [vmem:[%s16326_s29 + $0x4d4] ss:$120 sps:$4 sm:$0xff]   ;;  %v14208_v22 = vld [vmem:[%s16326_s29 + $0x4d0] ss:$120 sps:$4 sm:$0xff]  }
 0x194   : > { %9524 = vmatprep.subr.bf16.mxu0 %v14135_v21  ;;  %v14205_v21 = vld [vmem:[%s16326_s29 + $0x13c8] ss:$120 sps:$4 sm:$0xff]  }
 0x196   : > { %9566 = vmatpush1.bf16.msra.mxu1 %v14136_v25  ;;  %v14213_v25 = vld [vmem:[%s16326_s29 + $0x14bc] ss:$120 sps:$4 sm:$0xff]  }
 0x197   : > { %9525 = vmatpush1.bf16.msra.mxu0 %v14133_v24  ;;  %9567 = vmatprep.subr.bf16.mxu1 %v14144_v27  ;;  %v9213_v24 = vadd.f32 %v16671_v5, %v1777_v16  ;;  %v9215_v27 = vadd.f32 %v16673_v6, %v1781_v20  ;;  %v14219_v6 = vld [vmem:[%s16326_s29 + $0x15ac] ss:$120 sps:$4 sm:$0xff]  }
 0x198   : > { %9526 = vmatprep.subr.bf16.mxu0 %v14141_v26  ;;  %v14216_v26 = vld [vmem:[%s16326_s29 + $0x5c4] ss:$120 sps:$4 sm:$0xff]  }
 0x199   : > { %v14276_v16 = vld [vmem:[%s16326_s29 + $0xf24] ss:$120 sps:$4 sm:$0xff]  }
 0x19a   : > { %9568 = vmatpush1.bf16.msra.mxu1 %v14142_v29  ;;  %v14211_v29 = vld [vmem:[%s16326_s29 + $0x14b8] ss:$120 sps:$4 sm:$0xff]   ;;  %v14279_v20 = vld [vmem:[%s16326_s29 + $0x1f0c] ss:$120 sps:$4 sm:$0xff]  }
 0x19b   : > { %9527 = vmatpush1.bf16.msra.mxu0 %v14139_v28  ;;  %9569 = vmatprep.subr.bf16.mxu1 %v14150_v31 }
 0x19c   : > { %9528 = vmatprep.subr.bf16.mxu0 %v14147_v30  ;;  %v14214_v30 = vld [vmem:[%s16326_s29 + $0x5c0] ss:$120 sps:$4 sm:$0xff]  }
 0x19e   : > { %9570 = vmatpush1.bf16.msra.mxu1 %v14148_v33 }
 0x19f   : > { %9529 = vmatpush1.bf16.msra.mxu0 %v14145_v32  ;;  %9571 = vmatprep.subr.bf16.mxu1 %v14156_v35  ;;  %v14222_v35 = vld [vmem:[%s16326_s29 + $0x6b4] ss:$120 sps:$4 sm:$0xff]  }
 0x1a0   : > { %9530 = vmatprep.subr.bf16.mxu0 %v14153_v34 }
 0x1a2   : > { %9572 = vmatpush1.bf16.msra.mxu1 %v14154_v37  ;;  %v14220_v37 = vld [vmem:[%s16326_s29 + $0x6b0] ss:$120 sps:$4 sm:$0xff]  }
 0x1a3   : > { %9531 = vmatpush1.bf16.msra.mxu0 %v14151_v36  ;;  %9573 = vmatprep.subr.bf16.mxu1 %v14162_v39  ;;  %v14217_v36 = vld [vmem:[%s16326_s29 + $0x15a8] ss:$120 sps:$4 sm:$0xff]   ;;  %v14228_v39 = vld [vmem:[%s16326_s29 + $0x7a4] ss:$120 sps:$4 sm:$0xff]  }
 0x1a4   : > { %9532 = vmatprep.subr.bf16.mxu0 %v14159_v38  ;;  %v14225_v38 = vld [vmem:[%s16326_s29 + $0x169c] ss:$120 sps:$4 sm:$0xff]  }
 0x1a6   : > { %9574 = vmatpush1.bf16.msra.mxu1 %v14160_v41  ;;  %v14226_v41 = vld [vmem:[%s16326_s29 + $0x7a0] ss:$120 sps:$4 sm:$0xff]  }
 0x1a7   : > { %9533 = vmatpush1.bf16.msra.mxu0 %v14157_v40  ;;  %9575 = vmatprep.subr.bf16.mxu1 %v14168_v44  ;;  %v14223_v40 = vld [vmem:[%s16326_s29 + $0x1698] ss:$120 sps:$4 sm:$0xff]   ;;  %v14234_v44 = vld [vmem:[%s16326_s29 + $0x894] ss:$120 sps:$4 sm:$0xff]  }
 0x1a8   : > { %9534 = vmatprep.subr.bf16.mxu0 %v14165_v43  ;;  %v14231_v43 = vld [vmem:[%s16326_s29 + $0x178c] ss:$120 sps:$4 sm:$0xff]  }
 0x1aa   : > { %9576 = vmatpush1.bf16.msra.mxu1 %v14166_v46  ;;  %v14232_v46 = vld [vmem:[%s16326_s29 + $0x890] ss:$120 sps:$4 sm:$0xff]  }
 0x1ab   : > { %9535 = vmatpush1.bf16.msra.mxu0 %v14163_v45  ;;  %9577 = vmatprep.subr.bf16.mxu1 %v14174_v48  ;;  %v14229_v45 = vld [vmem:[%s16326_s29 + $0x1788] ss:$120 sps:$4 sm:$0xff]   ;;  %v14240_v48 = vld [vmem:[%s16326_s29 + $0x984] ss:$120 sps:$4 sm:$0xff]  }
 0x1ac   : > { %9536 = vmatprep.subr.bf16.mxu0 %v14171_v47  ;;  %v14237_v47 = vld [vmem:[%s16326_s29 + $0x187c] ss:$120 sps:$4 sm:$0xff]  }
 0x1ae   : > { %9578 = vmatpush1.bf16.msra.mxu1 %v14172_v50  ;;  %v14238_v50 = vld [vmem:[%s16326_s29 + $0x980] ss:$120 sps:$4 sm:$0xff]  }
 0x1af   : > { %9537 = vmatpush1.bf16.msra.mxu0 %v14169_v49  ;;  %9588 = vmatprep.subr.bf16.mxu1 %v14177_v51  ;;  %v14235_v49 = vld [vmem:[%s16326_s29 + $0x1878] ss:$120 sps:$4 sm:$0xff]   ;;  %v14243_v51 = vld [vmem:[%s16326_s29 + $0x196c] ss:$120 sps:$4 sm:$0xff]  }
 0x1b0   : > { %9670 = vmatprep.subr.bf16.mxu0 %v14180_v52  ;;  %v14246_v52 = vld [vmem:[%s16326_s29 + $0xa74] ss:$120 sps:$4 sm:$0xff]  }
 0x1b1   : > { %9580 = vmatmul.mubr.bf16.vlgmr.msra.gmra.mrb[8].mxu1 %v16427_v13 }
 0x1b2   : > { %9539 = vmatmul.mubr.bf16.vlgmr.msra.gmra.mrb[4].mxu0 %v16406_v63  ;;  %9589 = vmatpush1.bf16.msra.mxu1 %v14175_v53  ;;  %v14241_v53 = vld [vmem:[%s16326_s29 + $0x1968] ss:$120 sps:$4 sm:$0xff]  }
 0x1b3   : > { %9671 = vmatpush1.bf16.msra.mxu0 %v14178_v54  ;;  %9590 = vmatprep.subr.bf16.mxu1 %v14183_v55  ;;  %v14244_v54 = vld [vmem:[%s16326_s29 + $0xa70] ss:$120 sps:$4 sm:$0xff]   ;;  %v14249_v55 = vld [vmem:[%s16326_s29 + $0x1a5c] ss:$120 sps:$4 sm:$0xff]  }
 0x1b4   : > { %9672 = vmatprep.subr.bf16.mxu0 %v14186_v56  ;;  %9620 = vmatprep.mubr.bf16.mxu1 %v16413_v3  ;;  %v14252_v56 = vld [vmem:[%s16326_s29 + $0xb64] ss:$120 sps:$4 sm:$0xff]  }
 0x1b5   : > { %9702 = vmatprep.mubr.bf16.mxu0 %v16403_v62 }
 0x1b6   : > { %9591 = vmatpush1.bf16.msra.mxu1 %v14181_v57  ;;  %v14247_v57 = vld [vmem:[%s16326_s29 + $0x1a58] ss:$120 sps:$4 sm:$0xff]  }
 0x1b7   : > { %9673 = vmatpush1.bf16.msra.mxu0 %v14184_v58  ;;  %9592 = vmatprep.subr.bf16.mxu1 %v14189_v59  ;;  %v14250_v58 = vld [vmem:[%s16326_s29 + $0xb60] ss:$120 sps:$4 sm:$0xff]   ;;  %v14255_v59 = vld [vmem:[%s16326_s29 + $0x1b4c] ss:$120 sps:$4 sm:$0xff]  }
 0x1b8   : > { %9674 = vmatprep.subr.bf16.mxu0 %v14192_v60  ;;  %v14258_v60 = vld [vmem:[%s16326_s29 + $0xc54] ss:$120 sps:$4 sm:$0xff]  }
 0x1ba   : > { %9593 = vmatpush1.bf16.msra.mxu1 %v14187_v61  ;;  %v14253_v61 = vld [vmem:[%s16326_s29 + $0x1b48] ss:$120 sps:$4 sm:$0xff]  }
 0x1bb   : > { %9675 = vmatpush1.bf16.msra.mxu0 %v14190_v0  ;;  %9594 = vmatprep.subr.bf16.mxu1 %v14195_v1  ;;  %v14256_v0 = vld [vmem:[%s16326_s29 + $0xc50] ss:$120 sps:$4 sm:$0xff]   ;;  %v14261_v1 = vld [vmem:[%s16326_s29 + $0x1c3c] ss:$120 sps:$4 sm:$0xff]  }
 0x1bc   : > { %9676 = vmatprep.subr.bf16.mxu0 %v14198_v2  ;;  %v14264_v2 = vld [vmem:[%s16326_s29 + $0xd44] ss:$120 sps:$4 sm:$0xff]  }
 0x1be   : > { %9595 = vmatpush1.bf16.msra.mxu1 %v14193_v7  ;;  %v14262_v7 = vld [vmem:[%s16326_s29 + $0xd40] ss:$120 sps:$4 sm:$0xff]  }
 0x1bf   : > { %9677 = vmatpush1.bf16.msra.mxu0 %v14196_v8  ;;  %9596 = vmatprep.subr.bf16.mxu1 %v14201_v10  ;;  %v14267_v8 = vld [vmem:[%s16326_s29 + $0x1d2c] ss:$120 sps:$4 sm:$0xff]  }
 0x1c0   : > { %9678 = vmatprep.subr.bf16.mxu0 %v14204_v11  ;;  %v14270_v10 = vld [vmem:[%s16326_s29 + $0xe34] ss:$120 sps:$4 sm:$0xff]   ;;  %v14265_v11 = vld [vmem:[%s16326_s29 + $0x1d28] ss:$120 sps:$4 sm:$0xff]  }
 0x1c2   : > { %9597 = vmatpush1.bf16.msra.mxu1 %v14199_v14  ;;  %v14268_v14 = vld [vmem:[%s16326_s29 + $0xe30] ss:$120 sps:$4 sm:$0xff]  }
 0x1c3   : > { %9679 = vmatpush1.bf16.msra.mxu0 %v14202_v15  ;;  %9598 = vmatprep.subr.bf16.mxu1 %v14207_v17  ;;  %v14273_v15 = vld [vmem:[%s16326_s29 + $0x1e1c] ss:$120 sps:$4 sm:$0xff]   ;;  %v14271_v17 = vld [vmem:[%s16326_s29 + $0x1e18] ss:$120 sps:$4 sm:$0xff]  }
 0x1c4   : > { %9680 = vmatprep.subr.bf16.mxu0 %v14210_v18  ;;  %v14274_v18 = vld [vmem:[%s16326_s29 + $0xf20] ss:$120 sps:$4 sm:$0xff]  }
 0x1c5   : > { %v9294_v28 = vpop.f32.mrb[0].mxu0 }
 0x1c6   : > { %v16756_v31 = vadd.f32 %v9294_v28, %v9213_v24  ;;  %v9296_v32 = vpop.f32.mrb[1].mxu0  ;;  %9599 = vmatpush1.bf16.msra.mxu1 %v14205_v21  ;;  %v14282_v21 = vld [vmem:[%s16326_s29 + $0x1014] ss:$120 sps:$4 sm:$0xff]   ;;  %v14280_v24 = vld [vmem:[%s16326_s29 + $0x1010] ss:$120 sps:$4 sm:$0xff]  }
 0x1c7   : > { %v16758_v33 = vadd.f32 %v9296_v32, %v9215_v27  ;;  %v9298_v5 = vpop.f32.mrb[2].mxu0  ;;  %9681 = vmatpush1.bf16.msra.mxu0 %v14208_v22  ;;  %9600 = vmatprep.subr.bf16.mxu1 %v14213_v25  ;;  %v14277_v22 = vld [vmem:[%s16326_s29 + $0x1f08] ss:$120 sps:$4 sm:$0xff]   ;;  %v14285_v25 = vld [vmem:[%s16326_s29 + $0x1ffc] ss:$120 sps:$4 sm:$0xff]  }
 0x1c8   : > { %v9299_v34 = vpop.f32.mrb[3].mxu0  ;;  %9682 = vmatprep.subr.bf16.mxu0 %v14216_v26  ;;  %v14288_v26 = vld [vmem:[%s16326_s29 + $0x1104] ss:$120 sps:$4 sm:$0xff]   ;;  %v14283_v27 = vld [vmem:[%s16326_s29 + $0x1ff8] ss:$120 sps:$4 sm:$0xff]  }
 0x1c9   : > { %v14286_v28 = vld [vmem:[%s16326_s29 + $0x1100] ss:$120 sps:$4 sm:$0xff]   ;;  %v14292_v5 = vld [vmem:[%s16326_s29 + $0x11f0] ss:$120 sps:$4 sm:$0xff]   ;;  %v14297_v34 = vld [vmem:[%s16326_s29 + $0x21dc] ss:$120 sps:$4 sm:$0xff]  }
 0x1ca   : > { %9601 = vmatpush1.bf16.msra.mxu1 %v14211_v29  ;;  %v14291_v29 = vld [vmem:[%s16326_s29 + $0x20ec] ss:$120 sps:$4 sm:$0xff]   ;;  %v14289_v32 = vld [vmem:[%s16326_s29 + $0x20e8] ss:$120 sps:$4 sm:$0xff]  }
 0x1cb   : > { %9683 = vmatpush1.bf16.msra.mxu0 %v14214_v30  ;;  %9602 = vmatprep.subr.bf16.mxu1 %v14219_v6  ;;  %v14294_v30 = vld [vmem:[%s16326_s29 + $0x11f4] ss:$120 sps:$4 sm:$0xff]   ;;  %v14300_v6 = vld [vmem:[%s16326_s29 + $0x12e4] ss:$120 sps:$4 sm:$0xff]  }
 0x1cc   : > { %9684 = vmatprep.subr.bf16.mxu0 %v14222_v35  ;;  %v14295_v35 = vld [vmem:[%s16326_s29 + $0x21d8] ss:$120 sps:$4 sm:$0xff]  }
 0x1ce   : > { %9603 = vmatpush1.bf16.msra.mxu1 %v14217_v36  ;;  %v14298_v36 = vld [vmem:[%s16326_s29 + $0x12e0] ss:$120 sps:$4 sm:$0xff]  }
 0x1cf   : > { %9685 = vmatpush1.bf16.msra.mxu0 %v14220_v37  ;;  %9604 = vmatprep.subr.bf16.mxu1 %v14225_v38  ;;  %v14303_v37 = vld [vmem:[%s16326_s29 + $0x22cc] ss:$120 sps:$4 sm:$0xff]  }
 0x1d0   : > { %9686 = vmatprep.subr.bf16.mxu0 %v14228_v39  ;;  %v14306_v38 = vld [vmem:[%s16326_s29 + $0x13d4] ss:$120 sps:$4 sm:$0xff]   ;;  %v14301_v39 = vld [vmem:[%s16326_s29 + $0x22c8] ss:$120 sps:$4 sm:$0xff]  }
 0x1d2   : > { %9605 = vmatpush1.bf16.msra.mxu1 %v14223_v40  ;;  %v14304_v40 = vld [vmem:[%s16326_s29 + $0x13d0] ss:$120 sps:$4 sm:$0xff]  }
 0x1d3   : > { %9687 = vmatpush1.bf16.msra.mxu0 %v14226_v41  ;;  %9606 = vmatprep.subr.bf16.mxu1 %v14231_v43  ;;  %v14309_v41 = vld [vmem:[%s16326_s29 + $0x23bc] ss:$120 sps:$4 sm:$0xff]  }
 0x1d4   : > { %9688 = vmatprep.subr.bf16.mxu0 %v14234_v44  ;;  %v14312_v43 = vld [vmem:[%s16326_s29 + $0x14c4] ss:$120 sps:$4 sm:$0xff]   ;;  %v14307_v44 = vld [vmem:[%s16326_s29 + $0x23b8] ss:$120 sps:$4 sm:$0xff]  }
 0x1d6   : > { %9607 = vmatpush1.bf16.msra.mxu1 %v14229_v45  ;;  %v14310_v45 = vld [vmem:[%s16326_s29 + $0x14c0] ss:$120 sps:$4 sm:$0xff]  }
 0x1d7   : > { %9689 = vmatpush1.bf16.msra.mxu0 %v14232_v46  ;;  %9608 = vmatprep.subr.bf16.mxu1 %v14237_v47  ;;  %v14315_v46 = vld [vmem:[%s16326_s29 + $0x24ac] ss:$120 sps:$4 sm:$0xff]  }
 0x1d8   : > { %9690 = vmatprep.subr.bf16.mxu0 %v14240_v48  ;;  %v14318_v47 = vld [vmem:[%s16326_s29 + $0x15b4] ss:$120 sps:$4 sm:$0xff]   ;;  %v14313_v48 = vld [vmem:[%s16326_s29 + $0x24a8] ss:$120 sps:$4 sm:$0xff]  }
 0x1da   : > { %9609 = vmatpush1.bf16.msra.mxu1 %v14235_v49  ;;  %v14316_v49 = vld [vmem:[%s16326_s29 + $0x15b0] ss:$120 sps:$4 sm:$0xff]  }
 0x1db   : > { %9691 = vmatpush1.bf16.msra.mxu0 %v14238_v50  ;;  %9610 = vmatprep.subr.bf16.mxu1 %v14243_v51  ;;  %v14321_v50 = vld [vmem:[%s16326_s29 + $0x259c] ss:$120 sps:$4 sm:$0xff]  }
 0x1dc   : > { %9692 = vmatprep.subr.bf16.mxu0 %v14246_v52  ;;  %v14324_v51 = vld [vmem:[%s16326_s29 + $0x16a4] ss:$120 sps:$4 sm:$0xff]   ;;  %v14319_v52 = vld [vmem:[%s16326_s29 + $0x2598] ss:$120 sps:$4 sm:$0xff]  }
 0x1de   : > { %9611 = vmatpush1.bf16.msra.mxu1 %v14241_v53  ;;  %v14322_v53 = vld [vmem:[%s16326_s29 + $0x16a0] ss:$120 sps:$4 sm:$0xff]  }
 0x1df   : > { %9693 = vmatpush1.bf16.msra.mxu0 %v14244_v54  ;;  %9612 = vmatprep.subr.bf16.mxu1 %v14249_v55  ;;  %v14327_v54 = vld [vmem:[%s16326_s29 + $0x268c] ss:$120 sps:$4 sm:$0xff]  }
 0x1e0   : > { %9694 = vmatprep.subr.bf16.mxu0 %v14252_v56  ;;  %v14330_v55 = vld [vmem:[%s16326_s29 + $0x1794] ss:$120 sps:$4 sm:$0xff]   ;;  %v14325_v56 = vld [vmem:[%s16326_s29 + $0x2688] ss:$120 sps:$4 sm:$0xff]  }
 0x1e2   : > { %9613 = vmatpush1.bf16.msra.mxu1 %v14247_v57  ;;  %v14328_v57 = vld [vmem:[%s16326_s29 + $0x1790] ss:$120 sps:$4 sm:$0xff]  }
 0x1e3   : > { %9695 = vmatpush1.bf16.msra.mxu0 %v14250_v58  ;;  %9614 = vmatprep.subr.bf16.mxu1 %v14255_v59  ;;  %v14333_v58 = vld [vmem:[%s16326_s29 + $0x277c] ss:$120 sps:$4 sm:$0xff]  }
 0x1e4   : > { %9696 = vmatprep.subr.bf16.mxu0 %v14258_v60  ;;  %v14336_v59 = vld [vmem:[%s16326_s29 + $0x1884] ss:$120 sps:$4 sm:$0xff]   ;;  %v14331_v60 = vld [vmem:[%s16326_s29 + $0x2778] ss:$120 sps:$4 sm:$0xff]  }
 0x1e6   : > { %9615 = vmatpush1.bf16.msra.mxu1 %v14253_v61  ;;  %v14334_v61 = vld [vmem:[%s16326_s29 + $0x1880] ss:$120 sps:$4 sm:$0xff]  }
 0x1e7   : > { %9697 = vmatpush1.bf16.msra.mxu0 %v14256_v0  ;;  %9616 = vmatprep.subr.bf16.mxu1 %v14261_v1  ;;  %v14339_v0 = vld [vmem:[%s16326_s29 + $0x286c] ss:$120 sps:$4 sm:$0xff]  }
 0x1e8   : > { %9698 = vmatprep.subr.bf16.mxu0 %v14264_v2  ;;  %v14342_v1 = vld [vmem:[%s16326_s29 + $0x1974] ss:$120 sps:$4 sm:$0xff]   ;;  %v14337_v2 = vld [vmem:[%s16326_s29 + $0x2868] ss:$120 sps:$4 sm:$0xff]  }
 0x1ea   : > { %9617 = vmatpush1.bf16.msra.mxu1 %v14259_v4  ;;  %v14340_v4 = vld [vmem:[%s16326_s29 + $0x1970] ss:$120 sps:$4 sm:$0xff]  }
 0x1eb   : > { %9699 = vmatpush1.bf16.msra.mxu0 %v14262_v7  ;;  %9618 = vmatprep.subr.bf16.mxu1 %v14267_v8  ;;  %v14345_v7 = vld [vmem:[%s16326_s29 + $0x295c] ss:$120 sps:$4 sm:$0xff]  }
 0x1ec   : > { %9700 = vmatprep.subr.bf16.mxu0 %v14270_v10  ;;  %v14348_v8 = vld [vmem:[%s16326_s29 + $0x1a64] ss:$120 sps:$4 sm:$0xff]   ;;  %v14343_v10 = vld [vmem:[%s16326_s29 + $0x2958] ss:$120 sps:$4 sm:$0xff]  }
 0x1ee   : > { %9619 = vmatpush1.bf16.msra.mxu1 %v14265_v11  ;;  %v14346_v11 = vld [vmem:[%s16326_s29 + $0x1a60] ss:$120 sps:$4 sm:$0xff]  }
 0x1ef   : > { %9701 = vmatpush1.bf16.msra.mxu0 %v14268_v14  ;;  %9629 = vmatprep.subr.bf16.mxu1 %v14273_v15  ;;  %v14351_v14 = vld [vmem:[%s16326_s29 + $0x2a4c] ss:$120 sps:$4 sm:$0xff]  }
 0x1f0   : > { %9711 = vmatprep.subr.bf16.mxu0 %v14276_v16  ;;  %v14354_v15 = vld [vmem:[%s16326_s29 + $0x1b54] ss:$120 sps:$4 sm:$0xff]   ;;  %v14349_v16 = vld [vmem:[%s16326_s29 + $0x2a48] ss:$120 sps:$4 sm:$0xff]  }
 0x1f1   : > { %9621 = vmatmul.mubr.bf16.vlgmr.msra.gmra.mrb[8].mxu1 %v16435_v19 }
 0x1f2   : > { %9703 = vmatmul.mubr.bf16.vlgmr.msra.gmra.mrb[8].mxu0 %v16427_v13  ;;  %9630 = vmatpush1.bf16.msra.mxu1 %v14271_v17  ;;  %v14352_v17 = vld [vmem:[%s16326_s29 + $0x1b50] ss:$120 sps:$4 sm:$0xff]  }
 0x1f3   : > { %9712 = vmatpush1.bf16.msra.mxu0 %v14274_v18  ;;  %9631 = vmatprep.subr.bf16.mxu1 %v14279_v20  ;;  %v14357_v18 = vld [vmem:[%s16326_s29 + $0x2b3c] ss:$120 sps:$4 sm:$0xff]  }
 0x1f4   : > { %9713 = vmatprep.subr.bf16.mxu0 %v14282_v21  ;;  %9661 = vmatprep.mubr.bf16.mxu1 %v16441_v23  ;;  %v14360_v20 = vld [vmem:[%s16326_s29 + $0x1c44] ss:$120 sps:$4 sm:$0xff]   ;;  %v14355_v21 = vld [vmem:[%s16326_s29 + $0x2b38] ss:$120 sps:$4 sm:$0xff]  }
 0x1f5   : > { %9743 = vmatprep.mubr.bf16.mxu0 %v16413_v3 }
 0x1f6   : > { %9632 = vmatpush1.bf16.msra.mxu1 %v14277_v22  ;;  %v14358_v22 = vld [vmem:[%s16326_s29 + $0x1c40] ss:$120 sps:$4 sm:$0xff]  }
 0x1f7   : > { %9714 = vmatpush1.bf16.msra.mxu0 %v14280_v24  ;;  %9633 = vmatprep.subr.bf16.mxu1 %v14285_v25  ;;  %v14363_v24 = vld [vmem:[%s16326_s29 + $0x2c2c] ss:$120 sps:$4 sm:$0xff]  }
 0x1f8   : > { %9715 = vmatprep.subr.bf16.mxu0 %v14288_v26  ;;  %v14366_v25 = vld [vmem:[%s16326_s29 + $0x1d34] ss:$120 sps:$4 sm:$0xff]   ;;  %v14361_v26 = vld [vmem:[%s16326_s29 + $0x2c28] ss:$120 sps:$4 sm:$0xff]  }
 0x1fa   : > { %9634 = vmatpush1.bf16.msra.mxu1 %v14283_v27  ;;  %v14364_v27 = vld [vmem:[%s16326_s29 + $0x1d30] ss:$120 sps:$4 sm:$0xff]  }
 0x1fb   : > { %9716 = vmatpush1.bf16.msra.mxu0 %v14286_v28  ;;  %9635 = vmatprep.subr.bf16.mxu1 %v14291_v29  ;;  %v14369_v28 = vld [vmem:[%s16326_s29 + $0x1e24] ss:$120 sps:$4 sm:$0xff]  }
 0x1fc   : > { %9717 = vmatprep.subr.bf16.mxu0 %v14294_v30  ;;  %v14372_v29 = vld [vmem:[%s16326_s29 + $0x2c] ss:$120 sps:$4 sm:$0xff]   ;;  %v14367_v30 = vld [vmem:[%s16326_s29 + $0x1e20] ss:$120 sps:$4 sm:$0xff]  }
 0x1fe   : > { %9636 = vmatpush1.bf16.msra.mxu1 %v14289_v32  ;;  %v14370_v32 = vld [vmem:[%s16326_s29 + $0x28] ss:$120 sps:$4 sm:$0xff]  }
 0x1ff   : > { %9718 = vmatpush1.bf16.msra.mxu0 %v14292_v5  ;;  %9637 = vmatprep.subr.bf16.mxu1 %v14297_v34  ;;  %v14375_v5 = vld [vmem:[%s16326_s29 + $0x1f14] ss:$120 sps:$4 sm:$0xff]  }
 0x200   : > { %9719 = vmatprep.subr.bf16.mxu0 %v14300_v6  ;;  %v14378_v34 = vld [vmem:[%s16326_s29 + $0x11c] ss:$120 sps:$4 sm:$0xff]   ;;  %v14373_v6 = vld [vmem:[%s16326_s29 + $0x1f10] ss:$120 sps:$4 sm:$0xff]  }
 0x202   : > { %9638 = vmatpush1.bf16.msra.mxu1 %v14295_v35  ;;  %v14376_v35 = vld [vmem:[%s16326_s29 + $0x118] ss:$120 sps:$4 sm:$0xff]  }
 0x203   : > { %9720 = vmatpush1.bf16.msra.mxu0 %v14298_v36  ;;  %9639 = vmatprep.subr.bf16.mxu1 %v14303_v37  ;;  %v14381_v36 = vld [vmem:[%s16326_s29 + $0x2004] ss:$120 sps:$4 sm:$0xff]  }
 0x204   : > { %9721 = vmatprep.subr.bf16.mxu0 %v14306_v38  ;;  %v14384_v37 = vld [vmem:[%s16326_s29 + $0x20c] ss:$120 sps:$4 sm:$0xff]   ;;  %v14379_v38 = vld [vmem:[%s16326_s29 + $0x2000] ss:$120 sps:$4 sm:$0xff]  }
 0x206   : > { %9640 = vmatpush1.bf16.msra.mxu1 %v14301_v39  ;;  %v14382_v39 = vld [vmem:[%s16326_s29 + $0x208] ss:$120 sps:$4 sm:$0xff]  }
 0x207   : > { %9722 = vmatpush1.bf16.msra.mxu0 %v14304_v40  ;;  %9641 = vmatprep.subr.bf16.mxu1 %v14309_v41  ;;  %v14387_v40 = vld [vmem:[%s16326_s29 + $0x20f4] ss:$120 sps:$4 sm:$0xff]  }
 0x208   : > { %9723 = vmatprep.subr.bf16.mxu0 %v14312_v43  ;;  %v14390_v41 = vld [vmem:[%s16326_s29 + $0x2fc] ss:$120 sps:$4 sm:$0xff]   ;;  %v14385_v43 = vld [vmem:[%s16326_s29 + $0x20f0] ss:$120 sps:$4 sm:$0xff]  }
 0x20a   : > { %9642 = vmatpush1.bf16.msra.mxu1 %v14307_v44  ;;  %v14388_v44 = vld [vmem:[%s16326_s29 + $0x2f8] ss:$120 sps:$4 sm:$0xff]  }
 0x20b   : > { %9724 = vmatpush1.bf16.msra.mxu0 %v14310_v45  ;;  %9643 = vmatprep.subr.bf16.mxu1 %v14315_v46  ;;  %v14393_v45 = vld [vmem:[%s16326_s29 + $0x21e4] ss:$120 sps:$4 sm:$0xff]  }
 0x20c   : > { %9725 = vmatprep.subr.bf16.mxu0 %v14318_v47  ;;  %v14396_v46 = vld [vmem:[%s16326_s29 + $0x3ec] ss:$120 sps:$4 sm:$0xff]   ;;  %v14391_v47 = vld [vmem:[%s16326_s29 + $0x21e0] ss:$120 sps:$4 sm:$0xff]  }
 0x20e   : > { %9644 = vmatpush1.bf16.msra.mxu1 %v14313_v48  ;;  %v14394_v48 = vld [vmem:[%s16326_s29 + $0x3e8] ss:$120 sps:$4 sm:$0xff]  }
 0x20f   : > { %9726 = vmatpush1.bf16.msra.mxu0 %v14316_v49  ;;  %9645 = vmatprep.subr.bf16.mxu1 %v14321_v50  ;;  %v14399_v49 = vld [vmem:[%s16326_s29 + $0x22d4] ss:$120 sps:$4 sm:$0xff]  }
 0x210   : > { %9727 = vmatprep.subr.bf16.mxu0 %v14324_v51  ;;  %v14402_v50 = vld [vmem:[%s16326_s29 + $0x4dc] ss:$120 sps:$4 sm:$0xff]   ;;  %v14397_v51 = vld [vmem:[%s16326_s29 + $0x22d0] ss:$120 sps:$4 sm:$0xff]  }
 0x212   : > { %9646 = vmatpush1.bf16.msra.mxu1 %v14319_v52  ;;  %v14400_v52 = vld [vmem:[%s16326_s29 + $0x4d8] ss:$120 sps:$4 sm:$0xff]  }
 0x213   : > { %9728 = vmatpush1.bf16.msra.mxu0 %v14322_v53  ;;  %9647 = vmatprep.subr.bf16.mxu1 %v14327_v54  ;;  %v14405_v53 = vld [vmem:[%s16326_s29 + $0x23c4] ss:$120 sps:$4 sm:$0xff]  }
 0x214   : > { %9729 = vmatprep.subr.bf16.mxu0 %v14330_v55  ;;  %v14408_v54 = vld [vmem:[%s16326_s29 + $0x5cc] ss:$120 sps:$4 sm:$0xff]  }
 0x216   : > { %9648 = vmatpush1.bf16.msra.mxu1 %v14325_v56 }
 0x217   : > { %9730 = vmatpush1.bf16.msra.mxu0 %v14328_v57  ;;  %9649 = vmatprep.subr.bf16.mxu1 %v14333_v58  ;;  %v14403_v58 = vld [vmem:[%s16326_s29 + $0x23c0] ss:$120 sps:$4 sm:$0xff]  }
 0x218   : > { %9731 = vmatprep.subr.bf16.mxu0 %v14336_v59  ;;  %v14406_v59 = vld [vmem:[%s16326_s29 + $0x5c8] ss:$120 sps:$4 sm:$0xff]  }
 0x21a   : > { %9650 = vmatpush1.bf16.msra.mxu1 %v14331_v60 }
 0x21b   : > { %9732 = vmatpush1.bf16.msra.mxu0 %v14334_v61  ;;  %9651 = vmatprep.subr.bf16.mxu1 %v14339_v0  ;;  %v14411_v61 = vld [vmem:[%s16326_s29 + $0x24b4] ss:$120 sps:$4 sm:$0xff]  }
 0x21c   : > { %9733 = vmatprep.subr.bf16.mxu0 %v14342_v1  ;;  %v14414_v0 = vld [vmem:[%s16326_s29 + $0x6bc] ss:$120 sps:$4 sm:$0xff]   ;;  %v14409_v1 = vld [vmem:[%s16326_s29 + $0x24b0] ss:$120 sps:$4 sm:$0xff]  }
 0x21e   : > { %9652 = vmatpush1.bf16.msra.mxu1 %v14337_v2  ;;  %v14412_v2 = vld [vmem:[%s16326_s29 + $0x6b8] ss:$120 sps:$4 sm:$0xff]  }
 0x21f   : > { %9734 = vmatpush1.bf16.msra.mxu0 %v14340_v4  ;;  %9653 = vmatprep.subr.bf16.mxu1 %v14345_v7  ;;  %v14417_v4 = vld [vmem:[%s16326_s29 + $0x25a4] ss:$120 sps:$4 sm:$0xff]  }
 0x220   : > { %9735 = vmatprep.subr.bf16.mxu0 %v14348_v8  ;;  %v14420_v7 = vld [vmem:[%s16326_s29 + $0x7ac] ss:$120 sps:$4 sm:$0xff]   ;;  %v14415_v8 = vld [vmem:[%s16326_s29 + $0x25a0] ss:$120 sps:$4 sm:$0xff]  }
 0x222   : > { %9654 = vmatpush1.bf16.msra.mxu1 %v14343_v10  ;;  %v14418_v10 = vld [vmem:[%s16326_s29 + $0x7a8] ss:$120 sps:$4 sm:$0xff]  }
 0x223   : > { %9736 = vmatpush1.bf16.msra.mxu0 %v14346_v11  ;;  %9655 = vmatprep.subr.bf16.mxu1 %v14351_v14  ;;  %v14423_v11 = vld [vmem:[%s16326_s29 + $0x2694] ss:$120 sps:$4 sm:$0xff]  }
 0x224   : > { %9737 = vmatprep.subr.bf16.mxu0 %v14354_v15  ;;  %v14426_v14 = vld [vmem:[%s16326_s29 + $0x89c] ss:$120 sps:$4 sm:$0xff]   ;;  %v14421_v15 = vld [vmem:[%s16326_s29 + $0x2690] ss:$120 sps:$4 sm:$0xff]  }
 0x226   : > { %9656 = vmatpush1.bf16.msra.mxu1 %v14349_v16  ;;  %v14424_v16 = vld [vmem:[%s16326_s29 + $0x898] ss:$120 sps:$4 sm:$0xff]  }
 0x227   : > { %9738 = vmatpush1.bf16.msra.mxu0 %v14352_v17  ;;  %9657 = vmatprep.subr.bf16.mxu1 %v14357_v18  ;;  %v14429_v17 = vld [vmem:[%s16326_s29 + $0x2784] ss:$120 sps:$4 sm:$0xff]  }
 0x228   : > { %9739 = vmatprep.subr.bf16.mxu0 %v14360_v20  ;;  %v14432_v18 = vld [vmem:[%s16326_s29 + $0x98c] ss:$120 sps:$4 sm:$0xff]   ;;  %v14427_v20 = vld [vmem:[%s16326_s29 + $0x2780] ss:$120 sps:$4 sm:$0xff]  }
 0x22a   : > { %9658 = vmatpush1.bf16.msra.mxu1 %v14355_v21  ;;  %v14430_v21 = vld [vmem:[%s16326_s29 + $0x988] ss:$120 sps:$4 sm:$0xff]  }
 0x22b   : > { %9740 = vmatpush1.bf16.msra.mxu0 %v14358_v22  ;;  %9659 = vmatprep.subr.bf16.mxu1 %v14363_v24  ;;  %v14435_v22 = vld [vmem:[%s16326_s29 + $0x2874] ss:$120 sps:$4 sm:$0xff]  }
 0x22c   : > { %9741 = vmatprep.subr.bf16.mxu0 %v14366_v25  ;;  %v14438_v24 = vld [vmem:[%s16326_s29 + $0xa7c] ss:$120 sps:$4 sm:$0xff]   ;;  %v14433_v25 = vld [vmem:[%s16326_s29 + $0x2870] ss:$120 sps:$4 sm:$0xff]  }
 0x22e   : > { %9660 = vmatpush1.bf16.msra.mxu1 %v14361_v26  ;;  %v14436_v26 = vld [vmem:[%s16326_s29 + $0xa78] ss:$120 sps:$4 sm:$0xff]  }
 0x22f   : > { %9742 = vmatpush1.bf16.msra.mxu0 %v14364_v27  ;;  %9793 = vmatprep.subr.bf16.mxu1 %v14372_v29  ;;  %v14441_v27 = vld [vmem:[%s16326_s29 + $0x2964] ss:$120 sps:$4 sm:$0xff]   ;;  %v14439_v29 = vld [vmem:[%s16326_s29 + $0x2960] ss:$120 sps:$4 sm:$0xff]  }
 0x230   : > { %9752 = vmatprep.subr.bf16.mxu0 %v14369_v28  ;;  %v14444_v28 = vld [vmem:[%s16326_s29 + $0xb6c] ss:$120 sps:$4 sm:$0xff]  }
 0x231   : > { %9662 = vmatmul.mubr.bf16.vlgmr.msra.gmra.mrb[8].mxu1 %v16406_v63 }
 0x232   : > { %9744 = vmatmul.mubr.bf16.vlgmr.msra.gmra.mrb[8].mxu0 %v16435_v19  ;;  %9794 = vmatpush1.bf16.msra.mxu1 %v14370_v32  ;;  %v14447_v32 = vld [vmem:[%s16326_s29 + $0x2a54] ss:$120 sps:$4 sm:$0xff]  }
 0x233   : > { %9753 = vmatpush1.bf16.msra.mxu0 %v14367_v30  ;;  %9795 = vmatprep.subr.bf16.mxu1 %v14378_v34  ;;  %v14442_v30 = vld [vmem:[%s16326_s29 + $0xb68] ss:$120 sps:$4 sm:$0xff]  }
 0x234   : > { %9754 = vmatprep.subr.bf16.mxu0 %v14375_v5  ;;  %9784 = vmatprep.mubr.bf16.mxu0 %v16441_v23  ;;  %v14450_v5 = vld [vmem:[%s16326_s29 + $0xc5c] ss:$120 sps:$4 sm:$0xff]   ;;  %v14445_v34 = vld [vmem:[%s16326_s29 + $0x2a50] ss:$120 sps:$4 sm:$0xff]  }
 0x235   : > { %9825 = vmatprep.mubr.bf16.mxu1 %v16403_v62 }
 0x236   : > { %9796 = vmatpush1.bf16.msra.mxu1 %v14376_v35  ;;  %v14453_v35 = vld [vmem:[%s16326_s29 + $0x2b44] ss:$120 sps:$4 sm:$0xff]  }
 0x237   : > { %9755 = vmatpush1.bf16.msra.mxu0 %v14373_v6  ;;  %9797 = vmatprep.subr.bf16.mxu1 %v14384_v37  ;;  %v14448_v6 = vld [vmem:[%s16326_s29 + $0xc58] ss:$120 sps:$4 sm:$0xff]  }
 0x238   : > { %9756 = vmatprep.subr.bf16.mxu0 %v14381_v36  ;;  %v14456_v36 = vld [vmem:[%s16326_s29 + $0xd4c] ss:$120 sps:$4 sm:$0xff]   ;;  %v14451_v37 = vld [vmem:[%s16326_s29 + $0x2b40] ss:$120 sps:$4 sm:$0xff]  }
 0x23a   : > { %9798 = vmatpush1.bf16.msra.mxu1 %v14382_v39  ;;  %v14459_v39 = vld [vmem:[%s16326_s29 + $0x2c34] ss:$120 sps:$4 sm:$0xff]  }
 0x23b   : > { %9757 = vmatpush1.bf16.msra.mxu0 %v14379_v38  ;;  %9799 = vmatprep.subr.bf16.mxu1 %v14390_v41  ;;  %v14454_v38 = vld [vmem:[%s16326_s29 + $0xd48] ss:$120 sps:$4 sm:$0xff]  }
 0x23c   : > { %9758 = vmatprep.subr.bf16.mxu0 %v14387_v40  ;;  %v14462_v40 = vld [vmem:[%s16326_s29 + $0xe3c] ss:$120 sps:$4 sm:$0xff]   ;;  %v14457_v41 = vld [vmem:[%s16326_s29 + $0x2c30] ss:$120 sps:$4 sm:$0xff]  }
 0x23e   : > { %9800 = vmatpush1.bf16.msra.mxu1 %v14388_v44  ;;  %v14465_v44 = vld [vmem:[%s16326_s29 + $0xf2c] ss:$120 sps:$4 sm:$0xff]  }
 0x23f   : > { %9759 = vmatpush1.bf16.msra.mxu0 %v14385_v43  ;;  %9801 = vmatprep.subr.bf16.mxu1 %v14396_v46  ;;  %v14460_v43 = vld [vmem:[%s16326_s29 + $0xe38] ss:$120 sps:$4 sm:$0xff]   ;;  %v14463_v46 = vld [vmem:[%s16326_s29 + $0xf28] ss:$120 sps:$4 sm:$0xff]  }
 0x240   : > { %9760 = vmatprep.subr.bf16.mxu0 %v14393_v45  ;;  %v14468_v45 = vld [vmem:[%s16326_s29 + $0x34] ss:$120 sps:$4 sm:$0xff]  }
 0x242   : > { %9802 = vmatpush1.bf16.msra.mxu1 %v14394_v48  ;;  %v14471_v48 = vld [vmem:[%s16326_s29 + $0x101c] ss:$120 sps:$4 sm:$0xff]  }
 0x243   : > { %9761 = vmatpush1.bf16.msra.mxu0 %v14391_v47  ;;  %9803 = vmatprep.subr.bf16.mxu1 %v14402_v50  ;;  %v14466_v47 = vld [vmem:[%s16326_s29 + $0x30] ss:$120 sps:$4 sm:$0xff]  }
 0x244   : > { %9762 = vmatprep.subr.bf16.mxu0 %v14399_v49  ;;  %v16894_v55 = vpop.f32.mrb[4].mxu1  ;;  %v14474_v49 = vld [vmem:[%s16326_s29 + $0x124] ss:$120 sps:$4 sm:$0xff]   ;;  %v14469_v50 = vld [vmem:[%s16326_s29 + $0x1018] ss:$120 sps:$4 sm:$0xff]  }
 0x245   : > { %v16896_v56 = vpop.f32.mrb[5].mxu1 }
 0x246   : > { %v9421_v57 = vpop.f32.mrb[6].mxu1  ;;  %9804 = vmatpush1.bf16.msra.mxu1 %v14400_v52  ;;  %v14477_v52 = vld [vmem:[%s16326_s29 + $0x110c] ss:$120 sps:$4 sm:$0xff]  }
 0x247   : > { %9763 = vmatpush1.bf16.msra.mxu0 %v14397_v51  ;;  %v9422_v60 = vpop.f32.mrb[7].mxu1  ;;  %9805 = vmatprep.subr.bf16.mxu1 %v14408_v54  ;;  %v14472_v51 = vld [vmem:[%s16326_s29 + $0x120] ss:$120 sps:$4 sm:$0xff]   ;;  %v14478_v57 = vld [vmem:[%s16326_s29 + $0x210] ss:$120 sps:$4 sm:$0xff]  }
 0x248   : > { %9764 = vmatprep.subr.bf16.mxu0 %v14405_v53  ;;  %v14480_v53 = vld [vmem:[%s16326_s29 + $0x214] ss:$120 sps:$4 sm:$0xff]   ;;  %v14475_v54 = vld [vmem:[%s16326_s29 + $0x1108] ss:$120 sps:$4 sm:$0xff]   ;;  %v14481_v60 = vld [vmem:[%s16326_s29 + $0x11f8] ss:$120 sps:$4 sm:$0xff]  }
 0x24a   : > { %9806 = vmatpush1.bf16.msra.mxu1 %v14406_v59  ;;  %v14486_v59 = vld [vmem:[%s16326_s29 + $0x304] ss:$120 sps:$4 sm:$0xff]  }
 0x24b   : > { %9765 = vmatpush1.bf16.msra.mxu0 %v14403_v58  ;;  %9807 = vmatprep.subr.bf16.mxu1 %v14414_v0  ;;  %v14483_v58 = vld [vmem:[%s16326_s29 + $0x11fc] ss:$120 sps:$4 sm:$0xff]   ;;  %v14489_v0 = vld [vmem:[%s16326_s29 + $0x12ec] ss:$120 sps:$4 sm:$0xff]  }
 0x24c   : > { %9766 = vmatprep.subr.bf16.mxu0 %v14411_v61  ;;  %v14484_v61 = vld [vmem:[%s16326_s29 + $0x300] ss:$120 sps:$4 sm:$0xff]  }
 0x24e   : > { %9808 = vmatpush1.bf16.msra.mxu1 %v14412_v2  ;;  %v14487_v2 = vld [vmem:[%s16326_s29 + $0x12e8] ss:$120 sps:$4 sm:$0xff]  }
 0x24f   : > { %9767 = vmatpush1.bf16.msra.mxu0 %v14409_v1  ;;  %9809 = vmatprep.subr.bf16.mxu1 %v14420_v7  ;;  %v14492_v1 = vld [vmem:[%s16326_s29 + $0x3f4] ss:$120 sps:$4 sm:$0xff]  }
 0x250   : > { %9768 = vmatprep.subr.bf16.mxu0 %v14417_v4  ;;  %v14490_v4 = vld [vmem:[%s16326_s29 + $0x3f0] ss:$120 sps:$4 sm:$0xff]   ;;  %v14495_v7 = vld [vmem:[%s16326_s29 + $0x13dc] ss:$120 sps:$4 sm:$0xff]  }
 0x252   : > { %9810 = vmatpush1.bf16.msra.mxu1 %v14418_v10  ;;  %v14493_v10 = vld [vmem:[%s16326_s29 + $0x13d8] ss:$120 sps:$4 sm:$0xff]  }
 0x253   : > { %9769 = vmatpush1.bf16.msra.mxu0 %v14415_v8  ;;  %9811 = vmatprep.subr.bf16.mxu1 %v14426_v14  ;;  %v14498_v8 = vld [vmem:[%s16326_s29 + $0x4e4] ss:$120 sps:$4 sm:$0xff]  }
 0x254   : > { %9770 = vmatprep.subr.bf16.mxu0 %v14423_v11  ;;  %v14496_v11 = vld [vmem:[%s16326_s29 + $0x4e0] ss:$120 sps:$4 sm:$0xff]   ;;  %v14501_v14 = vld [vmem:[%s16326_s29 + $0x14cc] ss:$120 sps:$4 sm:$0xff]  }
 0x256   : > { %9812 = vmatpush1.bf16.msra.mxu1 %v14424_v16 }
 0x257   : > { %9771 = vmatpush1.bf16.msra.mxu0 %v14421_v15  ;;  %9813 = vmatprep.subr.bf16.mxu1 %v14432_v18  ;;  %v14504_v15 = vld [vmem:[%s16326_s29 + $0x5d4] ss:$120 sps:$4 sm:$0xff]   ;;  %v14502_v18 = vld [vmem:[%s16326_s29 + $0x5d0] ss:$120 sps:$4 sm:$0xff]  }
 0x258   : > { %9772 = vmatprep.subr.bf16.mxu0 %v14429_v17  ;;  %v14499_v17 = vld [vmem:[%s16326_s29 + $0x14c8] ss:$120 sps:$4 sm:$0xff]  }
 0x25a   : > { %9814 = vmatpush1.bf16.msra.mxu1 %v14430_v21 }
 0x25b   : > { %9773 = vmatpush1.bf16.msra.mxu0 %v14427_v20  ;;  %9815 = vmatprep.subr.bf16.mxu1 %v14438_v24  ;;  %v14507_v24 = vld [vmem:[%s16326_s29 + $0x15bc] ss:$120 sps:$4 sm:$0xff]  }
 0x25c   : > { %9774 = vmatprep.subr.bf16.mxu0 %v14435_v22 }
 0x25e   : > { %9816 = vmatpush1.bf16.msra.mxu1 %v14436_v26  ;;  %v14505_v26 = vld [vmem:[%s16326_s29 + $0x15b8] ss:$120 sps:$4 sm:$0xff]  }
 0x25f   : > { %9775 = vmatpush1.bf16.msra.mxu0 %v14433_v25  ;;  %9817 = vmatprep.subr.bf16.mxu1 %v14444_v28  ;;  %v14510_v25 = vld [vmem:[%s16326_s29 + $0x6c4] ss:$120 sps:$4 sm:$0xff]  }
 0x260   : > { %9776 = vmatprep.subr.bf16.mxu0 %v14441_v27  ;;  %v14508_v27 = vld [vmem:[%s16326_s29 + $0x6c0] ss:$120 sps:$4 sm:$0xff]   ;;  %v14513_v28 = vld [vmem:[%s16326_s29 + $0x16ac] ss:$120 sps:$4 sm:$0xff]  }
 0x262   : > { %9818 = vmatpush1.bf16.msra.mxu1 %v14442_v30  ;;  %v14511_v30 = vld [vmem:[%s16326_s29 + $0x16a8] ss:$120 sps:$4 sm:$0xff]  }
 0x263   : > { %9777 = vmatpush1.bf16.msra.mxu0 %v14439_v29  ;;  %9819 = vmatprep.subr.bf16.mxu1 %v14450_v5  ;;  %v14516_v29 = vld [vmem:[%s16326_s29 + $0x7b4] ss:$120 sps:$4 sm:$0xff]  }
 0x264   : > { %9778 = vmatprep.subr.bf16.mxu0 %v14447_v32  ;;  %v14514_v32 = vld [vmem:[%s16326_s29 + $0x7b0] ss:$120 sps:$4 sm:$0xff]   ;;  %v14519_v5 = vld [vmem:[%s16326_s29 + $0x179c] ss:$120 sps:$4 sm:$0xff]  }
 0x266   : > { %9820 = vmatpush1.bf16.msra.mxu1 %v14448_v6  ;;  %v14517_v6 = vld [vmem:[%s16326_s29 + $0x1798] ss:$120 sps:$4 sm:$0xff]  }
 0x267   : > { %9779 = vmatpush1.bf16.msra.mxu0 %v14445_v34  ;;  %9821 = vmatprep.subr.bf16.mxu1 %v14456_v36  ;;  %v14522_v34 = vld [vmem:[%s16326_s29 + $0x8a4] ss:$120 sps:$4 sm:$0xff]  }
 0x268   : > { %9780 = vmatprep.subr.bf16.mxu0 %v14453_v35  ;;  %v14520_v35 = vld [vmem:[%s16326_s29 + $0x8a0] ss:$120 sps:$4 sm:$0xff]   ;;  %v14525_v36 = vld [vmem:[%s16326_s29 + $0x188c] ss:$120 sps:$4 sm:$0xff]  }
 0x26a   : > { %9822 = vmatpush1.bf16.msra.mxu1 %v14454_v38  ;;  %v14523_v38 = vld [vmem:[%s16326_s29 + $0x1888] ss:$120 sps:$4 sm:$0xff]  }
 0x26b   : > { %9781 = vmatpush1.bf16.msra.mxu0 %v14451_v37  ;;  %9823 = vmatprep.subr.bf16.mxu1 %v14462_v40  ;;  %v14528_v37 = vld [vmem:[%s16326_s29 + $0x994] ss:$120 sps:$4 sm:$0xff]  }
 0x26c   : > { %9782 = vmatprep.subr.bf16.mxu0 %v14459_v39  ;;  %v14526_v39 = vld [vmem:[%s16326_s29 + $0x990] ss:$120 sps:$4 sm:$0xff]   ;;  %v14531_v40 = vld [vmem:[%s16326_s29 + $0x197c] ss:$120 sps:$4 sm:$0xff]  }
 0x26e   : > { %9824 = vmatpush1.bf16.msra.mxu1 %v14460_v43  ;;  %v14529_v43 = vld [vmem:[%s16326_s29 + $0x1978] ss:$120 sps:$4 sm:$0xff]  }
 0x26f   : > { %9783 = vmatpush1.bf16.msra.mxu0 %v14457_v41  ;;  %9834 = vmatprep.subr.bf16.mxu1 %v14465_v44  ;;  %v14534_v41 = vld [vmem:[%s16326_s29 + $0xa84] ss:$120 sps:$4 sm:$0xff]   ;;  %v14532_v44 = vld [vmem:[%s16326_s29 + $0xa80] ss:$120 sps:$4 sm:$0xff]  }
 0x270   : > { %9916 = vmatprep.subr.bf16.mxu0 %v14468_v45  ;;  %v14537_v45 = vld [vmem:[%s16326_s29 + $0x1a6c] ss:$120 sps:$4 sm:$0xff]  }
 0x271   : > { %9826 = vmatmul.mubr.bf16.vlgmr.msra.gmra.mrb[12].mxu1 %v16427_v13 }
 0x272   : > { %9785 = vmatmul.mubr.bf16.vlgmr.msra.gmra.mrb[8].mxu0 %v16406_v63  ;;  %9835 = vmatpush1.bf16.msra.mxu1 %v14463_v46  ;;  %v14540_v46 = vld [vmem:[%s16326_s29 + $0xb74] ss:$120 sps:$4 sm:$0xff]  }
 0x273   : > { %9917 = vmatpush1.bf16.msra.mxu0 %v14466_v47  ;;  %9836 = vmatprep.subr.bf16.mxu1 %v14471_v48  ;;  %v14535_v47 = vld [vmem:[%s16326_s29 + $0x1a68] ss:$120 sps:$4 sm:$0xff]  }
 0x274   : > { %9918 = vmatprep.subr.bf16.mxu0 %v14474_v49  ;;  %9866 = vmatprep.mubr.bf16.mxu1 %v16413_v3  ;;  %v14538_v48 = vld [vmem:[%s16326_s29 + $0xb70] ss:$120 sps:$4 sm:$0xff]   ;;  %v14543_v49 = vld [vmem:[%s16326_s29 + $0x1b5c] ss:$120 sps:$4 sm:$0xff]  }
 0x275   : > { %9948 = vmatprep.mubr.bf16.mxu0 %v16403_v62 }
 0x276   : > { %9837 = vmatpush1.bf16.msra.mxu1 %v14469_v50  ;;  %v14546_v50 = vld [vmem:[%s16326_s29 + $0xc64] ss:$120 sps:$4 sm:$0xff]  }
 0x277   : > { %9919 = vmatpush1.bf16.msra.mxu0 %v14472_v51  ;;  %9838 = vmatprep.subr.bf16.mxu1 %v14477_v52  ;;  %v14541_v51 = vld [vmem:[%s16326_s29 + $0x1b58] ss:$120 sps:$4 sm:$0xff]  }
 0x278   : > { %9920 = vmatprep.subr.bf16.mxu0 %v14480_v53  ;;  %v14544_v52 = vld [vmem:[%s16326_s29 + $0xc60] ss:$120 sps:$4 sm:$0xff]   ;;  %v14549_v53 = vld [vmem:[%s16326_s29 + $0x1c4c] ss:$120 sps:$4 sm:$0xff]  }
 0x27a   : > { %9839 = vmatpush1.bf16.msra.mxu1 %v14475_v54  ;;  %v14552_v54 = vld [vmem:[%s16326_s29 + $0xd54] ss:$120 sps:$4 sm:$0xff]  }
 0x27b   : > { %9921 = vmatpush1.bf16.msra.mxu0 %v14478_v57  ;;  %9840 = vmatprep.subr.bf16.mxu1 %v14483_v58  ;;  %v14547_v57 = vld [vmem:[%s16326_s29 + $0x1c48] ss:$120 sps:$4 sm:$0xff]  }
 0x27c   : > { %9922 = vmatprep.subr.bf16.mxu0 %v14486_v59  ;;  %v14550_v58 = vld [vmem:[%s16326_s29 + $0xd50] ss:$120 sps:$4 sm:$0xff]   ;;  %v14555_v59 = vld [vmem:[%s16326_s29 + $0x1d3c] ss:$120 sps:$4 sm:$0xff]  }
 0x27e   : > { %9841 = vmatpush1.bf16.msra.mxu1 %v14481_v60  ;;  %v14558_v60 = vld [vmem:[%s16326_s29 + $0xe44] ss:$120 sps:$4 sm:$0xff]  }
 0x27f   : > { %9923 = vmatpush1.bf16.msra.mxu0 %v14484_v61  ;;  %9842 = vmatprep.subr.bf16.mxu1 %v14489_v0  ;;  %v14553_v61 = vld [vmem:[%s16326_s29 + $0x1d38] ss:$120 sps:$4 sm:$0xff]  }
 0x280   : > { %9924 = vmatprep.subr.bf16.mxu0 %v14492_v1  ;;  %v14556_v0 = vld [vmem:[%s16326_s29 + $0xe40] ss:$120 sps:$4 sm:$0xff]   ;;  %v14561_v1 = vld [vmem:[%s16326_s29 + $0x1e2c] ss:$120 sps:$4 sm:$0xff]  }
 0x282   : > { %9843 = vmatpush1.bf16.msra.mxu1 %v14487_v2  ;;  %v14564_v2 = vld [vmem:[%s16326_s29 + $0xf34] ss:$120 sps:$4 sm:$0xff]  }
 0x283   : > { %9925 = vmatpush1.bf16.msra.mxu0 %v14490_v4  ;;  %9844 = vmatprep.subr.bf16.mxu1 %v14495_v7  ;;  %v14559_v4 = vld [vmem:[%s16326_s29 + $0x1e28] ss:$120 sps:$4 sm:$0xff]  }
 0x284   : > { %9926 = vmatprep.subr.bf16.mxu0 %v14498_v8  ;;  %v14562_v7 = vld [vmem:[%s16326_s29 + $0xf30] ss:$120 sps:$4 sm:$0xff]   ;;  %v14567_v8 = vld [vmem:[%s16326_s29 + $0x1f1c] ss:$120 sps:$4 sm:$0xff]  }
 0x285   : > { %v16966_v16 = vpop.f32.mrb[4].mxu0 }
 0x286   : > { %v16970_v20 = vpop.f32.mrb[5].mxu0  ;;  %9845 = vmatpush1.bf16.msra.mxu1 %v14493_v10  ;;  %v14570_v10 = vld [vmem:[%s16326_s29 + $0x1024] ss:$120 sps:$4 sm:$0xff]  }
 0x287   : > { %v9544_v21 = vpop.f32.mrb[6].mxu0  ;;  %9927 = vmatpush1.bf16.msra.mxu0 %v14496_v11  ;;  %9846 = vmatprep.subr.bf16.mxu1 %v14501_v14  ;;  %v14565_v11 = vld [vmem:[%s16326_s29 + $0x1f18] ss:$120 sps:$4 sm:$0xff]  }
 0x288   : > { %v9545_v22 = vpop.f32.mrb[7].mxu0  ;;  %9928 = vmatprep.subr.bf16.mxu0 %v14504_v15  ;;  %v14568_v14 = vld [vmem:[%s16326_s29 + $0x1020] ss:$120 sps:$4 sm:$0xff]   ;;  %v14573_v15 = vld [vmem:[%s16326_s29 + $0x200c] ss:$120 sps:$4 sm:$0xff]  }
 0x289   : > { %v14574_v21 = vld [vmem:[%s16326_s29 + $0x1110] ss:$120 sps:$4 sm:$0xff]   ;;  %v14579_v22 = vld [vmem:[%s16326_s29 + $0x20fc] ss:$120 sps:$4 sm:$0xff]  }
 0x28a   : > { %9847 = vmatpush1.bf16.msra.mxu1 %v14499_v17  ;;  %v14576_v17 = vld [vmem:[%s16326_s29 + $0x1114] ss:$120 sps:$4 sm:$0xff]  }
 0x28b   : > { %9929 = vmatpush1.bf16.msra.mxu0 %v14502_v18  ;;  %9848 = vmatprep.subr.bf16.mxu1 %v14507_v24  ;;  %v14571_v18 = vld [vmem:[%s16326_s29 + $0x2008] ss:$120 sps:$4 sm:$0xff]   ;;  %v14582_v24 = vld [vmem:[%s16326_s29 + $0x1204] ss:$120 sps:$4 sm:$0xff]  }
 0x28c   : > { %9930 = vmatprep.subr.bf16.mxu0 %v14510_v25  ;;  %v14577_v25 = vld [vmem:[%s16326_s29 + $0x20f8] ss:$120 sps:$4 sm:$0xff]  }
 0x28e   : > { %9849 = vmatpush1.bf16.msra.mxu1 %v14505_v26  ;;  %v14580_v26 = vld [vmem:[%s16326_s29 + $0x1200] ss:$120 sps:$4 sm:$0xff]  }
 0x28f   : > { %9931 = vmatpush1.bf16.msra.mxu0 %v14508_v27  ;;  %9850 = vmatprep.subr.bf16.mxu1 %v14513_v28  ;;  %v14585_v27 = vld [vmem:[%s16326_s29 + $0x21ec] ss:$120 sps:$4 sm:$0xff]  }
 0x290   : > { %9932 = vmatprep.subr.bf16.mxu0 %v14516_v29  ;;  %v14588_v28 = vld [vmem:[%s16326_s29 + $0x12f4] ss:$120 sps:$4 sm:$0xff]   ;;  %v14583_v29 = vld [vmem:[%s16326_s29 + $0x21e8] ss:$120 sps:$4 sm:$0xff]  }
 0x292   : > { %9851 = vmatpush1.bf16.msra.mxu1 %v14511_v30  ;;  %v14586_v30 = vld [vmem:[%s16326_s29 + $0x12f0] ss:$120 sps:$4 sm:$0xff]  }
 0x293   : > { %9933 = vmatpush1.bf16.msra.mxu0 %v14514_v32  ;;  %9852 = vmatprep.subr.bf16.mxu1 %v14519_v5  ;;  %v14591_v32 = vld [vmem:[%s16326_s29 + $0x22dc] ss:$120 sps:$4 sm:$0xff]  }
 0x294   : > { %9934 = vmatprep.subr.bf16.mxu0 %v14522_v34  ;;  %v14594_v5 = vld [vmem:[%s16326_s29 + $0x13e4] ss:$120 sps:$4 sm:$0xff]   ;;  %v14589_v34 = vld [vmem:[%s16326_s29 + $0x22d8] ss:$120 sps:$4 sm:$0xff]  }
 0x296   : > { %9853 = vmatpush1.bf16.msra.mxu1 %v14517_v6  ;;  %v14592_v6 = vld [vmem:[%s16326_s29 + $0x13e0] ss:$120 sps:$4 sm:$0xff]  }
 0x297   : > { %9935 = vmatpush1.bf16.msra.mxu0 %v14520_v35  ;;  %9854 = vmatprep.subr.bf16.mxu1 %v14525_v36  ;;  %v14597_v35 = vld [vmem:[%s16326_s29 + $0x23cc] ss:$120 sps:$4 sm:$0xff]  }
 0x298   : > { %9936 = vmatprep.subr.bf16.mxu0 %v14528_v37  ;;  %v14600_v36 = vld [vmem:[%s16326_s29 + $0x14d4] ss:$120 sps:$4 sm:$0xff]   ;;  %v14595_v37 = vld [vmem:[%s16326_s29 + $0x23c8] ss:$120 sps:$4 sm:$0xff]  }
 0x29a   : > { %9855 = vmatpush1.bf16.msra.mxu1 %v14523_v38  ;;  %v14598_v38 = vld [vmem:[%s16326_s29 + $0x14d0] ss:$120 sps:$4 sm:$0xff]  }
 0x29b   : > { %9937 = vmatpush1.bf16.msra.mxu0 %v14526_v39  ;;  %9856 = vmatprep.subr.bf16.mxu1 %v14531_v40  ;;  %v14603_v39 = vld [vmem:[%s16326_s29 + $0x24bc] ss:$120 sps:$4 sm:$0xff]  }
 0x29c   : > { %9938 = vmatprep.subr.bf16.mxu0 %v14534_v41  ;;  %v14606_v40 = vld [vmem:[%s16326_s29 + $0x15c4] ss:$120 sps:$4 sm:$0xff]   ;;  %v14601_v41 = vld [vmem:[%s16326_s29 + $0x24b8] ss:$120 sps:$4 sm:$0xff]  }
 0x29e   : > { %9857 = vmatpush1.bf16.msra.mxu1 %v14529_v43  ;;  %v14604_v43 = vld [vmem:[%s16326_s29 + $0x15c0] ss:$120 sps:$4 sm:$0xff]  }
 0x29f   : > { %9939 = vmatpush1.bf16.msra.mxu0 %v14532_v44  ;;  %9858 = vmatprep.subr.bf16.mxu1 %v14537_v45  ;;  %v14609_v44 = vld [vmem:[%s16326_s29 + $0x25ac] ss:$120 sps:$4 sm:$0xff]  }
 0x2a0   : > { %9940 = vmatprep.subr.bf16.mxu0 %v14540_v46  ;;  %v14612_v45 = vld [vmem:[%s16326_s29 + $0x16b4] ss:$120 sps:$4 sm:$0xff]   ;;  %v14607_v46 = vld [vmem:[%s16326_s29 + $0x25a8] ss:$120 sps:$4 sm:$0xff]  }
 0x2a2   : > { %9859 = vmatpush1.bf16.msra.mxu1 %v14535_v47  ;;  %v14610_v47 = vld [vmem:[%s16326_s29 + $0x16b0] ss:$120 sps:$4 sm:$0xff]  }
 0x2a3   : > { %9941 = vmatpush1.bf16.msra.mxu0 %v14538_v48  ;;  %9860 = vmatprep.subr.bf16.mxu1 %v14543_v49  ;;  %v14615_v48 = vld [vmem:[%s16326_s29 + $0x269c] ss:$120 sps:$4 sm:$0xff]  }
 0x2a4   : > { %9942 = vmatprep.subr.bf16.mxu0 %v14546_v50  ;;  %v14618_v49 = vld [vmem:[%s16326_s29 + $0x17a4] ss:$120 sps:$4 sm:$0xff]   ;;  %v14613_v50 = vld [vmem:[%s16326_s29 + $0x2698] ss:$120 sps:$4 sm:$0xff]  }
 0x2a6   : > { %9861 = vmatpush1.bf16.msra.mxu1 %v14541_v51  ;;  %v14616_v51 = vld [vmem:[%s16326_s29 + $0x17a0] ss:$120 sps:$4 sm:$0xff]  }
 0x2a7   : > { %9943 = vmatpush1.bf16.msra.mxu0 %v14544_v52  ;;  %9862 = vmatprep.subr.bf16.mxu1 %v14549_v53  ;;  %v14621_v52 = vld [vmem:[%s16326_s29 + $0x278c] ss:$120 sps:$4 sm:$0xff]  }
 0x2a8   : > { %9944 = vmatprep.subr.bf16.mxu0 %v14552_v54  ;;  %v14624_v53 = vld [vmem:[%s16326_s29 + $0x1894] ss:$120 sps:$4 sm:$0xff]   ;;  %v14619_v54 = vld [vmem:[%s16326_s29 + $0x2788] ss:$120 sps:$4 sm:$0xff]  }
 0x2aa   : > { %9863 = vmatpush1.bf16.msra.mxu1 %v14547_v57  ;;  %v14622_v57 = vld [vmem:[%s16326_s29 + $0x1890] ss:$120 sps:$4 sm:$0xff]  }
 0x2ab   : > { %9945 = vmatpush1.bf16.msra.mxu0 %v14550_v58  ;;  %9864 = vmatprep.subr.bf16.mxu1 %v14555_v59  ;;  %v14627_v58 = vld [vmem:[%s16326_s29 + $0x287c] ss:$120 sps:$4 sm:$0xff]  }
 0x2ac   : > { %9946 = vmatprep.subr.bf16.mxu0 %v14558_v60  ;;  %v14630_v59 = vld [vmem:[%s16326_s29 + $0x1984] ss:$120 sps:$4 sm:$0xff]   ;;  %v14625_v60 = vld [vmem:[%s16326_s29 + $0x2878] ss:$120 sps:$4 sm:$0xff]  }
 0x2ae   : > { %9865 = vmatpush1.bf16.msra.mxu1 %v14553_v61  ;;  %v14628_v61 = vld [vmem:[%s16326_s29 + $0x1980] ss:$120 sps:$4 sm:$0xff]  }
 0x2af   : > { %9947 = vmatpush1.bf16.msra.mxu0 %v14556_v0  ;;  %9875 = vmatprep.subr.bf16.mxu1 %v14561_v1  ;;  %v14633_v0 = vld [vmem:[%s16326_s29 + $0x296c] ss:$120 sps:$4 sm:$0xff]  }
 0x2b0   : > { %9957 = vmatprep.subr.bf16.mxu0 %v14564_v2  ;;  %v14636_v1 = vld [vmem:[%s16326_s29 + $0x1a74] ss:$120 sps:$4 sm:$0xff]   ;;  %v14631_v2 = vld [vmem:[%s16326_s29 + $0x2968] ss:$120 sps:$4 sm:$0xff]  }
 0x2b1   : > { %9867 = vmatmul.mubr.bf16.vlgmr.msra.gmra.mrb[12].mxu1 %v16435_v19 }
 0x2b2   : > { %9949 = vmatmul.mubr.bf16.vlgmr.msra.gmra.mrb[12].mxu0 %v16427_v13  ;;  %9876 = vmatpush1.bf16.msra.mxu1 %v14559_v4  ;;  %v14634_v4 = vld [vmem:[%s16326_s29 + $0x1a70] ss:$120 sps:$4 sm:$0xff]  }
 0x2b3   : > { %9958 = vmatpush1.bf16.msra.mxu0 %v14562_v7  ;;  %9877 = vmatprep.subr.bf16.mxu1 %v14567_v8  ;;  %v14639_v7 = vld [vmem:[%s16326_s29 + $0x2a5c] ss:$120 sps:$4 sm:$0xff]  }
 0x2b4   : > { %9959 = vmatprep.subr.bf16.mxu0 %v14570_v10  ;;  %9907 = vmatprep.mubr.bf16.mxu1 %v16441_v23  ;;  %v14642_v8 = vld [vmem:[%s16326_s29 + $0x1b64] ss:$120 sps:$4 sm:$0xff]   ;;  %v14637_v10 = vld [vmem:[%s16326_s29 + $0x2a58] ss:$120 sps:$4 sm:$0xff]  }
 0x2b5   : > { %9989 = vmatprep.mubr.bf16.mxu0 %v16413_v3 }
 0x2b6   : > { %9878 = vmatpush1.bf16.msra.mxu1 %v14565_v11  ;;  %v14640_v11 = vld [vmem:[%s16326_s29 + $0x1b60] ss:$120 sps:$4 sm:$0xff]  }
 0x2b7   : > { %9960 = vmatpush1.bf16.msra.mxu0 %v14568_v14  ;;  %9879 = vmatprep.subr.bf16.mxu1 %v14573_v15  ;;  %v14645_v14 = vld [vmem:[%s16326_s29 + $0x2b4c] ss:$120 sps:$4 sm:$0xff]  }
 0x2b8   : > { %9961 = vmatprep.subr.bf16.mxu0 %v14576_v17  ;;  %v14648_v15 = vld [vmem:[%s16326_s29 + $0x1c54] ss:$120 sps:$4 sm:$0xff]   ;;  %v14643_v17 = vld [vmem:[%s16326_s29 + $0x2b48] ss:$120 sps:$4 sm:$0xff]  }
 0x2ba   : > { %9880 = vmatpush1.bf16.msra.mxu1 %v14571_v18  ;;  %v14646_v18 = vld [vmem:[%s16326_s29 + $0x1c50] ss:$120 sps:$4 sm:$0xff]  }
 0x2bb   : > { %9962 = vmatpush1.bf16.msra.mxu0 %v14574_v21  ;;  %9881 = vmatprep.subr.bf16.mxu1 %v14579_v22  ;;  %v14651_v21 = vld [vmem:[%s16326_s29 + $0x2c3c] ss:$120 sps:$4 sm:$0xff]  }
 0x2bc   : > { %9963 = vmatprep.subr.bf16.mxu0 %v14582_v24  ;;  %v14654_v22 = vld [vmem:[%s16326_s29 + $0x1d44] ss:$120 sps:$4 sm:$0xff]   ;;  %v14649_v24 = vld [vmem:[%s16326_s29 + $0x2c38] ss:$120 sps:$4 sm:$0xff]  }
 0x2be   : > { %9882 = vmatpush1.bf16.msra.mxu1 %v14577_v25  ;;  %v14652_v25 = vld [vmem:[%s16326_s29 + $0x1d40] ss:$120 sps:$4 sm:$0xff]  }
 0x2bf   : > { %9964 = vmatpush1.bf16.msra.mxu0 %v14580_v26  ;;  %9883 = vmatprep.subr.bf16.mxu1 %v14585_v27  ;;  %v14657_v26 = vld [vmem:[%s16326_s29 + $0x1e34] ss:$120 sps:$4 sm:$0xff]  }
 0x2c0   : > { %9965 = vmatprep.subr.bf16.mxu0 %v14588_v28  ;;  %v14660_v27 = vld [vmem:[%s16326_s29 + $0x3c] ss:$120 sps:$4 sm:$0xff]   ;;  %v14655_v28 = vld [vmem:[%s16326_s29 + $0x1e30] ss:$120 sps:$4 sm:$0xff]  }
 0x2c2   : > { %9884 = vmatpush1.bf16.msra.mxu1 %v14583_v29  ;;  %v14658_v29 = vld [vmem:[%s16326_s29 + $0x38] ss:$120 sps:$4 sm:$0xff]  }
 0x2c3   : > { %9966 = vmatpush1.bf16.msra.mxu0 %v14586_v30  ;;  %9885 = vmatprep.subr.bf16.mxu1 %v14591_v32  ;;  %v14663_v30 = vld [vmem:[%s16326_s29 + $0x1f24] ss:$120 sps:$4 sm:$0xff]  }
 0x2c4   : > { %9967 = vmatprep.subr.bf16.mxu0 %v14594_v5  ;;  %v14666_v32 = vld [vmem:[%s16326_s29 + $0x12c] ss:$120 sps:$4 sm:$0xff]   ;;  %v14661_v5 = vld [vmem:[%s16326_s29 + $0x1f20] ss:$120 sps:$4 sm:$0xff]  }
 0x2c6   : > { %9886 = vmatpush1.bf16.msra.mxu1 %v14589_v34  ;;  %v14664_v34 = vld [vmem:[%s16326_s29 + $0x128] ss:$120 sps:$4 sm:$0xff]  }
 0x2c7   : > { %9968 = vmatpush1.bf16.msra.mxu0 %v14592_v6  ;;  %9887 = vmatprep.subr.bf16.mxu1 %v14597_v35  ;;  %v14669_v6 = vld [vmem:[%s16326_s29 + $0x2014] ss:$120 sps:$4 sm:$0xff]  }
 0x2c8   : > { %9969 = vmatprep.subr.bf16.mxu0 %v14600_v36  ;;  %v14672_v35 = vld [vmem:[%s16326_s29 + $0x21c] ss:$120 sps:$4 sm:$0xff]   ;;  %v14667_v36 = vld [vmem:[%s16326_s29 + $0x2010] ss:$120 sps:$4 sm:$0xff]  }
 0x2ca   : > { %9888 = vmatpush1.bf16.msra.mxu1 %v14595_v37  ;;  %v14670_v37 = vld [vmem:[%s16326_s29 + $0x218] ss:$120 sps:$4 sm:$0xff]  }
 0x2cb   : > { %9970 = vmatpush1.bf16.msra.mxu0 %v14598_v38  ;;  %9889 = vmatprep.subr.bf16.mxu1 %v14603_v39  ;;  %v14675_v38 = vld [vmem:[%s16326_s29 + $0x2104] ss:$120 sps:$4 sm:$0xff]  }
 0x2cc   : > { %9971 = vmatprep.subr.bf16.mxu0 %v14606_v40  ;;  %v14678_v39 = vld [vmem:[%s16326_s29 + $0x30c] ss:$120 sps:$4 sm:$0xff]   ;;  %v14673_v40 = vld [vmem:[%s16326_s29 + $0x2100] ss:$120 sps:$4 sm:$0xff]  }
 0x2ce   : > { %9890 = vmatpush1.bf16.msra.mxu1 %v14601_v41  ;;  %v14676_v41 = vld [vmem:[%s16326_s29 + $0x308] ss:$120 sps:$4 sm:$0xff]  }
 0x2cf   : > { %9972 = vmatpush1.bf16.msra.mxu0 %v14604_v43  ;;  %9891 = vmatprep.subr.bf16.mxu1 %v14609_v44  ;;  %v14681_v43 = vld [vmem:[%s16326_s29 + $0x21f4] ss:$120 sps:$4 sm:$0xff]  }
 0x2d0   : > { %9973 = vmatprep.subr.bf16.mxu0 %v14612_v45  ;;  %v14684_v44 = vld [vmem:[%s16326_s29 + $0x3fc] ss:$120 sps:$4 sm:$0xff]   ;;  %v14679_v45 = vld [vmem:[%s16326_s29 + $0x21f0] ss:$120 sps:$4 sm:$0xff]  }
 0x2d2   : > { %9892 = vmatpush1.bf16.msra.mxu1 %v14607_v46  ;;  %v14682_v46 = vld [vmem:[%s16326_s29 + $0x3f8] ss:$120 sps:$4 sm:$0xff]  }
 0x2d3   : > { %9974 = vmatpush1.bf16.msra.mxu0 %v14610_v47  ;;  %9893 = vmatprep.subr.bf16.mxu1 %v14615_v48  ;;  %v14687_v47 = vld [vmem:[%s16326_s29 + $0x22e4] ss:$120 sps:$4 sm:$0xff]  }
 0x2d4   : > { %9975 = vmatprep.subr.bf16.mxu0 %v14618_v49  ;;  %v14690_v48 = vld [vmem:[%s16326_s29 + $0x4ec] ss:$120 sps:$4 sm:$0xff]   ;;  %v14685_v49 = vld [vmem:[%s16326_s29 + $0x22e0] ss:$120 sps:$4 sm:$0xff]  }
 0x2d6   : > { %9894 = vmatpush1.bf16.msra.mxu1 %v14613_v50  ;;  %v14688_v50 = vld [vmem:[%s16326_s29 + $0x4e8] ss:$120 sps:$4 sm:$0xff]  }
 0x2d7   : > { %9976 = vmatpush1.bf16.msra.mxu0 %v14616_v51  ;;  %9895 = vmatprep.subr.bf16.mxu1 %v14621_v52  ;;  %v14693_v51 = vld [vmem:[%s16326_s29 + $0x23d4] ss:$120 sps:$4 sm:$0xff]  }
 0x2d8   : > { %9977 = vmatprep.subr.bf16.mxu0 %v14624_v53  ;;  %v14696_v52 = vld [vmem:[%s16326_s29 + $0x5dc] ss:$120 sps:$4 sm:$0xff]  }
 0x2da   : > { %9896 = vmatpush1.bf16.msra.mxu1 %v14619_v54 }
 0x2db   : > { %9978 = vmatpush1.bf16.msra.mxu0 %v14622_v57  ;;  %9897 = vmatprep.subr.bf16.mxu1 %v14627_v58  ;;  %v14691_v58 = vld [vmem:[%s16326_s29 + $0x23d0] ss:$120 sps:$4 sm:$0xff]  }
 0x2dc   : > { %9979 = vmatprep.subr.bf16.mxu0 %v14630_v59  ;;  %v14694_v59 = vld [vmem:[%s16326_s29 + $0x5d8] ss:$120 sps:$4 sm:$0xff]  }
 0x2de   : > { %9898 = vmatpush1.bf16.msra.mxu1 %v14625_v60 }
 0x2df   : > { %9980 = vmatpush1.bf16.msra.mxu0 %v14628_v61  ;;  %9899 = vmatprep.subr.bf16.mxu1 %v14633_v0  ;;  %v14699_v61 = vld [vmem:[%s16326_s29 + $0x24c4] ss:$120 sps:$4 sm:$0xff]  }
 0x2e0   : > { %9981 = vmatprep.subr.bf16.mxu0 %v14636_v1  ;;  %v14702_v0 = vld [vmem:[%s16326_s29 + $0x6cc] ss:$120 sps:$4 sm:$0xff]   ;;  %v14697_v1 = vld [vmem:[%s16326_s29 + $0x24c0] ss:$120 sps:$4 sm:$0xff]  }
 0x2e2   : > { %9900 = vmatpush1.bf16.msra.mxu1 %v14631_v2  ;;  %v14700_v2 = vld [vmem:[%s16326_s29 + $0x6c8] ss:$120 sps:$4 sm:$0xff]  }
 0x2e3   : > { %9982 = vmatpush1.bf16.msra.mxu0 %v14634_v4  ;;  %9901 = vmatprep.subr.bf16.mxu1 %v14639_v7  ;;  %v14705_v4 = vld [vmem:[%s16326_s29 + $0x25b4] ss:$120 sps:$4 sm:$0xff]  }
 0x2e4   : > { %9983 = vmatprep.subr.bf16.mxu0 %v14642_v8  ;;  %v14708_v7 = vld [vmem:[%s16326_s29 + $0x7bc] ss:$120 sps:$4 sm:$0xff]   ;;  %v14703_v8 = vld [vmem:[%s16326_s29 + $0x25b0] ss:$120 sps:$4 sm:$0xff]  }
 0x2e6   : > { %9902 = vmatpush1.bf16.msra.mxu1 %v14637_v10  ;;  %v14706_v10 = vld [vmem:[%s16326_s29 + $0x7b8] ss:$120 sps:$4 sm:$0xff]  }
 0x2e7   : > { %9984 = vmatpush1.bf16.msra.mxu0 %v14640_v11  ;;  %9903 = vmatprep.subr.bf16.mxu1 %v14645_v14  ;;  %v14711_v11 = vld [vmem:[%s16326_s29 + $0x26a4] ss:$120 sps:$4 sm:$0xff]  }
 0x2e8   : > { %9985 = vmatprep.subr.bf16.mxu0 %v14648_v15  ;;  %v14714_v14 = vld [vmem:[%s16326_s29 + $0x8ac] ss:$120 sps:$4 sm:$0xff]   ;;  %v14709_v15 = vld [vmem:[%s16326_s29 + $0x26a0] ss:$120 sps:$4 sm:$0xff]  }
 0x2ea   : > { %9904 = vmatpush1.bf16.msra.mxu1 %v14643_v17  ;;  %v14712_v17 = vld [vmem:[%s16326_s29 + $0x8a8] ss:$120 sps:$4 sm:$0xff]  }
 0x2eb   : > { %9986 = vmatpush1.bf16.msra.mxu0 %v14646_v18  ;;  %9905 = vmatprep.subr.bf16.mxu1 %v14651_v21  ;;  %v14717_v18 = vld [vmem:[%s16326_s29 + $0x2794] ss:$120 sps:$4 sm:$0xff]  }
 0x2ec   : > { %9987 = vmatprep.subr.bf16.mxu0 %v14654_v22  ;;  %v14720_v21 = vld [vmem:[%s16326_s29 + $0x99c] ss:$120 sps:$4 sm:$0xff]   ;;  %v14715_v22 = vld [vmem:[%s16326_s29 + $0x2790] ss:$120 sps:$4 sm:$0xff]  }
 0x2ee   : > { %9906 = vmatpush1.bf16.msra.mxu1 %v14649_v24  ;;  %v14718_v24 = vld [vmem:[%s16326_s29 + $0x998] ss:$120 sps:$4 sm:$0xff]  }
 0x2ef   : > { %9988 = vmatpush1.bf16.msra.mxu0 %v14652_v25  ;;  %10039 = vmatprep.subr.bf16.mxu1 %v14660_v27  ;;  %v14723_v25 = vld [vmem:[%s16326_s29 + $0x2884] ss:$120 sps:$4 sm:$0xff]   ;;  %v14721_v27 = vld [vmem:[%s16326_s29 + $0x2880] ss:$120 sps:$4 sm:$0xff]  }
 0x2f0   : > { %9998 = vmatprep.subr.bf16.mxu0 %v14657_v26  ;;  %v14726_v26 = vld [vmem:[%s16326_s29 + $0xa8c] ss:$120 sps:$4 sm:$0xff]  }
 0x2f1   : > { %9908 = vmatmul.mubr.bf16.vlgmr.msra.gmra.mrb[12].mxu1 %v16406_v63 }
 0x2f2   : > { %9990 = vmatmul.mubr.bf16.vlgmr.msra.gmra.mrb[12].mxu0 %v16435_v19  ;;  %10040 = vmatpush1.bf16.msra.mxu1 %v14658_v29  ;;  %v14729_v29 = vld [vmem:[%s16326_s29 + $0x2974] ss:$120 sps:$4 sm:$0xff]  }
 0x2f3   : > { %9999 = vmatpush1.bf16.msra.mxu0 %v14655_v28  ;;  %10041 = vmatprep.subr.bf16.mxu1 %v14666_v32  ;;  %v14724_v28 = vld [vmem:[%s16326_s29 + $0xa88] ss:$120 sps:$4 sm:$0xff]  }
 0x2f4   : > { %10000 = vmatprep.subr.bf16.mxu0 %v14663_v30  ;;  %10030 = vmatprep.mubr.bf16.mxu0 %v16441_v23  ;;  %v14732_v30 = vld [vmem:[%s16326_s29 + $0xb7c] ss:$120 sps:$4 sm:$0xff]   ;;  %v14727_v32 = vld [vmem:[%s16326_s29 + $0x2970] ss:$120 sps:$4 sm:$0xff]  }
 0x2f5   : > { %10071 = vmatprep.mubr.bf16.mxu1 %v16403_v62 }
 0x2f6   : > { %10042 = vmatpush1.bf16.msra.mxu1 %v14664_v34  ;;  %v14735_v34 = vld [vmem:[%s16326_s29 + $0x2a64] ss:$120 sps:$4 sm:$0xff]  }
 0x2f7   : > { %10001 = vmatpush1.bf16.msra.mxu0 %v14661_v5  ;;  %10043 = vmatprep.subr.bf16.mxu1 %v14672_v35  ;;  %v14730_v5 = vld [vmem:[%s16326_s29 + $0xb78] ss:$120 sps:$4 sm:$0xff]  }
 0x2f8   : > { %10002 = vmatprep.subr.bf16.mxu0 %v14669_v6  ;;  %v14738_v6 = vld [vmem:[%s16326_s29 + $0xc6c] ss:$120 sps:$4 sm:$0xff]   ;;  %v14733_v35 = vld [vmem:[%s16326_s29 + $0x2a60] ss:$120 sps:$4 sm:$0xff]  }
 0x2fa   : > { %10044 = vmatpush1.bf16.msra.mxu1 %v14670_v37  ;;  %v14741_v37 = vld [vmem:[%s16326_s29 + $0x2b54] ss:$120 sps:$4 sm:$0xff]  }
 0x2fb   : > { %10003 = vmatpush1.bf16.msra.mxu0 %v14667_v36  ;;  %10045 = vmatprep.subr.bf16.mxu1 %v14678_v39  ;;  %v14736_v36 = vld [vmem:[%s16326_s29 + $0xc68] ss:$120 sps:$4 sm:$0xff]  }
 0x2fc   : > { %10004 = vmatprep.subr.bf16.mxu0 %v14675_v38  ;;  %v14744_v38 = vld [vmem:[%s16326_s29 + $0xd5c] ss:$120 sps:$4 sm:$0xff]   ;;  %v14739_v39 = vld [vmem:[%s16326_s29 + $0x2b50] ss:$120 sps:$4 sm:$0xff]  }
 0x2fe   : > { %10046 = vmatpush1.bf16.msra.mxu1 %v14676_v41  ;;  %v14747_v41 = vld [vmem:[%s16326_s29 + $0x2c44] ss:$120 sps:$4 sm:$0xff]  }
 0x2ff   : > { %10005 = vmatpush1.bf16.msra.mxu0 %v14673_v40  ;;  %10047 = vmatprep.subr.bf16.mxu1 %v14684_v44  ;;  %v14742_v40 = vld [vmem:[%s16326_s29 + $0xd58] ss:$120 sps:$4 sm:$0xff]  }
 0x300   : > { %10006 = vmatprep.subr.bf16.mxu0 %v14681_v43  ;;  %v14750_v43 = vld [vmem:[%s16326_s29 + $0xe4c] ss:$120 sps:$4 sm:$0xff]   ;;  %v14745_v44 = vld [vmem:[%s16326_s29 + $0x2c40] ss:$120 sps:$4 sm:$0xff]  }
 0x302   : > { %10048 = vmatpush1.bf16.msra.mxu1 %v14682_v46  ;;  %v14753_v46 = vld [vmem:[%s16326_s29 + $0xf3c] ss:$120 sps:$4 sm:$0xff]  }
 0x303   : > { %10007 = vmatpush1.bf16.msra.mxu0 %v14679_v45  ;;  %10049 = vmatprep.subr.bf16.mxu1 %v14690_v48  ;;  %v14748_v45 = vld [vmem:[%s16326_s29 + $0xe48] ss:$120 sps:$4 sm:$0xff]   ;;  %v14751_v48 = vld [vmem:[%s16326_s29 + $0xf38] ss:$120 sps:$4 sm:$0xff]  }
 0x304   : > { %10008 = vmatprep.subr.bf16.mxu0 %v14687_v47  ;;  %v17106_v53 = vpop.f32.mrb[8].mxu1  ;;  %v14756_v47 = vld [vmem:[%s16326_s29 + $0x44] ss:$120 sps:$4 sm:$0xff]  }
 0x305   : > { %v17108_v54 = vpop.f32.mrb[9].mxu1 }
 0x306   : > { %v9667_v57 = vpop.f32.mrb[10].mxu1  ;;  %10050 = vmatpush1.bf16.msra.mxu1 %v14688_v50  ;;  %v14759_v50 = vld [vmem:[%s16326_s29 + $0x102c] ss:$120 sps:$4 sm:$0xff]  }
 0x307   : > { %10009 = vmatpush1.bf16.msra.mxu0 %v14685_v49  ;;  %v9668_v60 = vpop.f32.mrb[11].mxu1  ;;  %10051 = vmatprep.subr.bf16.mxu1 %v14696_v52  ;;  %v14754_v49 = vld [vmem:[%s16326_s29 + $0x40] ss:$120 sps:$4 sm:$0xff]   ;;  %v14760_v57 = vld [vmem:[%s16326_s29 + $0x130] ss:$120 sps:$4 sm:$0xff]  }
 0x308   : > { %10010 = vmatprep.subr.bf16.mxu0 %v14693_v51  ;;  %v14762_v51 = vld [vmem:[%s16326_s29 + $0x134] ss:$120 sps:$4 sm:$0xff]   ;;  %v14757_v52 = vld [vmem:[%s16326_s29 + $0x1028] ss:$120 sps:$4 sm:$0xff]   ;;  %v14763_v60 = vld [vmem:[%s16326_s29 + $0x1118] ss:$120 sps:$4 sm:$0xff]  }
 0x30a   : > { %10052 = vmatpush1.bf16.msra.mxu1 %v14694_v59  ;;  %v14768_v59 = vld [vmem:[%s16326_s29 + $0x224] ss:$120 sps:$4 sm:$0xff]  }
 0x30b   : > { %10011 = vmatpush1.bf16.msra.mxu0 %v14691_v58  ;;  %10053 = vmatprep.subr.bf16.mxu1 %v14702_v0  ;;  %v14765_v58 = vld [vmem:[%s16326_s29 + $0x111c] ss:$120 sps:$4 sm:$0xff]   ;;  %v14771_v0 = vld [vmem:[%s16326_s29 + $0x120c] ss:$120 sps:$4 sm:$0xff]  }
 0x30c   : > { %10012 = vmatprep.subr.bf16.mxu0 %v14699_v61  ;;  %v14766_v61 = vld [vmem:[%s16326_s29 + $0x220] ss:$120 sps:$4 sm:$0xff]  }
 0x30e   : > { %10054 = vmatpush1.bf16.msra.mxu1 %v14700_v2  ;;  %v14769_v2 = vld [vmem:[%s16326_s29 + $0x1208] ss:$120 sps:$4 sm:$0xff]  }
 0x30f   : > { %10013 = vmatpush1.bf16.msra.mxu0 %v14697_v1  ;;  %10055 = vmatprep.subr.bf16.mxu1 %v14708_v7  ;;  %v14774_v1 = vld [vmem:[%s16326_s29 + $0x314] ss:$120 sps:$4 sm:$0xff]  }
 0x310   : > { %10014 = vmatprep.subr.bf16.mxu0 %v14705_v4  ;;  %v14772_v4 = vld [vmem:[%s16326_s29 + $0x310] ss:$120 sps:$4 sm:$0xff]   ;;  %v14777_v7 = vld [vmem:[%s16326_s29 + $0x12fc] ss:$120 sps:$4 sm:$0xff]  }
 0x312   : > { %10056 = vmatpush1.bf16.msra.mxu1 %v14706_v10  ;;  %v14775_v10 = vld [vmem:[%s16326_s29 + $0x12f8] ss:$120 sps:$4 sm:$0xff]  }
 0x313   : > { %10015 = vmatpush1.bf16.msra.mxu0 %v14703_v8  ;;  %10057 = vmatprep.subr.bf16.mxu1 %v14714_v14  ;;  %v14780_v8 = vld [vmem:[%s16326_s29 + $0x404] ss:$120 sps:$4 sm:$0xff]  }
 0x314   : > { %10016 = vmatprep.subr.bf16.mxu0 %v14711_v11  ;;  %v14778_v11 = vld [vmem:[%s16326_s29 + $0x400] ss:$120 sps:$4 sm:$0xff]   ;;  %v14783_v14 = vld [vmem:[%s16326_s29 + $0x13ec] ss:$120 sps:$4 sm:$0xff]  }
 0x316   : > { %10058 = vmatpush1.bf16.msra.mxu1 %v14712_v17  ;;  %v14781_v17 = vld [vmem:[%s16326_s29 + $0x13e8] ss:$120 sps:$4 sm:$0xff]  }
 0x317   : > { %10017 = vmatpush1.bf16.msra.mxu0 %v14709_v15  ;;  %10059 = vmatprep.subr.bf16.mxu1 %v14720_v21  ;;  %v14786_v15 = vld [vmem:[%s16326_s29 + $0x4f4] ss:$120 sps:$4 sm:$0xff]  }
 0x318   : > { %10018 = vmatprep.subr.bf16.mxu0 %v14717_v18  ;;  %v14784_v18 = vld [vmem:[%s16326_s29 + $0x4f0] ss:$120 sps:$4 sm:$0xff]   ;;  %v14789_v21 = vld [vmem:[%s16326_s29 + $0x14dc] ss:$120 sps:$4 sm:$0xff]  }
 0x31a   : > { %10060 = vmatpush1.bf16.msra.mxu1 %v14718_v24 }
 0x31b   : > { %10019 = vmatpush1.bf16.msra.mxu0 %v14715_v22  ;;  %10061 = vmatprep.subr.bf16.mxu1 %v14726_v26  ;;  %v14792_v22 = vld [vmem:[%s16326_s29 + $0x5e4] ss:$120 sps:$4 sm:$0xff]   ;;  %v14790_v26 = vld [vmem:[%s16326_s29 + $0x5e0] ss:$120 sps:$4 sm:$0xff]  }
 0x31c   : > { %10020 = vmatprep.subr.bf16.mxu0 %v14723_v25  ;;  %v14787_v25 = vld [vmem:[%s16326_s29 + $0x14d8] ss:$120 sps:$4 sm:$0xff]  }
 0x31e   : > { %10062 = vmatpush1.bf16.msra.mxu1 %v14724_v28 }
 0x31f   : > { %10021 = vmatpush1.bf16.msra.mxu0 %v14721_v27  ;;  %10063 = vmatprep.subr.bf16.mxu1 %v14732_v30  ;;  %v14795_v30 = vld [vmem:[%s16326_s29 + $0x15cc] ss:$120 sps:$4 sm:$0xff]  }
 0x320   : > { %10022 = vmatprep.subr.bf16.mxu0 %v14729_v29 }
 0x322   : > { %10064 = vmatpush1.bf16.msra.mxu1 %v14730_v5  ;;  %v14793_v5 = vld [vmem:[%s16326_s29 + $0x15c8] ss:$120 sps:$4 sm:$0xff]  }
 0x323   : > { %10023 = vmatpush1.bf16.msra.mxu0 %v14727_v32  ;;  %10065 = vmatprep.subr.bf16.mxu1 %v14738_v6  ;;  %v14798_v32 = vld [vmem:[%s16326_s29 + $0x6d4] ss:$120 sps:$4 sm:$0xff]  }
 0x324   : > { %10024 = vmatprep.subr.bf16.mxu0 %v14735_v34  ;;  %v14796_v34 = vld [vmem:[%s16326_s29 + $0x6d0] ss:$120 sps:$4 sm:$0xff]   ;;  %v14801_v6 = vld [vmem:[%s16326_s29 + $0x16bc] ss:$120 sps:$4 sm:$0xff]  }
 0x326   : > { %10066 = vmatpush1.bf16.msra.mxu1 %v14736_v36  ;;  %v14799_v36 = vld [vmem:[%s16326_s29 + $0x16b8] ss:$120 sps:$4 sm:$0xff]  }
 0x327   : > { %10025 = vmatpush1.bf16.msra.mxu0 %v14733_v35  ;;  %10067 = vmatprep.subr.bf16.mxu1 %v14744_v38  ;;  %v14804_v35 = vld [vmem:[%s16326_s29 + $0x7c4] ss:$120 sps:$4 sm:$0xff]  }
 0x328   : > { %10026 = vmatprep.subr.bf16.mxu0 %v14741_v37  ;;  %v14802_v37 = vld [vmem:[%s16326_s29 + $0x7c0] ss:$120 sps:$4 sm:$0xff]   ;;  %v14807_v38 = vld [vmem:[%s16326_s29 + $0x17ac] ss:$120 sps:$4 sm:$0xff]  }
 0x32a   : > { %10068 = vmatpush1.bf16.msra.mxu1 %v14742_v40  ;;  %v14805_v40 = vld [vmem:[%s16326_s29 + $0x17a8] ss:$120 sps:$4 sm:$0xff]  }
 0x32b   : > { %10027 = vmatpush1.bf16.msra.mxu0 %v14739_v39  ;;  %10069 = vmatprep.subr.bf16.mxu1 %v14750_v43  ;;  %v14810_v39 = vld [vmem:[%s16326_s29 + $0x8b4] ss:$120 sps:$4 sm:$0xff]  }
 0x32c   : > { %10028 = vmatprep.subr.bf16.mxu0 %v14747_v41  ;;  %v14808_v41 = vld [vmem:[%s16326_s29 + $0x8b0] ss:$120 sps:$4 sm:$0xff]   ;;  %v14813_v43 = vld [vmem:[%s16326_s29 + $0x189c] ss:$120 sps:$4 sm:$0xff]  }
 0x32e   : > { %10070 = vmatpush1.bf16.msra.mxu1 %v14748_v45  ;;  %v14811_v45 = vld [vmem:[%s16326_s29 + $0x1898] ss:$120 sps:$4 sm:$0xff]  }
 0x32f   : > { %10029 = vmatpush1.bf16.msra.mxu0 %v14745_v44  ;;  %10080 = vmatprep.subr.bf16.mxu1 %v14753_v46  ;;  %v14816_v44 = vld [vmem:[%s16326_s29 + $0x9a4] ss:$120 sps:$4 sm:$0xff]   ;;  %v14814_v46 = vld [vmem:[%s16326_s29 + $0x9a0] ss:$120 sps:$4 sm:$0xff]  }
 0x330   : > { %10162 = vmatprep.subr.bf16.mxu0 %v14756_v47  ;;  %v14819_v47 = vld [vmem:[%s16326_s29 + $0x198c] ss:$120 sps:$4 sm:$0xff]  }
 0x331   : > { %10072 = vmatmul.mubr.bf16.vlgmr.msra.gmra.mrb[16].mxu1 %v16427_v13 }
 0x332   : > { %10031 = vmatmul.mubr.bf16.vlgmr.msra.gmra.mrb[12].mxu0 %v16406_v63  ;;  %10081 = vmatpush1.bf16.msra.mxu1 %v14751_v48  ;;  %v14822_v48 = vld [vmem:[%s16326_s29 + $0xa94] ss:$120 sps:$4 sm:$0xff]  }
 0x333   : > { %10163 = vmatpush1.bf16.msra.mxu0 %v14754_v49  ;;  %10082 = vmatprep.subr.bf16.mxu1 %v14759_v50  ;;  %v14817_v49 = vld [vmem:[%s16326_s29 + $0x1988] ss:$120 sps:$4 sm:$0xff]  }
 0x334   : > { %10164 = vmatprep.subr.bf16.mxu0 %v14762_v51  ;;  %10112 = vmatprep.mubr.bf16.mxu1 %v16413_v3  ;;  %v14820_v50 = vld [vmem:[%s16326_s29 + $0xa90] ss:$120 sps:$4 sm:$0xff]   ;;  %v14825_v51 = vld [vmem:[%s16326_s29 + $0x1a7c] ss:$120 sps:$4 sm:$0xff]  }
 0x335   : > { %10194 = vmatprep.mubr.bf16.mxu0 %v16403_v62 }
 0x336   : > { %10083 = vmatpush1.bf16.msra.mxu1 %v14757_v52  ;;  %v14828_v52 = vld [vmem:[%s16326_s29 + $0xb84] ss:$120 sps:$4 sm:$0xff]  }
 0x337   : > { %10165 = vmatpush1.bf16.msra.mxu0 %v14760_v57  ;;  %10084 = vmatprep.subr.bf16.mxu1 %v14765_v58  ;;  %v14823_v57 = vld [vmem:[%s16326_s29 + $0x1a78] ss:$120 sps:$4 sm:$0xff]  }
 0x338   : > { %10166 = vmatprep.subr.bf16.mxu0 %v14768_v59  ;;  %v14826_v58 = vld [vmem:[%s16326_s29 + $0xb80] ss:$120 sps:$4 sm:$0xff]   ;;  %v14831_v59 = vld [vmem:[%s16326_s29 + $0x1b6c] ss:$120 sps:$4 sm:$0xff]  }
 0x33a   : > { %10085 = vmatpush1.bf16.msra.mxu1 %v14763_v60  ;;  %v14834_v60 = vld [vmem:[%s16326_s29 + $0xc74] ss:$120 sps:$4 sm:$0xff]  }
 0x33b   : > { %10167 = vmatpush1.bf16.msra.mxu0 %v14766_v61  ;;  %10086 = vmatprep.subr.bf16.mxu1 %v14771_v0  ;;  %v14829_v61 = vld [vmem:[%s16326_s29 + $0x1b68] ss:$120 sps:$4 sm:$0xff]  }
 0x33c   : > { %10168 = vmatprep.subr.bf16.mxu0 %v14774_v1  ;;  %v14832_v0 = vld [vmem:[%s16326_s29 + $0xc70] ss:$120 sps:$4 sm:$0xff]   ;;  %v14837_v1 = vld [vmem:[%s16326_s29 + $0x1c5c] ss:$120 sps:$4 sm:$0xff]  }
 0x33e   : > { %10087 = vmatpush1.bf16.msra.mxu1 %v14769_v2  ;;  %v14840_v2 = vld [vmem:[%s16326_s29 + $0xd64] ss:$120 sps:$4 sm:$0xff]  }
 0x33f   : > { %10169 = vmatpush1.bf16.msra.mxu0 %v14772_v4  ;;  %10088 = vmatprep.subr.bf16.mxu1 %v14777_v7  ;;  %v14835_v4 = vld [vmem:[%s16326_s29 + $0x1c58] ss:$120 sps:$4 sm:$0xff]  }
 0x340   : > { %10170 = vmatprep.subr.bf16.mxu0 %v14780_v8  ;;  %v14838_v7 = vld [vmem:[%s16326_s29 + $0xd60] ss:$120 sps:$4 sm:$0xff]   ;;  %v14843_v8 = vld [vmem:[%s16326_s29 + $0x1d4c] ss:$120 sps:$4 sm:$0xff]  }
 0x342   : > { %10089 = vmatpush1.bf16.msra.mxu1 %v14775_v10  ;;  %v14846_v10 = vld [vmem:[%s16326_s29 + $0xe54] ss:$120 sps:$4 sm:$0xff]  }
 0x343   : > { %10171 = vmatpush1.bf16.msra.mxu0 %v14778_v11  ;;  %10090 = vmatprep.subr.bf16.mxu1 %v14783_v14  ;;  %v14841_v11 = vld [vmem:[%s16326_s29 + $0x1d48] ss:$120 sps:$4 sm:$0xff]  }
 0x344   : > { %10172 = vmatprep.subr.bf16.mxu0 %v14786_v15  ;;  %v14844_v14 = vld [vmem:[%s16326_s29 + $0xe50] ss:$120 sps:$4 sm:$0xff]   ;;  %v14849_v15 = vld [vmem:[%s16326_s29 + $0x1e3c] ss:$120 sps:$4 sm:$0xff]  }
 0x345   : > { %v17178_v24 = vpop.f32.mrb[8].mxu0 }
 0x346   : > { %v17182_v27 = vpop.f32.mrb[9].mxu0  ;;  %10091 = vmatpush1.bf16.msra.mxu1 %v14781_v17  ;;  %v14852_v17 = vld [vmem:[%s16326_s29 + $0xf44] ss:$120 sps:$4 sm:$0xff]  }
 0x347   : > { %v9790_v28 = vpop.f32.mrb[10].mxu0  ;;  %10173 = vmatpush1.bf16.msra.mxu0 %v14784_v18  ;;  %10092 = vmatprep.subr.bf16.mxu1 %v14789_v21  ;;  %v14847_v18 = vld [vmem:[%s16326_s29 + $0x1e38] ss:$120 sps:$4 sm:$0xff]  }
 0x348   : > { %v9791_v29 = vpop.f32.mrb[11].mxu0  ;;  %10174 = vmatprep.subr.bf16.mxu0 %v14792_v22  ;;  %v14850_v21 = vld [vmem:[%s16326_s29 + $0xf40] ss:$120 sps:$4 sm:$0xff]   ;;  %v14855_v22 = vld [vmem:[%s16326_s29 + $0x1f2c] ss:$120 sps:$4 sm:$0xff]  }
 0x349   : > { %v14856_v28 = vld [vmem:[%s16326_s29 + $0x1030] ss:$120 sps:$4 sm:$0xff]   ;;  %v14861_v29 = vld [vmem:[%s16326_s29 + $0x201c] ss:$120 sps:$4 sm:$0xff]  }
 0x34a   : > { %10093 = vmatpush1.bf16.msra.mxu1 %v14787_v25  ;;  %v14858_v25 = vld [vmem:[%s16326_s29 + $0x1034] ss:$120 sps:$4 sm:$0xff]  }
 0x34b   : > { %10175 = vmatpush1.bf16.msra.mxu0 %v14790_v26  ;;  %10094 = vmatprep.subr.bf16.mxu1 %v14795_v30  ;;  %v14853_v26 = vld [vmem:[%s16326_s29 + $0x1f28] ss:$120 sps:$4 sm:$0xff]   ;;  %v14864_v30 = vld [vmem:[%s16326_s29 + $0x1124] ss:$120 sps:$4 sm:$0xff]  }
 0x34c   : > { %10176 = vmatprep.subr.bf16.mxu0 %v14798_v32  ;;  %v14859_v32 = vld [vmem:[%s16326_s29 + $0x2018] ss:$120 sps:$4 sm:$0xff]  }
 0x34e   : > { %10095 = vmatpush1.bf16.msra.mxu1 %v14793_v5  ;;  %v14862_v5 = vld [vmem:[%s16326_s29 + $0x1120] ss:$120 sps:$4 sm:$0xff]  }
 0x34f   : > { %10177 = vmatpush1.bf16.msra.mxu0 %v14796_v34  ;;  %10096 = vmatprep.subr.bf16.mxu1 %v14801_v6  ;;  %v14867_v34 = vld [vmem:[%s16326_s29 + $0x210c] ss:$120 sps:$4 sm:$0xff]  }
 0x350   : > { %10178 = vmatprep.subr.bf16.mxu0 %v14804_v35  ;;  %v14870_v6 = vld [vmem:[%s16326_s29 + $0x1214] ss:$120 sps:$4 sm:$0xff]   ;;  %v14865_v35 = vld [vmem:[%s16326_s29 + $0x2108] ss:$120 sps:$4 sm:$0xff]  }
 0x352   : > { %10097 = vmatpush1.bf16.msra.mxu1 %v14799_v36  ;;  %v14868_v36 = vld [vmem:[%s16326_s29 + $0x1210] ss:$120 sps:$4 sm:$0xff]  }
 0x353   : > { %10179 = vmatpush1.bf16.msra.mxu0 %v14802_v37  ;;  %10098 = vmatprep.subr.bf16.mxu1 %v14807_v38  ;;  %v14873_v37 = vld [vmem:[%s16326_s29 + $0x21fc] ss:$120 sps:$4 sm:$0xff]  }
 0x354   : > { %10180 = vmatprep.subr.bf16.mxu0 %v14810_v39  ;;  %v14876_v38 = vld [vmem:[%s16326_s29 + $0x1304] ss:$120 sps:$4 sm:$0xff]   ;;  %v14871_v39 = vld [vmem:[%s16326_s29 + $0x21f8] ss:$120 sps:$4 sm:$0xff]  }
 0x356   : > { %10099 = vmatpush1.bf16.msra.mxu1 %v14805_v40  ;;  %v14874_v40 = vld [vmem:[%s16326_s29 + $0x1300] ss:$120 sps:$4 sm:$0xff]  }
 0x357   : > { %10181 = vmatpush1.bf16.msra.mxu0 %v14808_v41  ;;  %10100 = vmatprep.subr.bf16.mxu1 %v14813_v43  ;;  %v14879_v41 = vld [vmem:[%s16326_s29 + $0x22ec] ss:$120 sps:$4 sm:$0xff]  }
 0x358   : > { %10182 = vmatprep.subr.bf16.mxu0 %v14816_v44  ;;  %v14882_v43 = vld [vmem:[%s16326_s29 + $0x13f4] ss:$120 sps:$4 sm:$0xff]   ;;  %v14877_v44 = vld [vmem:[%s16326_s29 + $0x22e8] ss:$120 sps:$4 sm:$0xff]  }
 0x35a   : > { %10101 = vmatpush1.bf16.msra.mxu1 %v14811_v45  ;;  %v14880_v45 = vld [vmem:[%s16326_s29 + $0x13f0] ss:$120 sps:$4 sm:$0xff]  }
 0x35b   : > { %10183 = vmatpush1.bf16.msra.mxu0 %v14814_v46  ;;  %10102 = vmatprep.subr.bf16.mxu1 %v14819_v47  ;;  %v14885_v46 = vld [vmem:[%s16326_s29 + $0x23dc] ss:$120 sps:$4 sm:$0xff]  }
 0x35c   : > { %10184 = vmatprep.subr.bf16.mxu0 %v14822_v48  ;;  %v14888_v47 = vld [vmem:[%s16326_s29 + $0x14e4] ss:$120 sps:$4 sm:$0xff]   ;;  %v14883_v48 = vld [vmem:[%s16326_s29 + $0x23d8] ss:$120 sps:$4 sm:$0xff]  }
 0x35e   : > { %10103 = vmatpush1.bf16.msra.mxu1 %v14817_v49  ;;  %v14886_v49 = vld [vmem:[%s16326_s29 + $0x14e0] ss:$120 sps:$4 sm:$0xff]  }
 0x35f   : > { %10185 = vmatpush1.bf16.msra.mxu0 %v14820_v50  ;;  %10104 = vmatprep.subr.bf16.mxu1 %v14825_v51  ;;  %v14891_v50 = vld [vmem:[%s16326_s29 + $0x24cc] ss:$120 sps:$4 sm:$0xff]  }
 0x360   : > { %10186 = vmatprep.subr.bf16.mxu0 %v14828_v52  ;;  %v14894_v51 = vld [vmem:[%s16326_s29 + $0x15d4] ss:$120 sps:$4 sm:$0xff]   ;;  %v14889_v52 = vld [vmem:[%s16326_s29 + $0x24c8] ss:$120 sps:$4 sm:$0xff]  }
 0x362   : > { %10105 = vmatpush1.bf16.msra.mxu1 %v14823_v57  ;;  %v14892_v57 = vld [vmem:[%s16326_s29 + $0x15d0] ss:$120 sps:$4 sm:$0xff]  }
 0x363   : > { %10187 = vmatpush1.bf16.msra.mxu0 %v14826_v58  ;;  %10106 = vmatprep.subr.bf16.mxu1 %v14831_v59  ;;  %v14897_v58 = vld [vmem:[%s16326_s29 + $0x25bc] ss:$120 sps:$4 sm:$0xff]  }
 0x364   : > { %10188 = vmatprep.subr.bf16.mxu0 %v14834_v60  ;;  %v14900_v59 = vld [vmem:[%s16326_s29 + $0x16c4] ss:$120 sps:$4 sm:$0xff]   ;;  %v14895_v60 = vld [vmem:[%s16326_s29 + $0x25b8] ss:$120 sps:$4 sm:$0xff]  }
 0x366   : > { %10107 = vmatpush1.bf16.msra.mxu1 %v14829_v61  ;;  %v14898_v61 = vld [vmem:[%s16326_s29 + $0x16c0] ss:$120 sps:$4 sm:$0xff]  }
 0x367   : > { %10189 = vmatpush1.bf16.msra.mxu0 %v14832_v0  ;;  %10108 = vmatprep.subr.bf16.mxu1 %v14837_v1  ;;  %v14903_v0 = vld [vmem:[%s16326_s29 + $0x26ac] ss:$120 sps:$4 sm:$0xff]  }
 0x368   : > { %10190 = vmatprep.subr.bf16.mxu0 %v14840_v2  ;;  %v14906_v1 = vld [vmem:[%s16326_s29 + $0x17b4] ss:$120 sps:$4 sm:$0xff]   ;;  %v14901_v2 = vld [vmem:[%s16326_s29 + $0x26a8] ss:$120 sps:$4 sm:$0xff]  }
 0x36a   : > { %10109 = vmatpush1.bf16.msra.mxu1 %v14835_v4  ;;  %v14904_v4 = vld [vmem:[%s16326_s29 + $0x17b0] ss:$120 sps:$4 sm:$0xff]  }
 0x36b   : > { %10191 = vmatpush1.bf16.msra.mxu0 %v14838_v7  ;;  %10110 = vmatprep.subr.bf16.mxu1 %v14843_v8  ;;  %v14909_v7 = vld [vmem:[%s16326_s29 + $0x279c] ss:$120 sps:$4 sm:$0xff]  }
 0x36c   : > { %10192 = vmatprep.subr.bf16.mxu0 %v14846_v10  ;;  %v14912_v8 = vld [vmem:[%s16326_s29 + $0x18a4] ss:$120 sps:$4 sm:$0xff]   ;;  %v14907_v10 = vld [vmem:[%s16326_s29 + $0x2798] ss:$120 sps:$4 sm:$0xff]  }
 0x36e   : > { %10111 = vmatpush1.bf16.msra.mxu1 %v14841_v11  ;;  %v14910_v11 = vld [vmem:[%s16326_s29 + $0x18a0] ss:$120 sps:$4 sm:$0xff]  }
 0x36f   : > { %10193 = vmatpush1.bf16.msra.mxu0 %v14844_v14  ;;  %10121 = vmatprep.subr.bf16.mxu1 %v14849_v15  ;;  %v14915_v14 = vld [vmem:[%s16326_s29 + $0x288c] ss:$120 sps:$4 sm:$0xff]  }
 0x370   : > { %10203 = vmatprep.subr.bf16.mxu0 %v14852_v17  ;;  %v14918_v15 = vld [vmem:[%s16326_s29 + $0x1994] ss:$120 sps:$4 sm:$0xff]   ;;  %v14913_v17 = vld [vmem:[%s16326_s29 + $0x2888] ss:$120 sps:$4 sm:$0xff]  }
 0x371   : > { %10113 = vmatmul.mubr.bf16.vlgmr.msra.gmra.mrb[16].mxu1 %v16435_v19 }
 0x372   : > { %10195 = vmatmul.mubr.bf16.vlgmr.msra.gmra.mrb[16].mxu0 %v16427_v13  ;;  %10122 = vmatpush1.bf16.msra.mxu1 %v14847_v18  ;;  %v14916_v18 = vld [vmem:[%s16326_s29 + $0x1990] ss:$120 sps:$4 sm:$0xff]  }
 0x373   : > { %10204 = vmatpush1.bf16.msra.mxu0 %v14850_v21  ;;  %10123 = vmatprep.subr.bf16.mxu1 %v14855_v22  ;;  %v14921_v21 = vld [vmem:[%s16326_s29 + $0x297c] ss:$120 sps:$4 sm:$0xff]  }
 0x374   : > { %10205 = vmatprep.subr.bf16.mxu0 %v14858_v25  ;;  %10153 = vmatprep.mubr.bf16.mxu1 %v16441_v23  ;;  %v14924_v22 = vld [vmem:[%s16326_s29 + $0x1a84] ss:$120 sps:$4 sm:$0xff]   ;;  %v14919_v25 = vld [vmem:[%s16326_s29 + $0x2978] ss:$120 sps:$4 sm:$0xff]  }
 0x375   : > { %10235 = vmatprep.mubr.bf16.mxu0 %v16413_v3 }
 0x376   : > { %10124 = vmatpush1.bf16.msra.mxu1 %v14853_v26  ;;  %v14922_v26 = vld [vmem:[%s16326_s29 + $0x1a80] ss:$120 sps:$4 sm:$0xff]  }
 0x377   : > { %10206 = vmatpush1.bf16.msra.mxu0 %v14856_v28  ;;  %10125 = vmatprep.subr.bf16.mxu1 %v14861_v29  ;;  %v14927_v28 = vld [vmem:[%s16326_s29 + $0x2a6c] ss:$120 sps:$4 sm:$0xff]  }
 0x378   : > { %10207 = vmatprep.subr.bf16.mxu0 %v14864_v30  ;;  %v14930_v29 = vld [vmem:[%s16326_s29 + $0x1b74] ss:$120 sps:$4 sm:$0xff]   ;;  %v14925_v30 = vld [vmem:[%s16326_s29 + $0x2a68] ss:$120 sps:$4 sm:$0xff]  }
 0x37a   : > { %10126 = vmatpush1.bf16.msra.mxu1 %v14859_v32  ;;  %v14928_v32 = vld [vmem:[%s16326_s29 + $0x1b70] ss:$120 sps:$4 sm:$0xff]  }
 0x37b   : > { %10208 = vmatpush1.bf16.msra.mxu0 %v14862_v5  ;;  %10127 = vmatprep.subr.bf16.mxu1 %v14867_v34  ;;  %v14933_v5 = vld [vmem:[%s16326_s29 + $0x2b5c] ss:$120 sps:$4 sm:$0xff]  }
 0x37c   : > { %10209 = vmatprep.subr.bf16.mxu0 %v14870_v6  ;;  %v14936_v34 = vld [vmem:[%s16326_s29 + $0x1c64] ss:$120 sps:$4 sm:$0xff]   ;;  %v14931_v6 = vld [vmem:[%s16326_s29 + $0x2b58] ss:$120 sps:$4 sm:$0xff]  }
 0x37e   : > { %10128 = vmatpush1.bf16.msra.mxu1 %v14865_v35  ;;  %v14934_v35 = vld [vmem:[%s16326_s29 + $0x1c60] ss:$120 sps:$4 sm:$0xff]  }
 0x37f   : > { %10210 = vmatpush1.bf16.msra.mxu0 %v14868_v36  ;;  %10129 = vmatprep.subr.bf16.mxu1 %v14873_v37  ;;  %v14939_v36 = vld [vmem:[%s16326_s29 + $0x2c4c] ss:$120 sps:$4 sm:$0xff]  }
 0x380   : > { %10211 = vmatprep.subr.bf16.mxu0 %v14876_v38  ;;  %v14942_v37 = vld [vmem:[%s16326_s29 + $0x1d54] ss:$120 sps:$4 sm:$0xff]   ;;  %v14937_v38 = vld [vmem:[%s16326_s29 + $0x2c48] ss:$120 sps:$4 sm:$0xff]  }
 0x382   : > { %10130 = vmatpush1.bf16.msra.mxu1 %v14871_v39  ;;  %v14940_v39 = vld [vmem:[%s16326_s29 + $0x1d50] ss:$120 sps:$4 sm:$0xff]  }
 0x383   : > { %10212 = vmatpush1.bf16.msra.mxu0 %v14874_v40  ;;  %10131 = vmatprep.subr.bf16.mxu1 %v14879_v41  ;;  %v14945_v40 = vld [vmem:[%s16326_s29 + $0x1e44] ss:$120 sps:$4 sm:$0xff]  }
 0x384   : > { %10213 = vmatprep.subr.bf16.mxu0 %v14882_v43  ;;  %v14948_v41 = vld [vmem:[%s16326_s29 + $0x4c] ss:$120 sps:$4 sm:$0xff]   ;;  %v14943_v43 = vld [vmem:[%s16326_s29 + $0x1e40] ss:$120 sps:$4 sm:$0xff]  }
 0x386   : > { %10132 = vmatpush1.bf16.msra.mxu1 %v14877_v44  ;;  %v14946_v44 = vld [vmem:[%s16326_s29 + $0x48] ss:$120 sps:$4 sm:$0xff]  }
 0x387   : > { %10214 = vmatpush1.bf16.msra.mxu0 %v14880_v45  ;;  %10133 = vmatprep.subr.bf16.mxu1 %v14885_v46  ;;  %v14951_v45 = vld [vmem:[%s16326_s29 + $0x1f34] ss:$120 sps:$4 sm:$0xff]  }
 0x388   : > { %10215 = vmatprep.subr.bf16.mxu0 %v14888_v47  ;;  %v14954_v46 = vld [vmem:[%s16326_s29 + $0x13c] ss:$120 sps:$4 sm:$0xff]   ;;  %v14949_v47 = vld [vmem:[%s16326_s29 + $0x1f30] ss:$120 sps:$4 sm:$0xff]  }
 0x38a   : > { %10134 = vmatpush1.bf16.msra.mxu1 %v14883_v48  ;;  %v14952_v48 = vld [vmem:[%s16326_s29 + $0x138] ss:$120 sps:$4 sm:$0xff]  }
 0x38b   : > { %10216 = vmatpush1.bf16.msra.mxu0 %v14886_v49  ;;  %10135 = vmatprep.subr.bf16.mxu1 %v14891_v50  ;;  %v14957_v49 = vld [vmem:[%s16326_s29 + $0x2024] ss:$120 sps:$4 sm:$0xff]  }
 0x38c   : > { %10217 = vmatprep.subr.bf16.mxu0 %v14894_v51  ;;  %v14960_v50 = vld [vmem:[%s16326_s29 + $0x22c] ss:$120 sps:$4 sm:$0xff]   ;;  %v14955_v51 = vld [vmem:[%s16326_s29 + $0x2020] ss:$120 sps:$4 sm:$0xff]  }
 0x38e   : > { %10136 = vmatpush1.bf16.msra.mxu1 %v14889_v52  ;;  %v14958_v52 = vld [vmem:[%s16326_s29 + $0x228] ss:$120 sps:$4 sm:$0xff]  }
 0x38f   : > { %10218 = vmatpush1.bf16.msra.mxu0 %v14892_v57  ;;  %10137 = vmatprep.subr.bf16.mxu1 %v14897_v58  ;;  %v14963_v57 = vld [vmem:[%s16326_s29 + $0x2114] ss:$120 sps:$4 sm:$0xff]  }
 0x390   : > { %10219 = vmatprep.subr.bf16.mxu0 %v14900_v59  ;;  %v14966_v58 = vld [vmem:[%s16326_s29 + $0x31c] ss:$120 sps:$4 sm:$0xff]   ;;  %v14961_v59 = vld [vmem:[%s16326_s29 + $0x2110] ss:$120 sps:$4 sm:$0xff]  }
 0x392   : > { %10138 = vmatpush1.bf16.msra.mxu1 %v14895_v60  ;;  %v14964_v60 = vld [vmem:[%s16326_s29 + $0x318] ss:$120 sps:$4 sm:$0xff]  }
 0x393   : > { %10220 = vmatpush1.bf16.msra.mxu0 %v14898_v61  ;;  %10139 = vmatprep.subr.bf16.mxu1 %v14903_v0  ;;  %v14969_v61 = vld [vmem:[%s16326_s29 + $0x2204] ss:$120 sps:$4 sm:$0xff]  }
 0x394   : > { %10221 = vmatprep.subr.bf16.mxu0 %v14906_v1  ;;  %v14972_v0 = vld [vmem:[%s16326_s29 + $0x40c] ss:$120 sps:$4 sm:$0xff]   ;;  %v14967_v1 = vld [vmem:[%s16326_s29 + $0x2200] ss:$120 sps:$4 sm:$0xff]  }
 0x396   : > { %10140 = vmatpush1.bf16.msra.mxu1 %v14901_v2  ;;  %v14970_v2 = vld [vmem:[%s16326_s29 + $0x408] ss:$120 sps:$4 sm:$0xff]  }
 0x397   : > { %10222 = vmatpush1.bf16.msra.mxu0 %v14904_v4  ;;  %10141 = vmatprep.subr.bf16.mxu1 %v14909_v7  ;;  %v14975_v4 = vld [vmem:[%s16326_s29 + $0x22f4] ss:$120 sps:$4 sm:$0xff]  }
 0x398   : > { %10223 = vmatprep.subr.bf16.mxu0 %v14912_v8  ;;  %v14978_v7 = vld [vmem:[%s16326_s29 + $0x4fc] ss:$120 sps:$4 sm:$0xff]   ;;  %v14973_v8 = vld [vmem:[%s16326_s29 + $0x22f0] ss:$120 sps:$4 sm:$0xff]  }
 0x39a   : > { %10142 = vmatpush1.bf16.msra.mxu1 %v14907_v10  ;;  %v14976_v10 = vld [vmem:[%s16326_s29 + $0x4f8] ss:$120 sps:$4 sm:$0xff]  }
 0x39b   : > { %10224 = vmatpush1.bf16.msra.mxu0 %v14910_v11  ;;  %10143 = vmatprep.subr.bf16.mxu1 %v14915_v14  ;;  %v14981_v11 = vld [vmem:[%s16326_s29 + $0x23e4] ss:$120 sps:$4 sm:$0xff]  }
 0x39c   : > { %10225 = vmatprep.subr.bf16.mxu0 %v14918_v15  ;;  %v14984_v14 = vld [vmem:[%s16326_s29 + $0x5ec] ss:$120 sps:$4 sm:$0xff]  }
 0x39e   : > { %10144 = vmatpush1.bf16.msra.mxu1 %v14913_v17 }
 0x39f   : > { %10226 = vmatpush1.bf16.msra.mxu0 %v14916_v18  ;;  %10145 = vmatprep.subr.bf16.mxu1 %v14921_v21  ;;  %v14979_v21 = vld [vmem:[%s16326_s29 + $0x23e0] ss:$120 sps:$4 sm:$0xff]  }
 0x3a0   : > { %10227 = vmatprep.subr.bf16.mxu0 %v14924_v22  ;;  %v14982_v22 = vld [vmem:[%s16326_s29 + $0x5e8] ss:$120 sps:$4 sm:$0xff]  }
 0x3a2   : > { %10146 = vmatpush1.bf16.msra.mxu1 %v14919_v25 }
 0x3a3   : > { %10228 = vmatpush1.bf16.msra.mxu0 %v14922_v26  ;;  %10147 = vmatprep.subr.bf16.mxu1 %v14927_v28  ;;  %v14987_v26 = vld [vmem:[%s16326_s29 + $0x24d4] ss:$120 sps:$4 sm:$0xff]  }
 0x3a4   : > { %10229 = vmatprep.subr.bf16.mxu0 %v14930_v29  ;;  %v14990_v28 = vld [vmem:[%s16326_s29 + $0x6dc] ss:$120 sps:$4 sm:$0xff]   ;;  %v14985_v29 = vld [vmem:[%s16326_s29 + $0x24d0] ss:$120 sps:$4 sm:$0xff]  }
 0x3a6   : > { %10148 = vmatpush1.bf16.msra.mxu1 %v14925_v30  ;;  %v14988_v30 = vld [vmem:[%s16326_s29 + $0x6d8] ss:$120 sps:$4 sm:$0xff]  }
 0x3a7   : > { %10230 = vmatpush1.bf16.msra.mxu0 %v14928_v32  ;;  %10149 = vmatprep.subr.bf16.mxu1 %v14933_v5  ;;  %v14993_v32 = vld [vmem:[%s16326_s29 + $0x25c4] ss:$120 sps:$4 sm:$0xff]  }
 0x3a8   : > { %10231 = vmatprep.subr.bf16.mxu0 %v14936_v34  ;;  %v14996_v5 = vld [vmem:[%s16326_s29 + $0x7cc] ss:$120 sps:$4 sm:$0xff]   ;;  %v14991_v34 = vld [vmem:[%s16326_s29 + $0x25c0] ss:$120 sps:$4 sm:$0xff]  }
 0x3aa   : > { %10150 = vmatpush1.bf16.msra.mxu1 %v14931_v6  ;;  %v14994_v6 = vld [vmem:[%s16326_s29 + $0x7c8] ss:$120 sps:$4 sm:$0xff]  }
 0x3ab   : > { %10232 = vmatpush1.bf16.msra.mxu0 %v14934_v35  ;;  %10151 = vmatprep.subr.bf16.mxu1 %v14939_v36  ;;  %v14999_v35 = vld [vmem:[%s16326_s29 + $0x26b4] ss:$120 sps:$4 sm:$0xff]  }
 0x3ac   : > { %10233 = vmatprep.subr.bf16.mxu0 %v14942_v37  ;;  %v15002_v36 = vld [vmem:[%s16326_s29 + $0x8bc] ss:$120 sps:$4 sm:$0xff]   ;;  %v14997_v37 = vld [vmem:[%s16326_s29 + $0x26b0] ss:$120 sps:$4 sm:$0xff]  }
 0x3ae   : > { %10152 = vmatpush1.bf16.msra.mxu1 %v14937_v38  ;;  %v15000_v38 = vld [vmem:[%s16326_s29 + $0x8b8] ss:$120 sps:$4 sm:$0xff]  }
 0x3af   : > { %10234 = vmatpush1.bf16.msra.mxu0 %v14940_v39  ;;  %10285 = vmatprep.subr.bf16.mxu1 %v14948_v41  ;;  %v15005_v39 = vld [vmem:[%s16326_s29 + $0x27a4] ss:$120 sps:$4 sm:$0xff]   ;;  %v15003_v41 = vld [vmem:[%s16326_s29 + $0x27a0] ss:$120 sps:$4 sm:$0xff]  }
 0x3b0   : > { %10244 = vmatprep.subr.bf16.mxu0 %v14945_v40  ;;  %v15008_v40 = vld [vmem:[%s16326_s29 + $0x9ac] ss:$120 sps:$4 sm:$0xff]  }
 0x3b1   : > { %10154 = vmatmul.mubr.bf16.vlgmr.msra.gmra.mrb[16].mxu1 %v16406_v63 }
 0x3b2   : > { %10236 = vmatmul.mubr.bf16.vlgmr.msra.gmra.mrb[16].mxu0 %v16435_v19  ;;  %10286 = vmatpush1.bf16.msra.mxu1 %v14946_v44  ;;  %v15011_v44 = vld [vmem:[%s16326_s29 + $0x2894] ss:$120 sps:$4 sm:$0xff]  }
 0x3b3   : > { %10245 = vmatpush1.bf16.msra.mxu0 %v14943_v43  ;;  %10287 = vmatprep.subr.bf16.mxu1 %v14954_v46  ;;  %v15006_v43 = vld [vmem:[%s16326_s29 + $0x9a8] ss:$120 sps:$4 sm:$0xff]  }
 0x3b4   : > { %10246 = vmatprep.subr.bf16.mxu0 %v14951_v45  ;;  %10276 = vmatprep.mubr.bf16.mxu0 %v16441_v23  ;;  %v15014_v45 = vld [vmem:[%s16326_s29 + $0xa9c] ss:$120 sps:$4 sm:$0xff]   ;;  %v15009_v46 = vld [vmem:[%s16326_s29 + $0x2890] ss:$120 sps:$4 sm:$0xff]  }
 0x3b5   : > { %10317 = vmatprep.mubr.bf16.mxu1 %v16403_v62 }
 0x3b6   : > { %10288 = vmatpush1.bf16.msra.mxu1 %v14952_v48  ;;  %v15017_v48 = vld [vmem:[%s16326_s29 + $0x2984] ss:$120 sps:$4 sm:$0xff]  }
 0x3b7   : > { %10247 = vmatpush1.bf16.msra.mxu0 %v14949_v47  ;;  %10289 = vmatprep.subr.bf16.mxu1 %v14960_v50  ;;  %v15012_v47 = vld [vmem:[%s16326_s29 + $0xa98] ss:$120 sps:$4 sm:$0xff]  }
 0x3b8   : > { %10248 = vmatprep.subr.bf16.mxu0 %v14957_v49  ;;  %v15020_v49 = vld [vmem:[%s16326_s29 + $0xb8c] ss:$120 sps:$4 sm:$0xff]   ;;  %v15015_v50 = vld [vmem:[%s16326_s29 + $0x2980] ss:$120 sps:$4 sm:$0xff]  }
 0x3ba   : > { %10290 = vmatpush1.bf16.msra.mxu1 %v14958_v52  ;;  %v15023_v52 = vld [vmem:[%s16326_s29 + $0x2a74] ss:$120 sps:$4 sm:$0xff]  }
 0x3bb   : > { %10249 = vmatpush1.bf16.msra.mxu0 %v14955_v51  ;;  %10291 = vmatprep.subr.bf16.mxu1 %v14966_v58  ;;  %v15018_v51 = vld [vmem:[%s16326_s29 + $0xb88] ss:$120 sps:$4 sm:$0xff]  }
 0x3bc   : > { %10250 = vmatprep.subr.bf16.mxu0 %v14963_v57  ;;  %v15026_v57 = vld [vmem:[%s16326_s29 + $0xc7c] ss:$120 sps:$4 sm:$0xff]   ;;  %v15021_v58 = vld [vmem:[%s16326_s29 + $0x2a70] ss:$120 sps:$4 sm:$0xff]  }
 0x3be   : > { %10292 = vmatpush1.bf16.msra.mxu1 %v14964_v60  ;;  %v15029_v60 = vld [vmem:[%s16326_s29 + $0x2b64] ss:$120 sps:$4 sm:$0xff]  }
 0x3bf   : > { %10251 = vmatpush1.bf16.msra.mxu0 %v14961_v59  ;;  %10293 = vmatprep.subr.bf16.mxu1 %v14972_v0  ;;  %v15024_v59 = vld [vmem:[%s16326_s29 + $0xc78] ss:$120 sps:$4 sm:$0xff]  }
 0x3c0   : > { %10252 = vmatprep.subr.bf16.mxu0 %v14969_v61  ;;  %v15032_v61 = vld [vmem:[%s16326_s29 + $0xd6c] ss:$120 sps:$4 sm:$0xff]   ;;  %v15027_v0 = vld [vmem:[%s16326_s29 + $0x2b60] ss:$120 sps:$4 sm:$0xff]  }
 0x3c2   : > { %10294 = vmatpush1.bf16.msra.mxu1 %v14970_v2  ;;  %v15035_v2 = vld [vmem:[%s16326_s29 + $0x2c54] ss:$120 sps:$4 sm:$0xff]  }
 0x3c3   : > { %10253 = vmatpush1.bf16.msra.mxu0 %v14967_v1  ;;  %10295 = vmatprep.subr.bf16.mxu1 %v14978_v7  ;;  %v15030_v1 = vld [vmem:[%s16326_s29 + $0xd68] ss:$120 sps:$4 sm:$0xff]  }
 0x3c4   : > { %10254 = vmatprep.subr.bf16.mxu0 %v14975_v4  ;;  %v17318_v15 = vpop.f32.mrb[12].mxu1  ;;  %v15038_v4 = vld [vmem:[%s16326_s29 + $0xe5c] ss:$120 sps:$4 sm:$0xff]   ;;  %v15033_v7 = vld [vmem:[%s16326_s29 + $0x2c50] ss:$120 sps:$4 sm:$0xff]  }
 0x3c5   : > { %v17320_v17 = vpop.f32.mrb[13].mxu1 }
 0x3c6   : > { %v9913_v18 = vpop.f32.mrb[14].mxu1  ;;  %10296 = vmatpush1.bf16.msra.mxu1 %v14976_v10  ;;  %v15041_v10 = vld [vmem:[%s16326_s29 + $0xf4c] ss:$120 sps:$4 sm:$0xff]  }
 0x3c7   : > { %10255 = vmatpush1.bf16.msra.mxu0 %v14973_v8  ;;  %v9914_v25 = vpop.f32.mrb[15].mxu1  ;;  %10297 = vmatprep.subr.bf16.mxu1 %v14984_v14  ;;  %v15036_v8 = vld [vmem:[%s16326_s29 + $0xe58] ss:$120 sps:$4 sm:$0xff]   ;;  %v15039_v14 = vld [vmem:[%s16326_s29 + $0xf48] ss:$120 sps:$4 sm:$0xff]  }
 0x3c8   : > { %10256 = vmatprep.subr.bf16.mxu0 %v14981_v11  ;;  %v15044_v11 = vld [vmem:[%s16326_s29 + $0x54] ss:$120 sps:$4 sm:$0xff]   ;;  %v15042_v18 = vld [vmem:[%s16326_s29 + $0x50] ss:$120 sps:$4 sm:$0xff]  }
 0x3c9   : > { %v15045_v25 = vld [vmem:[%s16326_s29 + $0x1038] ss:$120 sps:$4 sm:$0xff]  }
 0x3ca   : > { %10298 = vmatpush1.bf16.msra.mxu1 %v14982_v22  ;;  %v15050_v22 = vld [vmem:[%s16326_s29 + $0x144] ss:$120 sps:$4 sm:$0xff]  }
 0x3cb   : > { %10257 = vmatpush1.bf16.msra.mxu0 %v14979_v21  ;;  %10299 = vmatprep.subr.bf16.mxu1 %v14990_v28  ;;  %v15047_v21 = vld [vmem:[%s16326_s29 + $0x103c] ss:$120 sps:$4 sm:$0xff]   ;;  %v15053_v28 = vld [vmem:[%s16326_s29 + $0x112c] ss:$120 sps:$4 sm:$0xff]  }
 0x3cc   : > { %10258 = vmatprep.subr.bf16.mxu0 %v14987_v26  ;;  %v15048_v26 = vld [vmem:[%s16326_s29 + $0x140] ss:$120 sps:$4 sm:$0xff]  }
 0x3ce   : > { %10300 = vmatpush1.bf16.msra.mxu1 %v14988_v30  ;;  %v15051_v30 = vld [vmem:[%s16326_s29 + $0x1128] ss:$120 sps:$4 sm:$0xff]  }
 0x3cf   : > { %10259 = vmatpush1.bf16.msra.mxu0 %v14985_v29  ;;  %10301 = vmatprep.subr.bf16.mxu1 %v14996_v5  ;;  %v15056_v29 = vld [vmem:[%s16326_s29 + $0x234] ss:$120 sps:$4 sm:$0xff]  }
 0x3d0   : > { %10260 = vmatprep.subr.bf16.mxu0 %v14993_v32  ;;  %v15054_v32 = vld [vmem:[%s16326_s29 + $0x230] ss:$120 sps:$4 sm:$0xff]   ;;  %v15059_v5 = vld [vmem:[%s16326_s29 + $0x121c] ss:$120 sps:$4 sm:$0xff]  }
 0x3d2   : > { %10302 = vmatpush1.bf16.msra.mxu1 %v14994_v6  ;;  %v15057_v6 = vld [vmem:[%s16326_s29 + $0x1218] ss:$120 sps:$4 sm:$0xff]  }
 0x3d3   : > { %10261 = vmatpush1.bf16.msra.mxu0 %v14991_v34  ;;  %10303 = vmatprep.subr.bf16.mxu1 %v15002_v36  ;;  %v15062_v34 = vld [vmem:[%s16326_s29 + $0x324] ss:$120 sps:$4 sm:$0xff]  }
 0x3d4   : > { %10262 = vmatprep.subr.bf16.mxu0 %v14999_v35  ;;  %v15060_v35 = vld [vmem:[%s16326_s29 + $0x320] ss:$120 sps:$4 sm:$0xff]   ;;  %v15065_v36 = vld [vmem:[%s16326_s29 + $0x130c] ss:$120 sps:$4 sm:$0xff]  }
 0x3d6   : > { %10304 = vmatpush1.bf16.msra.mxu1 %v15000_v38  ;;  %v15063_v38 = vld [vmem:[%s16326_s29 + $0x1308] ss:$120 sps:$4 sm:$0xff]  }
 0x3d7   : > { %10263 = vmatpush1.bf16.msra.mxu0 %v14997_v37  ;;  %10305 = vmatprep.subr.bf16.mxu1 %v15008_v40  ;;  %v15068_v37 = vld [vmem:[%s16326_s29 + $0x414] ss:$120 sps:$4 sm:$0xff]  }
 0x3d8   : > { %10264 = vmatprep.subr.bf16.mxu0 %v15005_v39  ;;  %v15066_v39 = vld [vmem:[%s16326_s29 + $0x410] ss:$120 sps:$4 sm:$0xff]   ;;  %v15071_v40 = vld [vmem:[%s16326_s29 + $0x13fc] ss:$120 sps:$4 sm:$0xff]  }
 0x3da   : > { %10306 = vmatpush1.bf16.msra.mxu1 %v15006_v43  ;;  %v15069_v43 = vld [vmem:[%s16326_s29 + $0x13f8] ss:$120 sps:$4 sm:$0xff]  }
 0x3db   : > { %10265 = vmatpush1.bf16.msra.mxu0 %v15003_v41  ;;  %10307 = vmatprep.subr.bf16.mxu1 %v15014_v45  ;;  %v15074_v41 = vld [vmem:[%s16326_s29 + $0x504] ss:$120 sps:$4 sm:$0xff]  }
 0x3dc   : > { %10266 = vmatprep.subr.bf16.mxu0 %v15011_v44  ;;  %v15072_v44 = vld [vmem:[%s16326_s29 + $0x500] ss:$120 sps:$4 sm:$0xff]   ;;  %v15077_v45 = vld [vmem:[%s16326_s29 + $0x14ec] ss:$120 sps:$4 sm:$0xff]  }
 0x3de   : > { %10308 = vmatpush1.bf16.msra.mxu1 %v15012_v47 }
 0x3df   : > { %10267 = vmatpush1.bf16.msra.mxu0 %v15009_v46  ;;  %10309 = vmatprep.subr.bf16.mxu1 %v15020_v49  ;;  %v15080_v46 = vld [vmem:[%s16326_s29 + $0x5f4] ss:$120 sps:$4 sm:$0xff]  }
 0x3e0   : > { %10268 = vmatprep.subr.bf16.mxu0 %v15017_v48 }
 0x3e2   : > { %10310 = vmatpush1.bf16.msra.mxu1 %v15018_v51  ;;  %v15078_v51 = vld [vmem:[%s16326_s29 + $0x5f0] ss:$120 sps:$4 sm:$0xff]  }
 0x3e3   : > { %10269 = vmatpush1.bf16.msra.mxu0 %v15015_v50  ;;  %10311 = vmatprep.subr.bf16.mxu1 %v15026_v57  ;;  %v15075_v50 = vld [vmem:[%s16326_s29 + $0x14e8] ss:$120 sps:$4 sm:$0xff]   ;;  %v15083_v57 = vld [vmem:[%s16326_s29 + $0x15dc] ss:$120 sps:$4 sm:$0xff]  }
 0x3e4   : > { %10270 = vmatprep.subr.bf16.mxu0 %v15023_v52 }
 0x3e6   : > { %10312 = vmatpush1.bf16.msra.mxu1 %v15024_v59  ;;  %v15081_v59 = vld [vmem:[%s16326_s29 + $0x15d8] ss:$120 sps:$4 sm:$0xff]  }
 0x3e7   : > { %10271 = vmatpush1.bf16.msra.mxu0 %v15021_v58  ;;  %10313 = vmatprep.subr.bf16.mxu1 %v15032_v61  ;;  %v15086_v58 = vld [vmem:[%s16326_s29 + $0x6e4] ss:$120 sps:$4 sm:$0xff]  }
 0x3e8   : > { %10272 = vmatprep.subr.bf16.mxu0 %v15029_v60  ;;  %v15084_v60 = vld [vmem:[%s16326_s29 + $0x6e0] ss:$120 sps:$4 sm:$0xff]   ;;  %v15089_v61 = vld [vmem:[%s16326_s29 + $0x16cc] ss:$120 sps:$4 sm:$0xff]  }
 0x3ea   : > { %10314 = vmatpush1.bf16.msra.mxu1 %v15030_v1  ;;  %v15087_v1 = vld [vmem:[%s16326_s29 + $0x16c8] ss:$120 sps:$4 sm:$0xff]  }
 0x3eb   : > { %10273 = vmatpush1.bf16.msra.mxu0 %v15027_v0  ;;  %10315 = vmatprep.subr.bf16.mxu1 %v15038_v4  ;;  %v15092_v0 = vld [vmem:[%s16326_s29 + $0x7d4] ss:$120 sps:$4 sm:$0xff]  }
 0x3ec   : > { %10274 = vmatprep.subr.bf16.mxu0 %v15035_v2  ;;  %v15090_v2 = vld [vmem:[%s16326_s29 + $0x7d0] ss:$120 sps:$4 sm:$0xff]   ;;  %v15095_v4 = vld [vmem:[%s16326_s29 + $0x17bc] ss:$120 sps:$4 sm:$0xff]  }
 0x3ee   : > { %10316 = vmatpush1.bf16.msra.mxu1 %v15036_v8  ;;  %v15093_v8 = vld [vmem:[%s16326_s29 + $0x17b8] ss:$120 sps:$4 sm:$0xff]  }
 0x3ef   : > { %10275 = vmatpush1.bf16.msra.mxu0 %v15033_v7  ;;  %10326 = vmatprep.subr.bf16.mxu1 %v15041_v10  ;;  %v15098_v7 = vld [vmem:[%s16326_s29 + $0x8c4] ss:$120 sps:$4 sm:$0xff]   ;;  %v15096_v10 = vld [vmem:[%s16326_s29 + $0x8c0] ss:$120 sps:$4 sm:$0xff]  }
 0x3f0   : > { %10408 = vmatprep.subr.bf16.mxu0 %v15044_v11  ;;  %v15101_v11 = vld [vmem:[%s16326_s29 + $0x18ac] ss:$120 sps:$4 sm:$0xff]  }
 0x3f1   : > { %10318 = vmatmul.mubr.bf16.vlgmr.msra.gmra.mrb[20].mxu1 %v16427_v13 }
 0x3f2   : > { %10277 = vmatmul.mubr.bf16.vlgmr.msra.gmra.mrb[16].mxu0 %v16406_v63  ;;  %10327 = vmatpush1.bf16.msra.mxu1 %v15039_v14  ;;  %v15104_v14 = vld [vmem:[%s16326_s29 + $0x9b4] ss:$120 sps:$4 sm:$0xff]  }
 0x3f3   : > { %10409 = vmatpush1.bf16.msra.mxu0 %v15042_v18  ;;  %10328 = vmatprep.subr.bf16.mxu1 %v15047_v21  ;;  %v15099_v18 = vld [vmem:[%s16326_s29 + $0x18a8] ss:$120 sps:$4 sm:$0xff]  }
 0x3f4   : > { %10410 = vmatprep.subr.bf16.mxu0 %v15050_v22  ;;  %10358 = vmatprep.mubr.bf16.mxu1 %v16413_v3  ;;  %v15102_v21 = vld [vmem:[%s16326_s29 + $0x9b0] ss:$120 sps:$4 sm:$0xff]   ;;  %v15107_v22 = vld [vmem:[%s16326_s29 + $0x199c] ss:$120 sps:$4 sm:$0xff]  }
 0x3f5   : > { %10440 = vmatprep.mubr.bf16.mxu0 %v16403_v62 }
 0x3f6   : > { %10329 = vmatpush1.bf16.msra.mxu1 %v15045_v25  ;;  %v15110_v25 = vld [vmem:[%s16326_s29 + $0xaa4] ss:$120 sps:$4 sm:$0xff]  }
 0x3f7   : > { %10411 = vmatpush1.bf16.msra.mxu0 %v15048_v26  ;;  %10330 = vmatprep.subr.bf16.mxu1 %v15053_v28  ;;  %v15105_v26 = vld [vmem:[%s16326_s29 + $0x1998] ss:$120 sps:$4 sm:$0xff]  }
 0x3f8   : > { %10412 = vmatprep.subr.bf16.mxu0 %v15056_v29  ;;  %v15108_v28 = vld [vmem:[%s16326_s29 + $0xaa0] ss:$120 sps:$4 sm:$0xff]   ;;  %v15113_v29 = vld [vmem:[%s16326_s29 + $0x1a8c] ss:$120 sps:$4 sm:$0xff]  }
 0x3fa   : > { %10331 = vmatpush1.bf16.msra.mxu1 %v15051_v30  ;;  %v15116_v30 = vld [vmem:[%s16326_s29 + $0xb94] ss:$120 sps:$4 sm:$0xff]  }
 0x3fb   : > { %10413 = vmatpush1.bf16.msra.mxu0 %v15054_v32  ;;  %10332 = vmatprep.subr.bf16.mxu1 %v15059_v5  ;;  %v15111_v32 = vld [vmem:[%s16326_s29 + $0x1a88] ss:$120 sps:$4 sm:$0xff]  }
 0x3fc   : > { %10414 = vmatprep.subr.bf16.mxu0 %v15062_v34  ;;  %v15114_v5 = vld [vmem:[%s16326_s29 + $0xb90] ss:$120 sps:$4 sm:$0xff]   ;;  %v15119_v34 = vld [vmem:[%s16326_s29 + $0x1b7c] ss:$120 sps:$4 sm:$0xff]  }
 0x3fe   : > { %10333 = vmatpush1.bf16.msra.mxu1 %v15057_v6  ;;  %v15122_v6 = vld [vmem:[%s16326_s29 + $0xc84] ss:$120 sps:$4 sm:$0xff]  }
 0x3ff   : > { %10415 = vmatpush1.bf16.msra.mxu0 %v15060_v35  ;;  %10334 = vmatprep.subr.bf16.mxu1 %v15065_v36  ;;  %v15117_v35 = vld [vmem:[%s16326_s29 + $0x1b78] ss:$120 sps:$4 sm:$0xff]  }
 0x400   : > { %10416 = vmatprep.subr.bf16.mxu0 %v15068_v37  ;;  %v15120_v36 = vld [vmem:[%s16326_s29 + $0xc80] ss:$120 sps:$4 sm:$0xff]   ;;  %v15125_v37 = vld [vmem:[%s16326_s29 + $0x1c6c] ss:$120 sps:$4 sm:$0xff]  }
 0x402   : > { %10335 = vmatpush1.bf16.msra.mxu1 %v15063_v38  ;;  %v15128_v38 = vld [vmem:[%s16326_s29 + $0xd74] ss:$120 sps:$4 sm:$0xff]  }
 0x403   : > { %10417 = vmatpush1.bf16.msra.mxu0 %v15066_v39  ;;  %10336 = vmatprep.subr.bf16.mxu1 %v15071_v40  ;;  %v15123_v39 = vld [vmem:[%s16326_s29 + $0x1c68] ss:$120 sps:$4 sm:$0xff]  }
 0x404   : > { %10418 = vmatprep.subr.bf16.mxu0 %v15074_v41  ;;  %v15126_v40 = vld [vmem:[%s16326_s29 + $0xd70] ss:$120 sps:$4 sm:$0xff]   ;;  %v15131_v41 = vld [vmem:[%s16326_s29 + $0x1d5c] ss:$120 sps:$4 sm:$0xff]  }
 0x405   : > { %v17390_v47 = vpop.f32.mrb[12].mxu0 }
 0x406   : > { %v17392_v48 = vpop.f32.mrb[13].mxu0  ;;  %10337 = vmatpush1.bf16.msra.mxu1 %v15069_v43  ;;  %v15134_v43 = vld [vmem:[%s16326_s29 + $0xe64] ss:$120 sps:$4 sm:$0xff]  }
 0x407   : > { %v10036_v49 = vpop.f32.mrb[14].mxu0  ;;  %10419 = vmatpush1.bf16.msra.mxu0 %v15072_v44  ;;  %10338 = vmatprep.subr.bf16.mxu1 %v15077_v45  ;;  %v15129_v44 = vld [vmem:[%s16326_s29 + $0x1d58] ss:$120 sps:$4 sm:$0xff]  }
 0x408   : > { %v10037_v52 = vpop.f32.mrb[15].mxu0  ;;  %10420 = vmatprep.subr.bf16.mxu0 %v15080_v46  ;;  %v15132_v45 = vld [vmem:[%s16326_s29 + $0xe60] ss:$120 sps:$4 sm:$0xff]   ;;  %v15137_v46 = vld [vmem:[%s16326_s29 + $0x1e4c] ss:$120 sps:$4 sm:$0xff]  }
 0x409   : > { %v15140_v49 = vld [vmem:[%s16326_s29 + $0xf54] ss:$120 sps:$4 sm:$0xff]  }
 0x40a   : > { %10339 = vmatpush1.bf16.msra.mxu1 %v15075_v50  ;;  %v15135_v50 = vld [vmem:[%s16326_s29 + $0x1e48] ss:$120 sps:$4 sm:$0xff]   ;;  %v15143_v52 = vld [vmem:[%s16326_s29 + $0x1f3c] ss:$120 sps:$4 sm:$0xff]  }
 0x40b   : > { %10421 = vmatpush1.bf16.msra.mxu0 %v15078_v51  ;;  %10340 = vmatprep.subr.bf16.mxu1 %v15083_v57  ;;  %v15138_v51 = vld [vmem:[%s16326_s29 + $0xf50] ss:$120 sps:$4 sm:$0xff]   ;;  %v15146_v57 = vld [vmem:[%s16326_s29 + $0x1044] ss:$120 sps:$4 sm:$0xff]  }
 0x40c   : > { %10422 = vmatprep.subr.bf16.mxu0 %v15086_v58  ;;  %v15141_v58 = vld [vmem:[%s16326_s29 + $0x1f38] ss:$120 sps:$4 sm:$0xff]  }
 0x40e   : > { %10341 = vmatpush1.bf16.msra.mxu1 %v15081_v59  ;;  %v15144_v59 = vld [vmem:[%s16326_s29 + $0x1040] ss:$120 sps:$4 sm:$0xff]  }
 0x40f   : > { %10423 = vmatpush1.bf16.msra.mxu0 %v15084_v60  ;;  %10342 = vmatprep.subr.bf16.mxu1 %v15089_v61  ;;  %v15149_v60 = vld [vmem:[%s16326_s29 + $0x202c] ss:$120 sps:$4 sm:$0xff]  }
 0x410   : > { %10424 = vmatprep.subr.bf16.mxu0 %v15092_v0  ;;  %v15152_v61 = vld [vmem:[%s16326_s29 + $0x1134] ss:$120 sps:$4 sm:$0xff]   ;;  %v15147_v0 = vld [vmem:[%s16326_s29 + $0x2028] ss:$120 sps:$4 sm:$0xff]  }
 0x412   : > { %10343 = vmatpush1.bf16.msra.mxu1 %v15087_v1  ;;  %v15150_v1 = vld [vmem:[%s16326_s29 + $0x1130] ss:$120 sps:$4 sm:$0xff]  }
 0x413   : > { %10425 = vmatpush1.bf16.msra.mxu0 %v15090_v2  ;;  %10344 = vmatprep.subr.bf16.mxu1 %v15095_v4  ;;  %v15155_v2 = vld [vmem:[%s16326_s29 + $0x211c] ss:$120 sps:$4 sm:$0xff]  }
 0x414   : > { %10426 = vmatprep.subr.bf16.mxu0 %v15098_v7  ;;  %v15158_v4 = vld [vmem:[%s16326_s29 + $0x1224] ss:$120 sps:$4 sm:$0xff]   ;;  %v15153_v7 = vld [vmem:[%s16326_s29 + $0x2118] ss:$120 sps:$4 sm:$0xff]  }
 0x416   : > { %10345 = vmatpush1.bf16.msra.mxu1 %v15093_v8  ;;  %v15156_v8 = vld [vmem:[%s16326_s29 + $0x1220] ss:$120 sps:$4 sm:$0xff]  }
 0x417   : > { %10427 = vmatpush1.bf16.msra.mxu0 %v15096_v10  ;;  %10346 = vmatprep.subr.bf16.mxu1 %v15101_v11  ;;  %v15161_v10 = vld [vmem:[%s16326_s29 + $0x220c] ss:$120 sps:$4 sm:$0xff]  }
 0x418   : > { %10428 = vmatprep.subr.bf16.mxu0 %v15104_v14  ;;  %v15164_v11 = vld [vmem:[%s16326_s29 + $0x1314] ss:$120 sps:$4 sm:$0xff]   ;;  %v15159_v14 = vld [vmem:[%s16326_s29 + $0x2208] ss:$120 sps:$4 sm:$0xff]  }
 0x41a   : > { %10347 = vmatpush1.bf16.msra.mxu1 %v15099_v18  ;;  %v15162_v18 = vld [vmem:[%s16326_s29 + $0x1310] ss:$120 sps:$4 sm:$0xff]  }
 0x41b   : > { %10429 = vmatpush1.bf16.msra.mxu0 %v15102_v21  ;;  %10348 = vmatprep.subr.bf16.mxu1 %v15107_v22  ;;  %v15167_v21 = vld [vmem:[%s16326_s29 + $0x22fc] ss:$120 sps:$4 sm:$0xff]  }
 0x41c   : > { %10430 = vmatprep.subr.bf16.mxu0 %v15110_v25  ;;  %v15170_v22 = vld [vmem:[%s16326_s29 + $0x1404] ss:$120 sps:$4 sm:$0xff]   ;;  %v15165_v25 = vld [vmem:[%s16326_s29 + $0x22f8] ss:$120 sps:$4 sm:$0xff]  }
 0x41e   : > { %10349 = vmatpush1.bf16.msra.mxu1 %v15105_v26  ;;  %v15168_v26 = vld [vmem:[%s16326_s29 + $0x1400] ss:$120 sps:$4 sm:$0xff]  }
 0x41f   : > { %10431 = vmatpush1.bf16.msra.mxu0 %v15108_v28  ;;  %10350 = vmatprep.subr.bf16.mxu1 %v15113_v29  ;;  %v15173_v28 = vld [vmem:[%s16326_s29 + $0x23ec] ss:$120 sps:$4 sm:$0xff]  }
 0x420   : > { %10432 = vmatprep.subr.bf16.mxu0 %v15116_v30  ;;  %v15176_v29 = vld [vmem:[%s16326_s29 + $0x14f4] ss:$120 sps:$4 sm:$0xff]   ;;  %v15171_v30 = vld [vmem:[%s16326_s29 + $0x23e8] ss:$120 sps:$4 sm:$0xff]  }
 0x422   : > { %10351 = vmatpush1.bf16.msra.mxu1 %v15111_v32  ;;  %v15174_v32 = vld [vmem:[%s16326_s29 + $0x14f0] ss:$120 sps:$4 sm:$0xff]  }
 0x423   : > { %10433 = vmatpush1.bf16.msra.mxu0 %v15114_v5  ;;  %10352 = vmatprep.subr.bf16.mxu1 %v15119_v34  ;;  %v15179_v5 = vld [vmem:[%s16326_s29 + $0x24dc] ss:$120 sps:$4 sm:$0xff]  }
 0x424   : > { %10434 = vmatprep.subr.bf16.mxu0 %v15122_v6  ;;  %v15182_v34 = vld [vmem:[%s16326_s29 + $0x15e4] ss:$120 sps:$4 sm:$0xff]   ;;  %v15177_v6 = vld [vmem:[%s16326_s29 + $0x24d8] ss:$120 sps:$4 sm:$0xff]  }
 0x426   : > { %10353 = vmatpush1.bf16.msra.mxu1 %v15117_v35  ;;  %v15180_v35 = vld [vmem:[%s16326_s29 + $0x15e0] ss:$120 sps:$4 sm:$0xff]  }
 0x427   : > { %10435 = vmatpush1.bf16.msra.mxu0 %v15120_v36  ;;  %10354 = vmatprep.subr.bf16.mxu1 %v15125_v37  ;;  %v15185_v36 = vld [vmem:[%s16326_s29 + $0x25cc] ss:$120 sps:$4 sm:$0xff]  }
 0x428   : > { %10436 = vmatprep.subr.bf16.mxu0 %v15128_v38  ;;  %v15188_v37 = vld [vmem:[%s16326_s29 + $0x16d4] ss:$120 sps:$4 sm:$0xff]   ;;  %v15183_v38 = vld [vmem:[%s16326_s29 + $0x25c8] ss:$120 sps:$4 sm:$0xff]  }
 0x42a   : > { %10355 = vmatpush1.bf16.msra.mxu1 %v15123_v39  ;;  %v15186_v39 = vld [vmem:[%s16326_s29 + $0x16d0] ss:$120 sps:$4 sm:$0xff]  }
 0x42b   : > { %10437 = vmatpush1.bf16.msra.mxu0 %v15126_v40  ;;  %10356 = vmatprep.subr.bf16.mxu1 %v15131_v41  ;;  %v15191_v40 = vld [vmem:[%s16326_s29 + $0x26bc] ss:$120 sps:$4 sm:$0xff]  }
 0x42c   : > { %10438 = vmatprep.subr.bf16.mxu0 %v15134_v43  ;;  %v15194_v41 = vld [vmem:[%s16326_s29 + $0x17c4] ss:$120 sps:$4 sm:$0xff]   ;;  %v15189_v43 = vld [vmem:[%s16326_s29 + $0x26b8] ss:$120 sps:$4 sm:$0xff]  }
 0x42e   : > { %10357 = vmatpush1.bf16.msra.mxu1 %v15129_v44  ;;  %v15192_v44 = vld [vmem:[%s16326_s29 + $0x17c0] ss:$120 sps:$4 sm:$0xff]  }
 0x42f   : > { %10439 = vmatpush1.bf16.msra.mxu0 %v15132_v45  ;;  %10367 = vmatprep.subr.bf16.mxu1 %v15137_v46  ;;  %v15197_v45 = vld [vmem:[%s16326_s29 + $0x27ac] ss:$120 sps:$4 sm:$0xff]  }
 0x430   : > { %10449 = vmatprep.subr.bf16.mxu0 %v15140_v49  ;;  %v15200_v46 = vld [vmem:[%s16326_s29 + $0x18b4] ss:$120 sps:$4 sm:$0xff]   ;;  %v15195_v49 = vld [vmem:[%s16326_s29 + $0x27a8] ss:$120 sps:$4 sm:$0xff]  }
 0x431   : > { %10359 = vmatmul.mubr.bf16.vlgmr.msra.gmra.mrb[20].mxu1 %v16435_v19 }
 0x432   : > { %10441 = vmatmul.mubr.bf16.vlgmr.msra.gmra.mrb[20].mxu0 %v16427_v13  ;;  %10368 = vmatpush1.bf16.msra.mxu1 %v15135_v50  ;;  %v15198_v50 = vld [vmem:[%s16326_s29 + $0x18b0] ss:$120 sps:$4 sm:$0xff]  }
 0x433   : > { %10450 = vmatpush1.bf16.msra.mxu0 %v15138_v51  ;;  %10369 = vmatprep.subr.bf16.mxu1 %v15143_v52  ;;  %v15203_v51 = vld [vmem:[%s16326_s29 + $0x289c] ss:$120 sps:$4 sm:$0xff]  }
 0x434   : > { %10451 = vmatprep.subr.bf16.mxu0 %v15146_v57  ;;  %10399 = vmatprep.mubr.bf16.mxu1 %v16441_v23  ;;  %v15206_v52 = vld [vmem:[%s16326_s29 + $0x19a4] ss:$120 sps:$4 sm:$0xff]   ;;  %v15201_v57 = vld [vmem:[%s16326_s29 + $0x2898] ss:$120 sps:$4 sm:$0xff]  }
 0x435   : > { %10481 = vmatprep.mubr.bf16.mxu0 %v16413_v3 }
 0x436   : > { %10370 = vmatpush1.bf16.msra.mxu1 %v15141_v58  ;;  %v15204_v58 = vld [vmem:[%s16326_s29 + $0x19a0] ss:$120 sps:$4 sm:$0xff]  }
 0x437   : > { %10452 = vmatpush1.bf16.msra.mxu0 %v15144_v59  ;;  %10371 = vmatprep.subr.bf16.mxu1 %v15149_v60  ;;  %v15209_v59 = vld [vmem:[%s16326_s29 + $0x298c] ss:$120 sps:$4 sm:$0xff]  }
 0x438   : > { %10453 = vmatprep.subr.bf16.mxu0 %v15152_v61  ;;  %v15212_v60 = vld [vmem:[%s16326_s29 + $0x1a94] ss:$120 sps:$4 sm:$0xff]   ;;  %v15207_v61 = vld [vmem:[%s16326_s29 + $0x2988] ss:$120 sps:$4 sm:$0xff]  }
 0x43a   : > { %10372 = vmatpush1.bf16.msra.mxu1 %v15147_v0  ;;  %v15210_v0 = vld [vmem:[%s16326_s29 + $0x1a90] ss:$120 sps:$4 sm:$0xff]  }
 0x43b   : > { %10454 = vmatpush1.bf16.msra.mxu0 %v15150_v1  ;;  %10373 = vmatprep.subr.bf16.mxu1 %v15155_v2  ;;  %v15215_v1 = vld [vmem:[%s16326_s29 + $0x2a7c] ss:$120 sps:$4 sm:$0xff]  }
 0x43c   : > { %10455 = vmatprep.subr.bf16.mxu0 %v15158_v4  ;;  %v15218_v2 = vld [vmem:[%s16326_s29 + $0x1b84] ss:$120 sps:$4 sm:$0xff]   ;;  %v15213_v4 = vld [vmem:[%s16326_s29 + $0x2a78] ss:$120 sps:$4 sm:$0xff]  }
 0x43e   : > { %10374 = vmatpush1.bf16.msra.mxu1 %v15153_v7  ;;  %v15216_v7 = vld [vmem:[%s16326_s29 + $0x1b80] ss:$120 sps:$4 sm:$0xff]  }
 0x43f   : > { %10456 = vmatpush1.bf16.msra.mxu0 %v15156_v8  ;;  %10375 = vmatprep.subr.bf16.mxu1 %v15161_v10  ;;  %v15221_v8 = vld [vmem:[%s16326_s29 + $0x2b6c] ss:$120 sps:$4 sm:$0xff]  }
 0x440   : > { %10457 = vmatprep.subr.bf16.mxu0 %v15164_v11  ;;  %v15224_v10 = vld [vmem:[%s16326_s29 + $0x1c74] ss:$120 sps:$4 sm:$0xff]   ;;  %v15219_v11 = vld [vmem:[%s16326_s29 + $0x2b68] ss:$120 sps:$4 sm:$0xff]  }
 0x442   : > { %10376 = vmatpush1.bf16.msra.mxu1 %v15159_v14  ;;  %v15222_v14 = vld [vmem:[%s16326_s29 + $0x1c70] ss:$120 sps:$4 sm:$0xff]  }
 0x443   : > { %10458 = vmatpush1.bf16.msra.mxu0 %v15162_v18  ;;  %10377 = vmatprep.subr.bf16.mxu1 %v15167_v21  ;;  %v15227_v18 = vld [vmem:[%s16326_s29 + $0x2c5c] ss:$120 sps:$4 sm:$0xff]  }
 0x444   : > { %10459 = vmatprep.subr.bf16.mxu0 %v15170_v22  ;;  %v15230_v21 = vld [vmem:[%s16326_s29 + $0x1d64] ss:$120 sps:$4 sm:$0xff]   ;;  %v15225_v22 = vld [vmem:[%s16326_s29 + $0x2c58] ss:$120 sps:$4 sm:$0xff]  }
 0x446   : > { %10378 = vmatpush1.bf16.msra.mxu1 %v15165_v25  ;;  %v15228_v25 = vld [vmem:[%s16326_s29 + $0x1d60] ss:$120 sps:$4 sm:$0xff]  }
 0x447   : > { %10460 = vmatpush1.bf16.msra.mxu0 %v15168_v26  ;;  %10379 = vmatprep.subr.bf16.mxu1 %v15173_v28  ;;  %v15233_v26 = vld [vmem:[%s16326_s29 + $0x1e54] ss:$120 sps:$4 sm:$0xff]  }
 0x448   : > { %10461 = vmatprep.subr.bf16.mxu0 %v15176_v29  ;;  %v15236_v28 = vld [vmem:[%s16326_s29 + $0x5c] ss:$120 sps:$4 sm:$0xff]   ;;  %v15231_v29 = vld [vmem:[%s16326_s29 + $0x1e50] ss:$120 sps:$4 sm:$0xff]  }
 0x44a   : > { %10380 = vmatpush1.bf16.msra.mxu1 %v15171_v30  ;;  %v15234_v30 = vld [vmem:[%s16326_s29 + $0x58] ss:$120 sps:$4 sm:$0xff]  }
 0x44b   : > { %10462 = vmatpush1.bf16.msra.mxu0 %v15174_v32  ;;  %10381 = vmatprep.subr.bf16.mxu1 %v15179_v5  ;;  %v15239_v32 = vld [vmem:[%s16326_s29 + $0x1f44] ss:$120 sps:$4 sm:$0xff]  }
 0x44c   : > { %10463 = vmatprep.subr.bf16.mxu0 %v15182_v34  ;;  %v15242_v5 = vld [vmem:[%s16326_s29 + $0x14c] ss:$120 sps:$4 sm:$0xff]   ;;  %v15237_v34 = vld [vmem:[%s16326_s29 + $0x1f40] ss:$120 sps:$4 sm:$0xff]  }
 0x44e   : > { %10382 = vmatpush1.bf16.msra.mxu1 %v15177_v6  ;;  %v15240_v6 = vld [vmem:[%s16326_s29 + $0x148] ss:$120 sps:$4 sm:$0xff]  }
 0x44f   : > { %10464 = vmatpush1.bf16.msra.mxu0 %v15180_v35  ;;  %10383 = vmatprep.subr.bf16.mxu1 %v15185_v36  ;;  %v15245_v35 = vld [vmem:[%s16326_s29 + $0x2034] ss:$120 sps:$4 sm:$0xff]  }
 0x450   : > { %10465 = vmatprep.subr.bf16.mxu0 %v15188_v37  ;;  %v15248_v36 = vld [vmem:[%s16326_s29 + $0x23c] ss:$120 sps:$4 sm:$0xff]   ;;  %v15243_v37 = vld [vmem:[%s16326_s29 + $0x2030] ss:$120 sps:$4 sm:$0xff]  }
 0x452   : > { %10384 = vmatpush1.bf16.msra.mxu1 %v15183_v38  ;;  %v15246_v38 = vld [vmem:[%s16326_s29 + $0x238] ss:$120 sps:$4 sm:$0xff]  }
 0x453   : > { %10466 = vmatpush1.bf16.msra.mxu0 %v15186_v39  ;;  %10385 = vmatprep.subr.bf16.mxu1 %v15191_v40  ;;  %v15251_v39 = vld [vmem:[%s16326_s29 + $0x2124] ss:$120 sps:$4 sm:$0xff]  }
 0x454   : > { %10467 = vmatprep.subr.bf16.mxu0 %v15194_v41  ;;  %v15254_v40 = vld [vmem:[%s16326_s29 + $0x32c] ss:$120 sps:$4 sm:$0xff]   ;;  %v15249_v41 = vld [vmem:[%s16326_s29 + $0x2120] ss:$120 sps:$4 sm:$0xff]  }
 0x456   : > { %10386 = vmatpush1.bf16.msra.mxu1 %v15189_v43  ;;  %v15252_v43 = vld [vmem:[%s16326_s29 + $0x328] ss:$120 sps:$4 sm:$0xff]  }
 0x457   : > { %10468 = vmatpush1.bf16.msra.mxu0 %v15192_v44  ;;  %10387 = vmatprep.subr.bf16.mxu1 %v15197_v45  ;;  %v15257_v44 = vld [vmem:[%s16326_s29 + $0x2214] ss:$120 sps:$4 sm:$0xff]  }
 0x458   : > { %10469 = vmatprep.subr.bf16.mxu0 %v15200_v46  ;;  %v15260_v45 = vld [vmem:[%s16326_s29 + $0x41c] ss:$120 sps:$4 sm:$0xff]   ;;  %v15255_v46 = vld [vmem:[%s16326_s29 + $0x2210] ss:$120 sps:$4 sm:$0xff]  }
 0x45a   : > { %10388 = vmatpush1.bf16.msra.mxu1 %v15195_v49  ;;  %v15258_v49 = vld [vmem:[%s16326_s29 + $0x418] ss:$120 sps:$4 sm:$0xff]  }
 0x45b   : > { %10470 = vmatpush1.bf16.msra.mxu0 %v15198_v50  ;;  %10389 = vmatprep.subr.bf16.mxu1 %v15203_v51  ;;  %v15263_v50 = vld [vmem:[%s16326_s29 + $0x2304] ss:$120 sps:$4 sm:$0xff]  }
 0x45c   : > { %10471 = vmatprep.subr.bf16.mxu0 %v15206_v52  ;;  %v15266_v51 = vld [vmem:[%s16326_s29 + $0x50c] ss:$120 sps:$4 sm:$0xff]   ;;  %v15261_v52 = vld [vmem:[%s16326_s29 + $0x2300] ss:$120 sps:$4 sm:$0xff]  }
 0x45e   : > { %10390 = vmatpush1.bf16.msra.mxu1 %v15201_v57  ;;  %v15264_v57 = vld [vmem:[%s16326_s29 + $0x508] ss:$120 sps:$4 sm:$0xff]  }
 0x45f   : > { %10472 = vmatpush1.bf16.msra.mxu0 %v15204_v58  ;;  %10391 = vmatprep.subr.bf16.mxu1 %v15209_v59  ;;  %v15269_v58 = vld [vmem:[%s16326_s29 + $0x23f4] ss:$120 sps:$4 sm:$0xff]  }
 0x460   : > { %10473 = vmatprep.subr.bf16.mxu0 %v15212_v60  ;;  %v15272_v59 = vld [vmem:[%s16326_s29 + $0x5fc] ss:$120 sps:$4 sm:$0xff]  }
 0x462   : > { %10392 = vmatpush1.bf16.msra.mxu1 %v15207_v61 }
 0x463   : > { %10474 = vmatpush1.bf16.msra.mxu0 %v15210_v0  ;;  %10393 = vmatprep.subr.bf16.mxu1 %v15215_v1  ;;  %v15267_v1 = vld [vmem:[%s16326_s29 + $0x23f0] ss:$120 sps:$4 sm:$0xff]  }
 0x464   : > { %10475 = vmatprep.subr.bf16.mxu0 %v15218_v2  ;;  %v15270_v2 = vld [vmem:[%s16326_s29 + $0x5f8] ss:$120 sps:$4 sm:$0xff]  }
 0x466   : > { %10394 = vmatpush1.bf16.msra.mxu1 %v15213_v4 }
 0x467   : > { %10476 = vmatpush1.bf16.msra.mxu0 %v15216_v7  ;;  %10395 = vmatprep.subr.bf16.mxu1 %v15221_v8  ;;  %v15275_v7 = vld [vmem:[%s16326_s29 + $0x24e4] ss:$120 sps:$4 sm:$0xff]  }
 0x468   : > { %10477 = vmatprep.subr.bf16.mxu0 %v15224_v10  ;;  %v15278_v8 = vld [vmem:[%s16326_s29 + $0x6ec] ss:$120 sps:$4 sm:$0xff]   ;;  %v15273_v10 = vld [vmem:[%s16326_s29 + $0x24e0] ss:$120 sps:$4 sm:$0xff]  }
 0x46a   : > { %10396 = vmatpush1.bf16.msra.mxu1 %v15219_v11  ;;  %v15276_v11 = vld [vmem:[%s16326_s29 + $0x6e8] ss:$120 sps:$4 sm:$0xff]  }
 0x46b   : > { %10478 = vmatpush1.bf16.msra.mxu0 %v15222_v14  ;;  %10397 = vmatprep.subr.bf16.mxu1 %v15227_v18  ;;  %v15281_v14 = vld [vmem:[%s16326_s29 + $0x25d4] ss:$120 sps:$4 sm:$0xff]  }
 0x46c   : > { %10479 = vmatprep.subr.bf16.mxu0 %v15230_v21  ;;  %v15284_v18 = vld [vmem:[%s16326_s29 + $0x7dc] ss:$120 sps:$4 sm:$0xff]   ;;  %v15279_v21 = vld [vmem:[%s16326_s29 + $0x25d0] ss:$120 sps:$4 sm:$0xff]  }
 0x46e   : > { %10398 = vmatpush1.bf16.msra.mxu1 %v15225_v22  ;;  %v15282_v22 = vld [vmem:[%s16326_s29 + $0x7d8] ss:$120 sps:$4 sm:$0xff]  }
 0x46f   : > { %10480 = vmatpush1.bf16.msra.mxu0 %v15228_v25  ;;  %10531 = vmatprep.subr.bf16.mxu1 %v15236_v28  ;;  %v15287_v25 = vld [vmem:[%s16326_s29 + $0x26c4] ss:$120 sps:$4 sm:$0xff]   ;;  %v15285_v28 = vld [vmem:[%s16326_s29 + $0x26c0] ss:$120 sps:$4 sm:$0xff]  }
 0x470   : > { %10490 = vmatprep.subr.bf16.mxu0 %v15233_v26  ;;  %v15290_v26 = vld [vmem:[%s16326_s29 + $0x8cc] ss:$120 sps:$4 sm:$0xff]  }
 0x471   : > { %10400 = vmatmul.mubr.bf16.vlgmr.msra.gmra.mrb[20].mxu1 %v16406_v63 }
 0x472   : > { %10482 = vmatmul.mubr.bf16.vlgmr.msra.gmra.mrb[20].mxu0 %v16435_v19  ;;  %10532 = vmatpush1.bf16.msra.mxu1 %v15234_v30  ;;  %v15293_v30 = vld [vmem:[%s16326_s29 + $0x27b4] ss:$120 sps:$4 sm:$0xff]  }
 0x473   : > { %10491 = vmatpush1.bf16.msra.mxu0 %v15231_v29  ;;  %10533 = vmatprep.subr.bf16.mxu1 %v15242_v5  ;;  %v15288_v29 = vld [vmem:[%s16326_s29 + $0x8c8] ss:$120 sps:$4 sm:$0xff]  }
 0x474   : > { %10492 = vmatprep.subr.bf16.mxu0 %v15239_v32  ;;  %10522 = vmatprep.mubr.bf16.mxu0 %v16441_v23  ;;  %v15296_v32 = vld [vmem:[%s16326_s29 + $0x9bc] ss:$120 sps:$4 sm:$0xff]   ;;  %v15291_v5 = vld [vmem:[%s16326_s29 + $0x27b0] ss:$120 sps:$4 sm:$0xff]  }
 0x475   : > { %10563 = vmatprep.mubr.bf16.mxu1 %v16403_v62 }
 0x476   : > { %10534 = vmatpush1.bf16.msra.mxu1 %v15240_v6  ;;  %v15299_v6 = vld [vmem:[%s16326_s29 + $0x28a4] ss:$120 sps:$4 sm:$0xff]  }
 0x477   : > { %10493 = vmatpush1.bf16.msra.mxu0 %v15237_v34  ;;  %10535 = vmatprep.subr.bf16.mxu1 %v15248_v36  ;;  %v15294_v34 = vld [vmem:[%s16326_s29 + $0x9b8] ss:$120 sps:$4 sm:$0xff]  }
 0x478   : > { %10494 = vmatprep.subr.bf16.mxu0 %v15245_v35  ;;  %v15302_v35 = vld [vmem:[%s16326_s29 + $0xaac] ss:$120 sps:$4 sm:$0xff]   ;;  %v15297_v36 = vld [vmem:[%s16326_s29 + $0x28a0] ss:$120 sps:$4 sm:$0xff]  }
 0x47a   : > { %10536 = vmatpush1.bf16.msra.mxu1 %v15246_v38  ;;  %v15305_v38 = vld [vmem:[%s16326_s29 + $0x2994] ss:$120 sps:$4 sm:$0xff]  }
 0x47b   : > { %10495 = vmatpush1.bf16.msra.mxu0 %v15243_v37  ;;  %10537 = vmatprep.subr.bf16.mxu1 %v15254_v40  ;;  %v15300_v37 = vld [vmem:[%s16326_s29 + $0xaa8] ss:$120 sps:$4 sm:$0xff]  }
 0x47c   : > { %10496 = vmatprep.subr.bf16.mxu0 %v15251_v39  ;;  %v15308_v39 = vld [vmem:[%s16326_s29 + $0xb9c] ss:$120 sps:$4 sm:$0xff]   ;;  %v15303_v40 = vld [vmem:[%s16326_s29 + $0x2990] ss:$120 sps:$4 sm:$0xff]  }
 0x47e   : > { %10538 = vmatpush1.bf16.msra.mxu1 %v15252_v43  ;;  %v15311_v43 = vld [vmem:[%s16326_s29 + $0x2a84] ss:$120 sps:$4 sm:$0xff]  }
 0x47f   : > { %10497 = vmatpush1.bf16.msra.mxu0 %v15249_v41  ;;  %10539 = vmatprep.subr.bf16.mxu1 %v15260_v45  ;;  %v15306_v41 = vld [vmem:[%s16326_s29 + $0xb98] ss:$120 sps:$4 sm:$0xff]  }
 0x480   : > { %10498 = vmatprep.subr.bf16.mxu0 %v15257_v44  ;;  %v15314_v44 = vld [vmem:[%s16326_s29 + $0xc8c] ss:$120 sps:$4 sm:$0xff]   ;;  %v15309_v45 = vld [vmem:[%s16326_s29 + $0x2a80] ss:$120 sps:$4 sm:$0xff]  }
 0x482   : > { %10540 = vmatpush1.bf16.msra.mxu1 %v15258_v49  ;;  %v15317_v49 = vld [vmem:[%s16326_s29 + $0x2b74] ss:$120 sps:$4 sm:$0xff]  }
 0x483   : > { %10499 = vmatpush1.bf16.msra.mxu0 %v15255_v46  ;;  %10541 = vmatprep.subr.bf16.mxu1 %v15266_v51  ;;  %v15312_v46 = vld [vmem:[%s16326_s29 + $0xc88] ss:$120 sps:$4 sm:$0xff]  }
 0x484   : > { %10500 = vmatprep.subr.bf16.mxu0 %v15263_v50  ;;  %v17530_v60 = vpop.f32.mrb[16].mxu1  ;;  %v15320_v50 = vld [vmem:[%s16326_s29 + $0xd7c] ss:$120 sps:$4 sm:$0xff]   ;;  %v15315_v51 = vld [vmem:[%s16326_s29 + $0x2b70] ss:$120 sps:$4 sm:$0xff]  }
 0x485   : > { %v17532_v61 = vpop.f32.mrb[17].mxu1 }
 0x486   : > { %v10159_v0 = vpop.f32.mrb[18].mxu1  ;;  %10542 = vmatpush1.bf16.msra.mxu1 %v15264_v57  ;;  %v15323_v57 = vld [vmem:[%s16326_s29 + $0x2c64] ss:$120 sps:$4 sm:$0xff]  }
 0x487   : > { %10501 = vmatpush1.bf16.msra.mxu0 %v15261_v52  ;;  %v10160_v4 = vpop.f32.mrb[19].mxu1  ;;  %10543 = vmatprep.subr.bf16.mxu1 %v15272_v59  ;;  %v15318_v52 = vld [vmem:[%s16326_s29 + $0xd78] ss:$120 sps:$4 sm:$0xff]   ;;  %v15324_v0 = vld [vmem:[%s16326_s29 + $0xe68] ss:$120 sps:$4 sm:$0xff]  }
 0x488   : > { %10502 = vmatprep.subr.bf16.mxu0 %v15269_v58  ;;  %v15326_v58 = vld [vmem:[%s16326_s29 + $0xe6c] ss:$120 sps:$4 sm:$0xff]   ;;  %v15321_v59 = vld [vmem:[%s16326_s29 + $0x2c60] ss:$120 sps:$4 sm:$0xff]  }
 0x489   : > { %v15327_v4 = vld [vmem:[%s16326_s29 + $0xf58] ss:$120 sps:$4 sm:$0xff]  }
 0x48a   : > { %10544 = vmatpush1.bf16.msra.mxu1 %v15270_v2  ;;  %v15332_v2 = vld [vmem:[%s16326_s29 + $0x64] ss:$120 sps:$4 sm:$0xff]  }
 0x48b   : > { %10503 = vmatpush1.bf16.msra.mxu0 %v15267_v1  ;;  %10545 = vmatprep.subr.bf16.mxu1 %v15278_v8  ;;  %v15329_v1 = vld [vmem:[%s16326_s29 + $0xf5c] ss:$120 sps:$4 sm:$0xff]   ;;  %v15335_v8 = vld [vmem:[%s16326_s29 + $0x104c] ss:$120 sps:$4 sm:$0xff]  }
 0x48c   : > { %10504 = vmatprep.subr.bf16.mxu0 %v15275_v7  ;;  %v15330_v7 = vld [vmem:[%s16326_s29 + $0x60] ss:$120 sps:$4 sm:$0xff]  }
 0x48e   : > { %10546 = vmatpush1.bf16.msra.mxu1 %v15276_v11  ;;  %v15333_v11 = vld [vmem:[%s16326_s29 + $0x1048] ss:$120 sps:$4 sm:$0xff]  }
 0x48f   : > { %10505 = vmatpush1.bf16.msra.mxu0 %v15273_v10  ;;  %10547 = vmatprep.subr.bf16.mxu1 %v15284_v18  ;;  %v15338_v10 = vld [vmem:[%s16326_s29 + $0x154] ss:$120 sps:$4 sm:$0xff]  }
 0x490   : > { %10506 = vmatprep.subr.bf16.mxu0 %v15281_v14  ;;  %v15336_v14 = vld [vmem:[%s16326_s29 + $0x150] ss:$120 sps:$4 sm:$0xff]   ;;  %v15341_v18 = vld [vmem:[%s16326_s29 + $0x113c] ss:$120 sps:$4 sm:$0xff]  }
 0x492   : > { %10548 = vmatpush1.bf16.msra.mxu1 %v15282_v22  ;;  %v15339_v22 = vld [vmem:[%s16326_s29 + $0x1138] ss:$120 sps:$4 sm:$0xff]  }
 0x493   : > { %10507 = vmatpush1.bf16.msra.mxu0 %v15279_v21  ;;  %10549 = vmatprep.subr.bf16.mxu1 %v15290_v26  ;;  %v15344_v21 = vld [vmem:[%s16326_s29 + $0x244] ss:$120 sps:$4 sm:$0xff]  }
 0x494   : > { %10508 = vmatprep.subr.bf16.mxu0 %v15287_v25  ;;  %v15342_v25 = vld [vmem:[%s16326_s29 + $0x240] ss:$120 sps:$4 sm:$0xff]   ;;  %v15347_v26 = vld [vmem:[%s16326_s29 + $0x122c] ss:$120 sps:$4 sm:$0xff]  }
 0x496   : > { %10550 = vmatpush1.bf16.msra.mxu1 %v15288_v29  ;;  %v15345_v29 = vld [vmem:[%s16326_s29 + $0x1228] ss:$120 sps:$4 sm:$0xff]  }
 0x497   : > { %10509 = vmatpush1.bf16.msra.mxu0 %v15285_v28  ;;  %10551 = vmatprep.subr.bf16.mxu1 %v15296_v32  ;;  %v15350_v28 = vld [vmem:[%s16326_s29 + $0x334] ss:$120 sps:$4 sm:$0xff]  }
 0x498   : > { %10510 = vmatprep.subr.bf16.mxu0 %v15293_v30  ;;  %v15348_v30 = vld [vmem:[%s16326_s29 + $0x330] ss:$120 sps:$4 sm:$0xff]   ;;  %v15353_v32 = vld [vmem:[%s16326_s29 + $0x131c] ss:$120 sps:$4 sm:$0xff]  }
 0x49a   : > { %10552 = vmatpush1.bf16.msra.mxu1 %v15294_v34  ;;  %v15351_v34 = vld [vmem:[%s16326_s29 + $0x1318] ss:$120 sps:$4 sm:$0xff]  }
 0x49b   : > { %10511 = vmatpush1.bf16.msra.mxu0 %v15291_v5  ;;  %10553 = vmatprep.subr.bf16.mxu1 %v15302_v35  ;;  %v15356_v5 = vld [vmem:[%s16326_s29 + $0x424] ss:$120 sps:$4 sm:$0xff]  }
 0x49c   : > { %10512 = vmatprep.subr.bf16.mxu0 %v15299_v6  ;;  %v15354_v6 = vld [vmem:[%s16326_s29 + $0x420] ss:$120 sps:$4 sm:$0xff]   ;;  %v15359_v35 = vld [vmem:[%s16326_s29 + $0x140c] ss:$120 sps:$4 sm:$0xff]  }
 0x49e   : > { %10554 = vmatpush1.bf16.msra.mxu1 %v15300_v37  ;;  %v15357_v37 = vld [vmem:[%s16326_s29 + $0x1408] ss:$120 sps:$4 sm:$0xff]  }
 0x49f   : > { %10513 = vmatpush1.bf16.msra.mxu0 %v15297_v36  ;;  %10555 = vmatprep.subr.bf16.mxu1 %v15308_v39  ;;  %v15362_v36 = vld [vmem:[%s16326_s29 + $0x514] ss:$120 sps:$4 sm:$0xff]  }
 0x4a0   : > { %10514 = vmatprep.subr.bf16.mxu0 %v15305_v38  ;;  %v15360_v38 = vld [vmem:[%s16326_s29 + $0x510] ss:$120 sps:$4 sm:$0xff]   ;;  %v15365_v39 = vld [vmem:[%s16326_s29 + $0x14fc] ss:$120 sps:$4 sm:$0xff]  }
 0x4a2   : > { %10556 = vmatpush1.bf16.msra.mxu1 %v15306_v41 }
 0x4a3   : > { %10515 = vmatpush1.bf16.msra.mxu0 %v15303_v40  ;;  %10557 = vmatprep.subr.bf16.mxu1 %v15314_v44  ;;  %v15368_v40 = vld [vmem:[%s16326_s29 + $0x604] ss:$120 sps:$4 sm:$0xff]  }
 0x4a4   : > { %10516 = vmatprep.subr.bf16.mxu0 %v15311_v43 }
 0x4a6   : > { %10558 = vmatpush1.bf16.msra.mxu1 %v15312_v46  ;;  %v15366_v46 = vld [vmem:[%s16326_s29 + $0x600] ss:$120 sps:$4 sm:$0xff]  }
 0x4a7   : > { %10517 = vmatpush1.bf16.msra.mxu0 %v15309_v45  ;;  %10559 = vmatprep.subr.bf16.mxu1 %v15320_v50  ;;  %v15363_v45 = vld [vmem:[%s16326_s29 + $0x14f8] ss:$120 sps:$4 sm:$0xff]   ;;  %v15371_v50 = vld [vmem:[%s16326_s29 + $0x15ec] ss:$120 sps:$4 sm:$0xff]  }
 0x4a8   : > { %10518 = vmatprep.subr.bf16.mxu0 %v15317_v49 }
 0x4aa   : > { %10560 = vmatpush1.bf16.msra.mxu1 %v15318_v52  ;;  %v15369_v52 = vld [vmem:[%s16326_s29 + $0x15e8] ss:$120 sps:$4 sm:$0xff]  }
 0x4ab   : > { %10519 = vmatpush1.bf16.msra.mxu0 %v15315_v51  ;;  %10561 = vmatprep.subr.bf16.mxu1 %v15326_v58  ;;  %v15374_v51 = vld [vmem:[%s16326_s29 + $0x6f4] ss:$120 sps:$4 sm:$0xff]  }
 0x4ac   : > { %10520 = vmatprep.subr.bf16.mxu0 %v15323_v57  ;;  %v15372_v57 = vld [vmem:[%s16326_s29 + $0x6f0] ss:$120 sps:$4 sm:$0xff]   ;;  %v15377_v58 = vld [vmem:[%s16326_s29 + $0x16dc] ss:$120 sps:$4 sm:$0xff]  }
 0x4ae   : > { %10562 = vmatpush1.bf16.msra.mxu1 %v15324_v0  ;;  %v15375_v0 = vld [vmem:[%s16326_s29 + $0x16d8] ss:$120 sps:$4 sm:$0xff]  }
 0x4af   : > { %10521 = vmatpush1.bf16.msra.mxu0 %v15321_v59  ;;  %10572 = vmatprep.subr.bf16.mxu1 %v15329_v1  ;;  %v15380_v59 = vld [vmem:[%s16326_s29 + $0x7e4] ss:$120 sps:$4 sm:$0xff]   ;;  %v15378_v1 = vld [vmem:[%s16326_s29 + $0x7e0] ss:$120 sps:$4 sm:$0xff]  }
 0x4b0   : > { %10654 = vmatprep.subr.bf16.mxu0 %v15332_v2  ;;  %v15383_v2 = vld [vmem:[%s16326_s29 + $0x17cc] ss:$120 sps:$4 sm:$0xff]  }
 0x4b1   : > { %10564 = vmatmul.mubr.bf16.vlgmr.msra.gmra.mrb[24].mxu1 %v16427_v13 }
 0x4b2   : > { %10523 = vmatmul.mubr.bf16.vlgmr.msra.gmra.mrb[20].mxu0 %v16406_v63  ;;  %10573 = vmatpush1.bf16.msra.mxu1 %v15327_v4  ;;  %v15386_v4 = vld [vmem:[%s16326_s29 + $0x8d4] ss:$120 sps:$4 sm:$0xff]  }
 0x4b3   : > { %10655 = vmatpush1.bf16.msra.mxu0 %v15330_v7  ;;  %10574 = vmatprep.subr.bf16.mxu1 %v15335_v8  ;;  %v15381_v7 = vld [vmem:[%s16326_s29 + $0x17c8] ss:$120 sps:$4 sm:$0xff]  }
 0x4b4   : > { %10656 = vmatprep.subr.bf16.mxu0 %v15338_v10  ;;  %10604 = vmatprep.mubr.bf16.mxu1 %v16413_v3  ;;  %v15384_v8 = vld [vmem:[%s16326_s29 + $0x8d0] ss:$120 sps:$4 sm:$0xff]   ;;  %v15389_v10 = vld [vmem:[%s16326_s29 + $0x18bc] ss:$120 sps:$4 sm:$0xff]  }
 0x4b5   : > { %10686 = vmatprep.mubr.bf16.mxu0 %v16403_v62 }
 0x4b6   : > { %10575 = vmatpush1.bf16.msra.mxu1 %v15333_v11  ;;  %v15392_v11 = vld [vmem:[%s16326_s29 + $0x9c4] ss:$120 sps:$4 sm:$0xff]  }
 0x4b7   : > { %10657 = vmatpush1.bf16.msra.mxu0 %v15336_v14  ;;  %10576 = vmatprep.subr.bf16.mxu1 %v15341_v18  ;;  %v15387_v14 = vld [vmem:[%s16326_s29 + $0x18b8] ss:$120 sps:$4 sm:$0xff]  }
 0x4b8   : > { %10658 = vmatprep.subr.bf16.mxu0 %v15344_v21  ;;  %v15390_v18 = vld [vmem:[%s16326_s29 + $0x9c0] ss:$120 sps:$4 sm:$0xff]   ;;  %v15395_v21 = vld [vmem:[%s16326_s29 + $0x19ac] ss:$120 sps:$4 sm:$0xff]  }
 0x4ba   : > { %10577 = vmatpush1.bf16.msra.mxu1 %v15339_v22  ;;  %v15398_v22 = vld [vmem:[%s16326_s29 + $0xab4] ss:$120 sps:$4 sm:$0xff]  }
 0x4bb   : > { %10659 = vmatpush1.bf16.msra.mxu0 %v15342_v25  ;;  %10578 = vmatprep.subr.bf16.mxu1 %v15347_v26  ;;  %v15393_v25 = vld [vmem:[%s16326_s29 + $0x19a8] ss:$120 sps:$4 sm:$0xff]  }
 0x4bc   : > { %10660 = vmatprep.subr.bf16.mxu0 %v15350_v28  ;;  %v15396_v26 = vld [vmem:[%s16326_s29 + $0xab0] ss:$120 sps:$4 sm:$0xff]   ;;  %v15401_v28 = vld [vmem:[%s16326_s29 + $0x1a9c] ss:$120 sps:$4 sm:$0xff]  }
 0x4be   : > { %10579 = vmatpush1.bf16.msra.mxu1 %v15345_v29  ;;  %v15404_v29 = vld [vmem:[%s16326_s29 + $0xba4] ss:$120 sps:$4 sm:$0xff]  }
 0x4bf   : > { %10661 = vmatpush1.bf16.msra.mxu0 %v15348_v30  ;;  %10580 = vmatprep.subr.bf16.mxu1 %v15353_v32  ;;  %v15399_v30 = vld [vmem:[%s16326_s29 + $0x1a98] ss:$120 sps:$4 sm:$0xff]  }
 0x4c0   : > { %10662 = vmatprep.subr.bf16.mxu0 %v15356_v5  ;;  %v15402_v32 = vld [vmem:[%s16326_s29 + $0xba0] ss:$120 sps:$4 sm:$0xff]   ;;  %v15407_v5 = vld [vmem:[%s16326_s29 + $0x1b8c] ss:$120 sps:$4 sm:$0xff]  }
 0x4c2   : > { %10581 = vmatpush1.bf16.msra.mxu1 %v15351_v34  ;;  %v15410_v34 = vld [vmem:[%s16326_s29 + $0xc94] ss:$120 sps:$4 sm:$0xff]  }
 0x4c3   : > { %10663 = vmatpush1.bf16.msra.mxu0 %v15354_v6  ;;  %10582 = vmatprep.subr.bf16.mxu1 %v15359_v35  ;;  %v15405_v6 = vld [vmem:[%s16326_s29 + $0x1b88] ss:$120 sps:$4 sm:$0xff]  }
 0x4c4   : > { %10664 = vmatprep.subr.bf16.mxu0 %v15362_v36  ;;  %v15408_v35 = vld [vmem:[%s16326_s29 + $0xc90] ss:$120 sps:$4 sm:$0xff]   ;;  %v15413_v36 = vld [vmem:[%s16326_s29 + $0x1c7c] ss:$120 sps:$4 sm:$0xff]  }
 0x4c5   : > { %v17602_v41 = vpop.f32.mrb[16].mxu0 }
 0x4c6   : > { %v17604_v43 = vpop.f32.mrb[17].mxu0  ;;  %10583 = vmatpush1.bf16.msra.mxu1 %v15357_v37  ;;  %v15416_v37 = vld [vmem:[%s16326_s29 + $0xd84] ss:$120 sps:$4 sm:$0xff]  }
 0x4c7   : > { %v10282_v44 = vpop.f32.mrb[18].mxu0  ;;  %10665 = vmatpush1.bf16.msra.mxu0 %v15360_v38  ;;  %10584 = vmatprep.subr.bf16.mxu1 %v15365_v39  ;;  %v15411_v38 = vld [vmem:[%s16326_s29 + $0x1c78] ss:$120 sps:$4 sm:$0xff]  }
 0x4c8   : > { %v10283_v49 = vpop.f32.mrb[19].mxu0  ;;  %10666 = vmatprep.subr.bf16.mxu0 %v15368_v40  ;;  %v15414_v39 = vld [vmem:[%s16326_s29 + $0xd80] ss:$120 sps:$4 sm:$0xff]   ;;  %v15419_v40 = vld [vmem:[%s16326_s29 + $0x1d6c] ss:$120 sps:$4 sm:$0xff]  }
 0x4c9   : > { %v15422_v44 = vld [vmem:[%s16326_s29 + $0xe74] ss:$120 sps:$4 sm:$0xff]  }
 0x4ca   : > { %10585 = vmatpush1.bf16.msra.mxu1 %v15363_v45  ;;  %v15417_v45 = vld [vmem:[%s16326_s29 + $0x1d68] ss:$120 sps:$4 sm:$0xff]   ;;  %v15425_v49 = vld [vmem:[%s16326_s29 + $0x1e5c] ss:$120 sps:$4 sm:$0xff]  }
 0x4cb   : > { %10667 = vmatpush1.bf16.msra.mxu0 %v15366_v46  ;;  %10586 = vmatprep.subr.bf16.mxu1 %v15371_v50  ;;  %v15420_v46 = vld [vmem:[%s16326_s29 + $0xe70] ss:$120 sps:$4 sm:$0xff]   ;;  %v15428_v50 = vld [vmem:[%s16326_s29 + $0xf64] ss:$120 sps:$4 sm:$0xff]  }
 0x4cc   : > { %10668 = vmatprep.subr.bf16.mxu0 %v15374_v51  ;;  %v15423_v51 = vld [vmem:[%s16326_s29 + $0x1e58] ss:$120 sps:$4 sm:$0xff]  }
 0x4ce   : > { %10587 = vmatpush1.bf16.msra.mxu1 %v15369_v52  ;;  %v15426_v52 = vld [vmem:[%s16326_s29 + $0xf60] ss:$120 sps:$4 sm:$0xff]  }
 0x4cf   : > { %10669 = vmatpush1.bf16.msra.mxu0 %v15372_v57  ;;  %10588 = vmatprep.subr.bf16.mxu1 %v15377_v58  ;;  %v15431_v57 = vld [vmem:[%s16326_s29 + $0x1f4c] ss:$120 sps:$4 sm:$0xff]  }
 0x4d0   : > { %10670 = vmatprep.subr.bf16.mxu0 %v15380_v59  ;;  %v15434_v58 = vld [vmem:[%s16326_s29 + $0x1054] ss:$120 sps:$4 sm:$0xff]   ;;  %v15429_v59 = vld [vmem:[%s16326_s29 + $0x1f48] ss:$120 sps:$4 sm:$0xff]  }
 0x4d2   : > { %10589 = vmatpush1.bf16.msra.mxu1 %v15375_v0  ;;  %v15432_v0 = vld [vmem:[%s16326_s29 + $0x1050] ss:$120 sps:$4 sm:$0xff]  }
 0x4d3   : > { %10671 = vmatpush1.bf16.msra.mxu0 %v15378_v1  ;;  %10590 = vmatprep.subr.bf16.mxu1 %v15383_v2  ;;  %v15437_v1 = vld [vmem:[%s16326_s29 + $0x203c] ss:$120 sps:$4 sm:$0xff]  }
 0x4d4   : > { %10672 = vmatprep.subr.bf16.mxu0 %v15386_v4  ;;  %v15440_v2 = vld [vmem:[%s16326_s29 + $0x1144] ss:$120 sps:$4 sm:$0xff]   ;;  %v15435_v4 = vld [vmem:[%s16326_s29 + $0x2038] ss:$120 sps:$4 sm:$0xff]  }
 0x4d6   : > { %10591 = vmatpush1.bf16.msra.mxu1 %v15381_v7  ;;  %v15438_v7 = vld [vmem:[%s16326_s29 + $0x1140] ss:$120 sps:$4 sm:$0xff]  }
 0x4d7   : > { %10673 = vmatpush1.bf16.msra.mxu0 %v15384_v8  ;;  %10592 = vmatprep.subr.bf16.mxu1 %v15389_v10  ;;  %v15443_v8 = vld [vmem:[%s16326_s29 + $0x212c] ss:$120 sps:$4 sm:$0xff]  }
 0x4d8   : > { %10674 = vmatprep.subr.bf16.mxu0 %v15392_v11  ;;  %v15446_v10 = vld [vmem:[%s16326_s29 + $0x1234] ss:$120 sps:$4 sm:$0xff]   ;;  %v15441_v11 = vld [vmem:[%s16326_s29 + $0x2128] ss:$120 sps:$4 sm:$0xff]  }
 0x4da   : > { %10593 = vmatpush1.bf16.msra.mxu1 %v15387_v14  ;;  %v15444_v14 = vld [vmem:[%s16326_s29 + $0x1230] ss:$120 sps:$4 sm:$0xff]  }
 0x4db   : > { %10675 = vmatpush1.bf16.msra.mxu0 %v15390_v18  ;;  %10594 = vmatprep.subr.bf16.mxu1 %v15395_v21  ;;  %v15449_v18 = vld [vmem:[%s16326_s29 + $0x221c] ss:$120 sps:$4 sm:$0xff]  }
 0x4dc   : > { %10676 = vmatprep.subr.bf16.mxu0 %v15398_v22  ;;  %v15452_v21 = vld [vmem:[%s16326_s29 + $0x1324] ss:$120 sps:$4 sm:$0xff]   ;;  %v15447_v22 = vld [vmem:[%s16326_s29 + $0x2218] ss:$120 sps:$4 sm:$0xff]  }
 0x4de   : > { %10595 = vmatpush1.bf16.msra.mxu1 %v15393_v25  ;;  %v15450_v25 = vld [vmem:[%s16326_s29 + $0x1320] ss:$120 sps:$4 sm:$0xff]  }
 0x4df   : > { %10677 = vmatpush1.bf16.msra.mxu0 %v15396_v26  ;;  %10596 = vmatprep.subr.bf16.mxu1 %v15401_v28  ;;  %v15455_v26 = vld [vmem:[%s16326_s29 + $0x230c] ss:$120 sps:$4 sm:$0xff]  }
 0x4e0   : > { %10678 = vmatprep.subr.bf16.mxu0 %v15404_v29  ;;  %v15458_v28 = vld [vmem:[%s16326_s29 + $0x1414] ss:$120 sps:$4 sm:$0xff]   ;;  %v15453_v29 = vld [vmem:[%s16326_s29 + $0x2308] ss:$120 sps:$4 sm:$0xff]  }
 0x4e2   : > { %10597 = vmatpush1.bf16.msra.mxu1 %v15399_v30  ;;  %v15456_v30 = vld [vmem:[%s16326_s29 + $0x1410] ss:$120 sps:$4 sm:$0xff]  }
 0x4e3   : > { %10679 = vmatpush1.bf16.msra.mxu0 %v15402_v32  ;;  %10598 = vmatprep.subr.bf16.mxu1 %v15407_v5  ;;  %v15461_v32 = vld [vmem:[%s16326_s29 + $0x23fc] ss:$120 sps:$4 sm:$0xff]  }
 0x4e4   : > { %10680 = vmatprep.subr.bf16.mxu0 %v15410_v34  ;;  %v15464_v5 = vld [vmem:[%s16326_s29 + $0x1504] ss:$120 sps:$4 sm:$0xff]   ;;  %v15459_v34 = vld [vmem:[%s16326_s29 + $0x23f8] ss:$120 sps:$4 sm:$0xff]  }
 0x4e6   : > { %10599 = vmatpush1.bf16.msra.mxu1 %v15405_v6  ;;  %v15462_v6 = vld [vmem:[%s16326_s29 + $0x1500] ss:$120 sps:$4 sm:$0xff]  }
 0x4e7   : > { %10681 = vmatpush1.bf16.msra.mxu0 %v15408_v35  ;;  %10600 = vmatprep.subr.bf16.mxu1 %v15413_v36  ;;  %v15467_v35 = vld [vmem:[%s16326_s29 + $0x24ec] ss:$120 sps:$4 sm:$0xff]  }
 0x4e8   : > { %10682 = vmatprep.subr.bf16.mxu0 %v15416_v37  ;;  %v15470_v36 = vld [vmem:[%s16326_s29 + $0x15f4] ss:$120 sps:$4 sm:$0xff]   ;;  %v15465_v37 = vld [vmem:[%s16326_s29 + $0x24e8] ss:$120 sps:$4 sm:$0xff]  }
 0x4ea   : > { %10601 = vmatpush1.bf16.msra.mxu1 %v15411_v38  ;;  %v15468_v38 = vld [vmem:[%s16326_s29 + $0x15f0] ss:$120 sps:$4 sm:$0xff]  }
 0x4eb   : > { %10683 = vmatpush1.bf16.msra.mxu0 %v15414_v39  ;;  %10602 = vmatprep.subr.bf16.mxu1 %v15419_v40  ;;  %v15473_v39 = vld [vmem:[%s16326_s29 + $0x25dc] ss:$120 sps:$4 sm:$0xff]  }
 0x4ec   : > { %10684 = vmatprep.subr.bf16.mxu0 %v15422_v44  ;;  %v15476_v40 = vld [vmem:[%s16326_s29 + $0x16e4] ss:$120 sps:$4 sm:$0xff]   ;;  %v15471_v44 = vld [vmem:[%s16326_s29 + $0x25d8] ss:$120 sps:$4 sm:$0xff]  }
 0x4ee   : > { %10603 = vmatpush1.bf16.msra.mxu1 %v15417_v45  ;;  %v15474_v45 = vld [vmem:[%s16326_s29 + $0x16e0] ss:$120 sps:$4 sm:$0xff]  }
 0x4ef   : > { %10685 = vmatpush1.bf16.msra.mxu0 %v15420_v46  ;;  %10613 = vmatprep.subr.bf16.mxu1 %v15425_v49  ;;  %v15479_v46 = vld [vmem:[%s16326_s29 + $0x26cc] ss:$120 sps:$4 sm:$0xff]  }
 0x4f0   : > { %10695 = vmatprep.subr.bf16.mxu0 %v15428_v50  ;;  %v15482_v49 = vld [vmem:[%s16326_s29 + $0x17d4] ss:$120 sps:$4 sm:$0xff]   ;;  %v15477_v50 = vld [vmem:[%s16326_s29 + $0x26c8] ss:$120 sps:$4 sm:$0xff]  }
 0x4f1   : > { %10605 = vmatmul.mubr.bf16.vlgmr.msra.gmra.mrb[24].mxu1 %v16435_v19 }
 0x4f2   : > { %10687 = vmatmul.mubr.bf16.vlgmr.msra.gmra.mrb[24].mxu0 %v16427_v13  ;;  %10614 = vmatpush1.bf16.msra.mxu1 %v15423_v51  ;;  %v15480_v51 = vld [vmem:[%s16326_s29 + $0x17d0] ss:$120 sps:$4 sm:$0xff]  }
 0x4f3   : > { %10696 = vmatpush1.bf16.msra.mxu0 %v15426_v52  ;;  %10615 = vmatprep.subr.bf16.mxu1 %v15431_v57  ;;  %v15485_v52 = vld [vmem:[%s16326_s29 + $0x27bc] ss:$120 sps:$4 sm:$0xff]  }
 0x4f4   : > { %10697 = vmatprep.subr.bf16.mxu0 %v15434_v58  ;;  %10645 = vmatprep.mubr.bf16.mxu1 %v16441_v23  ;;  %v15488_v57 = vld [vmem:[%s16326_s29 + $0x18c4] ss:$120 sps:$4 sm:$0xff]   ;;  %v15483_v58 = vld [vmem:[%s16326_s29 + $0x27b8] ss:$120 sps:$4 sm:$0xff]  }
 0x4f5   : > { %10727 = vmatprep.mubr.bf16.mxu0 %v16413_v3 }
 0x4f6   : > { %10616 = vmatpush1.bf16.msra.mxu1 %v15429_v59  ;;  %v15486_v59 = vld [vmem:[%s16326_s29 + $0x18c0] ss:$120 sps:$4 sm:$0xff]  }
 0x4f7   : > { %10698 = vmatpush1.bf16.msra.mxu0 %v15432_v0  ;;  %10617 = vmatprep.subr.bf16.mxu1 %v15437_v1  ;;  %v15491_v0 = vld [vmem:[%s16326_s29 + $0x28ac] ss:$120 sps:$4 sm:$0xff]  }
 0x4f8   : > { %10699 = vmatprep.subr.bf16.mxu0 %v15440_v2  ;;  %v15494_v1 = vld [vmem:[%s16326_s29 + $0x19b4] ss:$120 sps:$4 sm:$0xff]   ;;  %v15489_v2 = vld [vmem:[%s16326_s29 + $0x28a8] ss:$120 sps:$4 sm:$0xff]  }
 0x4fa   : > { %10618 = vmatpush1.bf16.msra.mxu1 %v15435_v4  ;;  %v15492_v4 = vld [vmem:[%s16326_s29 + $0x19b0] ss:$120 sps:$4 sm:$0xff]  }
 0x4fb   : > { %10700 = vmatpush1.bf16.msra.mxu0 %v15438_v7  ;;  %10619 = vmatprep.subr.bf16.mxu1 %v15443_v8  ;;  %v15497_v7 = vld [vmem:[%s16326_s29 + $0x299c] ss:$120 sps:$4 sm:$0xff]  }
 0x4fc   : > { %10701 = vmatprep.subr.bf16.mxu0 %v15446_v10  ;;  %v15500_v8 = vld [vmem:[%s16326_s29 + $0x1aa4] ss:$120 sps:$4 sm:$0xff]   ;;  %v15495_v10 = vld [vmem:[%s16326_s29 + $0x2998] ss:$120 sps:$4 sm:$0xff]  }
 0x4fe   : > { %10620 = vmatpush1.bf16.msra.mxu1 %v15441_v11  ;;  %v15498_v11 = vld [vmem:[%s16326_s29 + $0x1aa0] ss:$120 sps:$4 sm:$0xff]  }
 0x4ff   : > { %10702 = vmatpush1.bf16.msra.mxu0 %v15444_v14  ;;  %10621 = vmatprep.subr.bf16.mxu1 %v15449_v18  ;;  %v15503_v14 = vld [vmem:[%s16326_s29 + $0x2a8c] ss:$120 sps:$4 sm:$0xff]  }
 0x500   : > { %10703 = vmatprep.subr.bf16.mxu0 %v15452_v21  ;;  %v15506_v18 = vld [vmem:[%s16326_s29 + $0x1b94] ss:$120 sps:$4 sm:$0xff]   ;;  %v15501_v21 = vld [vmem:[%s16326_s29 + $0x2a88] ss:$120 sps:$4 sm:$0xff]  }
 0x502   : > { %10622 = vmatpush1.bf16.msra.mxu1 %v15447_v22  ;;  %v15504_v22 = vld [vmem:[%s16326_s29 + $0x1b90] ss:$120 sps:$4 sm:$0xff]  }
 0x503   : > { %10704 = vmatpush1.bf16.msra.mxu0 %v15450_v25  ;;  %10623 = vmatprep.subr.bf16.mxu1 %v15455_v26  ;;  %v15509_v25 = vld [vmem:[%s16326_s29 + $0x2b7c] ss:$120 sps:$4 sm:$0xff]  }
 0x504   : > { %10705 = vmatprep.subr.bf16.mxu0 %v15458_v28  ;;  %v15512_v26 = vld [vmem:[%s16326_s29 + $0x1c84] ss:$120 sps:$4 sm:$0xff]   ;;  %v15507_v28 = vld [vmem:[%s16326_s29 + $0x2b78] ss:$120 sps:$4 sm:$0xff]  }
 0x506   : > { %10624 = vmatpush1.bf16.msra.mxu1 %v15453_v29  ;;  %v15510_v29 = vld [vmem:[%s16326_s29 + $0x1c80] ss:$120 sps:$4 sm:$0xff]  }
 0x507   : > { %10706 = vmatpush1.bf16.msra.mxu0 %v15456_v30  ;;  %10625 = vmatprep.subr.bf16.mxu1 %v15461_v32  ;;  %v15515_v30 = vld [vmem:[%s16326_s29 + $0x2c6c] ss:$120 sps:$4 sm:$0xff]  }
 0x508   : > { %10707 = vmatprep.subr.bf16.mxu0 %v15464_v5  ;;  %v15518_v32 = vld [vmem:[%s16326_s29 + $0x1d74] ss:$120 sps:$4 sm:$0xff]   ;;  %v15513_v5 = vld [vmem:[%s16326_s29 + $0x2c68] ss:$120 sps:$4 sm:$0xff]  }
 0x50a   : > { %10626 = vmatpush1.bf16.msra.mxu1 %v15459_v34  ;;  %v15516_v34 = vld [vmem:[%s16326_s29 + $0x1d70] ss:$120 sps:$4 sm:$0xff]  }
 0x50b   : > { %10708 = vmatpush1.bf16.msra.mxu0 %v15462_v6  ;;  %10627 = vmatprep.subr.bf16.mxu1 %v15467_v35  ;;  %v15521_v6 = vld [vmem:[%s16326_s29 + $0x1e64] ss:$120 sps:$4 sm:$0xff]  }
 0x50c   : > { %10709 = vmatprep.subr.bf16.mxu0 %v15470_v36  ;;  %v15524_v35 = vld [vmem:[%s16326_s29 + $0x6c] ss:$120 sps:$4 sm:$0xff]   ;;  %v15519_v36 = vld [vmem:[%s16326_s29 + $0x1e60] ss:$120 sps:$4 sm:$0xff]  }
 0x50e   : > { %10628 = vmatpush1.bf16.msra.mxu1 %v15465_v37  ;;  %v15522_v37 = vld [vmem:[%s16326_s29 + $0x68] ss:$120 sps:$4 sm:$0xff]  }
 0x50f   : > { %10710 = vmatpush1.bf16.msra.mxu0 %v15468_v38  ;;  %10629 = vmatprep.subr.bf16.mxu1 %v15473_v39  ;;  %v15527_v38 = vld [vmem:[%s16326_s29 + $0x1f54] ss:$120 sps:$4 sm:$0xff]  }
 0x510   : > { %10711 = vmatprep.subr.bf16.mxu0 %v15476_v40  ;;  %v15530_v39 = vld [vmem:[%s16326_s29 + $0x15c] ss:$120 sps:$4 sm:$0xff]   ;;  %v15525_v40 = vld [vmem:[%s16326_s29 + $0x1f50] ss:$120 sps:$4 sm:$0xff]  }
 0x512   : > { %10630 = vmatpush1.bf16.msra.mxu1 %v15471_v44  ;;  %v15528_v44 = vld [vmem:[%s16326_s29 + $0x158] ss:$120 sps:$4 sm:$0xff]  }
 0x513   : > { %10712 = vmatpush1.bf16.msra.mxu0 %v15474_v45  ;;  %10631 = vmatprep.subr.bf16.mxu1 %v15479_v46  ;;  %v15533_v45 = vld [vmem:[%s16326_s29 + $0x2044] ss:$120 sps:$4 sm:$0xff]  }
 0x514   : > { %10713 = vmatprep.subr.bf16.mxu0 %v15482_v49  ;;  %v15536_v46 = vld [vmem:[%s16326_s29 + $0x24c] ss:$120 sps:$4 sm:$0xff]   ;;  %v15531_v49 = vld [vmem:[%s16326_s29 + $0x2040] ss:$120 sps:$4 sm:$0xff]  }
 0x516   : > { %10632 = vmatpush1.bf16.msra.mxu1 %v15477_v50  ;;  %v15534_v50 = vld [vmem:[%s16326_s29 + $0x248] ss:$120 sps:$4 sm:$0xff]  }
 0x517   : > { %10714 = vmatpush1.bf16.msra.mxu0 %v15480_v51  ;;  %10633 = vmatprep.subr.bf16.mxu1 %v15485_v52  ;;  %v15539_v51 = vld [vmem:[%s16326_s29 + $0x2134] ss:$120 sps:$4 sm:$0xff]  }
 0x518   : > { %10715 = vmatprep.subr.bf16.mxu0 %v15488_v57  ;;  %v15542_v52 = vld [vmem:[%s16326_s29 + $0x33c] ss:$120 sps:$4 sm:$0xff]   ;;  %v15537_v57 = vld [vmem:[%s16326_s29 + $0x2130] ss:$120 sps:$4 sm:$0xff]  }
 0x51a   : > { %10634 = vmatpush1.bf16.msra.mxu1 %v15483_v58  ;;  %v15540_v58 = vld [vmem:[%s16326_s29 + $0x338] ss:$120 sps:$4 sm:$0xff]  }
 0x51b   : > { %10716 = vmatpush1.bf16.msra.mxu0 %v15486_v59  ;;  %10635 = vmatprep.subr.bf16.mxu1 %v15491_v0  ;;  %v15545_v59 = vld [vmem:[%s16326_s29 + $0x2224] ss:$120 sps:$4 sm:$0xff]  }
 0x51c   : > { %10717 = vmatprep.subr.bf16.mxu0 %v15494_v1  ;;  %v15548_v0 = vld [vmem:[%s16326_s29 + $0x42c] ss:$120 sps:$4 sm:$0xff]   ;;  %v15543_v1 = vld [vmem:[%s16326_s29 + $0x2220] ss:$120 sps:$4 sm:$0xff]  }
 0x51e   : > { %10636 = vmatpush1.bf16.msra.mxu1 %v15489_v2  ;;  %v15546_v2 = vld [vmem:[%s16326_s29 + $0x428] ss:$120 sps:$4 sm:$0xff]  }
 0x51f   : > { %10718 = vmatpush1.bf16.msra.mxu0 %v15492_v4  ;;  %10637 = vmatprep.subr.bf16.mxu1 %v15497_v7  ;;  %v15551_v4 = vld [vmem:[%s16326_s29 + $0x2314] ss:$120 sps:$4 sm:$0xff]  }
 0x520   : > { %10719 = vmatprep.subr.bf16.mxu0 %v15500_v8  ;;  %v15554_v7 = vld [vmem:[%s16326_s29 + $0x51c] ss:$120 sps:$4 sm:$0xff]   ;;  %v15549_v8 = vld [vmem:[%s16326_s29 + $0x2310] ss:$120 sps:$4 sm:$0xff]  }
 0x522   : > { %10638 = vmatpush1.bf16.msra.mxu1 %v15495_v10  ;;  %v15552_v10 = vld [vmem:[%s16326_s29 + $0x518] ss:$120 sps:$4 sm:$0xff]  }
 0x523   : > { %10720 = vmatpush1.bf16.msra.mxu0 %v15498_v11  ;;  %10639 = vmatprep.subr.bf16.mxu1 %v15503_v14  ;;  %v15557_v11 = vld [vmem:[%s16326_s29 + $0x2404] ss:$120 sps:$4 sm:$0xff]  }
 0x524   : > { %10721 = vmatprep.subr.bf16.mxu0 %v15506_v18  ;;  %v15560_v14 = vld [vmem:[%s16326_s29 + $0x60c] ss:$120 sps:$4 sm:$0xff]  }
 0x526   : > { %10640 = vmatpush1.bf16.msra.mxu1 %v15501_v21 }
 0x527   : > { %10722 = vmatpush1.bf16.msra.mxu0 %v15504_v22  ;;  %10641 = vmatprep.subr.bf16.mxu1 %v15509_v25  ;;  %v15555_v25 = vld [vmem:[%s16326_s29 + $0x2400] ss:$120 sps:$4 sm:$0xff]  }
 0x528   : > { %10723 = vmatprep.subr.bf16.mxu0 %v15512_v26  ;;  %v15558_v26 = vld [vmem:[%s16326_s29 + $0x608] ss:$120 sps:$4 sm:$0xff]  }
 0x52a   : > { %10642 = vmatpush1.bf16.msra.mxu1 %v15507_v28 }
 0x52b   : > { %10724 = vmatpush1.bf16.msra.mxu0 %v15510_v29  ;;  %10643 = vmatprep.subr.bf16.mxu1 %v15515_v30  ;;  %v15563_v29 = vld [vmem:[%s16326_s29 + $0x24f4] ss:$120 sps:$4 sm:$0xff]  }
 0x52c   : > { %10725 = vmatprep.subr.bf16.mxu0 %v15518_v32  ;;  %v15566_v30 = vld [vmem:[%s16326_s29 + $0x6fc] ss:$120 sps:$4 sm:$0xff]   ;;  %v15561_v32 = vld [vmem:[%s16326_s29 + $0x24f0] ss:$120 sps:$4 sm:$0xff]  }
 0x52e   : > { %10644 = vmatpush1.bf16.msra.mxu1 %v15513_v5  ;;  %v15564_v5 = vld [vmem:[%s16326_s29 + $0x6f8] ss:$120 sps:$4 sm:$0xff]  }
 0x52f   : > { %10726 = vmatpush1.bf16.msra.mxu0 %v15516_v34  ;;  %10777 = vmatprep.subr.bf16.mxu1 %v15524_v35  ;;  %v15569_v34 = vld [vmem:[%s16326_s29 + $0x25e4] ss:$120 sps:$4 sm:$0xff]   ;;  %v15567_v35 = vld [vmem:[%s16326_s29 + $0x25e0] ss:$120 sps:$4 sm:$0xff]  }
 0x530   : > { %10736 = vmatprep.subr.bf16.mxu0 %v15521_v6  ;;  %v15572_v6 = vld [vmem:[%s16326_s29 + $0x7ec] ss:$120 sps:$4 sm:$0xff]  }
 0x531   : > { %10646 = vmatmul.mubr.bf16.vlgmr.msra.gmra.mrb[24].mxu1 %v16406_v63 }
 0x532   : > { %10728 = vmatmul.mubr.bf16.vlgmr.msra.gmra.mrb[24].mxu0 %v16435_v19  ;;  %10778 = vmatpush1.bf16.msra.mxu1 %v15522_v37  ;;  %v15575_v37 = vld [vmem:[%s16326_s29 + $0x26d4] ss:$120 sps:$4 sm:$0xff]  }
 0x533   : > { %10737 = vmatpush1.bf16.msra.mxu0 %v15519_v36  ;;  %10779 = vmatprep.subr.bf16.mxu1 %v15530_v39  ;;  %v15570_v36 = vld [vmem:[%s16326_s29 + $0x7e8] ss:$120 sps:$4 sm:$0xff]  }
 0x534   : > { %10738 = vmatprep.subr.bf16.mxu0 %v15527_v38  ;;  %10768 = vmatprep.mubr.bf16.mxu0 %v16441_v23  ;;  %v15578_v38 = vld [vmem:[%s16326_s29 + $0x8dc] ss:$120 sps:$4 sm:$0xff]   ;;  %v15573_v39 = vld [vmem:[%s16326_s29 + $0x26d0] ss:$120 sps:$4 sm:$0xff]  }
 0x535   : > { %10809 = vmatprep.mubr.bf16.mxu1 %v16403_v62 }
 0x536   : > { %10780 = vmatpush1.bf16.msra.mxu1 %v15528_v44  ;;  %v15581_v44 = vld [vmem:[%s16326_s29 + $0x27c4] ss:$120 sps:$4 sm:$0xff]  }
 0x537   : > { %10739 = vmatpush1.bf16.msra.mxu0 %v15525_v40  ;;  %10781 = vmatprep.subr.bf16.mxu1 %v15536_v46  ;;  %v15576_v40 = vld [vmem:[%s16326_s29 + $0x8d8] ss:$120 sps:$4 sm:$0xff]  }
 0x538   : > { %10740 = vmatprep.subr.bf16.mxu0 %v15533_v45  ;;  %v15584_v45 = vld [vmem:[%s16326_s29 + $0x9cc] ss:$120 sps:$4 sm:$0xff]   ;;  %v15579_v46 = vld [vmem:[%s16326_s29 + $0x27c0] ss:$120 sps:$4 sm:$0xff]  }
 0x53a   : > { %10782 = vmatpush1.bf16.msra.mxu1 %v15534_v50  ;;  %v15587_v50 = vld [vmem:[%s16326_s29 + $0x28b4] ss:$120 sps:$4 sm:$0xff]  }
 0x53b   : > { %10741 = vmatpush1.bf16.msra.mxu0 %v15531_v49  ;;  %10783 = vmatprep.subr.bf16.mxu1 %v15542_v52  ;;  %v15582_v49 = vld [vmem:[%s16326_s29 + $0x9c8] ss:$120 sps:$4 sm:$0xff]  }
 0x53c   : > { %10742 = vmatprep.subr.bf16.mxu0 %v15539_v51  ;;  %v15590_v51 = vld [vmem:[%s16326_s29 + $0xabc] ss:$120 sps:$4 sm:$0xff]   ;;  %v15585_v52 = vld [vmem:[%s16326_s29 + $0x28b0] ss:$120 sps:$4 sm:$0xff]  }
 0x53e   : > { %10784 = vmatpush1.bf16.msra.mxu1 %v15540_v58  ;;  %v15593_v58 = vld [vmem:[%s16326_s29 + $0x29a4] ss:$120 sps:$4 sm:$0xff]  }
 0x53f   : > { %10743 = vmatpush1.bf16.msra.mxu0 %v15537_v57  ;;  %10785 = vmatprep.subr.bf16.mxu1 %v15548_v0  ;;  %v15588_v57 = vld [vmem:[%s16326_s29 + $0xab8] ss:$120 sps:$4 sm:$0xff]  }
 0x540   : > { %10744 = vmatprep.subr.bf16.mxu0 %v15545_v59  ;;  %v15596_v59 = vld [vmem:[%s16326_s29 + $0xbac] ss:$120 sps:$4 sm:$0xff]   ;;  %v15591_v0 = vld [vmem:[%s16326_s29 + $0x29a0] ss:$120 sps:$4 sm:$0xff]  }
 0x542   : > { %10786 = vmatpush1.bf16.msra.mxu1 %v15546_v2  ;;  %v15599_v2 = vld [vmem:[%s16326_s29 + $0x2a94] ss:$120 sps:$4 sm:$0xff]  }
 0x543   : > { %10745 = vmatpush1.bf16.msra.mxu0 %v15543_v1  ;;  %10787 = vmatprep.subr.bf16.mxu1 %v15554_v7  ;;  %v15594_v1 = vld [vmem:[%s16326_s29 + $0xba8] ss:$120 sps:$4 sm:$0xff]  }
 0x544   : > { %10746 = vmatprep.subr.bf16.mxu0 %v15551_v4  ;;  %v17742_v18 = vpop.f32.mrb[20].mxu1  ;;  %v15602_v4 = vld [vmem:[%s16326_s29 + $0xc9c] ss:$120 sps:$4 sm:$0xff]   ;;  %v15597_v7 = vld [vmem:[%s16326_s29 + $0x2a90] ss:$120 sps:$4 sm:$0xff]  }
 0x545   : > { %v17744_v21 = vpop.f32.mrb[21].mxu1 }
 0x546   : > { %v10405_v22 = vpop.f32.mrb[22].mxu1  ;;  %10788 = vmatpush1.bf16.msra.mxu1 %v15552_v10  ;;  %v15605_v10 = vld [vmem:[%s16326_s29 + $0x2b84] ss:$120 sps:$4 sm:$0xff]  }
 0x547   : > { %10747 = vmatpush1.bf16.msra.mxu0 %v15549_v8  ;;  %v10406_v28 = vpop.f32.mrb[23].mxu1  ;;  %10789 = vmatprep.subr.bf16.mxu1 %v15560_v14  ;;  %v15600_v8 = vld [vmem:[%s16326_s29 + $0xc98] ss:$120 sps:$4 sm:$0xff]   ;;  %v15606_v22 = vld [vmem:[%s16326_s29 + $0xd88] ss:$120 sps:$4 sm:$0xff]  }
 0x548   : > { %10748 = vmatprep.subr.bf16.mxu0 %v15557_v11  ;;  %v15608_v11 = vld [vmem:[%s16326_s29 + $0xd8c] ss:$120 sps:$4 sm:$0xff]   ;;  %v15603_v14 = vld [vmem:[%s16326_s29 + $0x2b80] ss:$120 sps:$4 sm:$0xff]   ;;  %v15609_v28 = vld [vmem:[%s16326_s29 + $0x2c70] ss:$120 sps:$4 sm:$0xff]  }
 0x54a   : > { %10790 = vmatpush1.bf16.msra.mxu1 %v15558_v26  ;;  %v15614_v26 = vld [vmem:[%s16326_s29 + $0xe7c] ss:$120 sps:$4 sm:$0xff]  }
 0x54b   : > { %10749 = vmatpush1.bf16.msra.mxu0 %v15555_v25  ;;  %10791 = vmatprep.subr.bf16.mxu1 %v15566_v30  ;;  %v15611_v25 = vld [vmem:[%s16326_s29 + $0x2c74] ss:$120 sps:$4 sm:$0xff]  }
 0x54c   : > { %10750 = vmatprep.subr.bf16.mxu0 %v15563_v29  ;;  %v15612_v29 = vld [vmem:[%s16326_s29 + $0xe78] ss:$120 sps:$4 sm:$0xff]   ;;  %v15617_v30 = vld [vmem:[%s16326_s29 + $0xf6c] ss:$120 sps:$4 sm:$0xff]  }
 0x54e   : > { %10792 = vmatpush1.bf16.msra.mxu1 %v15564_v5  ;;  %v15615_v5 = vld [vmem:[%s16326_s29 + $0xf68] ss:$120 sps:$4 sm:$0xff]  }
 0x54f   : > { %10751 = vmatpush1.bf16.msra.mxu0 %v15561_v32  ;;  %10793 = vmatprep.subr.bf16.mxu1 %v15572_v6  ;;  %v15620_v32 = vld [vmem:[%s16326_s29 + $0x74] ss:$120 sps:$4 sm:$0xff]  }
 0x550   : > { %10752 = vmatprep.subr.bf16.mxu0 %v15569_v34  ;;  %v15618_v34 = vld [vmem:[%s16326_s29 + $0x70] ss:$120 sps:$4 sm:$0xff]   ;;  %v15623_v6 = vld [vmem:[%s16326_s29 + $0x105c] ss:$120 sps:$4 sm:$0xff]  }
 0x552   : > { %10794 = vmatpush1.bf16.msra.mxu1 %v15570_v36  ;;  %v15621_v36 = vld [vmem:[%s16326_s29 + $0x1058] ss:$120 sps:$4 sm:$0xff]  }
 0x553   : > { %10753 = vmatpush1.bf16.msra.mxu0 %v15567_v35  ;;  %10795 = vmatprep.subr.bf16.mxu1 %v15578_v38  ;;  %v15626_v35 = vld [vmem:[%s16326_s29 + $0x164] ss:$120 sps:$4 sm:$0xff]  }
 0x554   : > { %10754 = vmatprep.subr.bf16.mxu0 %v15575_v37  ;;  %v15624_v37 = vld [vmem:[%s16326_s29 + $0x160] ss:$120 sps:$4 sm:$0xff]   ;;  %v15629_v38 = vld [vmem:[%s16326_s29 + $0x114c] ss:$120 sps:$4 sm:$0xff]  }
 0x556   : > { %10796 = vmatpush1.bf16.msra.mxu1 %v15576_v40  ;;  %v15627_v40 = vld [vmem:[%s16326_s29 + $0x1148] ss:$120 sps:$4 sm:$0xff]  }
 0x557   : > { %10755 = vmatpush1.bf16.msra.mxu0 %v15573_v39  ;;  %10797 = vmatprep.subr.bf16.mxu1 %v15584_v45  ;;  %v15632_v39 = vld [vmem:[%s16326_s29 + $0x254] ss:$120 sps:$4 sm:$0xff]  }
 0x558   : > { %10756 = vmatprep.subr.bf16.mxu0 %v15581_v44  ;;  %v15630_v44 = vld [vmem:[%s16326_s29 + $0x250] ss:$120 sps:$4 sm:$0xff]   ;;  %v15635_v45 = vld [vmem:[%s16326_s29 + $0x123c] ss:$120 sps:$4 sm:$0xff]  }
 0x55a   : > { %10798 = vmatpush1.bf16.msra.mxu1 %v15582_v49  ;;  %v15633_v49 = vld [vmem:[%s16326_s29 + $0x1238] ss:$120 sps:$4 sm:$0xff]  }
 0x55b   : > { %10757 = vmatpush1.bf16.msra.mxu0 %v15579_v46  ;;  %10799 = vmatprep.subr.bf16.mxu1 %v15590_v51  ;;  %v15638_v46 = vld [vmem:[%s16326_s29 + $0x344] ss:$120 sps:$4 sm:$0xff]   ;;  %v15644_v51 = vld [vmem:[%s16326_s29 + $0x434] ss:$120 sps:$4 sm:$0xff]  }
 0x55c   : > { %10758 = vmatprep.subr.bf16.mxu0 %v15587_v50  ;;  %v15636_v50 = vld [vmem:[%s16326_s29 + $0x340] ss:$120 sps:$4 sm:$0xff]  }
 0x55e   : > { %10800 = vmatpush1.bf16.msra.mxu1 %v15588_v57  ;;  %v15642_v57 = vld [vmem:[%s16326_s29 + $0x430] ss:$120 sps:$4 sm:$0xff]  }
 0x55f   : > { %10759 = vmatpush1.bf16.msra.mxu0 %v15585_v52  ;;  %10801 = vmatprep.subr.bf16.mxu1 %v15596_v59  ;;  %v15639_v52 = vld [vmem:[%s16326_s29 + $0x1328] ss:$120 sps:$4 sm:$0xff]   ;;  %v15650_v59 = vld [vmem:[%s16326_s29 + $0x524] ss:$120 sps:$4 sm:$0xff]  }
 0x560   : > { %10760 = vmatprep.subr.bf16.mxu0 %v15593_v58  ;;  %v15647_v58 = vld [vmem:[%s16326_s29 + $0x141c] ss:$120 sps:$4 sm:$0xff]  }
 0x562   : > { %10802 = vmatpush1.bf16.msra.mxu1 %v15594_v1  ;;  %v15648_v1 = vld [vmem:[%s16326_s29 + $0x520] ss:$120 sps:$4 sm:$0xff]  }
 0x563   : > { %10761 = vmatpush1.bf16.msra.mxu0 %v15591_v0  ;;  %10803 = vmatprep.subr.bf16.mxu1 %v15602_v4  ;;  %v15645_v0 = vld [vmem:[%s16326_s29 + $0x1418] ss:$120 sps:$4 sm:$0xff]   ;;  %v15656_v4 = vld [vmem:[%s16326_s29 + $0x614] ss:$120 sps:$4 sm:$0xff]  }
 0x564   : > { %10762 = vmatprep.subr.bf16.mxu0 %v15599_v2  ;;  %v15653_v2 = vld [vmem:[%s16326_s29 + $0x150c] ss:$120 sps:$4 sm:$0xff]  }
 0x566   : > { %10804 = vmatpush1.bf16.msra.mxu1 %v15600_v8 }
 0x567   : > { %10763 = vmatpush1.bf16.msra.mxu0 %v15597_v7  ;;  %10805 = vmatprep.subr.bf16.mxu1 %v15608_v11  ;;  %v15651_v11 = vld [vmem:[%s16326_s29 + $0x1508] ss:$120 sps:$4 sm:$0xff]  }
 0x568   : > { %10764 = vmatprep.subr.bf16.mxu0 %v15605_v10 }
 0x56a   : > { %10806 = vmatpush1.bf16.msra.mxu1 %v15606_v22 }
 0x56b   : > { %10765 = vmatpush1.bf16.msra.mxu0 %v15603_v14  ;;  %10807 = vmatprep.subr.bf16.mxu1 %v15614_v26  ;;  %v15654_v14 = vld [vmem:[%s16326_s29 + $0x610] ss:$120 sps:$4 sm:$0xff]   ;;  %v15662_v26 = vld [vmem:[%s16326_s29 + $0x704] ss:$120 sps:$4 sm:$0xff]  }
 0x56c   : > { %10766 = vmatprep.subr.bf16.mxu0 %v15611_v25  ;;  %v15659_v25 = vld [vmem:[%s16326_s29 + $0x15fc] ss:$120 sps:$4 sm:$0xff]  }
 0x56e   : > { %10808 = vmatpush1.bf16.msra.mxu1 %v15612_v29  ;;  %v15660_v29 = vld [vmem:[%s16326_s29 + $0x700] ss:$120 sps:$4 sm:$0xff]  }
 0x56f   : > { %10767 = vmatpush1.bf16.msra.mxu0 %v15609_v28  ;;  %10818 = vmatprep.subr.bf16.mxu1 %v15617_v30  ;;  %v15657_v28 = vld [vmem:[%s16326_s29 + $0x15f8] ss:$120 sps:$4 sm:$0xff]   ;;  %v15665_v30 = vld [vmem:[%s16326_s29 + $0x16ec] ss:$120 sps:$4 sm:$0xff]  }
 0x570   : > { %10900 = vmatprep.subr.bf16.mxu0 %v15620_v32  ;;  %v15668_v32 = vld [vmem:[%s16326_s29 + $0x7f4] ss:$120 sps:$4 sm:$0xff]  }
 0x571   : > { %10810 = vmatmul.mubr.bf16.vlgmr.msra.gmra.mrb[28].mxu1 %v16427_v13 }
 0x572   : > { %10769 = vmatmul.mubr.bf16.vlgmr.msra.gmra.mrb[24].mxu0 %v16406_v63  ;;  %10819 = vmatpush1.bf16.msra.mxu1 %v15615_v5  ;;  %v15663_v5 = vld [vmem:[%s16326_s29 + $0x16e8] ss:$120 sps:$4 sm:$0xff]  }
 0x573   : > { %10901 = vmatpush1.bf16.msra.mxu0 %v15618_v34  ;;  %10820 = vmatprep.subr.bf16.mxu1 %v15623_v6  ;;  %v15666_v34 = vld [vmem:[%s16326_s29 + $0x7f0] ss:$120 sps:$4 sm:$0xff]   ;;  %v15671_v6 = vld [vmem:[%s16326_s29 + $0x17dc] ss:$120 sps:$4 sm:$0xff]  }
 0x574   : > { %10902 = vmatprep.subr.bf16.mxu0 %v15626_v35  ;;  %10850 = vmatprep.mubr.bf16.mxu1 %v16413_v3  ;;  %v15674_v35 = vld [vmem:[%s16326_s29 + $0x8e4] ss:$120 sps:$4 sm:$0xff]  }
 0x575   : > { %10932 = vmatprep.mubr.bf16.mxu0 %v16403_v62  ;;  %v15641_v62 = vld [vmem:[%s16326_s29 + $0x132c] ss:$120 sps:$4 sm:$0xff]  }
 0x576   : > { %10821 = vmatpush1.bf16.msra.mxu1 %v15621_v36  ;;  %v15669_v36 = vld [vmem:[%s16326_s29 + $0x17d8] ss:$120 sps:$4 sm:$0xff]  }
 0x577   : > { %10903 = vmatpush1.bf16.msra.mxu0 %v15624_v37  ;;  %10822 = vmatprep.subr.bf16.mxu1 %v15629_v38  ;;  %v15672_v37 = vld [vmem:[%s16326_s29 + $0x8e0] ss:$120 sps:$4 sm:$0xff]   ;;  %v15677_v38 = vld [vmem:[%s16326_s29 + $0x18cc] ss:$120 sps:$4 sm:$0xff]  }
 0x578   : > { %10904 = vmatprep.subr.bf16.mxu0 %v15632_v39  ;;  %v15680_v39 = vld [vmem:[%s16326_s29 + $0x9d4] ss:$120 sps:$4 sm:$0xff]  }
 0x57a   : > { %10823 = vmatpush1.bf16.msra.mxu1 %v15627_v40  ;;  %v15675_v40 = vld [vmem:[%s16326_s29 + $0x18c8] ss:$120 sps:$4 sm:$0xff]  }
 0x57b   : > { %10905 = vmatpush1.bf16.msra.mxu0 %v15630_v44  ;;  %10824 = vmatprep.subr.bf16.mxu1 %v15635_v45  ;;  %v15678_v44 = vld [vmem:[%s16326_s29 + $0x9d0] ss:$120 sps:$4 sm:$0xff]   ;;  %v15683_v45 = vld [vmem:[%s16326_s29 + $0x19bc] ss:$120 sps:$4 sm:$0xff]  }
 0x57c   : > { %10906 = vmatprep.subr.bf16.mxu0 %v15638_v46  ;;  %v15686_v46 = vld [vmem:[%s16326_s29 + $0xac4] ss:$120 sps:$4 sm:$0xff]  }
 0x57e   : > { %10825 = vmatpush1.bf16.msra.mxu1 %v15633_v49  ;;  %v15681_v49 = vld [vmem:[%s16326_s29 + $0x19b8] ss:$120 sps:$4 sm:$0xff]  }
 0x57f   : > { %10907 = vmatpush1.bf16.msra.mxu0 %v15636_v50  ;;  %10826 = vmatprep.subr.bf16.mxu1 %v15641_v62  ;;  %v15684_v50 = vld [vmem:[%s16326_s29 + $0xac0] ss:$120 sps:$4 sm:$0xff]   ;;  %v15689_v62 = vld [vmem:[%s16326_s29 + $0x1aac] ss:$120 sps:$4 sm:$0xff]  }
 0x580   : > { %10908 = vmatprep.subr.bf16.mxu0 %v15644_v51  ;;  %v15692_v51 = vld [vmem:[%s16326_s29 + $0xbb4] ss:$120 sps:$4 sm:$0xff]  }
 0x582   : > { %10827 = vmatpush1.bf16.msra.mxu1 %v15639_v52  ;;  %v15687_v52 = vld [vmem:[%s16326_s29 + $0x1aa8] ss:$120 sps:$4 sm:$0xff]  }
 0x583   : > { %10909 = vmatpush1.bf16.msra.mxu0 %v15642_v57  ;;  %10828 = vmatprep.subr.bf16.mxu1 %v15647_v58  ;;  %v15690_v57 = vld [vmem:[%s16326_s29 + $0xbb0] ss:$120 sps:$4 sm:$0xff]   ;;  %v15695_v58 = vld [vmem:[%s16326_s29 + $0x1b9c] ss:$120 sps:$4 sm:$0xff]  }
 0x584   : > { %10910 = vmatprep.subr.bf16.mxu0 %v15650_v59  ;;  %v15698_v59 = vld [vmem:[%s16326_s29 + $0xca4] ss:$120 sps:$4 sm:$0xff]  }
 0x585   : > { %v17817_v7 = vpop.f32.mrb[20].mxu0 }
 0x586   : > { %v17819_v8 = vpop.f32.mrb[21].mxu0  ;;  %10829 = vmatpush1.bf16.msra.mxu1 %v15645_v0  ;;  %v15693_v0 = vld [vmem:[%s16326_s29 + $0x1b98] ss:$120 sps:$4 sm:$0xff]  }
 0x587   : > { %v10528_v10 = vpop.f32.mrb[22].mxu0  ;;  %10911 = vmatpush1.bf16.msra.mxu0 %v15648_v1  ;;  %10830 = vmatprep.subr.bf16.mxu1 %v15653_v2  ;;  %v15696_v1 = vld [vmem:[%s16326_s29 + $0xca0] ss:$120 sps:$4 sm:$0xff]   ;;  %v15701_v2 = vld [vmem:[%s16326_s29 + $0x1c8c] ss:$120 sps:$4 sm:$0xff]  }
 0x588   : > { %v10529_v22 = vpop.f32.mrb[23].mxu0  ;;  %10912 = vmatprep.subr.bf16.mxu0 %v15656_v4  ;;  %v15704_v4 = vld [vmem:[%s16326_s29 + $0xd94] ss:$120 sps:$4 sm:$0xff]   ;;  %v15699_v10 = vld [vmem:[%s16326_s29 + $0x1c88] ss:$120 sps:$4 sm:$0xff]  }
 0x589   : > { %v15710_v22 = vld [vmem:[%s16326_s29 + $0xe84] ss:$120 sps:$4 sm:$0xff]  }
 0x58a   : > { %10831 = vmatpush1.bf16.msra.mxu1 %v15651_v11  ;;  %v15702_v11 = vld [vmem:[%s16326_s29 + $0xd90] ss:$120 sps:$4 sm:$0xff]  }
 0x58b   : > { %10913 = vmatpush1.bf16.msra.mxu0 %v15654_v14  ;;  %10832 = vmatprep.subr.bf16.mxu1 %v15659_v25  ;;  %v15707_v14 = vld [vmem:[%s16326_s29 + $0x1d7c] ss:$120 sps:$4 sm:$0xff]   ;;  %v15705_v25 = vld [vmem:[%s16326_s29 + $0x1d78] ss:$120 sps:$4 sm:$0xff]  }
 0x58c   : > { %10914 = vmatprep.subr.bf16.mxu0 %v15662_v26  ;;  %v15708_v26 = vld [vmem:[%s16326_s29 + $0xe80] ss:$120 sps:$4 sm:$0xff]  }
 0x58e   : > { %10833 = vmatpush1.bf16.msra.mxu1 %v15657_v28  ;;  %v15713_v28 = vld [vmem:[%s16326_s29 + $0x1e6c] ss:$120 sps:$4 sm:$0xff]  }
 0x58f   : > { %10915 = vmatpush1.bf16.msra.mxu0 %v15660_v29  ;;  %10834 = vmatprep.subr.bf16.mxu1 %v15665_v30  ;;  %v15716_v29 = vld [vmem:[%s16326_s29 + $0xf74] ss:$120 sps:$4 sm:$0xff]   ;;  %v15711_v30 = vld [vmem:[%s16326_s29 + $0x1e68] ss:$120 sps:$4 sm:$0xff]  }
 0x590   : > { %10916 = vmatprep.subr.bf16.mxu0 %v15668_v32  ;;  %v15714_v32 = vld [vmem:[%s16326_s29 + $0xf70] ss:$120 sps:$4 sm:$0xff]  }
 0x592   : > { %10835 = vmatpush1.bf16.msra.mxu1 %v15663_v5  ;;  %v15719_v5 = vld [vmem:[%s16326_s29 + $0x1f5c] ss:$120 sps:$4 sm:$0xff]  }
 0x593   : > { %10917 = vmatpush1.bf16.msra.mxu0 %v15666_v34  ;;  %10836 = vmatprep.subr.bf16.mxu1 %v15671_v6  ;;  %v15722_v34 = vld [vmem:[%s16326_s29 + $0x1064] ss:$120 sps:$4 sm:$0xff]   ;;  %v15717_v6 = vld [vmem:[%s16326_s29 + $0x1f58] ss:$120 sps:$4 sm:$0xff]  }
 0x594   : > { %10918 = vmatprep.subr.bf16.mxu0 %v15674_v35  ;;  %v15720_v35 = vld [vmem:[%s16326_s29 + $0x1060] ss:$120 sps:$4 sm:$0xff]  }
 0x596   : > { %10837 = vmatpush1.bf16.msra.mxu1 %v15669_v36  ;;  %v15725_v36 = vld [vmem:[%s16326_s29 + $0x204c] ss:$120 sps:$4 sm:$0xff]  }
 0x597   : > { %10919 = vmatpush1.bf16.msra.mxu0 %v15672_v37  ;;  %10838 = vmatprep.subr.bf16.mxu1 %v15677_v38  ;;  %v15728_v37 = vld [vmem:[%s16326_s29 + $0x1154] ss:$120 sps:$4 sm:$0xff]   ;;  %v15726_v38 = vld [vmem:[%s16326_s29 + $0x1150] ss:$120 sps:$4 sm:$0xff]  }
 0x598   : > { %10920 = vmatprep.subr.bf16.mxu0 %v15680_v39  ;;  %v15731_v39 = vld [vmem:[%s16326_s29 + $0x213c] ss:$120 sps:$4 sm:$0xff]  }
 0x59a   : > { %10839 = vmatpush1.bf16.msra.mxu1 %v15675_v40  ;;  %v15734_v40 = vld [vmem:[%s16326_s29 + $0x1244] ss:$120 sps:$4 sm:$0xff]  }
 0x59b   : > { %10921 = vmatpush1.bf16.msra.mxu0 %v15678_v44  ;;  %10840 = vmatprep.subr.bf16.mxu1 %v15683_v45  ;;  %v15729_v44 = vld [vmem:[%s16326_s29 + $0x2138] ss:$120 sps:$4 sm:$0xff]  }
 0x59c   : > { %10922 = vmatprep.subr.bf16.mxu0 %v15686_v46  ;;  %v15732_v45 = vld [vmem:[%s16326_s29 + $0x1240] ss:$120 sps:$4 sm:$0xff]   ;;  %v15740_v46 = vld [vmem:[%s16326_s29 + $0x1334] ss:$120 sps:$4 sm:$0xff]  }
 0x59e   : > { %10841 = vmatpush1.bf16.msra.mxu1 %v15681_v49  ;;  %v15735_v49 = vld [vmem:[%s16326_s29 + $0x2228] ss:$120 sps:$4 sm:$0xff]  }
 0x59f   : > { %10923 = vmatpush1.bf16.msra.mxu0 %v15684_v50  ;;  %10842 = vmatprep.subr.bf16.mxu1 %v15689_v62  ;;  %v15738_v50 = vld [vmem:[%s16326_s29 + $0x1330] ss:$120 sps:$4 sm:$0xff]   ;;  %v15743_v62 = vld [vmem:[%s16326_s29 + $0x231c] ss:$120 sps:$4 sm:$0xff]  }
 0x5a0   : > { %10924 = vmatprep.subr.bf16.mxu0 %v15692_v51  ;;  %v15746_v51 = vld [vmem:[%s16326_s29 + $0x1424] ss:$120 sps:$4 sm:$0xff]  }
 0x5a2   : > { %10843 = vmatpush1.bf16.msra.mxu1 %v15687_v52  ;;  %v15741_v52 = vld [vmem:[%s16326_s29 + $0x2318] ss:$120 sps:$4 sm:$0xff]  }
 0x5a3   : > { %10925 = vmatpush1.bf16.msra.mxu0 %v15690_v57  ;;  %10844 = vmatprep.subr.bf16.mxu1 %v15695_v58  ;;  %v15744_v57 = vld [vmem:[%s16326_s29 + $0x1420] ss:$120 sps:$4 sm:$0xff]   ;;  %v15749_v58 = vld [vmem:[%s16326_s29 + $0x240c] ss:$120 sps:$4 sm:$0xff]  }
 0x5a4   : > { %10926 = vmatprep.subr.bf16.mxu0 %v15698_v59  ;;  %v15752_v59 = vld [vmem:[%s16326_s29 + $0x1514] ss:$120 sps:$4 sm:$0xff]  }
 0x5a6   : > { %10845 = vmatpush1.bf16.msra.mxu1 %v15693_v0  ;;  %v15747_v0 = vld [vmem:[%s16326_s29 + $0x2408] ss:$120 sps:$4 sm:$0xff]  }
 0x5a7   : > { %10927 = vmatpush1.bf16.msra.mxu0 %v15696_v1  ;;  %10846 = vmatprep.subr.bf16.mxu1 %v15701_v2  ;;  %v15750_v1 = vld [vmem:[%s16326_s29 + $0x1510] ss:$120 sps:$4 sm:$0xff]   ;;  %v15755_v2 = vld [vmem:[%s16326_s29 + $0x24fc] ss:$120 sps:$4 sm:$0xff]  }
 0x5a8   : > { %10928 = vmatprep.subr.bf16.mxu0 %v15704_v4  ;;  %v15758_v4 = vld [vmem:[%s16326_s29 + $0x1604] ss:$120 sps:$4 sm:$0xff]  }
 0x5aa   : > { %10847 = vmatpush1.bf16.msra.mxu1 %v15699_v10  ;;  %v15753_v10 = vld [vmem:[%s16326_s29 + $0x24f8] ss:$120 sps:$4 sm:$0xff]  }
 0x5ab   : > { %10929 = vmatpush1.bf16.msra.mxu0 %v15702_v11  ;;  %10848 = vmatprep.subr.bf16.mxu1 %v15707_v14  ;;  %v15756_v11 = vld [vmem:[%s16326_s29 + $0x1600] ss:$120 sps:$4 sm:$0xff]   ;;  %v15761_v14 = vld [vmem:[%s16326_s29 + $0x25ec] ss:$120 sps:$4 sm:$0xff]  }
 0x5ac   : > { %10930 = vmatprep.subr.bf16.mxu0 %v15710_v22  ;;  %v15764_v22 = vld [vmem:[%s16326_s29 + $0x16f4] ss:$120 sps:$4 sm:$0xff]  }
 0x5ae   : > { %10849 = vmatpush1.bf16.msra.mxu1 %v15705_v25  ;;  %v15759_v25 = vld [vmem:[%s16326_s29 + $0x25e8] ss:$120 sps:$4 sm:$0xff]  }
 0x5af   : > { %10931 = vmatpush1.bf16.msra.mxu0 %v15708_v26  ;;  %10859 = vmatprep.subr.bf16.mxu1 %v15713_v28  ;;  %v15762_v26 = vld [vmem:[%s16326_s29 + $0x16f0] ss:$120 sps:$4 sm:$0xff]   ;;  %v15767_v28 = vld [vmem:[%s16326_s29 + $0x26dc] ss:$120 sps:$4 sm:$0xff]  }
 0x5b0   : > { %10941 = vmatprep.subr.bf16.mxu0 %v15716_v29  ;;  %v15770_v29 = vld [vmem:[%s16326_s29 + $0x17e4] ss:$120 sps:$4 sm:$0xff]  }
 0x5b1   : > { %10851 = vmatmul.mubr.bf16.vlgmr.msra.gmra.mrb[28].mxu1 %v16435_v19 }
 0x5b2   : > { %10933 = vmatmul.mubr.bf16.vlgmr.msra.gmra.mrb[28].mxu0 %v16427_v13  ;;  %10860 = vmatpush1.bf16.msra.mxu1 %v15711_v30  ;;  %v15723_v13 = vld [vmem:[%s16326_s29 + $0x2048] ss:$120 sps:$4 sm:$0xff]   ;;  %v15765_v30 = vld [vmem:[%s16326_s29 + $0x26d8] ss:$120 sps:$4 sm:$0xff]  }
 0x5b3   : > { %10942 = vmatpush1.bf16.msra.mxu0 %v15714_v32  ;;  %10861 = vmatprep.subr.bf16.mxu1 %v15719_v5  ;;  %v15768_v32 = vld [vmem:[%s16326_s29 + $0x17e0] ss:$120 sps:$4 sm:$0xff]   ;;  %v15773_v5 = vld [vmem:[%s16326_s29 + $0x27cc] ss:$120 sps:$4 sm:$0xff]  }
 0x5b4   : > { %10943 = vmatprep.subr.bf16.mxu0 %v15722_v34  ;;  %10891 = vmatprep.mubr.bf16.mxu1 %v16441_v23  ;;  %v15776_v34 = vld [vmem:[%s16326_s29 + $0x18d4] ss:$120 sps:$4 sm:$0xff]  }
 0x5b5   : > { %10973 = vmatprep.mubr.bf16.mxu0 %v16413_v3  ;;  %v15737_v3 = vld [vmem:[%s16326_s29 + $0x222c] ss:$120 sps:$4 sm:$0xff]  }
 0x5b6   : > { %10862 = vmatpush1.bf16.msra.mxu1 %v15717_v6  ;;  %v15771_v6 = vld [vmem:[%s16326_s29 + $0x27c8] ss:$120 sps:$4 sm:$0xff]  }
 0x5b7   : > { %10944 = vmatpush1.bf16.msra.mxu0 %v15720_v35  ;;  %10863 = vmatprep.subr.bf16.mxu1 %v15725_v36  ;;  %v15774_v35 = vld [vmem:[%s16326_s29 + $0x18d0] ss:$120 sps:$4 sm:$0xff]   ;;  %v17908_v36 = vsub.s32 7, %v16380_v42 }
 0x5b8   : > { %10945 = vmatprep.subr.bf16.mxu0 %v15728_v37  ;;  %v15779_v37 = vld [vmem:[%s16326_s29 + $0x28bc] ss:$120 sps:$4 sm:$0xff]  }
 0x5ba   : > { %10864 = vmatpush1.bf16.msra.mxu1 %v15723_v13  ;;  %v15782_v13 = vld [vmem:[%s16326_s29 + $0x19c4] ss:$120 sps:$4 sm:$0xff]  }
 0x5bb   : > { %10946 = vmatpush1.bf16.msra.mxu0 %v15726_v38  ;;  %10865 = vmatprep.subr.bf16.mxu1 %v15731_v39  ;;  %v15777_v38 = vld [vmem:[%s16326_s29 + $0x28b8] ss:$120 sps:$4 sm:$0xff]  }
 0x5bc   : > { %10947 = vmatprep.subr.bf16.mxu0 %v15734_v40  ;;  %v15780_v39 = vld [vmem:[%s16326_s29 + $0x19c0] ss:$120 sps:$4 sm:$0xff]  }
 0x5bd   : > { %v17915_v40 = vld [vmem:[%s16335_s12] sm:$0xff] }
 0x5be   : > { %10866 = vmatpush1.bf16.msra.mxu1 %v15729_v44  ;;  %v1805_v44 = vrot.slane %v17915_v40, %v17908_v36 }
 0x5bf   : > { %10948 = vmatpush1.bf16.msra.mxu0 %v15732_v45  ;;  %10867 = vmatprep.subr.bf16.mxu1 %v15737_v3  ;;  %v15785_v45 = vld [vmem:[%s16326_s29 + $0x29ac] ss:$120 sps:$4 sm:$0xff]  }
 0x5c0   : > { %10949 = vmatprep.subr.bf16.mxu0 %v15740_v46  ;;  %v15788_v3 = vld [vmem:[%s16326_s29 + $0x1ab4] ss:$120 sps:$4 sm:$0xff]   ;;  %v15783_v46 = vld [vmem:[%s16326_s29 + $0x29a8] ss:$120 sps:$4 sm:$0xff]  }
 0x5c2   : > { %10868 = vmatpush1.bf16.msra.mxu1 %v15735_v49  ;;  %v15786_v49 = vld [vmem:[%s16326_s29 + $0x1ab0] ss:$120 sps:$4 sm:$0xff]  }
 0x5c3   : > { %10950 = vmatpush1.bf16.msra.mxu0 %v15738_v50  ;;  %10869 = vmatprep.subr.bf16.mxu1 %v15743_v62  ;;  %v13479_v50 = vadd.f32 %v17108_v54, %v1805_v44  ;;  %v15791_v62 = vld [vmem:[%s16326_s29 + $0x2a9c] ss:$120 sps:$4 sm:$0xff]   ;;  %v15797_v54 = vld [vmem:[%s16326_s29 + $0x2b8c] ss:$120 sps:$4 sm:$0xff]  }
 0x5c4   : > { %10951 = vmatprep.subr.bf16.mxu0 %v15746_v51  ;;  %v15794_v51 = vld [vmem:[%s16326_s29 + $0x1ba4] ss:$120 sps:$4 sm:$0xff]  }
 0x5c5   : > { %15900 = vtanh.f32 %v13479_v50 }
 0x5c6   : > { %10870 = vmatpush1.bf16.msra.mxu1 %v15741_v52  ;;  %v15789_v52 = vld [vmem:[%s16326_s29 + $0x2a98] ss:$120 sps:$4 sm:$0xff]  }
 0x5c7   : > { %10952 = vmatpush1.bf16.msra.mxu0 %v15744_v57  ;;  %10871 = vmatprep.subr.bf16.mxu1 %v15749_v58  ;;  %v15792_v57 = vld [vmem:[%s16326_s29 + $0x1ba0] ss:$120 sps:$4 sm:$0xff]   ;;  %v17929_v58 = vsub.s32 6, %v16380_v42 }
 0x5c8   : > { %10953 = vmatprep.subr.bf16.mxu0 %v15752_v59  ;;  %v15800_v59 = vld [vmem:[%s16326_s29 + $0x1c94] ss:$120 sps:$4 sm:$0xff]  }
 0x5ca   : > { %10872 = vmatpush1.bf16.msra.mxu1 %v15747_v0  ;;  %v17934_v0 = vld [vmem:[%s16335_s12 + $0x8] sm:$0xff] }
 0x5cb   : > { %10954 = vmatpush1.bf16.msra.mxu0 %v15750_v1  ;;  %10873 = vmatprep.subr.bf16.mxu1 %v15755_v2  ;;  %v15795_v1 = vld [vmem:[%s16326_s29 + $0x2b88] ss:$120 sps:$4 sm:$0xff]  }
 0x5cc   : > { %10955 = vmatprep.subr.bf16.mxu0 %v15758_v4  ;;  %v15798_v2 = vld [vmem:[%s16326_s29 + $0x1c90] ss:$120 sps:$4 sm:$0xff]   ;;  %v1801_v4 = vrot.slane %v17915_v40, %v17929_v58 }
 0x5ce   : > { %10874 = vmatpush1.bf16.msra.mxu1 %v15753_v10  ;;  %v15803_v10 = vld [vmem:[%s16326_s29 + $0x2c7c] ss:$120 sps:$4 sm:$0xff]  }
 0x5cf   : > { %10956 = vmatpush1.bf16.msra.mxu0 %v15756_v11  ;;  %10875 = vmatprep.subr.bf16.mxu1 %v15761_v14  ;;  %v15806_v11 = vld [vmem:[%s16326_s29 + $0x1d84] ss:$120 sps:$4 sm:$0xff]   ;;  %v1813_v14 = vrot.slane %v17934_v0, %v16740_v12 }
 0x5d0   : > { %10957 = vmatprep.subr.bf16.mxu0 %v15764_v22  ;;  %v15801_v22 = vld [vmem:[%s16326_s29 + $0x2c78] ss:$120 sps:$4 sm:$0xff]  }
 0x5d2   : > { %10876 = vmatpush1.bf16.msra.mxu1 %v15759_v25  ;;  %v15804_v25 = vld [vmem:[%s16326_s29 + $0x1d80] ss:$120 sps:$4 sm:$0xff]  }
 0x5d3   : > { %10958 = vmatpush1.bf16.msra.mxu0 %v15762_v26  ;;  %10877 = vmatprep.subr.bf16.mxu1 %v15767_v28  ;;  %v13478_v26 = vadd.f32 %v17106_v53, %v1801_v4  ;;  %v15809_v28 = vld [vmem:[%s16326_s29 + $0x1e74] ss:$120 sps:$4 sm:$0xff]   ;;  %v1809_v53 = vrot.slane %v17934_v0, %v16735_v9 }
 0x5d4   : > { %10959 = vmatprep.subr.bf16.mxu0 %v15770_v29  ;;  %v15815_v29 = vld [vmem:[%s17800_s24 + $0x1c] ss:$120 sps:$4 sm:$0x1f]  }
 0x5d5   : > { %15902 = vtanh.f32 %v13478_v26  ;;  %v15828_v26 = vld [vmem:[%s16326_s29 + $0x2320] ss:$120 sps:$4 sm:$0xff]  }
 0x5d6   : > { %10878 = vmatpush1.bf16.msra.mxu1 %v15765_v30  ;;  %v13481_v30 = vadd.f32 %v17182_v27, %v1813_v14 }
 0x5d7   : > { %10960 = vmatpush1.bf16.msra.mxu0 %v15768_v32  ;;  %10879 = vmatprep.subr.bf16.mxu1 %v15773_v5  ;;  %v15901_v32 = vpop.eup %15900  ;;  %v17951_v5 = vsub.s32 3, %v16380_v42 }
 0x5d8   : > { %10961 = vmatprep.subr.bf16.mxu0 %v15776_v34  ;;  %v15807_v34 = vld [vmem:[%s16326_s29 + $0x1e70] ss:$120 sps:$4 sm:$0xff]   ;;  %15904 = vtanh.f32 %v13481_v30 }
 0x5d9   : > { %v1821_v27 = vrot.slane %v17934_v0, %v17951_v5 }
 0x5da   : > { %10880 = vmatpush1.bf16.msra.mxu1 %v15771_v6  ;;  %v15812_v6 = vld [vmem:[%s16326_s29 + $0x1f64] ss:$120 sps:$4 sm:$0xff]  }
 0x5db   : > { %10962 = vmatpush1.bf16.msra.mxu0 %v15774_v35  ;;  %10881 = vmatprep.subr.bf16.mxu1 %v15779_v37  ;;  %v11061_v35 = vpack.c.bf16 %v15901_v32, %v15901_v32  ;;  %v15810_v37 = vld [vmem:[%s16326_s29 + $0x1f60] ss:$120 sps:$4 sm:$0xff]   ;;  %v13483_v44 = vadd.f32 %v17320_v17, %v1821_v27 }
 0x5dc   : > { %10963 = vmatprep.subr.bf16.mxu0 %v15782_v13  ;;  %v13480_v13 = vadd.f32 %v17178_v24, %v1809_v53  ;;  %v15836_v53 = vld [vmem:[%s16326_s29 + $0x2414] ss:$120 sps:$4 sm:$0xff]  }
 0x5de   : > { %10882 = vmatpush1.bf16.msra.mxu1 %v15777_v38  ;;  %v15813_v38 = vld [vmem:[%s17800_s24 + $0x18] ss:$120 sps:$4 sm:$0x1f]   ;;  %15906 = vtanh.f32 %v13480_v13 }
 0x5df   : > { %10964 = vmatpush1.bf16.msra.mxu0 %v15780_v39  ;;  %10883 = vmatprep.subr.bf16.mxu1 %v15785_v45  ;;  %v15818_v39 = vld [vmem:[%s16326_s29 + $0x2054] ss:$120 sps:$4 sm:$0xff]   ;;  %v15824_v45 = vld [vmem:[%s17800_s24 + $0x24] ss:$120 sps:$4 sm:$0x1f]   ;;  %15908 = vtanh.f32 %v13483_v44 }
 0x5e0   : > { %10965 = vmatprep.subr.bf16.mxu0 %v15788_v3  ;;  %v17969_v3 = vsub.s32 2, %v16380_v42 }
 0x5e2   : > { %10884 = vmatpush1.bf16.msra.mxu1 %v15783_v46  ;;  %v15816_v46 = vld [vmem:[%s16326_s29 + $0x2050] ss:$120 sps:$4 sm:$0xff]   ;;  %v1817_v24 = vrot.slane %v17934_v0, %v17969_v3 }
 0x5e3   : > { %10966 = vmatpush1.bf16.msra.mxu0 %v15786_v49  ;;  %10885 = vmatprep.subr.bf16.mxu1 %v15791_v62  ;;  %v15903_v49 = vpop.eup %15902  ;;  %v15819_v62 = vld [vmem:[%s16326_s29 + $0x2140] ss:$120 sps:$4 sm:$0xff]  }
 0x5e4   : > { %10967 = vmatprep.subr.bf16.mxu0 %v15794_v51  ;;  %v15905_v50 = vpop.eup %15904  ;;  %v13482_v51 = vadd.f32 %v17318_v15, %v1817_v24  ;;  %v15837_v24 = vld [vmem:[%s16326_s29 + $0x2500] ss:$120 sps:$4 sm:$0xff]  }
 0x5e5   : > { %v11063_v4 = vpack.c.bf16 %v15905_v50, %v15905_v50  ;;  %v15851_v50 = vld [vmem:[%s17800_s24 + $0x3c] ss:$120 sps:$4 sm:$0x1f]  }
 0x5e6   : > { %10886 = vmatpush1.bf16.msra.mxu1 %v15789_v52  ;;  %v15822_v52 = vld [vmem:[%s17800_s24 + $0x20] ss:$120 sps:$4 sm:$0x1f]   ;;  %15910 = vtanh.f32 %v13482_v51  ;;  %v15843_v51 = vld [vmem:[%s16326_s29 + $0x25f0] ss:$120 sps:$4 sm:$0xff]  }
 0x5e7   : > { %10968 = vmatpush1.bf16.msra.mxu0 %v15792_v57  ;;  %10887 = vmatprep.subr.bf16.mxu1 %v15797_v54  ;;  %v11060_v57 = vpack.c.bf16 %v15903_v49, %v15903_v49  ;;  %v15845_v49 = vld [vmem:[%s16326_s29 + $0x25f4] ss:$120 sps:$4 sm:$0xff]  }
 0x5e8   : > { %10969 = vmatprep.subr.bf16.mxu0 %v15800_v59  ;;  %v15827_v59 = vld [vmem:[%s16326_s29 + $0x2234] ss:$120 sps:$4 sm:$0xff]   ;;  %v15907_v14 = vpop.eup %15906 }
 0x5e9   : > { %v11062_v30 = vpack.c.bf16 %v15907_v14, %v15907_v14 }
 0x5ea   : > { %10888 = vmatpush1.bf16.msra.mxu1 %v15795_v1  ;;  %v15833_v1 = vld [vmem:[%s17800_s24 + $0x2c] ss:$120 sps:$4 sm:$0x1f]  }
 0x5eb   : > { %10970 = vmatpush1.bf16.msra.mxu0 %v15798_v2  ;;  %10889 = vmatprep.subr.bf16.mxu1 %v15803_v10  ;;  %v17987_v2 = vsub.s32 4, %v16380_v42  ;;  %v15825_v10 = vld [vmem:[%s16326_s29 + $0x2230] ss:$120 sps:$4 sm:$0xff]  }
 0x5ec   : > { %10971 = vmatprep.subr.bf16.mxu0 %v15806_v11  ;;  %v15830_v11 = vld [vmem:[%s16326_s29 + $0x2324] ss:$120 sps:$4 sm:$0xff]  }
 0x5ed   : > { %v1825_v15 = vrot.slane %v17934_v0, %v17987_v2 }
 0x5ee   : > { %10890 = vmatpush1.bf16.msra.mxu1 %v15801_v22 }
 0x5ef   : > { %10972 = vmatpush1.bf16.msra.mxu0 %v15804_v25  ;;  %11384 = vmatprep.subr.bf16.mxu1 %v15815_v29  ;;  %v15909_v25 = vpop.eup %15908  ;;  %v15831_v29 = vld [vmem:[%s17800_s24 + $0x28] ss:$120 sps:$4 sm:$0x1f]  }
 0x5f0   : > { %10982 = vmatprep.subr.bf16.mxu0 %v15809_v28  ;;  %v13484_v28 = vadd.f32 %v17390_v47, %v1825_v15  ;;  %v1833_v47 = vrot.slane %v17934_v0, %v17929_v58 }
 0x5f1   : > { %10892 = vmatmul.mubr.bf16.vlgmr.msra.gmra.mrb[28].mxu1 %v16406_v63 }
 0x5f2   : > { %10974 = vmatmul.mubr.bf16.vlgmr.msra.gmra.mrb[28].mxu0 %v16435_v19  ;;  %11416 = vmatprep.mubr.bf16.mxu1 %v11061_v35  ;;  %v17972_v19 = vsub.s32 5, %v16380_v42  ;;  %v17996_v42 = vld [vmem:[%s16335_s12 + $0x10] sm:$0xff]  ;;  %v11065_v35 = vpack.c.bf16 %v15909_v25, %v15909_v25 }
 0x5f3   : > { %10983 = vmatpush1.bf16.msra.mxu0 %v15807_v34  ;;  %11014 = vmatprep.mubr.bf16.mxu0 %v16441_v23  ;;  %v15821_v23 = vld [vmem:[%s16326_s29 + $0x2144] ss:$120 sps:$4 sm:$0xff]   ;;  %v1865_v22 = vrot.slane %v17996_v42, %v17929_v58  ;;  %v1845_v44 = vrot.slane %v17996_v42, %v16740_v12  ;;  %v13486_v58 = vadd.f32 %v17530_v60, %v1833_v47 }
 0x5f4   : > { %10984 = vmatprep.subr.bf16.mxu0 %v15812_v6  ;;  %v1829_v17 = vrot.slane %v17934_v0, %v17972_v19  ;;  %v15842_v6 = vld [vmem:[%s17800_s24 + $0x34] ss:$120 sps:$4 sm:$0x1f]   ;;  %v15848_v60 = vld [vmem:[%s16326_s29 + $0x26e4] ss:$120 sps:$4 sm:$0xff]   ;;  %v1849_v25 = vrot.slane %v17996_v42, %v17969_v3  ;;  %v1857_v47 = vrot.slane %v17996_v42, %v17987_v2 }
 0x5f6   : > { %v13485_v54 = vadd.f32 %v17392_v48, %v1829_v17  ;;  %v1837_v48 = vrot.slane %v17934_v0, %v17908_v36  ;;  %v15840_v0 = vld [vmem:[%s17800_s24 + $0x30] ss:$120 sps:$4 sm:$0x1f]   ;;  %v13489_v17 = vadd.f32 %v17604_v43, %v1845_v44  ;;  %v1853_v43 = vrot.slane %v17996_v42, %v17951_v5  ;;  %v15864_v44 = vld [vmem:[%s16326_s29 + $0x2aa0] ss:$120 sps:$4 sm:$0xff]  }
 0x5f7   : > { %10985 = vmatpush1.bf16.msra.mxu0 %v15810_v37  ;;  %11385 = vmatpush1.bf16.xpose.msra.mxu1 %v15813_v38  ;;  %v15834_v38 = vld [vmem:[%s16326_s29 + $0x2410] ss:$120 sps:$4 sm:$0xff]  }
 0x5f8   : > { %10986 = vmatprep.subr.bf16.mxu0 %v15818_v39  ;;  %11424 = vmatprep.subr.bf16.mxu1 %v15824_v45  ;;  %15912 = vtanh.f32 %v13485_v54  ;;  %v13487_v32 = vadd.f32 %v17532_v61, %v1837_v48  ;;  %v15839_v39 = vld [vmem:[%s16326_s29 + $0x2504] ss:$120 sps:$4 sm:$0xff]   ;;  %v15911_v45 = vpop.eup %15910  ;;  %v13491_v15 = vadd.f32 %v17744_v21, %v1853_v43  ;;  %v15860_v48 = vld [vmem:[%s17800_s24 + $0x44] ss:$120 sps:$4 sm:$0x1f]   ;;  %v1861_v21 = vrot.slane %v17996_v42, %v17972_v19 }
 0x5f9   : > { %15914 = vtanh.f32 %v13484_v28 }
 0x5fa   : > { %15916 = vtanh.f32 %v13487_v32  ;;  %v15858_v32 = vld [vmem:[%s17800_s24 + $0x40] ss:$120 sps:$4 sm:$0x1f]  }
 0x5fb   : > { %10987 = vmatpush1.bf16.msra.mxu0 %v15816_v46  ;;  %15918 = vtanh.f32 %v13486_v58  ;;  %v15872_v58 = vld [vmem:[%s16326_s29 + $0x2b94] ss:$120 sps:$4 sm:$0xff]  }
 0x5fc   : > { %10988 = vmatprep.subr.bf16.mxu0 %v15821_v23  ;;  %v11064_v23 = vpack.c.bf16 %v15911_v45, %v15911_v45  ;;  %15920 = vtanh.f32 %v13489_v17  ;;  %v13492_v45 = vadd.f32 %v17817_v7, %v1857_v47  ;;  %v1789_v7 = vrot.slane %v17915_v40, %v17951_v5 }
 0x5fe   : > { %11417 = vmatmul.mubr.bf16.vlgmr.msra.gmra.mrb[32].mxu1 %v11060_v57 }
 0x5ff   : > { %10989 = vmatpush1.bf16.msra.mxu0 %v15819_v62  ;;  %11425 = vmatpush1.bf16.xpose.msra.mxu1 %v15822_v52  ;;  %v1841_v52 = vrot.slane %v17996_v42, %v16735_v9 }
 0x600   : > { %11456 = vmatprep.mubr.bf16.mxu1 %v11063_v4  ;;  %10990 = vmatprep.subr.bf16.mxu0 %v15827_v59  ;;  %v15846_v59 = vld [vmem:[%s16326_s29 + $0x26e0] ss:$120 sps:$4 sm:$0xff]   ;;  %v15849_v4 = vld [vmem:[%s17800_s24 + $0x38] ss:$120 sps:$4 sm:$0x1f]  }
 0x601   : > { %11464 = vmatprep.subr.bf16.mxu1 %v15833_v1  ;;  %v13488_v1 = vadd.f32 %v17602_v41, %v1841_v52  ;;  %v15857_v41 = vld [vmem:[%s16326_s29 + $0x28c4] ss:$120 sps:$4 sm:$0xff]   ;;  %v15881_v52 = vld [vmem:[%s17800_s24 + $0x4] ss:$120 sps:$4 sm:$0x1f]  }
 0x602   : > { %v15913_v46 = vpop.eup %15912 }
 0x603   : > { %10991 = vmatpush1.bf16.msra.mxu0 %v15825_v10  ;;  %v11067_v62 = vpack.c.bf16 %v15913_v46, %v15913_v46  ;;  %v15915_v57 = vpop.eup %15914  ;;  %15922 = vtanh.f32 %v13488_v1  ;;  %v15867_v46 = vld [vmem:[%s17800_s24 + $0x48] ss:$120 sps:$4 sm:$0x1f]  }
 0x604   : > { %10992 = vmatprep.subr.bf16.mxu0 %v15830_v11  ;;  %v10647_v34 = vpop.f32.mrb[24].mxu1  ;;  %v15917_v54 = vpop.eup %15916  ;;  %v11066_v10 = vpack.c.bf16 %v15915_v57, %v15915_v57  ;;  %v15854_v11 = vld [vmem:[%s16326_s29 + $0x27d4] ss:$120 sps:$4 sm:$0xff]   ;;  %15924 = vtanh.f32 %v13491_v15 }
 0x605   : > { %v18006_v27 = vadd.f32 %v10647_v34, %v1865_v22  ;;  %v18008_v37 = vpop.f32.mrb[25].mxu1  ;;  %v11069_v14 = vpack.c.bf16 %v15917_v54, %v15917_v54  ;;  %v15852_v22 = vld [vmem:[%s16326_s29 + $0x27d0] ss:$120 sps:$4 sm:$0xff]   ;;  %v1785_v54 = vrot.slane %v17915_v40, %v17969_v3 }
 0x606   : > { %v10651_v13 = vpop.f32.mrb[26].mxu1  ;;  %11457 = vmatmul.mubr.bf16.vlgmr.msra.gmra.mrb[36].mxu1 %v11062_v30  ;;  %v13490_v30 = vadd.f32 %v17742_v18, %v1849_v25  ;;  %v15866_v18 = vld [vmem:[%s16326_s29 + $0x2aa4] ss:$120 sps:$4 sm:$0xff]  }
 0x607   : > { %10993 = vmatpush1.bf16.msra.mxu0 %v15828_v26  ;;  %v10652_v61 = vpop.f32.mrb[27].mxu1  ;;  %11465 = vmatpush1.bf16.xpose.msra.mxu1 %v15831_v29  ;;  %v15919_v26 = vpop.eup %15918  ;;  %v15855_v29 = vld [vmem:[%s16326_s29 + $0x28c0] ss:$120 sps:$4 sm:$0xff]  }
 0x608   : > { %11496 = vmatprep.mubr.bf16.mxu1 %v11065_v35  ;;  %10994 = vmatprep.subr.bf16.mxu0 %v15836_v53  ;;  %v15921_v28 = vpop.eup %15920  ;;  %v11068_v34 = vpack.c.bf16 %v15919_v26, %v15919_v26  ;;  %v13493_v53 = vadd.f32 %v17819_v8, %v1861_v21  ;;  %v15869_v35 = vld [vmem:[%s17800_s24 + $0x4c] ss:$120 sps:$4 sm:$0x1f]   ;;  %15926 = vtanh.f32 %v13490_v30  ;;  %v1869_v61 = vrot.slane %v17996_v42, %v17908_v36  ;;  %v15885_v21 = vld [vmem:[%s17800_s24 + $0x8] ss:$120 sps:$4 sm:$0x1f]  }
 0x609   : > { %11504 = vmatprep.subr.bf16.mxu1 %v15842_v6  ;;  %v15863_v6 = vld [vmem:[%s16326_s29 + $0x29b4] ss:$120 sps:$4 sm:$0xff]   ;;  %v11071_v13 = vpack.c.bf16 %v15921_v28, %v15921_v28  ;;  %v15870_v36 = vld [vmem:[%s16326_s29 + $0x2b90] ss:$120 sps:$4 sm:$0xff]  }
 0x60a   : > { %15928 = vtanh.f32 %v13493_v53  ;;  %v13495_v17 = vadd.f32 %v18008_v37, %v1869_v61  ;;  %v15873_v37 = vld [vmem:[%s16326_s29 + $0x2c80] ss:$120 sps:$4 sm:$0xff]   ;;  %v15891_v30 = vld [vmem:[%s17800_s24 + $0x60] ss:$120 sps:$4 sm:$0x1f]  }
 0x60b   : > { %10995 = vmatpush1.bf16.msra.mxu0 %v15834_v38  ;;  %v15861_v38 = vld [vmem:[%s16326_s29 + $0x29b0] ss:$120 sps:$4 sm:$0xff]   ;;  %15930 = vtanh.f32 %v16758_v33  ;;  %v15875_v33 = vld [vmem:[%s16326_s29 + $0x2c84] ss:$120 sps:$4 sm:$0xff]  }
 0x60c   : > { %10996 = vmatprep.subr.bf16.mxu0 %v15839_v39  ;;  %15932 = vtanh.f32 %v13492_v45 }
 0x60d   : > { %v15923_v8 = vpop.eup %15922  ;;  %15934 = vtanh.f32 %v13495_v17  ;;  %v15899_v17 = vld [vmem:[%s17800_s24 + $0x74] ss:$120 sps:$4 sm:$0x1f]  }
 0x60e   : > { %11497 = vmatmul.mubr.bf16.vlgmr.msra.gmra.mrb[40].mxu1 %v11064_v23  ;;  %v15925_v39 = vpop.eup %15924  ;;  %15936 = vtanh.f32 %v16756_v31 }
 0x60f   : > { %10997 = vmatpush1.bf16.msra.mxu0 %v15837_v24  ;;  %11505 = vmatpush1.bf16.xpose.msra.mxu1 %v15840_v0  ;;  %v11070_v24 = vpack.c.bf16 %v15923_v8, %v15923_v8  ;;  %v15878_v0 = vld [vmem:[%s17800_s24 + $0x54] ss:$120 sps:$4 sm:$0x1f]   ;;  %v11073_v23 = vpack.c.bf16 %v15925_v39, %v15925_v39  ;;  %15938 = vtanh.f32 %v18006_v27  ;;  %v15882_v27 = vld [vmem:[%s17800_s24 + $0x58] ss:$120 sps:$4 sm:$0x1f]  }
 0x610   : > { %11536 = vmatprep.mubr.bf16.mxu1 %v11067_v62  ;;  %10998 = vmatprep.subr.bf16.mxu0 %v15845_v49  ;;  %v13475_v62 = vadd.f32 %v16896_v56, %v1789_v7 }
 0x611   : > { %11544 = vmatprep.subr.bf16.mxu1 %v15851_v50  ;;  %v15876_v50 = vld [vmem:[%s17800_s24 + $0x50] ss:$120 sps:$4 sm:$0x1f]  }
 0x612   : > { %v15927_v42 = vpop.eup %15926  ;;  %15940 = vtanh.f32 %v13475_v62 }
 0x613   : > { %10999 = vmatpush1.bf16.msra.mxu0 %v15843_v51  ;;  %v11072_v51 = vpack.c.bf16 %v15927_v42, %v15927_v42 }
 0x614   : > { %11000 = vmatprep.subr.bf16.mxu0 %v15848_v60  ;;  %v15929_v49 = vpop.eup %15928  ;;  %v15884_v60 = vld [vmem:[%s17800_s24 + $0x5c] ss:$120 sps:$4 sm:$0x1f]  }
 0x615   : > { %v15931_v43 = vpop.eup %15930  ;;  %v11075_v57 = vpack.c.bf16 %v15929_v49, %v15929_v49 }
 0x616   : > { %11537 = vmatmul.mubr.bf16.vlgmr.msra.gmra.mrb[44].mxu1 %v11066_v10  ;;  %v11055_v56 = vpack.c.bf16 %v15931_v43, %v15931_v43  ;;  %v15933_v31 = vpop.eup %15932  ;;  %v15879_v10 = vld [vmem:[%s17800_s24] ss:$120 sps:$4 sm:$0x1f]  }
 0x617   : > { %11001 = vmatpush1.bf16.msra.mxu0 %v15846_v59  ;;  %11545 = vmatpush1.bf16.xpose.msra.mxu1 %v15849_v4  ;;  %v1797_v59 = vrot.slane %v17915_v40, %v17972_v19  ;;  %v15935_v1 = vpop.eup %15934  ;;  %v13474_v4 = vadd.f32 %v16894_v55, %v1785_v54 }
 0x618   : > { %11576 = vmatprep.mubr.bf16.mxu1 %v11069_v14  ;;  %11002 = vmatprep.subr.bf16.mxu0 %v15854_v11  ;;  %v11074_v11 = vpack.c.bf16 %v15933_v31, %v15933_v31  ;;  %v15893_v14 = vld [vmem:[%s17800_s24 + $0x64] ss:$120 sps:$4 sm:$0x1f]   ;;  %v15937_v25 = vpop.eup %15936 }
 0x619   : > { %11584 = vmatprep.subr.bf16.mxu1 %v15860_v48  ;;  %v13477_v15 = vadd.f32 %v16970_v20, %v1797_v59  ;;  %v15887_v48 = vld [vmem:[%s17800_s24 + $0xc] ss:$120 sps:$4 sm:$0x1f]   ;;  %15942 = vtanh.f32 %v13474_v4  ;;  %v15939_v55 = vpop.eup %15938  ;;  %v11054_v26 = vpack.c.bf16 %v15937_v25, %v15937_v25 }
 0x61a   : > { %v11076_v28 = vpack.c.bf16 %v15939_v55, %v15939_v55 }
 0x61b   : > { %11003 = vmatpush1.bf16.msra.mxu0 %v15852_v22  ;;  %v11077_v22 = vpack.c.bf16 %v15935_v1, %v15935_v1  ;;  %15944 = vtanh.f32 %v13477_v15 }
 0x61c   : > { %11004 = vmatprep.subr.bf16.mxu0 %v15857_v41  ;;  %v15941_v20 = vpop.eup %15940 }
 0x61e   : > { %11577 = vmatmul.mubr.bf16.vlgmr.msra.gmra.mrb[48].mxu1 %v11068_v34 }
 0x61f   : > { %11005 = vmatpush1.bf16.msra.mxu0 %v15855_v29  ;;  %11585 = vmatpush1.bf16.xpose.msra.mxu1 %v15858_v32  ;;  %v15890_v29 = vld [vmem:[%s17800_s24 + $0x14] ss:$120 sps:$4 sm:$0x1f]   ;;  %v11057_v32 = vpack.c.bf16 %v15941_v20, %v15941_v20 }
 0x620   : > { %11616 = vmatprep.mubr.bf16.mxu1 %v11071_v13  ;;  %11006 = vmatprep.subr.bf16.mxu0 %v15863_v6 }
 0x621   : > { %11624 = vmatprep.subr.bf16.mxu1 %v15869_v35  ;;  %v15888_v35 = vld [vmem:[%s17800_s24 + $0x10] ss:$120 sps:$4 sm:$0x1f]  }
 0x623   : > { %11007 = vmatpush1.bf16.msra.mxu0 %v15861_v38  ;;  %v15943_v34 = vpop.eup %15942 }
 0x624   : > { %11008 = vmatprep.subr.bf16.mxu0 %v15866_v18  ;;  %v11056_v13 = vpack.c.bf16 %v15943_v34, %v15943_v34 }
 0x625   : > { %v15945_v53 = vpop.eup %15944 }
 0x626   : > { %11617 = vmatmul.mubr.bf16.vlgmr.msra.gmra.mrb[52].mxu1 %v11070_v24  ;;  %v11059_v47 = vpack.c.bf16 %v15945_v53, %v15945_v53 }
 0x627   : > { %11009 = vmatpush1.bf16.msra.mxu0 %v15864_v44  ;;  %11625 = vmatpush1.bf16.xpose.msra.mxu1 %v15867_v46 }
 0x628   : > { %11656 = vmatprep.mubr.bf16.mxu1 %v11073_v23  ;;  %11010 = vmatprep.subr.bf16.mxu0 %v15872_v58 }
 0x629   : > { %11664 = vmatprep.subr.bf16.mxu1 %v15878_v0  ;;  %v15894_v0 = vld [vmem:[%s17800_s24 + $0x68] ss:$120 sps:$4 sm:$0x1f]  }
 0x62b   : > { %11011 = vmatpush1.bf16.msra.mxu0 %v15870_v36 }
 0x62c   : > { %11012 = vmatprep.subr.bf16.mxu0 %v15875_v33 }
 0x62e   : > { %11657 = vmatmul.mubr.bf16.vlgmr.msra.gmra.mrb[56].mxu1 %v11072_v51 }
 0x62f   : > { %11013 = vmatpush1.bf16.msra.mxu0 %v15873_v37  ;;  %11665 = vmatpush1.bf16.xpose.msra.mxu1 %v15876_v50 }
 0x630   : > { %11696 = vmatprep.mubr.bf16.mxu1 %v11075_v57  ;;  %11264 = vmatprep.subr.bf16.mxu0 %v15881_v52 }
 0x631   : > { %11704 = vmatprep.subr.bf16.mxu1 %v15884_v60 }
 0x632   : > { %11015 = vmatmul.mubr.bf16.vlgmr.msra.gmra.mrb[28].mxu0 %v16406_v63  ;;  %v1793_v63 = vrot.slane %v17915_v40, %v17987_v2  ;;  %v18088_v40 = vld [vmem:[%s16335_s12 + $0x18] sm:$0x3f] }
 0x633   : > { %11296 = vmatprep.mubr.bf16.mxu0 %v11055_v56  ;;  %v1877_v6 = vrot.slane %v18088_v40, %v16740_v12  ;;  %v15896_v12 = vld [vmem:[%s17800_s24 + $0x6c] ss:$120 sps:$4 sm:$0x1f]   ;;  %v1881_v36 = vrot.slane %v18088_v40, %v17969_v3  ;;  %v1885_v33 = vrot.slane %v18088_v40, %v17951_v5  ;;  %v15897_v3 = vld [vmem:[%s17800_s24 + $0x70] ss:$120 sps:$4 sm:$0x1f]  }
 0x634   : > { %v13476_v41 = vadd.f32 %v16966_v16, %v1793_v63  ;;  %v1873_v16 = vrot.slane %v18088_v40, %v16735_v9 }
 0x636   : > { %11697 = vmatmul.mubr.bf16.vlgmr.msra.gmra.mrb[60].mxu1 %v11074_v11  ;;  %15946 = vtanh.f32 %v13476_v41 }
 0x637   : > { %11705 = vmatpush1.bf16.xpose.msra.mxu1 %v15882_v27  ;;  %11736 = vmatprep.mubr.bf16.mxu1 %v11077_v22 }
 0x638   : > { %11265 = vmatpush1.bf16.xpose.msra.mxu0 %v15879_v10  ;;  %11744 = vmatprep.subr.bf16.mxu1 %v15893_v14 }
 0x639   : > { %11304 = vmatprep.subr.bf16.mxu0 %v15887_v48 }
 0x63e   : > { %11737 = vmatmul.mubr.bf16.vlgmr.msra.gmra.mrb[64].mxu1 %v11076_v28 }
 0x63f   : > { %11297 = vmatmul.mubr.bf16.vlgmr.msra.gmra.mrb[32].mxu0 %v11054_v26  ;;  %11745 = vmatpush1.bf16.xpose.msra.mxu1 %v15891_v30 }
 0x640   : > { %11305 = vmatpush1.bf16.xpose.msra.mxu0 %v15885_v21  ;;  %11336 = vmatprep.mubr.bf16.mxu0 %v11057_v32  ;;  %v15947_v9 = vpop.eup %15946  ;;  %v1889_v32 = vrot.slane %v18088_v40, %v17987_v2 }
 0x641   : > { %11344 = vmatprep.subr.bf16.mxu0 %v15890_v29  ;;  %v11058_v45 = vpack.c.bf16 %v15947_v9, %v15947_v9  ;;  %11784 = vmatprep.subr.bf16.mxu1 %v15896_v12 }
 0x645   : > { %v10770_v38 = vpop.f32.mrb[24].mxu0 }
 0x646   : > { %v13496_v18 = vadd.f32 %v10770_v38, %v1873_v16  ;;  %v10772_v8 = vpop.f32.mrb[25].mxu0  ;;  %v1893_v16 = vrot.slane %v18088_v40, %v17972_v19 }
 0x647   : > { %v13497_v61 = vadd.f32 %v10772_v8, %v1877_v6  ;;  %v10774_v39 = vpop.f32.mrb[26].mxu0  ;;  %11337 = vmatmul.mubr.bf16.vlgmr.msra.gmra.mrb[36].mxu0 %v11056_v13 }
 0x648   : > { %15948 = vtanh.f32 %v13496_v18  ;;  %v10775_v44 = vpop.f32.mrb[27].mxu0  ;;  %11345 = vmatpush1.bf16.xpose.msra.mxu0 %v15888_v35  ;;  %11376 = vmatprep.mubr.bf16.mxu0 %v11059_v47 }
 0x649   : > { %15950 = vtanh.f32 %v13497_v61 }
 0x64f   : > { %11377 = vmatmul.mubr.bf16.vlgmr.msra.gmra.mrb[40].mxu0 %v11058_v45 }
 0x652   : > { %v15949_v46 = vpop.eup %15948 }
 0x653   : > { %v15951_v24 = vpop.eup %15950  ;;  %v11078_v23 = vpack.c.bf16 %v15949_v46, %v15949_v46 }
 0x654   : > { %v11079_v58 = vpack.c.bf16 %v15951_v24, %v15951_v24 }
 0x656   : > { %11776 = vmatprep.mubr.bf16.mxu1 %v11079_v58 }
 0x657   : > { %11777 = vmatmul.mubr.bf16.vlgmr.msra.gmra.mrb[68].mxu1 %v11078_v23 }
 0x658   : > { %11785 = vmatpush1.bf16.xpose.msra.mxu1 %v15894_v0 }
 0x659   : > { %11824 = vmatprep.subr.bf16.mxu1 %v15899_v17 }
 0x6c4   : > { %v10893_v7 = vpop.f32.mrb[28].mxu1 }
 0x6c5   : > { %v13498_v42 = vadd.f32 %v10893_v7, %v1881_v36  ;;  %v10895_v49 = vpop.f32.mrb[29].mxu1 }
 0x6c6   : > { %v13499_v37 = vadd.f32 %v10895_v49, %v1885_v33  ;;  %v10897_v50 = vpop.f32.mrb[30].mxu1 }
 0x6c7   : > { %15952 = vtanh.f32 %v13498_v42  ;;  %v10898_v62 = vpop.f32.mrb[31].mxu1 }
 0x6c8   : > { %15954 = vtanh.f32 %v13499_v37 }
 0x6d1   : > { %v15953_v51 = vpop.eup %15952  ;;  %v18102_v52 = vpop.f32.mrb[32].mxu1 }
 0x6d2   : > { %v15955_v60 = vpop.eup %15954  ;;  %v11420_v43 = vpop.f32.mrb[33].mxu1  ;;  %v11080_v56 = vpack.c.bf16 %v15953_v51, %v15953_v51 }
 0x6d3   : > { %v11081_v57 = vpack.c.bf16 %v15955_v60, %v15955_v60  ;;  %v11421_v54 = vpop.f32.mrb[34].mxu1 }
 0x6d4   : > { %v11422_v59 = vpop.f32.mrb[35].mxu1 }
 0x6d5   : > { %11816 = vmatprep.mubr.bf16.mxu1 %v11081_v57 }
 0x6d6   : > { %11817 = vmatmul.mubr.bf16.vlgmr.msra.gmra.mrb[72].mxu1 %v11080_v56 }
 0x6d7   : > { %11825 = vmatpush1.bf16.xpose.msra.mxu1 %v15897_v3 }
 0x6d9   : > { %v18105_v5 = vpop.f32.mrb[36].mxu1 }
 0x6da   : > { %v11460_v31 = vpop.f32.mrb[37].mxu1 }
 0x6db   : > { %v11461_v1 = vpop.f32.mrb[38].mxu1 }
 0x6dc   : > { %v11462_v4 = vpop.f32.mrb[39].mxu1 }
 0x6e1   : > { %v11498_v10 = vpop.f32.mrb[40].mxu1 }
 0x6e2   : > { %v11500_v27 = vpop.f32.mrb[41].mxu1 }
 0x6e3   : > { %v11501_v15 = vpop.f32.mrb[42].mxu1 }
 0x6e4   : > { %v11502_v11 = vpop.f32.mrb[43].mxu1 }
 0x6e9   : > { %v11538_v48 = vpop.f32.mrb[44].mxu1 }
 0x6ea   : > { %v11540_v14 = vpop.f32.mrb[45].mxu1 }
 0x6eb   : > { %v11541_v22 = vpop.f32.mrb[46].mxu1  ;;  %v16114_v14 = vmov 0.0  }
 0x6ec   : > { %v11542_v63 = vpop.f32.mrb[47].mxu1  ;;  %324 = vst.msk [vmem:[%s317_s27] sm:$0x3] %vm323_vm0, %v16114_v14 }
 0x6f1   : > { %v11578_v25 = vpop.f32.mrb[48].mxu1 }
 0x6f2   : > { %v11580_v55 = vpop.f32.mrb[49].mxu1 }
 0x6f3   : > { %v11581_v20 = vpop.f32.mrb[50].mxu1 }
 0x6f4   : > { %v11582_v41 = vpop.f32.mrb[51].mxu1  ;;  %v11053_v20 = vld [vmem:[%s317_s27] sm:$0x3] }
 0x6f9   : > { %v11618_v21 = vpop.f32.mrb[52].mxu1 }
 0x6fa   : > { %v11620_v26 = vpop.f32.mrb[53].mxu1 }
 0x6fb   : > { %v11621_v28 = vpop.f32.mrb[54].mxu1 }
 0x6fc   : > { %v11622_v29 = vpop.f32.mrb[55].mxu1 }
 0x701   : > { %v11658_v30 = vpop.f32.mrb[56].mxu1 }
 0x702   : > { %v11660_v34 = vpop.f32.mrb[57].mxu1 }
 0x703   : > { %v11661_v53 = vpop.f32.mrb[58].mxu1 }
 0x704   : > { %v11662_v35 = vpop.f32.mrb[59].mxu1 }
 0x705   : > { %v11016_v6 = vpop.f32.mrb[28].mxu0 }
 0x706   : > { %v13500_v13 = vadd.f32 %v11016_v6, %v1889_v32  ;;  %v11018_v38 = vpop.f32.mrb[29].mxu0 }
 0x707   : > { %v13501_v47 = vadd.f32 %v11018_v38, %v1893_v16  ;;  %v11020_v18 = vpop.f32.mrb[30].mxu0 }
 0x708   : > { %15956 = vtanh.f32 %v13500_v13  ;;  %v11021_v8 = vpop.f32.mrb[31].mxu0 }
 0x709   : > { %15958 = vtanh.f32 %v13501_v47  ;;  %v11698_v61 = vpop.f32.mrb[60].mxu1 }
 0x70a   : > { %v11700_v39 = vpop.f32.mrb[61].mxu1 }
 0x70b   : > { %v11701_v44 = vpop.f32.mrb[62].mxu1 }
 0x70c   : > { %v11702_v9 = vpop.f32.mrb[63].mxu1 }
 0x711   : > { %v11738_v12 = vpop.f32.mrb[64].mxu1 }
 0x712   : > { %v15957_v45 = vpop.eup %15956  ;;  %v11298_v2 = vpop.f32.mrb[32].mxu0 }
 0x713   : > { %v15959_v46 = vpop.eup %15958  ;;  %v11300_v24 = vpop.f32.mrb[33].mxu0  ;;  %v11082_v23 = vpack.c.bf16 %v15957_v45, %v15957_v45 }
 0x714   : > { %v11740_v19 = vpop.f32.mrb[65].mxu1  ;;  %v11083_v40 = vpack.c.bf16 %v15959_v46, %v15959_v46  ;;  %v11301_v58 = vpop.f32.mrb[34].mxu0 }
 0x715   : > { %v11741_v0 = vpop.f32.mrb[66].mxu1  ;;  %v11302_v17 = vpop.f32.mrb[35].mxu0 }
 0x716   : > { %v11742_v36 = vpop.f32.mrb[67].mxu1  ;;  %11856 = vmatprep.mubr.bf16.mxu1 %v11083_v40 }
 0x717   : > { %11857 = vmatmul.mubr.bf16.vlgmr.msra.gmra.mrb[76].mxu1 %v11082_v23 }
 0x71a   : > { %v11338_v33 = vpop.f32.mrb[36].mxu0 }
 0x71b   : > { %v11339_v7 = vadd.f32 %v11338_v33, %v11298_v2  ;;  %v11340_v42 = vpop.f32.mrb[37].mxu0 }
 0x71c   : > { %v11341_v49 = vpop.f32.mrb[38].mxu0 }
 0x71d   : > { %v11342_v37 = vpop.f32.mrb[39].mxu0 }
 0x722   : > { %v11378_v50 = vpop.f32.mrb[40].mxu0 }
 0x723   : > { %v11379_v62 = vadd.f32 %v11378_v50, %v11339_v7  ;;  %v11380_v51 = vpop.f32.mrb[41].mxu0 }
 0x724   : > { %v11381_v60 = vpop.f32.mrb[42].mxu0 }
 0x725   : > { %v11419_v43 = vadd.f32 %v18102_v52, %v11379_v62  ;;  %v11382_v57 = vpop.f32.mrb[43].mxu0 }
 0x727   : > { %v11459_v54 = vadd.f32 %v18105_v5, %v11419_v43 }
 0x729   : > { %v11499_v3 = vadd.f32 %v11498_v10, %v11459_v54 }
 0x72a   : > { %v11778_v56 = vpop.f32.mrb[68].mxu1 }
 0x72b   : > { %v11539_v59 = vadd.f32 %v11538_v48, %v11499_v3  ;;  %v11780_v31 = vpop.f32.mrb[69].mxu1 }
 0x72c   : > { %v11781_v1 = vpop.f32.mrb[70].mxu1 }
 0x72d   : > { %v11579_v4 = vadd.f32 %v11578_v25, %v11539_v59  ;;  %v11782_v27 = vpop.f32.mrb[71].mxu1 }
 0x72f   : > { %v11619_v15 = vadd.f32 %v11618_v21, %v11579_v4 }
 0x731   : > { %v11659_v11 = vadd.f32 %v11658_v30, %v11619_v15 }
 0x733   : > { %v11699_v52 = vadd.f32 %v11698_v61, %v11659_v11 }
 0x735   : > { %v11739_v5 = vadd.f32 %v11738_v12, %v11699_v52 }
 0x737   : > { %v11779_v10 = vadd.f32 %v11778_v56, %v11739_v5 }
 0x7a9   : > { %v11818_v48 = vpop.f32.mrb[72].mxu1 }
 0x7aa   : > { %v11819_v22 = vadd.f32 %v11818_v48, %v11779_v10  ;;  %v11820_v63 = vpop.f32.mrb[73].mxu1 }
 0x7ab   : > { %v11821_v25 = vpop.f32.mrb[74].mxu1 }
 0x7ac   : > { %v11822_v55 = vpop.f32.mrb[75].mxu1 }
 0x7ea   : > { %v11858_v41 = vpop.f32.mrb[76].mxu1 }
 0x7eb   : > { %v11859_v21 = vadd.f32 %v11858_v41, %v11819_v22  ;;  %v11860_v26 = vpop.f32.mrb[77].mxu1 }
 0x7ec   : > { %v11861_v28 = vpop.f32.mrb[78].mxu1 }
 0x7ed   : > { %v11864_v29 = vadd.f32 %v11859_v21, %v11053_v20  ;;  %v11862_v30 = vpop.f32.mrb[79].mxu1 }
 0x7ef   : > { %11866 = vst.msk [vmem:[%s317_s27] sm:$0x3] %vm323_vm0, %v11864_v29 }
 0x7f0 PF: > { %s20_s20 = sadd.s32 1, %s16105_s20   ;;  %s18154_s15 = smov %s16089_s16 }
 0x7f1   : > { %p17_p1 = scmp.ge.s32.totalorder %s20_s20, 4   ;;  %s18155_s16 = smov %s16093_s17 }
 0x7f2   : > { %s18156_s17 = smov %s16187_s26  ;;  %s18157_s18 = smov %s16101_s19 }
 0x7f3   : > { %s18158_s19 = smov %s18160_s22  ;;  %19 = sbr.rel (!%p17_p1) target bundleno = 8 (0x8), region = 104 }
 0x7fa   :  { %11886 = vsyncpa [#allocation3], 1 }
 0x7fb   :  { %11888 = vsyncpa [#allocation3 + $0x1], 1 }
 0x7fc   :  { %11889 = vsyncpa [#allocation5], 1 }
 0x7fd   :  { %11891 = vsyncpa [#allocation5 + $0x1], 1 }

</bundles_post_ra>
